<compile_context>
chip_gen: v6e
topology: v6e:2x2x1
jax: 0.10.0
libtpu: 0.0.40
codegen_flags: <defaults>
</compile_context>

<pallas_src>
import functools

import jax
import jax.numpy as jnp
from jax.experimental import pallas as pl
from jax.experimental.pallas import tpu as pltpu

EPS = 1e-5  # PyTorch GroupNorm default eps


def _pool_selector(wo, w):
    """(wo, w) matrix with 0.25 at (v, 2v) and (v, 2v+1): pairwise average."""
    row = jax.lax.broadcasted_iota(jnp.int32, (wo, w), 0)
    col = jax.lax.broadcasted_iota(jnp.int32, (wo, w), 1)
    hit = (col == 2 * row) | (col == 2 * row + 1)
    return jnp.where(hit, 0.25, 0.0).astype(jnp.float32)


def _instance_norm_relu(acc, g, b):
    """acc: (HW, C) f32. Per-channel stats over the spatial axis, gamma folded
    into the rsqrt scale (2 VPU ops/element instead of 4), then ReLU."""
    mean = jnp.mean(acc, axis=0, keepdims=True)
    var = jnp.mean((acc - mean) ** 2, axis=0, keepdims=True)
    scale = g * jax.lax.rsqrt(var + EPS)
    shift = b - mean * scale
    return jnp.maximum(acc * scale + shift, 0.0)


# ----------------------------------------------------------------------------
# Fused kernel: block1 (conv+IN+relu+pool) -> block2 (in-VMEM taps) -> linear
# ----------------------------------------------------------------------------
def _convnet_kernel(xs_ref, w1_ref, g1_ref, b1_ref, w2_ref, g2_ref, b2_ref,
                    wfc_ref, bfc_ref, o_ref, h_sc, *, bt, H1, W1):
    """
    xs_ref : (bt*H1*W1, K1pad) bf16   layer-1 im2col (9 taps concat on channels)
    w1_ref : (K1pad, Cpad)     bf16   layer-1 conv weight (zero-padded rows/cols)
    g*,b*  : (1, Cpad)         f32    instancenorm affine (0 on padded channels)
    w2_ref : (9, Cpad, Cpad)   bf16   layer-2 per-tap weights
    wfc_ref: (H3*W3*Cpad, Npad) bf16  classifier weight, rows in (h,w,cpad) order
    bfc_ref: (1, Npad)         f32
    o_ref  : (bt, Npad)        f32    logits (padded classes)
    h_sc   : (bt, H2+2, W2+2, Cpad) bf16 VMEM scratch, halo ring kept at 0
    """
    Cpad = w1_ref.shape[1]
    H2, W2 = H1 // 2, W1 // 2
    H3, W3 = H2 // 2, W2 // 2
    HW1 = H1 * W1

    # Hoisted affine params and pooling selectors (shared by all samples).
    g1 = g1_ref[...]
    b1 = b1_ref[...]
    g2 = g2_ref[...]
    b2 = b2_ref[...]
    sel1 = _pool_selector(W2, W1)          # (W1/2, W1)
    sel2 = _pool_selector(W3, W2)          # (W2/2, W2)

    # Zero the padded intermediate: the halo ring is layer-2's conv padding.
    h_sc[...] = jnp.zeros(h_sc.shape, h_sc.dtype)

    feats = []
    for s in range(bt):                    # static unroll; bt is 1 or 2 here
        # ---------------- block 1: 3x3 conv as one K=9*Cin matmul ----------
        acc1 = jnp.dot(xs_ref[s * HW1:(s + 1) * HW1, :], w1_ref[...],
                       preferred_element_type=jnp.float32)       # (HW1, Cpad)
        y1 = _instance_norm_relu(acc1, g1, b1)

        # 2x2/2 avg-pool: H direction via VPU adds, W direction via a tiny
        # in-register selector matmul per pooled row (0.25 folded into sel).
        y1 = y1.reshape(H2, 2, W1, Cpad)
        y1 = y1[:, 0] + y1[:, 1]                                  # (H2, W1, Cpad)
        pooled1 = jnp.stack(
            [jnp.dot(sel1, y1[h], preferred_element_type=jnp.float32)
             for h in range(H2)], axis=0)                         # (H2, W2, Cpad)

        # Stash inside the zero halo for layer-2's in-kernel im2col.
        h_sc[s, 1:1 + H2, 1:1 + W2, :] = pooled1.astype(h_sc.dtype)

        # ---------------- block 2: 3x3 conv via 9 shifted in-VMEM taps -----
        acc2 = jnp.zeros((H2 * W2, Cpad), jnp.float32)
        for ky in range(3):
            for kx in range(3):
                tap = h_sc[s, ky:ky + H2, kx:kx + W2, :].reshape(H2 * W2, Cpad)
                acc2 = acc2 + jnp.dot(tap, w2_ref[ky * 3 + kx],
                                      preferred_element_type=jnp.float32)
        y2 = _instance_norm_relu(acc2, g2, b2)

        y2 = y2.reshape(H3, 2, W2, Cpad)
        y2 = y2[:, 0] + y2[:, 1]                                  # (H3, W2, Cpad)
        # Flatten in (h, w, cpad) order (matches the pre-permuted FC weight)
        # via lane-concatenation of 128-wide, 128-aligned row slices.
        pieces = []
        for h in range(H3):
            r = jnp.dot(sel2, y2[h],
                        preferred_element_type=jnp.float32)       # (W3, Cpad)
            r = r.astype(jnp.bfloat16)
            for wv in range(W3):
                pieces.append(r[wv:wv + 1, :])                    # (1, Cpad)
        feats.append(jnp.concatenate(pieces, axis=1))             # (1, H3*W3*Cpad)

    feat = feats[0] if bt == 1 else jnp.concatenate(feats, axis=0)
    o_ref[...] = (jnp.dot(feat, wfc_ref[...],
                          preferred_element_type=jnp.float32)
                  + bfc_ref[...]).astype(o_ref.dtype)


def _multi_tensorcore():
    """Best effort: v7x exposes 2 TensorCores per chip; v5e/v6e have 1."""
    try:
        kind = jax.devices()[0].device_kind.lower()
    except Exception:
        return False
    return "7" in kind


# ----------------------------------------------------------------------------
# Forward wrapper
# ----------------------------------------------------------------------------
@functools.partial(jax.jit, static_argnames=("num_classes",))
def convnet_forward(x_nchw, params, *, num_classes):
    (w1, g1, b1, w2, g2, b2, wfc, bfc) = params
    B, Cin, H, W = x_nchw.shape
    assert H % 4 == 0 and W % 4 == 0
    K1pad, Cpad = w1.shape
    H2, W2, H3, W3 = H // 2, W // 2, H // 4, W // 4
    NCPAD = wfc.shape[1]
    HW = H * W
    F = H3 * W3 * Cpad

    # NCHW -> NHWC once, then layer-1 im2col (9 taps concat on channels) as
    # XLA glue -- tiny at Cin=3; layer-2's im2col happens inside the kernel.
    x = jnp.transpose(x_nchw, (0, 2, 3, 1))
    xp = jnp.pad(x, ((0, 0), (1, 1), (1, 1), (0, 0)))
    xs = jnp.concatenate(
        [xp[:, ky:ky + H, kx:kx + W, :] for ky in range(3) for kx in range(3)],
        axis=-1).reshape(B * HW, 9 * Cin)
    xs = jnp.pad(xs, ((0, 0), (0, K1pad - 9 * Cin))).astype(jnp.bfloat16)

    # Grid of 2 only when there are 2 TensorCores (v7x); otherwise a single
    # step keeps the full M on the conv matmul and avoids per-step overhead.
    n_steps = 2 if (B % 2 == 0 and _multi_tensorcore()) else 1
    bt = B // n_steps

    kernel = functools.partial(_convnet_kernel, bt=bt, H1=H, W1=W)
    out = pl.pallas_call(
        kernel,
        out_shape=jax.ShapeDtypeStruct((B, NCPAD), jnp.float32),
        grid=(n_steps,),
        in_specs=[
            pl.BlockSpec((bt * HW, K1pad), lambda i: (i, 0)),
            pl.BlockSpec((K1pad, Cpad), lambda i: (0, 0)),
            pl.BlockSpec((1, Cpad), lambda i: (0, 0)),
            pl.BlockSpec((1, Cpad), lambda i: (0, 0)),
            pl.BlockSpec((9, Cpad, Cpad), lambda i: (0, 0, 0)),
            pl.BlockSpec((1, Cpad), lambda i: (0, 0)),
            pl.BlockSpec((1, Cpad), lambda i: (0, 0)),
            pl.BlockSpec((F, NCPAD), lambda i: (0, 0)),
            pl.BlockSpec((1, NCPAD), lambda i: (0, 0)),
        ],
        out_specs=pl.BlockSpec((bt, NCPAD), lambda i: (i, 0)),
        scratch_shapes=[pltpu.VMEM((bt, H2 + 2, W2 + 2, Cpad), jnp.bfloat16)],
        compiler_params=pltpu.CompilerParams(
            dimension_semantics=("parallel",)),
    )(xs, w1, g1, b1, w2, g2, b2, wfc, bfc)
    return out[:, :num_classes]


# ----------------------------------------------------------------------------
# Parameter packing (run once, outside jit)
# ----------------------------------------------------------------------------
def prep_conv1(w_pt, gamma, beta, cpad, k1pad):
    """w_pt: (Cout, Cin, 3, 3) -> (K1pad, Cpad) with rows in (ky,kx,cin) order."""
    cout, cin, kh, kw = w_pt.shape
    assert kh * kw * cin <= k1pad
    w = jnp.transpose(w_pt, (2, 3, 1, 0)).reshape(kh * kw * cin, cout)
    wk = jnp.zeros((k1pad, cpad), jnp.float32).at[:kh * kw * cin, :cout].set(w)
    g = jnp.zeros((1, cpad), jnp.float32).at[:, :cout].set(gamma[None, :])
    b = jnp.zeros((1, cpad), jnp.float32).at[:, :cout].set(beta[None, :])
    return wk.astype(jnp.bfloat16), g, b


def prep_conv2(w_pt, gamma, beta, cpad):
    """w_pt: (Cout, Cin, 3, 3) -> (9, Cpad, Cpad) per-tap weights."""
    cout, cin, kh, kw = w_pt.shape
    w = jnp.transpose(w_pt, (2, 3, 1, 0)).reshape(kh * kw, cin, cout)
    wk = jnp.zeros((kh * kw, cpad, cpad), jnp.float32).at[:, :cin, :cout].set(w)
    g = jnp.zeros((1, cpad), jnp.float32).at[:, :cout].set(gamma[None, :])
    b = jnp.zeros((1, cpad), jnp.float32).at[:, :cout].set(beta[None, :])
    return wk.astype(jnp.bfloat16), g, b


def prep_fc(w_pt, b_pt, net_width, h3, w3, cpad, ncpad):
    """PyTorch (nc, C*H3*W3) -> (H3*W3*Cpad, ncpad), rows in (h,w,cpad) order."""
    nc = w_pt.shape[0]
    w = w_pt.reshape(nc, net_width, h3, w3)
    w = jnp.transpose(w, (2, 3, 1, 0))                     # (h, w, c, nc)
    wfull = jnp.zeros((h3, w3, cpad, nc), jnp.float32)
    wfull = wfull.at[:, :, :net_width, :].set(w)
    wfull = wfull.reshape(h3 * w3 * cpad, nc)
    wfull = jnp.pad(wfull, ((0, 0), (0, ncpad - nc))).astype(jnp.bfloat16)
    bfull = jnp.zeros((1, ncpad), jnp.float32).at[:, :nc].set(b_pt[None, :])
    return wfull, bfull


# ----------------------------------------------------------------------------
# Pure-JAX f32 reference (matches the PyTorch module, conv bias omitted: it is
# exactly cancelled by instancenorm's per-channel mean subtraction)
# ----------------------------------------------------------------------------
def reference_forward(x, w1, g1, b1, w2, g2, b2, wfc, bfc):
    def block(h, wk, g, b):
        y = jax.lax.conv_general_dilated(
            h, wk, window_strides=(1, 1), padding=((1, 1), (1, 1)),
            dimension_numbers=("NCHW", "OIHW", "NCHW"))
        mean = jnp.mean(y, axis=(2, 3), keepdims=True)
        var = jnp.var(y, axis=(2, 3), keepdims=True)
        y = (y - mean) * jax.lax.rsqrt(var + EPS)
        y = y * g[None, :, None, None] + b[None, :, None, None]
        y = jnp.maximum(y, 0.0)
        bb, cc, hh, ww = y.shape
        return y.reshape(bb, cc, hh // 2, 2, ww // 2, 2).mean(axis=(3, 5))

    h = block(x, w1, g1, b1)
    h = block(h, w2, g2, b2)
    feat = h.reshape(h.shape[0], -1)
    return feat @ wfc.T + bfc[None, :]


if __name__ == "__main__":
    # ConvNet(channel=3, num_classes=10, net_width=32, net_depth=2,
    #         net_act='relu', net_norm='instancenorm',
    #         net_pooling='avgpooling', im_size=(16, 16))
    channel, num_classes, net_width = 3, 10, 32
    H, W = 16, 16
    batch = 2
    CPAD, NCPAD, K1PAD = 128, 128, 128
    H3, W3 = H // 4, W // 4

    key = jax.random.PRNGKey(0)
    key, kx, k1, k2, k3, k4, k5, k6 = jax.random.split(key, 8)
    x = jax.random.normal(kx, (batch, channel, H, W), jnp.float32)   # NCHW

    # Deterministic synthetic parameters (PyTorch layouts).
    w1_pt = jax.random.normal(k1, (net_width, channel, 3, 3), jnp.float32) \
        / ((channel * 9) ** 0.5)
    w2_pt = jax.random.normal(k2, (net_width, net_width, 3, 3), jnp.float32) \
        / ((net_width * 9) ** 0.5)
    g1_pt = 1.0 + 0.1 * jax.random.normal(k5, (net_width,), jnp.float32)
    b1_pt = 0.1 * jax.random.normal(k6, (net_width,), jnp.float32)
    g2_pt = jnp.ones((net_width,), jnp.float32)
    b2_pt = jnp.zeros((net_width,), jnp.float32)
    num_feat = net_width * H3 * W3
    wfc_pt = jax.random.normal(k3, (num_classes, num_feat), jnp.float32) \
        / (num_feat ** 0.5)
    bfc_pt = 0.01 * jax.random.normal(k4, (num_classes,), jnp.float32)

    w1, g1, b1 = prep_conv1(w1_pt, g1_pt, b1_pt, CPAD, K1PAD)
    w2, g2, b2 = prep_conv2(w2_pt, g2_pt, b2_pt, CPAD)
    wfc, bfc = prep_fc(wfc_pt, bfc_pt, net_width, H3, W3, CPAD, NCPAD)
    params = (w1, g1, b1, w2, g2, b2, wfc, bfc)

    out = convnet_forward(x, params, num_classes=num_classes)
    out = jax.block_until_ready(out)
    assert out.shape == (batch, num_classes), out.shape

    ref = reference_forward(x, w1_pt, g1_pt, b1_pt, w2_pt, g2_pt, b2_pt,
                            wfc_pt, bfc_pt)
    max_err = float(jnp.max(jnp.abs(out - ref)))
    assert max_err < 0.25, f"max abs error vs f32 reference: {max_err}"
    print("KERNEL_OK")
</pallas_src>

<mosaic_0001>
module attributes {stable_mosaic.version = 11 : i64} {
  func.func @_convnet_kernel(%arg0: i32, %arg1: memref<512x128xbf16, #tpu.memory_space<vmem>>, %arg2: memref<128x128xbf16, #tpu.memory_space<vmem>>, %arg3: memref<1x128xf32, #tpu.memory_space<vmem>>, %arg4: memref<1x128xf32, #tpu.memory_space<vmem>>, %arg5: memref<9x128x128xbf16, #tpu.memory_space<vmem>>, %arg6: memref<1x128xf32, #tpu.memory_space<vmem>>, %arg7: memref<1x128xf32, #tpu.memory_space<vmem>>, %arg8: memref<2048x128xbf16, #tpu.memory_space<vmem>>, %arg9: memref<1x128xf32, #tpu.memory_space<vmem>>, %arg10: memref<2x128xf32, #tpu.memory_space<vmem>>, %arg11: memref<2x10x10x128xbf16, #tpu.memory_space<vmem>>) attributes {dimension_semantics = [#tpu.dimension_semantics<parallel>], iteration_bounds = array<i64: 1>, scalar_prefetch = 0 : i64, scratch_operands = 1 : i64, tpu.core_type = #tpu.core_type<tc>, window_params = [{transform_indices = @transform_0, window_bounds = array<i64: 512, 128>}, {pipeline_mode = #tpu.pipeline_mode<synchronous>, transform_indices = @transform_1, window_bounds = array<i64: 128, 128>}, {pipeline_mode = #tpu.pipeline_mode<synchronous>, transform_indices = @transform_2, window_bounds = array<i64: 1, 128>}, {pipeline_mode = #tpu.pipeline_mode<synchronous>, transform_indices = @transform_3, window_bounds = array<i64: 1, 128>}, {pipeline_mode = #tpu.pipeline_mode<synchronous>, transform_indices = @transform_4, window_bounds = array<i64: 9, 128, 128>}, {pipeline_mode = #tpu.pipeline_mode<synchronous>, transform_indices = @transform_5, window_bounds = array<i64: 1, 128>}, {pipeline_mode = #tpu.pipeline_mode<synchronous>, transform_indices = @transform_6, window_bounds = array<i64: 1, 128>}, {pipeline_mode = #tpu.pipeline_mode<synchronous>, transform_indices = @transform_7, window_bounds = array<i64: 2048, 128>}, {pipeline_mode = #tpu.pipeline_mode<synchronous>, transform_indices = @transform_8, window_bounds = array<i64: 1, 128>}, {transform_indices = @transform_9, window_bounds = array<i64: 2, 128>}]} {
    %c0 = arith.constant 0 : index
    %c0_0 = arith.constant 0 : index
    %0 = vector.load %arg3[%c0, %c0_0] : memref<1x128xf32, #tpu.memory_space<vmem>>, vector<1x128xf32>
    %c0_1 = arith.constant 0 : index
    %c0_2 = arith.constant 0 : index
    %1 = vector.load %arg4[%c0_1, %c0_2] : memref<1x128xf32, #tpu.memory_space<vmem>>, vector<1x128xf32>
    %c0_3 = arith.constant 0 : index
    %c0_4 = arith.constant 0 : index
    %2 = vector.load %arg6[%c0_3, %c0_4] : memref<1x128xf32, #tpu.memory_space<vmem>>, vector<1x128xf32>
    %c0_5 = arith.constant 0 : index
    %c0_6 = arith.constant 0 : index
    %3 = vector.load %arg7[%c0_5, %c0_6] : memref<1x128xf32, #tpu.memory_space<vmem>>, vector<1x128xf32>
    %4 = tpu.iota {dimensions = array<i32: 0>} : vector<8x16xi32>
    %5 = tpu.iota {dimensions = array<i32: 1>} : vector<8x16xi32>
    %c2_i32 = arith.constant 2 : i32
    %6 = vector.broadcast %c2_i32 : i32 to vector<8x16xi32>
    %7 = arith.muli %6, %4 : vector<8x16xi32>
    %8 = arith.cmpi eq, %5, %7 : vector<8x16xi32>
    %c2_i32_7 = arith.constant 2 : i32
    %9 = vector.broadcast %c2_i32_7 : i32 to vector<8x16xi32>
    %10 = arith.muli %9, %4 : vector<8x16xi32>
    %c1_i32 = arith.constant 1 : i32
    %11 = vector.broadcast %c1_i32 : i32 to vector<8x16xi32>
    %12 = arith.addi %10, %11 : vector<8x16xi32>
    %13 = arith.cmpi eq, %5, %12 : vector<8x16xi32>
    %14 = arith.ori %8, %13 : vector<8x16xi1>
    %cst = arith.constant 2.500000e-01 : f32
    %cst_8 = arith.constant 0.000000e+00 : f32
    %15 = vector.broadcast %cst : f32 to vector<8x16xf32>
    %16 = vector.broadcast %cst_8 : f32 to vector<8x16xf32>
    %17 = arith.select %14, %15, %16 : vector<8x16xi1>, vector<8x16xf32>
    %18 = tpu.iota {dimensions = array<i32: 0>} : vector<4x8xi32>
    %19 = tpu.iota {dimensions = array<i32: 1>} : vector<4x8xi32>
    %c2_i32_9 = arith.constant 2 : i32
    %20 = vector.broadcast %c2_i32_9 : i32 to vector<4x8xi32>
    %21 = arith.muli %20, %18 : vector<4x8xi32>
    %22 = arith.cmpi eq, %19, %21 : vector<4x8xi32>
    %c2_i32_10 = arith.constant 2 : i32
    %23 = vector.broadcast %c2_i32_10 : i32 to vector<4x8xi32>
    %24 = arith.muli %23, %18 : vector<4x8xi32>
    %c1_i32_11 = arith.constant 1 : i32
    %25 = vector.broadcast %c1_i32_11 : i32 to vector<4x8xi32>
    %26 = arith.addi %24, %25 : vector<4x8xi32>
    %27 = arith.cmpi eq, %19, %26 : vector<4x8xi32>
    %28 = arith.ori %22, %27 : vector<4x8xi1>
    %cst_12 = arith.constant 2.500000e-01 : f32
    %cst_13 = arith.constant 0.000000e+00 : f32
    %29 = vector.broadcast %cst_12 : f32 to vector<4x8xf32>
    %30 = vector.broadcast %cst_13 : f32 to vector<4x8xf32>
    %31 = arith.select %28, %29, %30 : vector<4x8xi1>, vector<4x8xf32>
    %cst_14 = arith.constant 0.000000e+00 : bf16
    %32 = vector.broadcast %cst_14 : bf16 to vector<2x10x10x128xbf16>
    %c0_15 = arith.constant 0 : index
    %c0_16 = arith.constant 0 : index
    %c0_17 = arith.constant 0 : index
    %c0_18 = arith.constant 0 : index
    %33 = vector.load %arg11[%c0_15, %c0_16, %c0_17, %c0_18] : memref<2x10x10x128xbf16, #tpu.memory_space<vmem>>, vector<2x10x10x128xbf16>
    tpu.vector_store %arg11[%c0_15, %c0_16, %c0_17, %c0_18], %32 {strides = array<i32>} : memref<2x10x10x128xbf16, #tpu.memory_space<vmem>>, vector<2x10x10x128xbf16>,
    %c0_19 = arith.constant 0 : index
    %c0_20 = arith.constant 0 : index
    %34 = vector.load %arg1[%c0_19, %c0_20] : memref<512x128xbf16, #tpu.memory_space<vmem>>, vector<256x128xbf16>
    %c0_21 = arith.constant 0 : index
    %c0_22 = arith.constant 0 : index
    %35 = vector.load %arg2[%c0_21, %c0_22] : memref<128x128xbf16, #tpu.memory_space<vmem>>, vector<128x128xbf16>
    %cst_23 = arith.constant dense<0.000000e+00> : vector<256x128xf32>
    %36 = tpu.matmul %34, %35, %cst_23 {dimension_numbers = #tpu.dot_dimension_numbers<[1], [0], [0], [1], [0, 0, 1, 1], [], []>} : vector<256x128xbf16>, vector<128x128xbf16>, vector<256x128xf32> -> vector<256x128xf32>
    %cst_24 = arith.constant dense<0.000000e+00> : vector<128xf32>
    %37 = vector.multi_reduction <add>, %36, %cst_24 [0] : vector<256x128xf32> to vector<128xf32>
    %38 = vector.shape_cast %37 : vector<128xf32> to vector<1x128xf32>
    %cst_25 = arith.constant 2.560000e+02 : f32
    %39 = vector.broadcast %cst_25 : f32 to vector<1x128xf32>
    %40 = arith.divf %38, %39 : vector<1x128xf32>
    %41 = vector.broadcast %40 : vector<1x128xf32> to vector<256x128xf32>
    %42 = arith.subf %36, %41 : vector<256x128xf32>
    %43 = arith.mulf %42, %42 : vector<256x128xf32>
    %cst_26 = arith.constant dense<0.000000e+00> : vector<128xf32>
    %44 = vector.multi_reduction <add>, %43, %cst_26 [0] : vector<256x128xf32> to vector<128xf32>
    %45 = vector.shape_cast %44 : vector<128xf32> to vector<1x128xf32>
    %cst_27 = arith.constant 2.560000e+02 : f32
    %46 = vector.broadcast %cst_27 : f32 to vector<1x128xf32>
    %47 = arith.divf %45, %46 : vector<1x128xf32>
    %cst_28 = arith.constant 9.99999974E-6 : f32
    %48 = vector.broadcast %cst_28 : f32 to vector<1x128xf32>
    %49 = arith.addf %47, %48 : vector<1x128xf32>
    %50 = math.rsqrt %49 : vector<1x128xf32>
    %51 = arith.mulf %0, %50 : vector<1x128xf32>
    %52 = arith.mulf %40, %51 : vector<1x128xf32>
    %53 = arith.subf %1, %52 : vector<1x128xf32>
    %54 = vector.broadcast %51 : vector<1x128xf32> to vector<256x128xf32>
    %55 = arith.mulf %36, %54 : vector<256x128xf32>
    %56 = vector.broadcast %53 : vector<1x128xf32> to vector<256x128xf32>
    %57 = arith.addf %55, %56 : vector<256x128xf32>
    %cst_29 = arith.constant 0.000000e+00 : f32
    %58 = vector.broadcast %cst_29 : f32 to vector<256x128xf32>
    %59 = arith.maximumf %57, %58 : vector<256x128xf32>
    %60 = vector.shape_cast %59 : vector<256x128xf32> to vector<8x2x16x128xf32>
    %61 = vector.extract_strided_slice %60 {offsets = [0, 0, 0, 0], sizes = [8, 1, 16, 128], strides = [1, 1, 1, 1]} : vector<8x2x16x128xf32> to vector<8x1x16x128xf32>
    %62 = vector.shape_cast %61 : vector<8x1x16x128xf32> to vector<8x16x128xf32>
    %63 = vector.extract_strided_slice %60 {offsets = [0, 1, 0, 0], sizes = [8, 1, 16, 128], strides = [1, 1, 1, 1]} : vector<8x2x16x128xf32> to vector<8x1x16x128xf32>
    %64 = vector.shape_cast %63 : vector<8x1x16x128xf32> to vector<8x16x128xf32>
    %65 = arith.addf %62, %64 : vector<8x16x128xf32>
    %66 = vector.extract_strided_slice %65 {offsets = [0, 0, 0], sizes = [1, 16, 128], strides = [1, 1, 1]} : vector<8x16x128xf32> to vector<1x16x128xf32>
    %67 = vector.shape_cast %66 : vector<1x16x128xf32> to vector<16x128xf32>
    %cst_30 = arith.constant dense<0.000000e+00> : vector<8x128xf32>
    %68 = tpu.matmul %17, %67, %cst_30 {dimension_numbers = #tpu.dot_dimension_numbers<[1], [0], [0], [1], [0, 0, 1, 1], [], []>} : vector<8x16xf32>, vector<16x128xf32>, vector<8x128xf32> -> vector<8x128xf32>
    %69 = vector.extract_strided_slice %65 {offsets = [1, 0, 0], sizes = [1, 16, 128], strides = [1, 1, 1]} : vector<8x16x128xf32> to vector<1x16x128xf32>
    %70 = vector.shape_cast %69 : vector<1x16x128xf32> to vector<16x128xf32>
    %cst_31 = arith.constant dense<0.000000e+00> : vector<8x128xf32>
    %71 = tpu.matmul %17, %70, %cst_31 {dimension_numbers = #tpu.dot_dimension_numbers<[1], [0], [0], [1], [0, 0, 1, 1], [], []>} : vector<8x16xf32>, vector<16x128xf32>, vector<8x128xf32> -> vector<8x128xf32>
    %72 = vector.extract_strided_slice %65 {offsets = [2, 0, 0], sizes = [1, 16, 128], strides = [1, 1, 1]} : vector<8x16x128xf32> to vector<1x16x128xf32>
    %73 = vector.shape_cast %72 : vector<1x16x128xf32> to vector<16x128xf32>
    %cst_32 = arith.constant dense<0.000000e+00> : vector<8x128xf32>
    %74 = tpu.matmul %17, %73, %cst_32 {dimension_numbers = #tpu.dot_dimension_numbers<[1], [0], [0], [1], [0, 0, 1, 1], [], []>} : vector<8x16xf32>, vector<16x128xf32>, vector<8x128xf32> -> vector<8x128xf32>
    %75 = vector.extract_strided_slice %65 {offsets = [3, 0, 0], sizes = [1, 16, 128], strides = [1, 1, 1]} : vector<8x16x128xf32> to vector<1x16x128xf32>
    %76 = vector.shape_cast %75 : vector<1x16x128xf32> to vector<16x128xf32>
    %cst_33 = arith.constant dense<0.000000e+00> : vector<8x128xf32>
    %77 = tpu.matmul %17, %76, %cst_33 {dimension_numbers = #tpu.dot_dimension_numbers<[1], [0], [0], [1], [0, 0, 1, 1], [], []>} : vector<8x16xf32>, vector<16x128xf32>, vector<8x128xf32> -> vector<8x128xf32>
    %78 = vector.extract_strided_slice %65 {offsets = [4, 0, 0], sizes = [1, 16, 128], strides = [1, 1, 1]} : vector<8x16x128xf32> to vector<1x16x128xf32>
    %79 = vector.shape_cast %78 : vector<1x16x128xf32> to vector<16x128xf32>
    %cst_34 = arith.constant dense<0.000000e+00> : vector<8x128xf32>
    %80 = tpu.matmul %17, %79, %cst_34 {dimension_numbers = #tpu.dot_dimension_numbers<[1], [0], [0], [1], [0, 0, 1, 1], [], []>} : vector<8x16xf32>, vector<16x128xf32>, vector<8x128xf32> -> vector<8x128xf32>
    %81 = vector.extract_strided_slice %65 {offsets = [5, 0, 0], sizes = [1, 16, 128], strides = [1, 1, 1]} : vector<8x16x128xf32> to vector<1x16x128xf32>
    %82 = vector.shape_cast %81 : vector<1x16x128xf32> to vector<16x128xf32>
    %cst_35 = arith.constant dense<0.000000e+00> : vector<8x128xf32>
    %83 = tpu.matmul %17, %82, %cst_35 {dimension_numbers = #tpu.dot_dimension_numbers<[1], [0], [0], [1], [0, 0, 1, 1], [], []>} : vector<8x16xf32>, vector<16x128xf32>, vector<8x128xf32> -> vector<8x128xf32>
    %84 = vector.extract_strided_slice %65 {offsets = [6, 0, 0], sizes = [1, 16, 128], strides = [1, 1, 1]} : vector<8x16x128xf32> to vector<1x16x128xf32>
    %85 = vector.shape_cast %84 : vector<1x16x128xf32> to vector<16x128xf32>
    %cst_36 = arith.constant dense<0.000000e+00> : vector<8x128xf32>
    %86 = tpu.matmul %17, %85, %cst_36 {dimension_numbers = #tpu.dot_dimension_numbers<[1], [0], [0], [1], [0, 0, 1, 1], [], []>} : vector<8x16xf32>, vector<16x128xf32>, vector<8x128xf32> -> vector<8x128xf32>
    %87 = vector.extract_strided_slice %65 {offsets = [7, 0, 0], sizes = [1, 16, 128], strides = [1, 1, 1]} : vector<8x16x128xf32> to vector<1x16x128xf32>
    %88 = vector.shape_cast %87 : vector<1x16x128xf32> to vector<16x128xf32>
    %cst_37 = arith.constant dense<0.000000e+00> : vector<8x128xf32>
    %89 = tpu.matmul %17, %88, %cst_37 {dimension_numbers = #tpu.dot_dimension_numbers<[1], [0], [0], [1], [0, 0, 1, 1], [], []>} : vector<8x16xf32>, vector<16x128xf32>, vector<8x128xf32> -> vector<8x128xf32>
    %90 = vector.shape_cast %68 : vector<8x128xf32> to vector<1x8x128xf32>
    %91 = vector.shape_cast %71 : vector<8x128xf32> to vector<1x8x128xf32>
    %92 = vector.shape_cast %74 : vector<8x128xf32> to vector<1x8x128xf32>
    %93 = vector.shape_cast %77 : vector<8x128xf32> to vector<1x8x128xf32>
    %94 = vector.shape_cast %80 : vector<8x128xf32> to vector<1x8x128xf32>
    %95 = vector.shape_cast %83 : vector<8x128xf32> to vector<1x8x128xf32>
    %96 = vector.shape_cast %86 : vector<8x128xf32> to vector<1x8x128xf32>
    %97 = vector.shape_cast %89 : vector<8x128xf32> to vector<1x8x128xf32>
    %98 = tpu.concatenate %90, %91, %92, %93, %94, %95, %96, %97 in 0 : vector<1x8x128xf32>, vector<1x8x128xf32>, vector<1x8x128xf32>, vector<1x8x128xf32>, vector<1x8x128xf32>, vector<1x8x128xf32>, vector<1x8x128xf32>, vector<1x8x128xf32> -> vector<8x8x128xf32>
    %99 = arith.truncf %98 : vector<8x8x128xf32> to vector<8x8x128xbf16>
    %c0_38 = arith.constant 0 : index
    %c1 = arith.constant 1 : index
    %c1_39 = arith.constant 1 : index
    %c0_40 = arith.constant 0 : index
    %100 = vector.load %arg11[%c0_38, %c1, %c1_39, %c0_40] : memref<2x10x10x128xbf16, #tpu.memory_space<vmem>>, vector<1x8x8x128xbf16>
    %101 = vector.shape_cast %100 : vector<1x8x8x128xbf16> to vector<8x8x128xbf16>
    %102 = vector.shape_cast %99 : vector<8x8x128xbf16> to vector<1x8x8x128xbf16>
    tpu.vector_store %arg11[%c0_38, %c1, %c1_39, %c0_40], %102 {strides = array<i32>} : memref<2x10x10x128xbf16, #tpu.memory_space<vmem>>, vector<1x8x8x128xbf16>,
    %cst_41 = arith.constant 0.000000e+00 : f32
    %103 = vector.broadcast %cst_41 : f32 to vector<64x128xf32>
    %c0_42 = arith.constant 0 : index
    %c0_43 = arith.constant 0 : index
    %c0_44 = arith.constant 0 : index
    %c0_45 = arith.constant 0 : index
    %104 = vector.load %arg11[%c0_42, %c0_43, %c0_44, %c0_45] : memref<2x10x10x128xbf16, #tpu.memory_space<vmem>>, vector<1x8x8x128xbf16>
    %105 = vector.shape_cast %104 : vector<1x8x8x128xbf16> to vector<8x8x128xbf16>
    %106 = vector.shape_cast %105 : vector<8x8x128xbf16> to vector<64x128xbf16>
    %c0_46 = arith.constant 0 : index
    %c0_47 = arith.constant 0 : index
    %c0_48 = arith.constant 0 : index
    %107 = vector.load %arg5[%c0_46, %c0_47, %c0_48] : memref<9x128x128xbf16, #tpu.memory_space<vmem>>, vector<1x128x128xbf16>
    %108 = vector.shape_cast %107 : vector<1x128x128xbf16> to vector<128x128xbf16>
    %cst_49 = arith.constant dense<0.000000e+00> : vector<64x128xf32>
    %109 = tpu.matmul %106, %108, %cst_49 {dimension_numbers = #tpu.dot_dimension_numbers<[1], [0], [0], [1], [0, 0, 1, 1], [], []>} : vector<64x128xbf16>, vector<128x128xbf16>, vector<64x128xf32> -> vector<64x128xf32>
    %110 = arith.addf %103, %109 : vector<64x128xf32>
    %c0_50 = arith.constant 0 : index
    %c0_51 = arith.constant 0 : index
    %c1_52 = arith.constant 1 : index
    %c0_53 = arith.constant 0 : index
    %111 = vector.load %arg11[%c0_50, %c0_51, %c1_52, %c0_53] : memref<2x10x10x128xbf16, #tpu.memory_space<vmem>>, vector<1x8x8x128xbf16>
    %112 = vector.shape_cast %111 : vector<1x8x8x128xbf16> to vector<8x8x128xbf16>
    %113 = vector.shape_cast %112 : vector<8x8x128xbf16> to vector<64x128xbf16>
    %c1_54 = arith.constant 1 : index
    %c0_55 = arith.constant 0 : index
    %c0_56 = arith.constant 0 : index
    %114 = vector.load %arg5[%c1_54, %c0_55, %c0_56] : memref<9x128x128xbf16, #tpu.memory_space<vmem>>, vector<1x128x128xbf16>
    %115 = vector.shape_cast %114 : vector<1x128x128xbf16> to vector<128x128xbf16>
    %cst_57 = arith.constant dense<0.000000e+00> : vector<64x128xf32>
    %116 = tpu.matmul %113, %115, %cst_57 {dimension_numbers = #tpu.dot_dimension_numbers<[1], [0], [0], [1], [0, 0, 1, 1], [], []>} : vector<64x128xbf16>, vector<128x128xbf16>, vector<64x128xf32> -> vector<64x128xf32>
    %117 = arith.addf %110, %116 : vector<64x128xf32>
    %c0_58 = arith.constant 0 : index
    %c0_59 = arith.constant 0 : index
    %c2 = arith.constant 2 : index
    %c0_60 = arith.constant 0 : index
    %118 = vector.load %arg11[%c0_58, %c0_59, %c2, %c0_60] : memref<2x10x10x128xbf16, #tpu.memory_space<vmem>>, vector<1x8x8x128xbf16>
    %119 = vector.shape_cast %118 : vector<1x8x8x128xbf16> to vector<8x8x128xbf16>
    %120 = vector.shape_cast %119 : vector<8x8x128xbf16> to vector<64x128xbf16>
    %c2_61 = arith.constant 2 : index
    %c0_62 = arith.constant 0 : index
    %c0_63 = arith.constant 0 : index
    %121 = vector.load %arg5[%c2_61, %c0_62, %c0_63] : memref<9x128x128xbf16, #tpu.memory_space<vmem>>, vector<1x128x128xbf16>
    %122 = vector.shape_cast %121 : vector<1x128x128xbf16> to vector<128x128xbf16>
    %cst_64 = arith.constant dense<0.000000e+00> : vector<64x128xf32>
    %123 = tpu.matmul %120, %122, %cst_64 {dimension_numbers = #tpu.dot_dimension_numbers<[1], [0], [0], [1], [0, 0, 1, 1], [], []>} : vector<64x128xbf16>, vector<128x128xbf16>, vector<64x128xf32> -> vector<64x128xf32>
    %124 = arith.addf %117, %123 : vector<64x128xf32>
    %c0_65 = arith.constant 0 : index
    %c1_66 = arith.constant 1 : index
    %c0_67 = arith.constant 0 : index
    %c0_68 = arith.constant 0 : index
    %125 = vector.load %arg11[%c0_65, %c1_66, %c0_67, %c0_68] : memref<2x10x10x128xbf16, #tpu.memory_space<vmem>>, vector<1x8x8x128xbf16>
    %126 = vector.shape_cast %125 : vector<1x8x8x128xbf16> to vector<8x8x128xbf16>
    %127 = vector.shape_cast %126 : vector<8x8x128xbf16> to vector<64x128xbf16>
    %c3 = arith.constant 3 : index
    %c0_69 = arith.constant 0 : index
    %c0_70 = arith.constant 0 : index
    %128 = vector.load %arg5[%c3, %c0_69, %c0_70] : memref<9x128x128xbf16, #tpu.memory_space<vmem>>, vector<1x128x128xbf16>
    %129 = vector.shape_cast %128 : vector<1x128x128xbf16> to vector<128x128xbf16>
    %cst_71 = arith.constant dense<0.000000e+00> : vector<64x128xf32>
    %130 = tpu.matmul %127, %129, %cst_71 {dimension_numbers = #tpu.dot_dimension_numbers<[1], [0], [0], [1], [0, 0, 1, 1], [], []>} : vector<64x128xbf16>, vector<128x128xbf16>, vector<64x128xf32> -> vector<64x128xf32>
    %131 = arith.addf %124, %130 : vector<64x128xf32>
    %c0_72 = arith.constant 0 : index
    %c1_73 = arith.constant 1 : index
    %c1_74 = arith.constant 1 : index
    %c0_75 = arith.constant 0 : index
    %132 = vector.load %arg11[%c0_72, %c1_73, %c1_74, %c0_75] : memref<2x10x10x128xbf16, #tpu.memory_space<vmem>>, vector<1x8x8x128xbf16>
    %133 = vector.shape_cast %132 : vector<1x8x8x128xbf16> to vector<8x8x128xbf16>
    %134 = vector.shape_cast %133 : vector<8x8x128xbf16> to vector<64x128xbf16>
    %c4 = arith.constant 4 : index
    %c0_76 = arith.constant 0 : index
    %c0_77 = arith.constant 0 : index
    %135 = vector.load %arg5[%c4, %c0_76, %c0_77] : memref<9x128x128xbf16, #tpu.memory_space<vmem>>, vector<1x128x128xbf16>
    %136 = vector.shape_cast %135 : vector<1x128x128xbf16> to vector<128x128xbf16>
    %cst_78 = arith.constant dense<0.000000e+00> : vector<64x128xf32>
    %137 = tpu.matmul %134, %136, %cst_78 {dimension_numbers = #tpu.dot_dimension_numbers<[1], [0], [0], [1], [0, 0, 1, 1], [], []>} : vector<64x128xbf16>, vector<128x128xbf16>, vector<64x128xf32> -> vector<64x128xf32>
    %138 = arith.addf %131, %137 : vector<64x128xf32>
    %c0_79 = arith.constant 0 : index
    %c1_80 = arith.constant 1 : index
    %c2_81 = arith.constant 2 : index
    %c0_82 = arith.constant 0 : index
    %139 = vector.load %arg11[%c0_79, %c1_80, %c2_81, %c0_82] : memref<2x10x10x128xbf16, #tpu.memory_space<vmem>>, vector<1x8x8x128xbf16>
    %140 = vector.shape_cast %139 : vector<1x8x8x128xbf16> to vector<8x8x128xbf16>
    %141 = vector.shape_cast %140 : vector<8x8x128xbf16> to vector<64x128xbf16>
    %c5 = arith.constant 5 : index
    %c0_83 = arith.constant 0 : index
    %c0_84 = arith.constant 0 : index
    %142 = vector.load %arg5[%c5, %c0_83, %c0_84] : memref<9x128x128xbf16, #tpu.memory_space<vmem>>, vector<1x128x128xbf16>
    %143 = vector.shape_cast %142 : vector<1x128x128xbf16> to vector<128x128xbf16>
    %cst_85 = arith.constant dense<0.000000e+00> : vector<64x128xf32>
    %144 = tpu.matmul %141, %143, %cst_85 {dimension_numbers = #tpu.dot_dimension_numbers<[1], [0], [0], [1], [0, 0, 1, 1], [], []>} : vector<64x128xbf16>, vector<128x128xbf16>, vector<64x128xf32> -> vector<64x128xf32>
    %145 = arith.addf %138, %144 : vector<64x128xf32>
    %c0_86 = arith.constant 0 : index
    %c2_87 = arith.constant 2 : index
    %c0_88 = arith.constant 0 : index
    %c0_89 = arith.constant 0 : index
    %146 = vector.load %arg11[%c0_86, %c2_87, %c0_88, %c0_89] : memref<2x10x10x128xbf16, #tpu.memory_space<vmem>>, vector<1x8x8x128xbf16>
    %147 = vector.shape_cast %146 : vector<1x8x8x128xbf16> to vector<8x8x128xbf16>
    %148 = vector.shape_cast %147 : vector<8x8x128xbf16> to vector<64x128xbf16>
    %c6 = arith.constant 6 : index
    %c0_90 = arith.constant 0 : index
    %c0_91 = arith.constant 0 : index
    %149 = vector.load %arg5[%c6, %c0_90, %c0_91] : memref<9x128x128xbf16, #tpu.memory_space<vmem>>, vector<1x128x128xbf16>
    %150 = vector.shape_cast %149 : vector<1x128x128xbf16> to vector<128x128xbf16>
    %cst_92 = arith.constant dense<0.000000e+00> : vector<64x128xf32>
    %151 = tpu.matmul %148, %150, %cst_92 {dimension_numbers = #tpu.dot_dimension_numbers<[1], [0], [0], [1], [0, 0, 1, 1], [], []>} : vector<64x128xbf16>, vector<128x128xbf16>, vector<64x128xf32> -> vector<64x128xf32>
    %152 = arith.addf %145, %151 : vector<64x128xf32>
    %c0_93 = arith.constant 0 : index
    %c2_94 = arith.constant 2 : index
    %c1_95 = arith.constant 1 : index
    %c0_96 = arith.constant 0 : index
    %153 = vector.load %arg11[%c0_93, %c2_94, %c1_95, %c0_96] : memref<2x10x10x128xbf16, #tpu.memory_space<vmem>>, vector<1x8x8x128xbf16>
    %154 = vector.shape_cast %153 : vector<1x8x8x128xbf16> to vector<8x8x128xbf16>
    %155 = vector.shape_cast %154 : vector<8x8x128xbf16> to vector<64x128xbf16>
    %c7 = arith.constant 7 : index
    %c0_97 = arith.constant 0 : index
    %c0_98 = arith.constant 0 : index
    %156 = vector.load %arg5[%c7, %c0_97, %c0_98] : memref<9x128x128xbf16, #tpu.memory_space<vmem>>, vector<1x128x128xbf16>
    %157 = vector.shape_cast %156 : vector<1x128x128xbf16> to vector<128x128xbf16>
    %cst_99 = arith.constant dense<0.000000e+00> : vector<64x128xf32>
    %158 = tpu.matmul %155, %157, %cst_99 {dimension_numbers = #tpu.dot_dimension_numbers<[1], [0], [0], [1], [0, 0, 1, 1], [], []>} : vector<64x128xbf16>, vector<128x128xbf16>, vector<64x128xf32> -> vector<64x128xf32>
    %159 = arith.addf %152, %158 : vector<64x128xf32>
    %c0_100 = arith.constant 0 : index
    %c2_101 = arith.constant 2 : index
    %c2_102 = arith.constant 2 : index
    %c0_103 = arith.constant 0 : index
    %160 = vector.load %arg11[%c0_100, %c2_101, %c2_102, %c0_103] : memref<2x10x10x128xbf16, #tpu.memory_space<vmem>>, vector<1x8x8x128xbf16>
    %161 = vector.shape_cast %160 : vector<1x8x8x128xbf16> to vector<8x8x128xbf16>
    %162 = vector.shape_cast %161 : vector<8x8x128xbf16> to vector<64x128xbf16>
    %c8 = arith.constant 8 : index
    %c0_104 = arith.constant 0 : index
    %c0_105 = arith.constant 0 : index
    %163 = vector.load %arg5[%c8, %c0_104, %c0_105] : memref<9x128x128xbf16, #tpu.memory_space<vmem>>, vector<1x128x128xbf16>
    %164 = vector.shape_cast %163 : vector<1x128x128xbf16> to vector<128x128xbf16>
    %cst_106 = arith.constant dense<0.000000e+00> : vector<64x128xf32>
    %165 = tpu.matmul %162, %164, %cst_106 {dimension_numbers = #tpu.dot_dimension_numbers<[1], [0], [0], [1], [0, 0, 1, 1], [], []>} : vector<64x128xbf16>, vector<128x128xbf16>, vector<64x128xf32> -> vector<64x128xf32>
    %166 = arith.addf %159, %165 : vector<64x128xf32>
    %cst_107 = arith.constant dense<0.000000e+00> : vector<128xf32>
    %167 = vector.multi_reduction <add>, %166, %cst_107 [0] : vector<64x128xf32> to vector<128xf32>
    %168 = vector.shape_cast %167 : vector<128xf32> to vector<1x128xf32>
    %cst_108 = arith.constant 6.400000e+01 : f32
    %169 = vector.broadcast %cst_108 : f32 to vector<1x128xf32>
    %170 = arith.divf %168, %169 : vector<1x128xf32>
    %171 = vector.broadcast %170 : vector<1x128xf32> to vector<64x128xf32>
    %172 = arith.subf %166, %171 : vector<64x128xf32>
    %173 = arith.mulf %172, %172 : vector<64x128xf32>
    %cst_109 = arith.constant dense<0.000000e+00> : vector<128xf32>
    %174 = vector.multi_reduction <add>, %173, %cst_109 [0] : vector<64x128xf32> to vector<128xf32>
    %175 = vector.shape_cast %174 : vector<128xf32> to vector<1x128xf32>
    %cst_110 = arith.constant 6.400000e+01 : f32
    %176 = vector.broadcast %cst_110 : f32 to vector<1x128xf32>
    %177 = arith.divf %175, %176 : vector<1x128xf32>
    %cst_111 = arith.constant 9.99999974E-6 : f32
    %178 = vector.broadcast %cst_111 : f32 to vector<1x128xf32>
    %179 = arith.addf %177, %178 : vector<1x128xf32>
    %180 = math.rsqrt %179 : vector<1x128xf32>
    %181 = arith.mulf %2, %180 : vector<1x128xf32>
    %182 = arith.mulf %170, %181 : vector<1x128xf32>
    %183 = arith.subf %3, %182 : vector<1x128xf32>
    %184 = vector.broadcast %181 : vector<1x128xf32> to vector<64x128xf32>
    %185 = arith.mulf %166, %184 : vector<64x128xf32>
    %186 = vector.broadcast %183 : vector<1x128xf32> to vector<64x128xf32>
    %187 = arith.addf %185, %186 : vector<64x128xf32>
    %cst_112 = arith.constant 0.000000e+00 : f32
    %188 = vector.broadcast %cst_112 : f32 to vector<64x128xf32>
    %189 = arith.maximumf %187, %188 : vector<64x128xf32>
    %190 = vector.shape_cast %189 : vector<64x128xf32> to vector<4x2x8x128xf32>
    %191 = vector.extract_strided_slice %190 {offsets = [0, 0, 0, 0], sizes = [4, 1, 8, 128], strides = [1, 1, 1, 1]} : vector<4x2x8x128xf32> to vector<4x1x8x128xf32>
    %192 = vector.shape_cast %191 : vector<4x1x8x128xf32> to vector<4x8x128xf32>
    %193 = vector.extract_strided_slice %190 {offsets = [0, 1, 0, 0], sizes = [4, 1, 8, 128], strides = [1, 1, 1, 1]} : vector<4x2x8x128xf32> to vector<4x1x8x128xf32>
    %194 = vector.shape_cast %193 : vector<4x1x8x128xf32> to vector<4x8x128xf32>
    %195 = arith.addf %192, %194 : vector<4x8x128xf32>
    %196 = vector.extract_strided_slice %195 {offsets = [0, 0, 0], sizes = [1, 8, 128], strides = [1, 1, 1]} : vector<4x8x128xf32> to vector<1x8x128xf32>
    %197 = vector.shape_cast %196 : vector<1x8x128xf32> to vector<8x128xf32>
    %cst_113 = arith.constant dense<0.000000e+00> : vector<4x128xf32>
    %198 = tpu.matmul %31, %197, %cst_113 {dimension_numbers = #tpu.dot_dimension_numbers<[1], [0], [0], [1], [0, 0, 1, 1], [], []>} : vector<4x8xf32>, vector<8x128xf32>, vector<4x128xf32> -> vector<4x128xf32>
    %199 = arith.truncf %198 : vector<4x128xf32> to vector<4x128xbf16>
    %200 = vector.extract_strided_slice %199 {offsets = [0, 0], sizes = [1, 128], strides = [1, 1]} : vector<4x128xbf16> to vector<1x128xbf16>
    %201 = vector.extract_strided_slice %199 {offsets = [1, 0], sizes = [1, 128], strides = [1, 1]} : vector<4x128xbf16> to vector<1x128xbf16>
    %202 = vector.extract_strided_slice %199 {offsets = [2, 0], sizes = [1, 128], strides = [1, 1]} : vector<4x128xbf16> to vector<1x128xbf16>
    %203 = vector.extract_strided_slice %199 {offsets = [3, 0], sizes = [1, 128], strides = [1, 1]} : vector<4x128xbf16> to vector<1x128xbf16>
    %204 = vector.extract_strided_slice %195 {offsets = [1, 0, 0], sizes = [1, 8, 128], strides = [1, 1, 1]} : vector<4x8x128xf32> to vector<1x8x128xf32>
    %205 = vector.shape_cast %204 : vector<1x8x128xf32> to vector<8x128xf32>
    %cst_114 = arith.constant dense<0.000000e+00> : vector<4x128xf32>
    %206 = tpu.matmul %31, %205, %cst_114 {dimension_numbers = #tpu.dot_dimension_numbers<[1], [0], [0], [1], [0, 0, 1, 1], [], []>} : vector<4x8xf32>, vector<8x128xf32>, vector<4x128xf32> -> vector<4x128xf32>
    %207 = arith.truncf %206 : vector<4x128xf32> to vector<4x128xbf16>
    %208 = vector.extract_strided_slice %207 {offsets = [0, 0], sizes = [1, 128], strides = [1, 1]} : vector<4x128xbf16> to vector<1x128xbf16>
    %209 = vector.extract_strided_slice %207 {offsets = [1, 0], sizes = [1, 128], strides = [1, 1]} : vector<4x128xbf16> to vector<1x128xbf16>
    %210 = vector.extract_strided_slice %207 {offsets = [2, 0], sizes = [1, 128], strides = [1, 1]} : vector<4x128xbf16> to vector<1x128xbf16>
    %211 = vector.extract_strided_slice %207 {offsets = [3, 0], sizes = [1, 128], strides = [1, 1]} : vector<4x128xbf16> to vector<1x128xbf16>
    %212 = vector.extract_strided_slice %195 {offsets = [2, 0, 0], sizes = [1, 8, 128], strides = [1, 1, 1]} : vector<4x8x128xf32> to vector<1x8x128xf32>
    %213 = vector.shape_cast %212 : vector<1x8x128xf32> to vector<8x128xf32>
    %cst_115 = arith.constant dense<0.000000e+00> : vector<4x128xf32>
    %214 = tpu.matmul %31, %213, %cst_115 {dimension_numbers = #tpu.dot_dimension_numbers<[1], [0], [0], [1], [0, 0, 1, 1], [], []>} : vector<4x8xf32>, vector<8x128xf32>, vector<4x128xf32> -> vector<4x128xf32>
    %215 = arith.truncf %214 : vector<4x128xf32> to vector<4x128xbf16>
    %216 = vector.extract_strided_slice %215 {offsets = [0, 0], sizes = [1, 128], strides = [1, 1]} : vector<4x128xbf16> to vector<1x128xbf16>
    %217 = vector.extract_strided_slice %215 {offsets = [1, 0], sizes = [1, 128], strides = [1, 1]} : vector<4x128xbf16> to vector<1x128xbf16>
    %218 = vector.extract_strided_slice %215 {offsets = [2, 0], sizes = [1, 128], strides = [1, 1]} : vector<4x128xbf16> to vector<1x128xbf16>
    %219 = vector.extract_strided_slice %215 {offsets = [3, 0], sizes = [1, 128], strides = [1, 1]} : vector<4x128xbf16> to vector<1x128xbf16>
    %220 = vector.extract_strided_slice %195 {offsets = [3, 0, 0], sizes = [1, 8, 128], strides = [1, 1, 1]} : vector<4x8x128xf32> to vector<1x8x128xf32>
    %221 = vector.shape_cast %220 : vector<1x8x128xf32> to vector<8x128xf32>
    %cst_116 = arith.constant dense<0.000000e+00> : vector<4x128xf32>
    %222 = tpu.matmul %31, %221, %cst_116 {dimension_numbers = #tpu.dot_dimension_numbers<[1], [0], [0], [1], [0, 0, 1, 1], [], []>} : vector<4x8xf32>, vector<8x128xf32>, vector<4x128xf32> -> vector<4x128xf32>
    %223 = arith.truncf %222 : vector<4x128xf32> to vector<4x128xbf16>
    %224 = vector.extract_strided_slice %223 {offsets = [0, 0], sizes = [1, 128], strides = [1, 1]} : vector<4x128xbf16> to vector<1x128xbf16>
    %225 = vector.extract_strided_slice %223 {offsets = [1, 0], sizes = [1, 128], strides = [1, 1]} : vector<4x128xbf16> to vector<1x128xbf16>
    %226 = vector.extract_strided_slice %223 {offsets = [2, 0], sizes = [1, 128], strides = [1, 1]} : vector<4x128xbf16> to vector<1x128xbf16>
    %227 = vector.extract_strided_slice %223 {offsets = [3, 0], sizes = [1, 128], strides = [1, 1]} : vector<4x128xbf16> to vector<1x128xbf16>
    %228 = tpu.concatenate %200, %201, %202, %203, %208, %209, %210, %211, %216, %217, %218, %219, %224, %225, %226, %227 in 1 : vector<1x128xbf16>, vector<1x128xbf16>, vector<1x128xbf16>, vector<1x128xbf16>, vector<1x128xbf16>, vector<1x128xbf16>, vector<1x128xbf16>, vector<1x128xbf16>, vector<1x128xbf16>, vector<1x128xbf16>, vector<1x128xbf16>, vector<1x128xbf16>, vector<1x128xbf16>, vector<1x128xbf16>, vector<1x128xbf16>, vector<1x128xbf16> -> vector<1x2048xbf16>
    %c256 = arith.constant 256 : index
    %c0_117 = arith.constant 0 : index
    %229 = vector.load %arg1[%c256, %c0_117] : memref<512x128xbf16, #tpu.memory_space<vmem>>, vector<256x128xbf16>
    %c0_118 = arith.constant 0 : index
    %c0_119 = arith.constant 0 : index
    %230 = vector.load %arg2[%c0_118, %c0_119] : memref<128x128xbf16, #tpu.memory_space<vmem>>, vector<128x128xbf16>
    %cst_120 = arith.constant dense<0.000000e+00> : vector<256x128xf32>
    %231 = tpu.matmul %229, %230, %cst_120 {dimension_numbers = #tpu.dot_dimension_numbers<[1], [0], [0], [1], [0, 0, 1, 1], [], []>} : vector<256x128xbf16>, vector<128x128xbf16>, vector<256x128xf32> -> vector<256x128xf32>
    %cst_121 = arith.constant dense<0.000000e+00> : vector<128xf32>
    %232 = vector.multi_reduction <add>, %231, %cst_121 [0] : vector<256x128xf32> to vector<128xf32>
    %233 = vector.shape_cast %232 : vector<128xf32> to vector<1x128xf32>
    %cst_122 = arith.constant 2.560000e+02 : f32
    %234 = vector.broadcast %cst_122 : f32 to vector<1x128xf32>
    %235 = arith.divf %233, %234 : vector<1x128xf32>
    %236 = vector.broadcast %235 : vector<1x128xf32> to vector<256x128xf32>
    %237 = arith.subf %231, %236 : vector<256x128xf32>
    %238 = arith.mulf %237, %237 : vector<256x128xf32>
    %cst_123 = arith.constant dense<0.000000e+00> : vector<128xf32>
    %239 = vector.multi_reduction <add>, %238, %cst_123 [0] : vector<256x128xf32> to vector<128xf32>
    %240 = vector.shape_cast %239 : vector<128xf32> to vector<1x128xf32>
    %cst_124 = arith.constant 2.560000e+02 : f32
    %241 = vector.broadcast %cst_124 : f32 to vector<1x128xf32>
    %242 = arith.divf %240, %241 : vector<1x128xf32>
    %cst_125 = arith.constant 9.99999974E-6 : f32
    %243 = vector.broadcast %cst_125 : f32 to vector<1x128xf32>
    %244 = arith.addf %242, %243 : vector<1x128xf32>
    %245 = math.rsqrt %244 : vector<1x128xf32>
    %246 = arith.mulf %0, %245 : vector<1x128xf32>
    %247 = arith.mulf %235, %246 : vector<1x128xf32>
    %248 = arith.subf %1, %247 : vector<1x128xf32>
    %249 = vector.broadcast %246 : vector<1x128xf32> to vector<256x128xf32>
    %250 = arith.mulf %231, %249 : vector<256x128xf32>
    %251 = vector.broadcast %248 : vector<1x128xf32> to vector<256x128xf32>
    %252 = arith.addf %250, %251 : vector<256x128xf32>
    %cst_126 = arith.constant 0.000000e+00 : f32
    %253 = vector.broadcast %cst_126 : f32 to vector<256x128xf32>
    %254 = arith.maximumf %252, %253 : vector<256x128xf32>
    %255 = vector.shape_cast %254 : vector<256x128xf32> to vector<8x2x16x128xf32>
    %256 = vector.extract_strided_slice %255 {offsets = [0, 0, 0, 0], sizes = [8, 1, 16, 128], strides = [1, 1, 1, 1]} : vector<8x2x16x128xf32> to vector<8x1x16x128xf32>
    %257 = vector.shape_cast %256 : vector<8x1x16x128xf32> to vector<8x16x128xf32>
    %258 = vector.extract_strided_slice %255 {offsets = [0, 1, 0, 0], sizes = [8, 1, 16, 128], strides = [1, 1, 1, 1]} : vector<8x2x16x128xf32> to vector<8x1x16x128xf32>
    %259 = vector.shape_cast %258 : vector<8x1x16x128xf32> to vector<8x16x128xf32>
    %260 = arith.addf %257, %259 : vector<8x16x128xf32>
    %261 = vector.extract_strided_slice %260 {offsets = [0, 0, 0], sizes = [1, 16, 128], strides = [1, 1, 1]} : vector<8x16x128xf32> to vector<1x16x128xf32>
    %262 = vector.shape_cast %261 : vector<1x16x128xf32> to vector<16x128xf32>
    %cst_127 = arith.constant dense<0.000000e+00> : vector<8x128xf32>
    %263 = tpu.matmul %17, %262, %cst_127 {dimension_numbers = #tpu.dot_dimension_numbers<[1], [0], [0], [1], [0, 0, 1, 1], [], []>} : vector<8x16xf32>, vector<16x128xf32>, vector<8x128xf32> -> vector<8x128xf32>
    %264 = vector.extract_strided_slice %260 {offsets = [1, 0, 0], sizes = [1, 16, 128], strides = [1, 1, 1]} : vector<8x16x128xf32> to vector<1x16x128xf32>
    %265 = vector.shape_cast %264 : vector<1x16x128xf32> to vector<16x128xf32>
    %cst_128 = arith.constant dense<0.000000e+00> : vector<8x128xf32>
    %266 = tpu.matmul %17, %265, %cst_128 {dimension_numbers = #tpu.dot_dimension_numbers<[1], [0], [0], [1], [0, 0, 1, 1], [], []>} : vector<8x16xf32>, vector<16x128xf32>, vector<8x128xf32> -> vector<8x128xf32>
    %267 = vector.extract_strided_slice %260 {offsets = [2, 0, 0], sizes = [1, 16, 128], strides = [1, 1, 1]} : vector<8x16x128xf32> to vector<1x16x128xf32>
    %268 = vector.shape_cast %267 : vector<1x16x128xf32> to vector<16x128xf32>
    %cst_129 = arith.constant dense<0.000000e+00> : vector<8x128xf32>
    %269 = tpu.matmul %17, %268, %cst_129 {dimension_numbers = #tpu.dot_dimension_numbers<[1], [0], [0], [1], [0, 0, 1, 1], [], []>} : vector<8x16xf32>, vector<16x128xf32>, vector<8x128xf32> -> vector<8x128xf32>
    %270 = vector.extract_strided_slice %260 {offsets = [3, 0, 0], sizes = [1, 16, 128], strides = [1, 1, 1]} : vector<8x16x128xf32> to vector<1x16x128xf32>
    %271 = vector.shape_cast %270 : vector<1x16x128xf32> to vector<16x128xf32>
    %cst_130 = arith.constant dense<0.000000e+00> : vector<8x128xf32>
    %272 = tpu.matmul %17, %271, %cst_130 {dimension_numbers = #tpu.dot_dimension_numbers<[1], [0], [0], [1], [0, 0, 1, 1], [], []>} : vector<8x16xf32>, vector<16x128xf32>, vector<8x128xf32> -> vector<8x128xf32>
    %273 = vector.extract_strided_slice %260 {offsets = [4, 0, 0], sizes = [1, 16, 128], strides = [1, 1, 1]} : vector<8x16x128xf32> to vector<1x16x128xf32>
    %274 = vector.shape_cast %273 : vector<1x16x128xf32> to vector<16x128xf32>
    %cst_131 = arith.constant dense<0.000000e+00> : vector<8x128xf32>
    %275 = tpu.matmul %17, %274, %cst_131 {dimension_numbers = #tpu.dot_dimension_numbers<[1], [0], [0], [1], [0, 0, 1, 1], [], []>} : vector<8x16xf32>, vector<16x128xf32>, vector<8x128xf32> -> vector<8x128xf32>
    %276 = vector.extract_strided_slice %260 {offsets = [5, 0, 0], sizes = [1, 16, 128], strides = [1, 1, 1]} : vector<8x16x128xf32> to vector<1x16x128xf32>
    %277 = vector.shape_cast %276 : vector<1x16x128xf32> to vector<16x128xf32>
    %cst_132 = arith.constant dense<0.000000e+00> : vector<8x128xf32>
    %278 = tpu.matmul %17, %277, %cst_132 {dimension_numbers = #tpu.dot_dimension_numbers<[1], [0], [0], [1], [0, 0, 1, 1], [], []>} : vector<8x16xf32>, vector<16x128xf32>, vector<8x128xf32> -> vector<8x128xf32>
    %279 = vector.extract_strided_slice %260 {offsets = [6, 0, 0], sizes = [1, 16, 128], strides = [1, 1, 1]} : vector<8x16x128xf32> to vector<1x16x128xf32>
    %280 = vector.shape_cast %279 : vector<1x16x128xf32> to vector<16x128xf32>
    %cst_133 = arith.constant dense<0.000000e+00> : vector<8x128xf32>
    %281 = tpu.matmul %17, %280, %cst_133 {dimension_numbers = #tpu.dot_dimension_numbers<[1], [0], [0], [1], [0, 0, 1, 1], [], []>} : vector<8x16xf32>, vector<16x128xf32>, vector<8x128xf32> -> vector<8x128xf32>
    %282 = vector.extract_strided_slice %260 {offsets = [7, 0, 0], sizes = [1, 16, 128], strides = [1, 1, 1]} : vector<8x16x128xf32> to vector<1x16x128xf32>
    %283 = vector.shape_cast %282 : vector<1x16x128xf32> to vector<16x128xf32>
    %cst_134 = arith.constant dense<0.000000e+00> : vector<8x128xf32>
    %284 = tpu.matmul %17, %283, %cst_134 {dimension_numbers = #tpu.dot_dimension_numbers<[1], [0], [0], [1], [0, 0, 1, 1], [], []>} : vector<8x16xf32>, vector<16x128xf32>, vector<8x128xf32> -> vector<8x128xf32>
    %285 = vector.shape_cast %263 : vector<8x128xf32> to vector<1x8x128xf32>
    %286 = vector.shape_cast %266 : vector<8x128xf32> to vector<1x8x128xf32>
    %287 = vector.shape_cast %269 : vector<8x128xf32> to vector<1x8x128xf32>
    %288 = vector.shape_cast %272 : vector<8x128xf32> to vector<1x8x128xf32>
    %289 = vector.shape_cast %275 : vector<8x128xf32> to vector<1x8x128xf32>
    %290 = vector.shape_cast %278 : vector<8x128xf32> to vector<1x8x128xf32>
    %291 = vector.shape_cast %281 : vector<8x128xf32> to vector<1x8x128xf32>
    %292 = vector.shape_cast %284 : vector<8x128xf32> to vector<1x8x128xf32>
    %293 = tpu.concatenate %285, %286, %287, %288, %289, %290, %291, %292 in 0 : vector<1x8x128xf32>, vector<1x8x128xf32>, vector<1x8x128xf32>, vector<1x8x128xf32>, vector<1x8x128xf32>, vector<1x8x128xf32>, vector<1x8x128xf32>, vector<1x8x128xf32> -> vector<8x8x128xf32>
    %294 = arith.truncf %293 : vector<8x8x128xf32> to vector<8x8x128xbf16>
    %c1_135 = arith.constant 1 : index
    %c1_136 = arith.constant 1 : index
    %c1_137 = arith.constant 1 : index
    %c0_138 = arith.constant 0 : index
    %295 = vector.load %arg11[%c1_135, %c1_136, %c1_137, %c0_138] : memref<2x10x10x128xbf16, #tpu.memory_space<vmem>>, vector<1x8x8x128xbf16>
    %296 = vector.shape_cast %295 : vector<1x8x8x128xbf16> to vector<8x8x128xbf16>
    %297 = vector.shape_cast %294 : vector<8x8x128xbf16> to vector<1x8x8x128xbf16>
    tpu.vector_store %arg11[%c1_135, %c1_136, %c1_137, %c0_138], %297 {strides = array<i32>} : memref<2x10x10x128xbf16, #tpu.memory_space<vmem>>, vector<1x8x8x128xbf16>,
    %cst_139 = arith.constant 0.000000e+00 : f32
    %298 = vector.broadcast %cst_139 : f32 to vector<64x128xf32>
    %c1_140 = arith.constant 1 : index
    %c0_141 = arith.constant 0 : index
    %c0_142 = arith.constant 0 : index
    %c0_143 = arith.constant 0 : index
    %299 = vector.load %arg11[%c1_140, %c0_141, %c0_142, %c0_143] : memref<2x10x10x128xbf16, #tpu.memory_space<vmem>>, vector<1x8x8x128xbf16>
    %300 = vector.shape_cast %299 : vector<1x8x8x128xbf16> to vector<8x8x128xbf16>
    %301 = vector.shape_cast %300 : vector<8x8x128xbf16> to vector<64x128xbf16>
    %c0_144 = arith.constant 0 : index
    %c0_145 = arith.constant 0 : index
    %c0_146 = arith.constant 0 : index
    %302 = vector.load %arg5[%c0_144, %c0_145, %c0_146] : memref<9x128x128xbf16, #tpu.memory_space<vmem>>, vector<1x128x128xbf16>
    %303 = vector.shape_cast %302 : vector<1x128x128xbf16> to vector<128x128xbf16>
    %cst_147 = arith.constant dense<0.000000e+00> : vector<64x128xf32>
    %304 = tpu.matmul %301, %303, %cst_147 {dimension_numbers = #tpu.dot_dimension_numbers<[1], [0], [0], [1], [0, 0, 1, 1], [], []>} : vector<64x128xbf16>, vector<128x128xbf16>, vector<64x128xf32> -> vector<64x128xf32>
    %305 = arith.addf %298, %304 : vector<64x128xf32>
    %c1_148 = arith.constant 1 : index
    %c0_149 = arith.constant 0 : index
    %c1_150 = arith.constant 1 : index
    %c0_151 = arith.constant 0 : index
    %306 = vector.load %arg11[%c1_148, %c0_149, %c1_150, %c0_151] : memref<2x10x10x128xbf16, #tpu.memory_space<vmem>>, vector<1x8x8x128xbf16>
    %307 = vector.shape_cast %306 : vector<1x8x8x128xbf16> to vector<8x8x128xbf16>
    %308 = vector.shape_cast %307 : vector<8x8x128xbf16> to vector<64x128xbf16>
    %c1_152 = arith.constant 1 : index
    %c0_153 = arith.constant 0 : index
    %c0_154 = arith.constant 0 : index
    %309 = vector.load %arg5[%c1_152, %c0_153, %c0_154] : memref<9x128x128xbf16, #tpu.memory_space<vmem>>, vector<1x128x128xbf16>
    %310 = vector.shape_cast %309 : vector<1x128x128xbf16> to vector<128x128xbf16>
    %cst_155 = arith.constant dense<0.000000e+00> : vector<64x128xf32>
    %311 = tpu.matmul %308, %310, %cst_155 {dimension_numbers = #tpu.dot_dimension_numbers<[1], [0], [0], [1], [0, 0, 1, 1], [], []>} : vector<64x128xbf16>, vector<128x128xbf16>, vector<64x128xf32> -> vector<64x128xf32>
    %312 = arith.addf %305, %311 : vector<64x128xf32>
    %c1_156 = arith.constant 1 : index
    %c0_157 = arith.constant 0 : index
    %c2_158 = arith.constant 2 : index
    %c0_159 = arith.constant 0 : index
    %313 = vector.load %arg11[%c1_156, %c0_157, %c2_158, %c0_159] : memref<2x10x10x128xbf16, #tpu.memory_space<vmem>>, vector<1x8x8x128xbf16>
    %314 = vector.shape_cast %313 : vector<1x8x8x128xbf16> to vector<8x8x128xbf16>
    %315 = vector.shape_cast %314 : vector<8x8x128xbf16> to vector<64x128xbf16>
    %c2_160 = arith.constant 2 : index
    %c0_161 = arith.constant 0 : index
    %c0_162 = arith.constant 0 : index
    %316 = vector.load %arg5[%c2_160, %c0_161, %c0_162] : memref<9x128x128xbf16, #tpu.memory_space<vmem>>, vector<1x128x128xbf16>
    %317 = vector.shape_cast %316 : vector<1x128x128xbf16> to vector<128x128xbf16>
    %cst_163 = arith.constant dense<0.000000e+00> : vector<64x128xf32>
    %318 = tpu.matmul %315, %317, %cst_163 {dimension_numbers = #tpu.dot_dimension_numbers<[1], [0], [0], [1], [0, 0, 1, 1], [], []>} : vector<64x128xbf16>, vector<128x128xbf16>, vector<64x128xf32> -> vector<64x128xf32>
    %319 = arith.addf %312, %318 : vector<64x128xf32>
    %c1_164 = arith.constant 1 : index
    %c1_165 = arith.constant 1 : index
    %c0_166 = arith.constant 0 : index
    %c0_167 = arith.constant 0 : index
    %320 = vector.load %arg11[%c1_164, %c1_165, %c0_166, %c0_167] : memref<2x10x10x128xbf16, #tpu.memory_space<vmem>>, vector<1x8x8x128xbf16>
    %321 = vector.shape_cast %320 : vector<1x8x8x128xbf16> to vector<8x8x128xbf16>
    %322 = vector.shape_cast %321 : vector<8x8x128xbf16> to vector<64x128xbf16>
    %c3_168 = arith.constant 3 : index
    %c0_169 = arith.constant 0 : index
    %c0_170 = arith.constant 0 : index
    %323 = vector.load %arg5[%c3_168, %c0_169, %c0_170] : memref<9x128x128xbf16, #tpu.memory_space<vmem>>, vector<1x128x128xbf16>
    %324 = vector.shape_cast %323 : vector<1x128x128xbf16> to vector<128x128xbf16>
    %cst_171 = arith.constant dense<0.000000e+00> : vector<64x128xf32>
    %325 = tpu.matmul %322, %324, %cst_171 {dimension_numbers = #tpu.dot_dimension_numbers<[1], [0], [0], [1], [0, 0, 1, 1], [], []>} : vector<64x128xbf16>, vector<128x128xbf16>, vector<64x128xf32> -> vector<64x128xf32>
    %326 = arith.addf %319, %325 : vector<64x128xf32>
    %c1_172 = arith.constant 1 : index
    %c1_173 = arith.constant 1 : index
    %c1_174 = arith.constant 1 : index
    %c0_175 = arith.constant 0 : index
    %327 = vector.load %arg11[%c1_172, %c1_173, %c1_174, %c0_175] : memref<2x10x10x128xbf16, #tpu.memory_space<vmem>>, vector<1x8x8x128xbf16>
    %328 = vector.shape_cast %327 : vector<1x8x8x128xbf16> to vector<8x8x128xbf16>
    %329 = vector.shape_cast %328 : vector<8x8x128xbf16> to vector<64x128xbf16>
    %c4_176 = arith.constant 4 : index
    %c0_177 = arith.constant 0 : index
    %c0_178 = arith.constant 0 : index
    %330 = vector.load %arg5[%c4_176, %c0_177, %c0_178] : memref<9x128x128xbf16, #tpu.memory_space<vmem>>, vector<1x128x128xbf16>
    %331 = vector.shape_cast %330 : vector<1x128x128xbf16> to vector<128x128xbf16>
    %cst_179 = arith.constant dense<0.000000e+00> : vector<64x128xf32>
    %332 = tpu.matmul %329, %331, %cst_179 {dimension_numbers = #tpu.dot_dimension_numbers<[1], [0], [0], [1], [0, 0, 1, 1], [], []>} : vector<64x128xbf16>, vector<128x128xbf16>, vector<64x128xf32> -> vector<64x128xf32>
    %333 = arith.addf %326, %332 : vector<64x128xf32>
    %c1_180 = arith.constant 1 : index
    %c1_181 = arith.constant 1 : index
    %c2_182 = arith.constant 2 : index
    %c0_183 = arith.constant 0 : index
    %334 = vector.load %arg11[%c1_180, %c1_181, %c2_182, %c0_183] : memref<2x10x10x128xbf16, #tpu.memory_space<vmem>>, vector<1x8x8x128xbf16>
    %335 = vector.shape_cast %334 : vector<1x8x8x128xbf16> to vector<8x8x128xbf16>
    %336 = vector.shape_cast %335 : vector<8x8x128xbf16> to vector<64x128xbf16>
    %c5_184 = arith.constant 5 : index
    %c0_185 = arith.constant 0 : index
    %c0_186 = arith.constant 0 : index
    %337 = vector.load %arg5[%c5_184, %c0_185, %c0_186] : memref<9x128x128xbf16, #tpu.memory_space<vmem>>, vector<1x128x128xbf16>
    %338 = vector.shape_cast %337 : vector<1x128x128xbf16> to vector<128x128xbf16>
    %cst_187 = arith.constant dense<0.000000e+00> : vector<64x128xf32>
    %339 = tpu.matmul %336, %338, %cst_187 {dimension_numbers = #tpu.dot_dimension_numbers<[1], [0], [0], [1], [0, 0, 1, 1], [], []>} : vector<64x128xbf16>, vector<128x128xbf16>, vector<64x128xf32> -> vector<64x128xf32>
    %340 = arith.addf %333, %339 : vector<64x128xf32>
    %c1_188 = arith.constant 1 : index
    %c2_189 = arith.constant 2 : index
    %c0_190 = arith.constant 0 : index
    %c0_191 = arith.constant 0 : index
    %341 = vector.load %arg11[%c1_188, %c2_189, %c0_190, %c0_191] : memref<2x10x10x128xbf16, #tpu.memory_space<vmem>>, vector<1x8x8x128xbf16>
    %342 = vector.shape_cast %341 : vector<1x8x8x128xbf16> to vector<8x8x128xbf16>
    %343 = vector.shape_cast %342 : vector<8x8x128xbf16> to vector<64x128xbf16>
    %c6_192 = arith.constant 6 : index
    %c0_193 = arith.constant 0 : index
    %c0_194 = arith.constant 0 : index
    %344 = vector.load %arg5[%c6_192, %c0_193, %c0_194] : memref<9x128x128xbf16, #tpu.memory_space<vmem>>, vector<1x128x128xbf16>
    %345 = vector.shape_cast %344 : vector<1x128x128xbf16> to vector<128x128xbf16>
    %cst_195 = arith.constant dense<0.000000e+00> : vector<64x128xf32>
    %346 = tpu.matmul %343, %345, %cst_195 {dimension_numbers = #tpu.dot_dimension_numbers<[1], [0], [0], [1], [0, 0, 1, 1], [], []>} : vector<64x128xbf16>, vector<128x128xbf16>, vector<64x128xf32> -> vector<64x128xf32>
    %347 = arith.addf %340, %346 : vector<64x128xf32>
    %c1_196 = arith.constant 1 : index
    %c2_197 = arith.constant 2 : index
    %c1_198 = arith.constant 1 : index
    %c0_199 = arith.constant 0 : index
    %348 = vector.load %arg11[%c1_196, %c2_197, %c1_198, %c0_199] : memref<2x10x10x128xbf16, #tpu.memory_space<vmem>>, vector<1x8x8x128xbf16>
    %349 = vector.shape_cast %348 : vector<1x8x8x128xbf16> to vector<8x8x128xbf16>
    %350 = vector.shape_cast %349 : vector<8x8x128xbf16> to vector<64x128xbf16>
    %c7_200 = arith.constant 7 : index
    %c0_201 = arith.constant 0 : index
    %c0_202 = arith.constant 0 : index
    %351 = vector.load %arg5[%c7_200, %c0_201, %c0_202] : memref<9x128x128xbf16, #tpu.memory_space<vmem>>, vector<1x128x128xbf16>
    %352 = vector.shape_cast %351 : vector<1x128x128xbf16> to vector<128x128xbf16>
    %cst_203 = arith.constant dense<0.000000e+00> : vector<64x128xf32>
    %353 = tpu.matmul %350, %352, %cst_203 {dimension_numbers = #tpu.dot_dimension_numbers<[1], [0], [0], [1], [0, 0, 1, 1], [], []>} : vector<64x128xbf16>, vector<128x128xbf16>, vector<64x128xf32> -> vector<64x128xf32>
    %354 = arith.addf %347, %353 : vector<64x128xf32>
    %c1_204 = arith.constant 1 : index
    %c2_205 = arith.constant 2 : index
    %c2_206 = arith.constant 2 : index
    %c0_207 = arith.constant 0 : index
    %355 = vector.load %arg11[%c1_204, %c2_205, %c2_206, %c0_207] : memref<2x10x10x128xbf16, #tpu.memory_space<vmem>>, vector<1x8x8x128xbf16>
    %356 = vector.shape_cast %355 : vector<1x8x8x128xbf16> to vector<8x8x128xbf16>
    %357 = vector.shape_cast %356 : vector<8x8x128xbf16> to vector<64x128xbf16>
    %c8_208 = arith.constant 8 : index
    %c0_209 = arith.constant 0 : index
    %c0_210 = arith.constant 0 : index
    %358 = vector.load %arg5[%c8_208, %c0_209, %c0_210] : memref<9x128x128xbf16, #tpu.memory_space<vmem>>, vector<1x128x128xbf16>
    %359 = vector.shape_cast %358 : vector<1x128x128xbf16> to vector<128x128xbf16>
    %cst_211 = arith.constant dense<0.000000e+00> : vector<64x128xf32>
    %360 = tpu.matmul %357, %359, %cst_211 {dimension_numbers = #tpu.dot_dimension_numbers<[1], [0], [0], [1], [0, 0, 1, 1], [], []>} : vector<64x128xbf16>, vector<128x128xbf16>, vector<64x128xf32> -> vector<64x128xf32>
    %361 = arith.addf %354, %360 : vector<64x128xf32>
    %cst_212 = arith.constant dense<0.000000e+00> : vector<128xf32>
    %362 = vector.multi_reduction <add>, %361, %cst_212 [0] : vector<64x128xf32> to vector<128xf32>
    %363 = vector.shape_cast %362 : vector<128xf32> to vector<1x128xf32>
    %cst_213 = arith.constant 6.400000e+01 : f32
    %364 = vector.broadcast %cst_213 : f32 to vector<1x128xf32>
    %365 = arith.divf %363, %364 : vector<1x128xf32>
    %366 = vector.broadcast %365 : vector<1x128xf32> to vector<64x128xf32>
    %367 = arith.subf %361, %366 : vector<64x128xf32>
    %368 = arith.mulf %367, %367 : vector<64x128xf32>
    %cst_214 = arith.constant dense<0.000000e+00> : vector<128xf32>
    %369 = vector.multi_reduction <add>, %368, %cst_214 [0] : vector<64x128xf32> to vector<128xf32>
    %370 = vector.shape_cast %369 : vector<128xf32> to vector<1x128xf32>
    %cst_215 = arith.constant 6.400000e+01 : f32
    %371 = vector.broadcast %cst_215 : f32 to vector<1x128xf32>
    %372 = arith.divf %370, %371 : vector<1x128xf32>
    %cst_216 = arith.constant 9.99999974E-6 : f32
    %373 = vector.broadcast %cst_216 : f32 to vector<1x128xf32>
    %374 = arith.addf %372, %373 : vector<1x128xf32>
    %375 = math.rsqrt %374 : vector<1x128xf32>
    %376 = arith.mulf %2, %375 : vector<1x128xf32>
    %377 = arith.mulf %365, %376 : vector<1x128xf32>
    %378 = arith.subf %3, %377 : vector<1x128xf32>
    %379 = vector.broadcast %376 : vector<1x128xf32> to vector<64x128xf32>
    %380 = arith.mulf %361, %379 : vector<64x128xf32>
    %381 = vector.broadcast %378 : vector<1x128xf32> to vector<64x128xf32>
    %382 = arith.addf %380, %381 : vector<64x128xf32>
    %cst_217 = arith.constant 0.000000e+00 : f32
    %383 = vector.broadcast %cst_217 : f32 to vector<64x128xf32>
    %384 = arith.maximumf %382, %383 : vector<64x128xf32>
    %385 = vector.shape_cast %384 : vector<64x128xf32> to vector<4x2x8x128xf32>
    %386 = vector.extract_strided_slice %385 {offsets = [0, 0, 0, 0], sizes = [4, 1, 8, 128], strides = [1, 1, 1, 1]} : vector<4x2x8x128xf32> to vector<4x1x8x128xf32>
    %387 = vector.shape_cast %386 : vector<4x1x8x128xf32> to vector<4x8x128xf32>
    %388 = vector.extract_strided_slice %385 {offsets = [0, 1, 0, 0], sizes = [4, 1, 8, 128], strides = [1, 1, 1, 1]} : vector<4x2x8x128xf32> to vector<4x1x8x128xf32>
    %389 = vector.shape_cast %388 : vector<4x1x8x128xf32> to vector<4x8x128xf32>
    %390 = arith.addf %387, %389 : vector<4x8x128xf32>
    %391 = vector.extract_strided_slice %390 {offsets = [0, 0, 0], sizes = [1, 8, 128], strides = [1, 1, 1]} : vector<4x8x128xf32> to vector<1x8x128xf32>
    %392 = vector.shape_cast %391 : vector<1x8x128xf32> to vector<8x128xf32>
    %cst_218 = arith.constant dense<0.000000e+00> : vector<4x128xf32>
    %393 = tpu.matmul %31, %392, %cst_218 {dimension_numbers = #tpu.dot_dimension_numbers<[1], [0], [0], [1], [0, 0, 1, 1], [], []>} : vector<4x8xf32>, vector<8x128xf32>, vector<4x128xf32> -> vector<4x128xf32>
    %394 = arith.truncf %393 : vector<4x128xf32> to vector<4x128xbf16>
    %395 = vector.extract_strided_slice %394 {offsets = [0, 0], sizes = [1, 128], strides = [1, 1]} : vector<4x128xbf16> to vector<1x128xbf16>
    %396 = vector.extract_strided_slice %394 {offsets = [1, 0], sizes = [1, 128], strides = [1, 1]} : vector<4x128xbf16> to vector<1x128xbf16>
    %397 = vector.extract_strided_slice %394 {offsets = [2, 0], sizes = [1, 128], strides = [1, 1]} : vector<4x128xbf16> to vector<1x128xbf16>
    %398 = vector.extract_strided_slice %394 {offsets = [3, 0], sizes = [1, 128], strides = [1, 1]} : vector<4x128xbf16> to vector<1x128xbf16>
    %399 = vector.extract_strided_slice %390 {offsets = [1, 0, 0], sizes = [1, 8, 128], strides = [1, 1, 1]} : vector<4x8x128xf32> to vector<1x8x128xf32>
    %400 = vector.shape_cast %399 : vector<1x8x128xf32> to vector<8x128xf32>
    %cst_219 = arith.constant dense<0.000000e+00> : vector<4x128xf32>
    %401 = tpu.matmul %31, %400, %cst_219 {dimension_numbers = #tpu.dot_dimension_numbers<[1], [0], [0], [1], [0, 0, 1, 1], [], []>} : vector<4x8xf32>, vector<8x128xf32>, vector<4x128xf32> -> vector<4x128xf32>
    %402 = arith.truncf %401 : vector<4x128xf32> to vector<4x128xbf16>
    %403 = vector.extract_strided_slice %402 {offsets = [0, 0], sizes = [1, 128], strides = [1, 1]} : vector<4x128xbf16> to vector<1x128xbf16>
    %404 = vector.extract_strided_slice %402 {offsets = [1, 0], sizes = [1, 128], strides = [1, 1]} : vector<4x128xbf16> to vector<1x128xbf16>
    %405 = vector.extract_strided_slice %402 {offsets = [2, 0], sizes = [1, 128], strides = [1, 1]} : vector<4x128xbf16> to vector<1x128xbf16>
    %406 = vector.extract_strided_slice %402 {offsets = [3, 0], sizes = [1, 128], strides = [1, 1]} : vector<4x128xbf16> to vector<1x128xbf16>
    %407 = vector.extract_strided_slice %390 {offsets = [2, 0, 0], sizes = [1, 8, 128], strides = [1, 1, 1]} : vector<4x8x128xf32> to vector<1x8x128xf32>
    %408 = vector.shape_cast %407 : vector<1x8x128xf32> to vector<8x128xf32>
    %cst_220 = arith.constant dense<0.000000e+00> : vector<4x128xf32>
    %409 = tpu.matmul %31, %408, %cst_220 {dimension_numbers = #tpu.dot_dimension_numbers<[1], [0], [0], [1], [0, 0, 1, 1], [], []>} : vector<4x8xf32>, vector<8x128xf32>, vector<4x128xf32> -> vector<4x128xf32>
    %410 = arith.truncf %409 : vector<4x128xf32> to vector<4x128xbf16>
    %411 = vector.extract_strided_slice %410 {offsets = [0, 0], sizes = [1, 128], strides = [1, 1]} : vector<4x128xbf16> to vector<1x128xbf16>
    %412 = vector.extract_strided_slice %410 {offsets = [1, 0], sizes = [1, 128], strides = [1, 1]} : vector<4x128xbf16> to vector<1x128xbf16>
    %413 = vector.extract_strided_slice %410 {offsets = [2, 0], sizes = [1, 128], strides = [1, 1]} : vector<4x128xbf16> to vector<1x128xbf16>
    %414 = vector.extract_strided_slice %410 {offsets = [3, 0], sizes = [1, 128], strides = [1, 1]} : vector<4x128xbf16> to vector<1x128xbf16>
    %415 = vector.extract_strided_slice %390 {offsets = [3, 0, 0], sizes = [1, 8, 128], strides = [1, 1, 1]} : vector<4x8x128xf32> to vector<1x8x128xf32>
    %416 = vector.shape_cast %415 : vector<1x8x128xf32> to vector<8x128xf32>
    %cst_221 = arith.constant dense<0.000000e+00> : vector<4x128xf32>
    %417 = tpu.matmul %31, %416, %cst_221 {dimension_numbers = #tpu.dot_dimension_numbers<[1], [0], [0], [1], [0, 0, 1, 1], [], []>} : vector<4x8xf32>, vector<8x128xf32>, vector<4x128xf32> -> vector<4x128xf32>
    %418 = arith.truncf %417 : vector<4x128xf32> to vector<4x128xbf16>
    %419 = vector.extract_strided_slice %418 {offsets = [0, 0], sizes = [1, 128], strides = [1, 1]} : vector<4x128xbf16> to vector<1x128xbf16>
    %420 = vector.extract_strided_slice %418 {offsets = [1, 0], sizes = [1, 128], strides = [1, 1]} : vector<4x128xbf16> to vector<1x128xbf16>
    %421 = vector.extract_strided_slice %418 {offsets = [2, 0], sizes = [1, 128], strides = [1, 1]} : vector<4x128xbf16> to vector<1x128xbf16>
    %422 = vector.extract_strided_slice %418 {offsets = [3, 0], sizes = [1, 128], strides = [1, 1]} : vector<4x128xbf16> to vector<1x128xbf16>
    %423 = tpu.concatenate %395, %396, %397, %398, %403, %404, %405, %406, %411, %412, %413, %414, %419, %420, %421, %422 in 1 : vector<1x128xbf16>, vector<1x128xbf16>, vector<1x128xbf16>, vector<1x128xbf16>, vector<1x128xbf16>, vector<1x128xbf16>, vector<1x128xbf16>, vector<1x128xbf16>, vector<1x128xbf16>, vector<1x128xbf16>, vector<1x128xbf16>, vector<1x128xbf16>, vector<1x128xbf16>, vector<1x128xbf16>, vector<1x128xbf16>, vector<1x128xbf16> -> vector<1x2048xbf16>
    %424 = tpu.concatenate %228, %423 in 0 : vector<1x2048xbf16>, vector<1x2048xbf16> -> vector<2x2048xbf16>
    %c0_222 = arith.constant 0 : index
    %c0_223 = arith.constant 0 : index
    %425 = vector.load %arg8[%c0_222, %c0_223] : memref<2048x128xbf16, #tpu.memory_space<vmem>>, vector<2048x128xbf16>
    %cst_224 = arith.constant dense<0.000000e+00> : vector<2x128xf32>
    %426 = tpu.matmul %424, %425, %cst_224 {dimension_numbers = #tpu.dot_dimension_numbers<[1], [0], [0], [1], [0, 0, 1, 1], [], []>} : vector<2x2048xbf16>, vector<2048x128xbf16>, vector<2x128xf32> -> vector<2x128xf32>
    %c0_225 = arith.constant 0 : index
    %c0_226 = arith.constant 0 : index
    %427 = vector.load %arg9[%c0_225, %c0_226] : memref<1x128xf32, #tpu.memory_space<vmem>>, vector<1x128xf32>
    %428 = vector.broadcast %427 : vector<1x128xf32> to vector<2x128xf32>
    %429 = arith.addf %426, %428 : vector<2x128xf32>
    %c0_227 = arith.constant 0 : index
    %c0_228 = arith.constant 0 : index
    %430 = vector.load %arg10[%c0_227, %c0_228] : memref<2x128xf32, #tpu.memory_space<vmem>>, vector<2x128xf32>
    tpu.vector_store %arg10[%c0_227, %c0_228], %429 {strides = array<i32>} : memref<2x128xf32, #tpu.memory_space<vmem>>, vector<2x128xf32>,
    return
  }
  func.func @transform_0(%arg0: i32) -> (i32, i32) {
    %c0_i32 = arith.constant 0 : i32
    %c0_i32_0 = arith.constant 0 : i32
    return %arg0, %c0_i32 : i32, i32
  }
  func.func @transform_1(%arg0: i32) -> (i32, i32) {
    %c0_i32 = arith.constant 0 : i32
    %c0_i32_0 = arith.constant 0 : i32
    %c0_i32_1 = arith.constant 0 : i32
    return %c0_i32, %c0_i32_0 : i32, i32
  }
  func.func @transform_2(%arg0: i32) -> (i32, i32) {
    %c0_i32 = arith.constant 0 : i32
    %c0_i32_0 = arith.constant 0 : i32
    %c0_i32_1 = arith.constant 0 : i32
    return %c0_i32, %c0_i32_0 : i32, i32
  }
  func.func @transform_3(%arg0: i32) -> (i32, i32) {
    %c0_i32 = arith.constant 0 : i32
    %c0_i32_0 = arith.constant 0 : i32
    %c0_i32_1 = arith.constant 0 : i32
    return %c0_i32, %c0_i32_0 : i32, i32
  }
  func.func @transform_4(%arg0: i32) -> (i32, i32, i32) {
    %c0_i32 = arith.constant 0 : i32
    %c0_i32_0 = arith.constant 0 : i32
    %c0_i32_1 = arith.constant 0 : i32
    %c0_i32_2 = arith.constant 0 : i32
    return %c0_i32, %c0_i32_0, %c0_i32_1 : i32, i32, i32
  }
  func.func @transform_5(%arg0: i32) -> (i32, i32) {
    %c0_i32 = arith.constant 0 : i32
    %c0_i32_0 = arith.constant 0 : i32
    %c0_i32_1 = arith.constant 0 : i32
    return %c0_i32, %c0_i32_0 : i32, i32
  }
  func.func @transform_6(%arg0: i32) -> (i32, i32) {
    %c0_i32 = arith.constant 0 : i32
    %c0_i32_0 = arith.constant 0 : i32
    %c0_i32_1 = arith.constant 0 : i32
    return %c0_i32, %c0_i32_0 : i32, i32
  }
  func.func @transform_7(%arg0: i32) -> (i32, i32) {
    %c0_i32 = arith.constant 0 : i32
    %c0_i32_0 = arith.constant 0 : i32
    %c0_i32_1 = arith.constant 0 : i32
    return %c0_i32, %c0_i32_0 : i32, i32
  }
  func.func @transform_8(%arg0: i32) -> (i32, i32) {
    %c0_i32 = arith.constant 0 : i32
    %c0_i32_0 = arith.constant 0 : i32
    %c0_i32_1 = arith.constant 0 : i32
    return %c0_i32, %c0_i32_0 : i32, i32
  }
  func.func @transform_9(%arg0: i32) -> (i32, i32) {
    %c0_i32 = arith.constant 0 : i32
    %c0_i32_0 = arith.constant 0 : i32
    return %arg0, %c0_i32 : i32, i32
  }
}

</mosaic_0001>

<bundles_post_ra>
// kernel: convnet_forward.1
= control target key start
LH: loop header
LB: loop body
LE: loop exit
PB: predicated region body
PF: predicated region fallthrough
CT: control target
= control target key end

     0   :  { %s13734_s0 = inlined_call_operand.vmem [shape: bf16[512,128], index: 0, kind: input, shape index: {}]   ;;  %s13735_s1 = inlined_call_operand.vmem [shape: bf16[128,128], index: 1, kind: input, shape index: {}]   ;;  %s13736_s2 = inlined_call_operand.vmem [shape: f32[1,128], index: 2, kind: input, shape index: {}]   ;;  %s13737_s3 = inlined_call_operand.vmem [shape: f32[1,128], index: 3, kind: input, shape index: {}]   ;;  %s13738_s4 = inlined_call_operand.vmem [shape: bf16[9,128,128], index: 4, kind: input, shape index: {}]   ;;  %s13739_s5 = inlined_call_operand.vmem [shape: f32[1,128], index: 5, kind: input, shape index: {}]   ;;  %s13740_s6 = inlined_call_operand.vmem [shape: f32[1,128], index: 6, kind: input, shape index: {}]   ;;  %s13741_s7 = inlined_call_operand.vmem [shape: bf16[2048,128], index: 7, kind: input, shape index: {}]   ;;  %s13742_s8 = inlined_call_operand.vmem [shape: f32[1,128], index: 8, kind: input, shape index: {}]   ;;  %s13743_s9 = inlined_call_operand.hbm [shape: f32[2,128], index: 9, kind: output, shape index: {}]  }
   0x1   :  { %v10901_v0 = vld [vmem:[%s13735_s1 + $0x38] sm:$0xff]   ;;  %v10902_v1 = vld [vmem:[%s13735_s1 + $0x30] sm:$0xff]   ;;  %v10903_v2 = vld [vmem:[%s13735_s1 + $0x28] sm:$0xff]  }
   0x2   :  { %10217 = vmatprep.subr.bf16.mxu0 %v10901_v0  ;;  %v10904_v3 = vld [vmem:[%s13735_s1 + $0x20] sm:$0xff]   ;;  %v10905_v5 = vld [vmem:[%s13735_s1 + $0x18] sm:$0xff]   ;;  %v10906_v6 = vld [vmem:[%s13735_s1 + $0x10] sm:$0xff]  }
   0x3   :  { %10218 = vmatpush3.bf16.msra.mxu0 %v10901_v0  ;;  %v10909_v4 = vld [vmem:[%s13734_s0] sm:$0xff]   ;;  %v10907_v7 = vld [vmem:[%s13735_s1 + $0x8] sm:$0xff]   ;;  %v10911_v10 = vld [vmem:[%s13734_s0 + $0x10] sm:$0xff]  }
   0x4   :  { %10219 = vmatprep.subr.bf16.mxu0 %v10902_v1  ;;  %10233 = vmatprep.mubr.bf16.mxu0 %v10909_v4  ;;  %v10908_v8 = vld [vmem:[%s13735_s1] sm:$0xff]   ;;  %v10910_v9 = vld [vmem:[%s13734_s0 + $0x8] sm:$0xff]   ;;  %v10912_v11 = vld [vmem:[%s13734_s0 + $0x18] sm:$0xff]  }
   0x5   :  { %v10913_v12 = vld [vmem:[%s13734_s0 + $0x20] sm:$0xff]   ;;  %v10914_v13 = vld [vmem:[%s13734_s0 + $0x28] sm:$0xff]   ;;  %v10915_v14 = vld [vmem:[%s13734_s0 + $0x30] sm:$0xff]  }
   0x6   :  { %v10916_v15 = vld [vmem:[%s13734_s0 + $0x38] sm:$0xff]   ;;  %v10917_v16 = vld [vmem:[%s13734_s0 + $0x40] sm:$0xff]   ;;  %v10918_v17 = vld [vmem:[%s13734_s0 + $0x48] sm:$0xff]  }
   0x7   :  { %10220 = vmatpush3.bf16.msra.mxu0 %v10902_v1  ;;  %v10919_v18 = vld [vmem:[%s13734_s0 + $0x50] sm:$0xff]   ;;  %v10920_v19 = vld [vmem:[%s13734_s0 + $0x58] sm:$0xff]   ;;  %v10921_v20 = vld [vmem:[%s13734_s0 + $0x60] sm:$0xff]  }
   0x8   :  { %10221 = vmatprep.subr.bf16.mxu0 %v10903_v2  ;;  %v10922_v21 = vld [vmem:[%s13734_s0 + $0x68] sm:$0xff]   ;;  %v10923_v22 = vld [vmem:[%s13734_s0 + $0x70] sm:$0xff]   ;;  %v10924_v23 = vld [vmem:[%s13734_s0 + $0x78] sm:$0xff]  }
   0xb   :  { %10222 = vmatpush3.bf16.msra.mxu0 %v10903_v2 }
   0xc   :  { %10223 = vmatprep.subr.bf16.mxu0 %v10904_v3 }
   0xf   :  { %10224 = vmatpush3.bf16.msra.mxu0 %v10904_v3 }
  0x10   :  { %10225 = vmatprep.subr.bf16.mxu0 %v10905_v5 }
  0x13   :  { %10226 = vmatpush3.bf16.msra.mxu0 %v10905_v5 }
  0x14   :  { %10227 = vmatprep.subr.bf16.mxu0 %v10906_v6 }
  0x17   :  { %10228 = vmatpush3.bf16.msra.mxu0 %v10906_v6 }
  0x18   :  { %10229 = vmatprep.subr.bf16.mxu0 %v10907_v7 }
  0x1b   :  { %10230 = vmatpush3.bf16.msra.mxu0 %v10907_v7 }
  0x1c   :  { %10231 = vmatprep.subr.bf16.mxu0 %v10908_v8 }
  0x1f   :  { %10232 = vmatpush3.bf16.msra.mxu0 %v10908_v8 }
  0x22   :  { %10234 = vmatmul.mubr.bf16.vlgmr.msra.gmra.mxu0 %v10910_v9 }
  0x23   :  { %10237 = vmatprep.mubr.bf16.mxu0 %v10911_v10 }
  0x2a   :  { %10238 = vmatmul.mubr.bf16.gmra.mxu0 %v10912_v11 }
  0x2b   :  { %10241 = vmatprep.mubr.bf16.mxu0 %v10913_v12 }
  0x32   :  { %10242 = vmatmul.mubr.bf16.gmra.mxu0 %v10914_v13 }
  0x33   :  { %10245 = vmatprep.mubr.bf16.mxu0 %v10915_v14 }
  0x3a   :  { %10246 = vmatmul.mubr.bf16.gmra.mxu0 %v10916_v15 }
  0x3b   :  { %10249 = vmatprep.mubr.bf16.mxu0 %v10917_v16 }
  0x42   :  { %10250 = vmatmul.mubr.bf16.gmra.mxu0 %v10918_v17 }
  0x43   :  { %10253 = vmatprep.mubr.bf16.mxu0 %v10919_v18 }
  0x4a   :  { %10254 = vmatmul.mubr.bf16.gmra.mxu0 %v10920_v19 }
  0x4b   :  { %10257 = vmatprep.mubr.bf16.mxu0 %v10921_v20 }
  0x52   :  { %10258 = vmatmul.mubr.bf16.gmra.mxu0 %v10922_v21 }
  0x53   :  { %10261 = vmatprep.mubr.bf16.mxu0 %v10923_v22 }
  0x5a   :  { %10262 = vmatmul.mubr.bf16.gmra.mxu0 %v10924_v23 }
  0x5b   :  { %14 = vsyncpa [#allocation4], 0  ;;  %vm11280_vm0 = vmmov 0   ;;  %vm711_vm4 = vcmask 130048   ;;  %vm1388_vm5 = vcmask 1043456   ;;  %vm1394_vm7 = vcmask 1040384  }
  0x5c   :  { %vm1389_vm6 = vsmask.f32 7938  ;;  %vm1395_vm8 = vsmask.f32 256  ;;  %vm1474_vm11 = vsmask.f32 3328 }
  0x5d   :  { %vm11793_vm9 = vmand %vm1388_vm5, %vm1389_vm6  ;;  %vm1475_vm12 = vsmask.f32 7440  ;;  %vm1896_vm14 = vcmask 1042432   ;;  %vm1897_vm15 = vcmask 1046532  }
  0x5e   :  { %vm11797_vm10 = vmand %vm1394_vm7, %vm1395_vm8 }
  0x5f   :  { %vm11824_vm13 = vmor %vm1474_vm11, %vm1475_vm12 }
  0xe2   :  { %v11405_v24 = vpop.f32.mrf.mxu0 }
  0xe4   :  { %v11407_v25 = vpop.f32.mrf.mxu0 }
  0xe6   :  { %v11409_v26 = vpop.f32.mrf.mxu0 }
  0xe8   :  { %v11411_v27 = vpop.f32.mrf.mxu0 }
  0xe9   :  { %v441_v28 = vadd.f32 %v11411_v27, %v11407_v25 }
  0xea   :  { %v11415_v29 = vpop.f32.mrf.mxu0 }
  0xeb   :  { %v442_v30 = vadd.f32 %v11405_v24, %v441_v28 }
  0xec   :  { %v11418_v31 = vpop.f32.mrf.mxu0 }
  0xed   :  { %v443_v32 = vadd.f32 %v11409_v26, %v442_v30 }
  0xee   :  { %v11421_v33 = vpop.f32.mrf.mxu0 }
  0xef   :  { %v444_v34 = vadd.f32 %v443_v32, %v11418_v31 }
  0xf0   :  { %v11424_v35 = vpop.f32.mrf.mxu0 }
  0xf1   :  { %v445_v36 = vadd.f32 %v444_v34, %v11424_v35  ;;  %v13744_v34 = vmov 0.0  }
  0xf2   :  { %v11427_v37 = vpop.f32.mrf.mxu0  ;;  %10265 = vmatprep.subr.mxu1 %v13744_v34  ;;  %10269 = vmatprep.mubr.msk.f32.mxu1 %vm11280_vm0, %v13744_v34 }
  0xf3   :  { %v446_v38 = vadd.f32 %v11415_v29, %v445_v36 }
  0xf4   :  { %v11430_v39 = vpop.f32.mrf.mxu0 }
  0xf5   :  { %v447_v40 = vadd.f32 %v11421_v33, %v446_v38 }
  0xf6   :  { %v11433_v41 = vpop.f32.mrf.mxu0 }
  0xf7   :  { %v448_v42 = vadd.f32 %v447_v40, %v11430_v39 }
  0xf8   :  { %v11436_v43 = vpop.f32.mrf.mxu0 }
  0xf9   :  { %v449_v44 = vadd.f32 %v448_v42, %v11436_v43 }
  0xfa   :  { %v11439_v45 = vpop.f32.mrf.mxu0 }
  0xfb   :  { %v450_v46 = vadd.f32 %v11427_v37, %v449_v44 }
  0xfc   :  { %v11442_v47 = vpop.f32.mrf.mxu0 }
  0xfd   :  { %v451_v48 = vadd.f32 %v11433_v41, %v450_v46 }
  0xfe   :  { %v11445_v49 = vpop.f32.mrf.mxu0 }
  0xff   :  { %v452_v50 = vadd.f32 %v451_v48, %v11442_v47 }
 0x100   :  { %v11448_v51 = vpop.f32.mrf.mxu0 }
 0x101   :  { %v453_v52 = vadd.f32 %v452_v50, %v11448_v51 }
 0x102   :  { %v11451_v53 = vpop.f32.mrf.mxu0 }
 0x103   :  { %v454_v54 = vadd.f32 %v11439_v45, %v453_v52 }
 0x104   :  { %v11454_v55 = vpop.f32.mrf.mxu0 }
 0x105   :  { %v455_v56 = vadd.f32 %v11445_v49, %v454_v54 }
 0x106   :  { %v11457_v57 = vpop.f32.mrf.mxu0 }
 0x107   :  { %v456_v58 = vadd.f32 %v455_v56, %v11454_v55 }
 0x108   :  { %v11460_v59 = vpop.f32.mrf.mxu0 }
 0x109   :  { %v457_v60 = vadd.f32 %v456_v58, %v11460_v59 }
 0x10a   :  { %v11463_v61 = vpop.f32.mrf.mxu0 }
 0x10b   :  { %v458_v62 = vadd.f32 %v11451_v53, %v457_v60 }
 0x10c   :  { %v11466_v63 = vpop.f32.mrf.mxu0 }
 0x10d   :  { %v459_v0 = vadd.f32 %v11457_v57, %v458_v62 }
 0x10e   :  { %v11469_v1 = vpop.f32.mrf.mxu0 }
 0x10f   :  { %v460_v2 = vadd.f32 %v459_v0, %v11466_v63 }
 0x110   :  { %v11472_v3 = vpop.f32.mrf.mxu0 }
 0x111   :  { %v461_v4 = vadd.f32 %v460_v2, %v11472_v3 }
 0x112   :  { %v11475_v5 = vpop.f32.mrf.mxu0 }
 0x113   :  { %v462_v6 = vadd.f32 %v11463_v61, %v461_v4 }
 0x114   :  { %v11478_v7 = vpop.f32.mrf.mxu0 }
 0x115   :  { %v463_v8 = vadd.f32 %v11469_v1, %v462_v6 }
 0x116   :  { %v11481_v9 = vpop.f32.mrf.mxu0 }
 0x117   :  { %v464_v10 = vadd.f32 %v463_v8, %v11478_v7 }
 0x118   :  { %v11484_v11 = vpop.f32.mrf.mxu0 }
 0x119   :  { %v465_v12 = vadd.f32 %v464_v10, %v11484_v11 }
 0x11a   :  { %v11487_v13 = vpop.f32.mrf.mxu0 }
 0x11b   :  { %v466_v14 = vadd.f32 %v11475_v5, %v465_v12 }
 0x11c   :  { %v11490_v15 = vpop.f32.mrf.mxu0 }
 0x11d   :  { %v467_v16 = vadd.f32 %v11481_v9, %v466_v14 }
 0x11e   :  { %v11493_v17 = vpop.f32.mrf.mxu0 }
 0x11f   :  { %v468_v18 = vadd.f32 %v467_v16, %v11490_v15 }
 0x120   :  { %v11496_v19 = vpop.f32.mrf.mxu0 }
 0x121   :  { %v469_v20 = vadd.f32 %v468_v18, %v11496_v19 }
 0x123   :  { %v470_v21 = vadd.f32 %v11487_v13, %v469_v20 }
 0x125   :  { %v471_v22 = vadd.f32 %v11493_v17, %v470_v21 }
 0x127   :  { %v472_v23 = vrot.slane %v471_v22, 4 }
 0x129   :  { %v473_v28 = vadd.f32 %v472_v23, %v471_v22 }
 0x12b   :  { %v474_v30 = vrot.slane %v473_v28, 2 }
 0x12d   :  { %v475_v32 = vadd.f32 %v474_v30, %v473_v28 }
 0x12f   :  { %v476_v36 = vrot.slane %v475_v32, 1 }
 0x131   :  { %v477_v38 = vadd.f32 %v476_v36, %v475_v32 }
 0x133   :  { %v11502_v40 = vmul.f32 0.00390625, %v477_v38 }
 0x135   :  { %v480_v42 = vsub.f32 %v11407_v25, %v11502_v40  ;;  %v481_v44 = vsub.f32 %v11411_v27, %v11502_v40  ;;  %v482_v46 = vsub.f32 %v11405_v24, %v11502_v40  ;;  %v483_v52 = vsub.f32 %v11409_v26, %v11502_v40 }
 0x136   :  { %v484_v54 = vsub.f32 %v11418_v31, %v11502_v40  ;;  %v485_v60 = vsub.f32 %v11424_v35, %v11502_v40  ;;  %v486_v2 = vsub.f32 %v11415_v29, %v11502_v40  ;;  %v487_v8 = vsub.f32 %v11421_v33, %v11502_v40 }
 0x137   :  { %v512_v48 = vmul.f32 %v480_v42, %v480_v42  ;;  %v513_v50 = vmul.f32 %v481_v44, %v481_v44  ;;  %v514_v56 = vmul.f32 %v482_v46, %v482_v46  ;;  %v515_v62 = vmul.f32 %v483_v52, %v483_v52 }
 0x138   :  { %v516_v4 = vmul.f32 %v484_v54, %v484_v54  ;;  %v517_v10 = vmul.f32 %v485_v60, %v485_v60  ;;  %v488_v14 = vsub.f32 %v11430_v39, %v11502_v40  ;;  %v518_v16 = vmul.f32 %v486_v2, %v486_v2 }
 0x139   :  { %v544_v58 = vadd.f32 %v513_v50, %v512_v48  ;;  %v489_v20 = vsub.f32 %v11436_v43, %v11502_v40  ;;  %v519_v21 = vmul.f32 %v487_v8, %v487_v8  ;;  %v490_v23 = vsub.f32 %v11427_v37, %v11502_v40 }
 0x13a   :  { %v520_v28 = vmul.f32 %v488_v14, %v488_v14  ;;  %v491_v32 = vsub.f32 %v11433_v41, %v11502_v40  ;;  %v492_v42 = vsub.f32 %v11442_v47, %v11502_v40  ;;  %v493_v48 = vsub.f32 %v11448_v51, %v11502_v40 }
 0x13b   :  { %v545_v0 = vadd.f32 %v544_v58, %v514_v56  ;;  %v521_v36 = vmul.f32 %v489_v20, %v489_v20  ;;  %v522_v44 = vmul.f32 %v490_v23, %v490_v23  ;;  %v494_v54 = vsub.f32 %v11439_v45, %v11502_v40  ;;  %v10925_v20 = vld [vmem:[%s13738_s4 + $0x38] sm:$0xff]  }
 0x13c   :  { %v523_v50 = vmul.f32 %v491_v32, %v491_v32  ;;  %v524_v56 = vmul.f32 %v492_v42, %v492_v42  ;;  %v495_v60 = vsub.f32 %v11445_v49, %v11502_v40  ;;  %v496_v2 = vsub.f32 %v11454_v55, %v11502_v40  ;;  %10345 = vmatprep.subr.bf16.mxu0 %v10925_v20 }
 0x13d   :  { %v546_v6 = vadd.f32 %v545_v0, %v515_v62  ;;  %v525_v62 = vmul.f32 %v493_v48, %v493_v48  ;;  %v497_v8 = vsub.f32 %v11460_v59, %v11502_v40  ;;  %v498_v14 = vsub.f32 %v11451_v53, %v11502_v40  ;;  %10346 = vmatpush3.bf16.msra.mxu0 %v10925_v20 }
 0x13e   :  { %v499_v23 = vsub.f32 %v11457_v57, %v11502_v40  ;;  %v500_v32 = vsub.f32 %v11466_v63, %v11502_v40  ;;  %v501_v42 = vsub.f32 %v11472_v3, %v11502_v40  ;;  %v502_v48 = vsub.f32 %v11463_v61, %v11502_v40 }
 0x13f   :  { %v547_v12 = vadd.f32 %v546_v6, %v516_v4  ;;  %v526_v4 = vmul.f32 %v494_v54, %v494_v54  ;;  %v503_v54 = vsub.f32 %v11469_v1, %v11502_v40  ;;  %v508_v20 = vsub.f32 %v11490_v15, %v11502_v40 }
 0x141   :  { %v548_v18 = vadd.f32 %v547_v12, %v517_v10  ;;  %v527_v10 = vmul.f32 %v495_v60, %v495_v60  ;;  %v504_v60 = vsub.f32 %v11478_v7, %v11502_v40 }
 0x143   :  { %v549_v22 = vadd.f32 %v548_v18, %v518_v16  ;;  %v528_v16 = vmul.f32 %v496_v2, %v496_v2  ;;  %v505_v2 = vsub.f32 %v11484_v11, %v11502_v40 }
 0x145   :  { %v550_v30 = vadd.f32 %v549_v22, %v519_v21  ;;  %v10926_v21 = vld [vmem:[%s13738_s4 + $0x30] sm:$0xff]   ;;  %v11281_v22 = vmov 0  }
 0x146   :  { %50 = vst [vmem:[#allocation2 + $0x8] sm:$0xf] %v11281_v22  ;;  %51 = vst [vmem:[#allocation2 + $0xc] sm:$0x1] %v11281_v22  ;;  %10347 = vmatprep.subr.bf16.mxu0 %v10926_v21 }
 0x147   :  { %v551_v38 = vadd.f32 %v550_v30, %v520_v28  ;;  %48 = vst [vmem:[#allocation2] sm:$0xf] %v11281_v22  ;;  %49 = vst [vmem:[#allocation2 + $0x4] sm:$0x1] %v11281_v22  ;;  %v529_v28 = vmul.f32 %v497_v8, %v497_v8  ;;  %10348 = vmatpush3.bf16.msra.mxu0 %v10926_v21  ;;  %v506_v8 = vsub.f32 %v11475_v5, %v11502_v40 }
 0x148   :  { %52 = vst [vmem:[#allocation2 + $0x10] sm:$0xf] %v11281_v22  ;;  %53 = vst [vmem:[#allocation2 + $0x14] sm:$0x1] %v11281_v22 }
 0x149   :  { %v552_v46 = vadd.f32 %v551_v38, %v521_v36  ;;  %54 = vst [vmem:[#allocation2 + $0x18] sm:$0xf] %v11281_v22  ;;  %55 = vst [vmem:[#allocation2 + $0x1c] sm:$0x1] %v11281_v22  ;;  %v530_v36 = vmul.f32 %v498_v14, %v498_v14  ;;  %v507_v14 = vsub.f32 %v11481_v9, %v11502_v40 }
 0x14a   :  { %56 = vst [vmem:[#allocation2 + $0x20] sm:$0xf] %v11281_v22  ;;  %57 = vst [vmem:[#allocation2 + $0x24] sm:$0x1] %v11281_v22  ;;  %v538_v21 = vmul.f32 %v506_v8, %v506_v8 }
 0x14b   :  { %v553_v52 = vadd.f32 %v552_v46, %v522_v44  ;;  %58 = vst [vmem:[#allocation2 + $0x28] sm:$0xf] %v11281_v22  ;;  %59 = vst [vmem:[#allocation2 + $0x2c] sm:$0x1] %v11281_v22  ;;  %v531_v44 = vmul.f32 %v499_v23, %v499_v23  ;;  %v509_v23 = vsub.f32 %v11496_v19, %v11502_v40 }
 0x14c   :  { %60 = vst [vmem:[#allocation2 + $0x30] sm:$0xf] %v11281_v22  ;;  %61 = vst [vmem:[#allocation2 + $0x34] sm:$0x1] %v11281_v22 }
 0x14d   :  { %v554_v58 = vadd.f32 %v553_v52, %v523_v50  ;;  %62 = vst [vmem:[#allocation2 + $0x38] sm:$0xf] %v11281_v22  ;;  %63 = vst [vmem:[#allocation2 + $0x3c] sm:$0x1] %v11281_v22  ;;  %v532_v50 = vmul.f32 %v500_v32, %v500_v32  ;;  %v510_v32 = vsub.f32 %v11487_v13, %v11502_v40 }
 0x14e   :  { %64 = vst [vmem:[#allocation2 + $0x40] sm:$0xf] %v11281_v22  ;;  %65 = vst [vmem:[#allocation2 + $0x44] sm:$0x1] %v11281_v22 }
 0x14f   :  { %v555_v0 = vadd.f32 %v554_v58, %v524_v56  ;;  %66 = vst [vmem:[#allocation2 + $0x48] sm:$0xf] %v11281_v22  ;;  %67 = vst [vmem:[#allocation2 + $0x4c] sm:$0x1] %v11281_v22  ;;  %v533_v56 = vmul.f32 %v501_v42, %v501_v42  ;;  %v511_v42 = vsub.f32 %v11493_v17, %v11502_v40 }
 0x150   :  { %68 = vst [vmem:[#allocation2 + $0x50] sm:$0xf] %v11281_v22  ;;  %69 = vst [vmem:[#allocation2 + $0x54] sm:$0x1] %v11281_v22 }
 0x151   :  { %v556_v6 = vadd.f32 %v555_v0, %v525_v62  ;;  %70 = vst [vmem:[#allocation2 + $0x58] sm:$0xf] %v11281_v22  ;;  %71 = vst [vmem:[#allocation2 + $0x5c] sm:$0x1] %v11281_v22  ;;  %v534_v62 = vmul.f32 %v502_v48, %v502_v48  ;;  %v542_v48 = vmul.f32 %v510_v32, %v510_v32 }
 0x152   :  { %72 = vst [vmem:[#allocation2 + $0x60] sm:$0xf] %v11281_v22  ;;  %73 = vst [vmem:[#allocation2 + $0x64] sm:$0x1] %v11281_v22 }
 0x153   :  { %v557_v12 = vadd.f32 %v556_v6, %v526_v4  ;;  %74 = vst [vmem:[#allocation2 + $0x68] sm:$0xf] %v11281_v22  ;;  %75 = vst [vmem:[#allocation2 + $0x6c] sm:$0x1] %v11281_v22  ;;  %v535_v4 = vmul.f32 %v503_v54, %v503_v54 }
 0x154   :  { %76 = vst [vmem:[#allocation2 + $0x70] sm:$0xf] %v11281_v22  ;;  %77 = vst [vmem:[#allocation2 + $0x74] sm:$0x1] %v11281_v22 }
 0x155   :  { %v558_v18 = vadd.f32 %v557_v12, %v527_v10  ;;  %78 = vst [vmem:[#allocation2 + $0x78] sm:$0xf] %v11281_v22  ;;  %79 = vst [vmem:[#allocation2 + $0x7c] sm:$0x1] %v11281_v22  ;;  %v536_v10 = vmul.f32 %v504_v60, %v504_v60 }
 0x156   :  { %80 = vst [vmem:[#allocation2 + $0x80] sm:$0xf] %v11281_v22  ;;  %81 = vst [vmem:[#allocation2 + $0x84] sm:$0x1] %v11281_v22 }
 0x157   :  { %82 = vst [vmem:[#allocation2 + $0x88] sm:$0xf] %v11281_v22  ;;  %83 = vst [vmem:[#allocation2 + $0x8c] sm:$0x1] %v11281_v22  ;;  %v559_v30 = vadd.f32 %v558_v18, %v528_v16  ;;  %v537_v16 = vmul.f32 %v505_v2, %v505_v2 }
 0x158   :  { %84 = vst [vmem:[#allocation2 + $0x90] sm:$0xf] %v11281_v22  ;;  %85 = vst [vmem:[#allocation2 + $0x94] sm:$0x1] %v11281_v22 }
 0x159   :  { %86 = vst [vmem:[#allocation2 + $0x98] sm:$0xf] %v11281_v22  ;;  %87 = vst [vmem:[#allocation2 + $0x9c] sm:$0x1] %v11281_v22  ;;  %v560_v38 = vadd.f32 %v559_v30, %v529_v28  ;;  %v539_v28 = vmul.f32 %v507_v14, %v507_v14  ;;  %v38_v14 = vlaneseq }
 0x15b   :  { %v561_v46 = vadd.f32 %v560_v38, %v530_v36  ;;  %v540_v36 = vmul.f32 %v508_v20, %v508_v20 }
 0x15d   :  { %v562_v52 = vadd.f32 %v561_v46, %v531_v44  ;;  %v541_v44 = vmul.f32 %v509_v23, %v509_v23 }
 0x15f   :  { %v563_v58 = vadd.f32 %v562_v52, %v532_v50  ;;  %v543_v52 = vmul.f32 %v511_v42, %v511_v42 }
 0x161   :  { %v564_v0 = vadd.f32 %v563_v58, %v533_v56 }
 0x163   :  { %v565_v6 = vadd.f32 %v564_v0, %v534_v62 }
 0x165   :  { %v566_v12 = vadd.f32 %v565_v6, %v535_v4 }
 0x167   :  { %v567_v18 = vadd.f32 %v566_v12, %v536_v10  ;;  %v34_v12 = vld [vmem:[%s13736_s2] sm:$0x1] }
 0x169   :  { %v568_v22 = vadd.f32 %v567_v18, %v537_v16  ;;  %v39_v18 = vshrl.u32 %v38_v14, 7 }
 0x16b   :  { %v569_v30 = vadd.f32 %v568_v22, %v538_v21  ;;  %v35_v21 = vld [vmem:[%s13737_s3] sm:$0x1]  ;;  %v11583_v22 = vsub.s32 0, %v39_v18 }
 0x16d   :  { %v570_v38 = vadd.f32 %v569_v30, %v539_v28  ;;  %13762 = vst [vmem:[#allocation6_spill] sm:$0xff] %v11583_v22  ;;  %v42_v28 = vmul.u32 2, %v39_v18 }
 0x16f   :  { %v571_v46 = vadd.f32 %v570_v38, %v540_v36  ;;  %v41_v36 = vand.u32 127, %v38_v14  ;;  %v44_v38 = vadd.s32 1, %v42_v28 }
 0x171   :  { %v572_v50 = vadd.f32 %v571_v46, %v541_v44  ;;  %vm43_vm1 = vcmp.eq.s32.totalorder %v41_v36, %v42_v28  ;;  %vm45_vm2 = vcmp.eq.s32.totalorder %v41_v36, %v44_v38 }
 0x172   :  { %vm46_vm3 = vmor %vm43_vm1, %vm45_vm2  ;;  %vm3500_vm2 = vcmask 64512  }
 0x173   :  { %v573_v54 = vadd.f32 %v572_v50, %v542_v48  ;;  %vm11915_vm1 = vmor %vm1896_vm14, %vm1897_vm15 }
 0x175   :  { %v574_v56 = vadd.f32 %v573_v54, %v543_v52 }
 0x177   :  { %v575_v58 = vrot.slane %v574_v56, 4 }
 0x179   :  { %v576_v60 = vadd.f32 %v575_v58, %v574_v56 }
 0x17b   :  { %v577_v62 = vrot.slane %v576_v60, 2 }
 0x17d   :  { %v578_v0 = vadd.f32 %v577_v62, %v576_v60 }
 0x17f   :  { %v579_v2 = vrot.slane %v578_v0, 1 }
 0x181   :  { %v580_v4 = vadd.f32 %v579_v2, %v578_v0 }
 0x183   :  { %v581_v6 = vmul.f32 0.00390625, %v580_v4 }
 0x185   :  { %v582_v8 = vadd.f32 1e-05, %v581_v6 }
 0x187   :  { %11245 = vrsqrt.f32 %v582_v8 }
 0x194   :  { %v11246_v10 = vpop.eup %11245 }
 0x195   :  { %v584_v16 = vmul.f32 %v11246_v10, %v34_v12 }
 0x197   :  { %v585_v20 = vmul.f32 %v584_v16, %v11502_v40  ;;  %v11586_v30 = vrot.slane %v584_v16, %v11583_v22 }
 0x199   :  { %v586_v23 = vsub.f32 %v35_v21, %v585_v20  ;;  %v593_v42 = vmul.f32 %v11586_v30, %v11407_v25  ;;  %v595_v40 = vmul.f32 %v11405_v24, %v11586_v30  ;;  %v594_v44 = vmul.f32 %v11586_v30, %v11411_v27 }
 0x19a   :  { %v596_v46 = vmul.f32 %v11409_v26, %v11586_v30  ;;  %v598_v48 = vmul.f32 %v11586_v30, %v11424_v35  ;;  %v600_v50 = vmul.f32 %v11421_v33, %v11586_v30  ;;  %v597_v25 = vmul.f32 %v11586_v30, %v11418_v31 }
 0x19b   :  { %v11589_v32 = vrot.slane %v586_v23, %v11583_v22  ;;  %v599_v24 = vmul.f32 %v11415_v29, %v11586_v30  ;;  %v602_v56 = vmul.f32 %v11586_v30, %v11436_v43  ;;  %v604_v58 = vmul.f32 %v11433_v41, %v11586_v30 }
 0x19c   :  { %v601_v4 = vmul.f32 %v11586_v30, %v11430_v39  ;;  %v603_v6 = vmul.f32 %v11427_v37, %v11586_v30  ;;  %v606_v14 = vmul.f32 %v11586_v30, %v11448_v51  ;;  %v608_v16 = vmul.f32 %v11445_v49, %v11586_v30 }
 0x19d   :  { %v631_v52 = vadd.f32 %v11589_v32, %v593_v42  ;;  %v633_v54 = vadd.f32 %v11589_v32, %v595_v40  ;;  %v636_v26 = vadd.f32 %v11589_v32, %v598_v48  ;;  %v638_v27 = vadd.f32 %v11589_v32, %v600_v50 }
 0x19e   :  { %v632_v35 = vadd.f32 %v11589_v32, %v594_v44  ;;  %v634_v33 = vadd.f32 %v11589_v32, %v596_v46  ;;  %v635_v31 = vadd.f32 %v11589_v32, %v597_v25  ;;  %v637_v29 = vadd.f32 %v11589_v32, %v599_v24 }
 0x19f   :  { %v663_v0 = vmax.f32 %v631_v52, 0.0  ;;  %v665_v2 = vmax.f32 %v633_v54, 0.0  ;;  %v640_v43 = vadd.f32 %v11589_v32, %v602_v56  ;;  %v642_v41 = vadd.f32 %v11589_v32, %v604_v58 }
 0x1a0   :  { %v664_v60 = vmax.f32 %v632_v35, 0.0  ;;  %v666_v62 = vmax.f32 %v634_v33, 0.0  ;;  %v668_v8 = vmax.f32 %v636_v26, 0.0  ;;  %v670_v10 = vmax.f32 %v638_v27, 0.0 }
 0x1a1   :  { %v639_v18 = vadd.f32 %v11589_v32, %v601_v4  ;;  %v11631_v39 = vsel %vm46_vm3, 0.25, %v13744_v34  ;;  %v641_v37 = vadd.f32 %v11589_v32, %v603_v6  ;;  %v667_v20 = vmax.f32 %v635_v31, 0.0 }
 0x1a2   :  { %v696_v12 = vadd.f32 %v666_v62, %v664_v60  ;;  %13763 = vst [vmem:[#allocation7_spill] sm:$0xff] %v11631_v39  ;;  %v669_v21 = vmax.f32 %v637_v29, 0.0  ;;  %v695_v23 = vadd.f32 %v665_v2, %v663_v0  ;;  %v605_v28 = vmul.f32 %v11586_v30, %v11442_v47 }
 0x1a3   :  { %v607_v51 = vmul.f32 %v11439_v45, %v11586_v30  ;;  %v644_v36 = vadd.f32 %v11589_v32, %v606_v14  ;;  %v646_v49 = vadd.f32 %v11589_v32, %v608_v16  ;;  %v672_v38 = vmax.f32 %v640_v43, 0.0 }
 0x1a4   :  { %10266 = vmatpush3.msra.mxu1 %v696_v12  ;;  %v674_v42 = vmax.f32 %v642_v41, 0.0  ;;  %v698_v40 = vadd.f32 %v670_v10, %v668_v8  ;;  %v610_v44 = vmul.f32 %v11586_v30, %v11460_v59  ;;  %v612_v46 = vmul.f32 %v11457_v57, %v11586_v30 }
 0x1a5   :  { %10267 = vmatprep.subr.mxu1 %v13744_v34  ;;  %v643_v47 = vadd.f32 %v11589_v32, %v605_v28  ;;  %v645_v45 = vadd.f32 %v11589_v32, %v607_v51  ;;  %v671_v48 = vmax.f32 %v639_v18, 0.0  ;;  %v673_v50 = vmax.f32 %v641_v37, 0.0 }
 0x1a6   :  { %10268 = vmatpush3.msra.mxu1 %v695_v23  ;;  %v697_v52 = vadd.f32 %v669_v21, %v667_v20  ;;  %v609_v59 = vmul.f32 %v11586_v30, %v11454_v55  ;;  %v611_v57 = vmul.f32 %v11451_v53, %v11586_v30  ;;  %v648_v54 = vadd.f32 %v11589_v32, %v610_v44 }
 0x1a7   :  { %10270 = vmatmul.mubr.msk.f32.vlgmr.msra.gmra.mxu1 %vm711_vm4, %v11631_v39  ;;  %10272 = vmatprep.subr.mxu1 %v13744_v34  ;;  %v650_v25 = vadd.f32 %v11589_v32, %v612_v46  ;;  %v676_v24 = vmax.f32 %v644_v36, 0.0  ;;  %v678_v26 = vmax.f32 %v646_v49, 0.0  ;;  %v700_v27 = vadd.f32 %v674_v42, %v672_v38 }
 0x1a8   :  { %10273 = vmatpush3.msra.mxu1 %v698_v40  ;;  %10276 = vmatprep.mubr.msk.f32.mxu1 %vm11280_vm0, %v13744_v34  ;;  %v614_v35 = vmul.f32 %v11586_v30, %v11472_v3  ;;  %v616_v33 = vmul.f32 %v11469_v1, %v11586_v30  ;;  %v647_v55 = vadd.f32 %v11589_v32, %v609_v59  ;;  %v675_v56 = vmax.f32 %v643_v47, 0.0 }
 0x1a9   :  { %10274 = vmatprep.subr.mxu1 %v13744_v34  ;;  %v649_v53 = vadd.f32 %v11589_v32, %v611_v57  ;;  %v677_v58 = vmax.f32 %v645_v45, 0.0  ;;  %v699_v31 = vadd.f32 %v673_v50, %v671_v48  ;;  %v613_v3 = vmul.f32 %v11586_v30, %v11466_v63  ;;  %v10927_v57 = vld [vmem:[%s13738_s4 + $0x28] sm:$0xff]  }
 0x1aa   :  { %10275 = vmatpush3.msra.mxu1 %v697_v52  ;;  %v615_v1 = vmul.f32 %v11463_v61, %v11586_v30  ;;  %v652_v29 = vadd.f32 %v11589_v32, %v614_v35  ;;  %v654_v60 = vadd.f32 %v11589_v32, %v616_v33  ;;  %v680_v62 = vmax.f32 %v648_v54, 0.0  ;;  %v10928_v54 = vld [vmem:[%s13738_s4 + $0x78] sm:$0xff]   ;;  %10349 = vmatprep.subr.bf16.mxu0 %v10927_v57  ;;  %v10933_v35 = vld [vmem:[%s13738_s4 + $0x10] sm:$0xff]   ;;  %v10934_v33 = vld [vmem:[%s13738_s4 + $0x60] sm:$0xff]  }
 0x1ab   :  { %10277 = vmatmul.mubr.msk.f32.vlgmr.msra.gmra.mxu1 %vm711_vm4, %v11631_v39  ;;  %10279 = vmatprep.subr.mxu1 %v13744_v34  ;;  %v682_v0 = vmax.f32 %v650_v25, 0.0  ;;  %v702_v2 = vadd.f32 %v678_v26, %v676_v24  ;;  %v618_v4 = vmul.f32 %v11586_v30, %v11484_v11  ;;  %v620_v6 = vmul.f32 %v11481_v9, %v11586_v30  ;;  %v10929_v25 = vld [vmem:[%s13738_s4 + $0x20] sm:$0xff]   ;;  %v10930_v24 = vld [vmem:[%s13738_s4 + $0x70] sm:$0xff]   ;;  %v10931_v26 = vld [vmem:[%s13738_s4 + $0x18] sm:$0xff]  }
 0x1ac   :  { %10280 = vmatpush3.msra.mxu1 %v700_v27  ;;  %10283 = vmatprep.mubr.msk.f32.mxu1 %vm11280_vm0, %v13744_v34  ;;  %v651_v63 = vadd.f32 %v11589_v32, %v613_v3  ;;  %v653_v61 = vadd.f32 %v11589_v32, %v615_v1  ;;  %v679_v43 = vmax.f32 %v647_v55, 0.0  ;;  %v681_v41 = vmax.f32 %v649_v53, 0.0  ;;  %v10932_v27 = vld [vmem:[%s13738_s4 + $0x68] sm:$0xff]   ;;  %v10936_v53 = vld [vmem:[%s13738_s4 + $0x58] sm:$0xff]   ;;  %v10944_v1 = vld [vmem:[%s13738_s4 + $0x40] sm:$0xff]  }
 0x1ad   :  { %10281 = vmatprep.subr.mxu1 %v13744_v34  ;;  %v701_v8 = vadd.f32 %v677_v58, %v675_v56  ;;  %v617_v11 = vmul.f32 %v11586_v30, %v11478_v7  ;;  %v619_v9 = vmul.f32 %v11475_v5, %v11586_v30  ;;  %v656_v10 = vadd.f32 %v11589_v32, %v618_v4  ;;  %v10935_v55 = vld [vmem:[%s13738_s4 + $0x8] sm:$0xff]   ;;  %v10938_v56 = vld [vmem:[%s13738_s4] sm:$0xff]   ;;  %v10939_v58 = vld [vmem:[%s13738_s4 + $0x50] sm:$0xff]  }
 0x1ae   :  { %10282 = vmatpush3.msra.mxu1 %v699_v31  ;;  %v658_v12 = vadd.f32 %v11589_v32, %v620_v6  ;;  %v684_v14 = vmax.f32 %v652_v29, 0.0  ;;  %v686_v16 = vmax.f32 %v654_v60, 0.0  ;;  %v704_v18 = vadd.f32 %v682_v0, %v680_v62  ;;  %10350 = vmatpush3.bf16.msra.mxu0 %v10927_v57  ;;  %v11774_v31 = vld [vmem:[%s13738_s4 + $0xf8] sm:$0xff]   ;;  %v10941_v3 = vld [vmem:[%s13738_s4 + $0x48] sm:$0xff]   ;;  %v11789_v0 = vld [vmem:[#allocation2] sm:$0xf] }
 0x1af   :  { %10284 = vmatmul.mubr.msk.f32.vlgmr.msra.gmra.mxu1 %vm711_vm4, %v11631_v39  ;;  %10286 = vmatprep.subr.mxu1 %v13744_v34  ;;  %v622_v37 = vmul.f32 %v11586_v30, %v11496_v19  ;;  %v624_v20 = vmul.f32 %v11493_v17, %v11586_v30  ;;  %v655_v7 = vadd.f32 %v11589_v32, %v617_v11  ;;  %v683_v21 = vmax.f32 %v651_v63, 0.0  ;;  %v11786_v29 = vld [vmem:[%s13738_s4 + $0xb8] sm:$0xff]  }
 0x1b0   :  { %10287 = vmatpush3.msra.mxu1 %v702_v2  ;;  %10290 = vmatprep.mubr.msk.f32.mxu1 %vm11280_vm0, %v13744_v34  ;;  %v657_v5 = vadd.f32 %v11589_v32, %v619_v9  ;;  %v685_v23 = vmax.f32 %v653_v61, 0.0  ;;  %v703_v28 = vadd.f32 %v681_v41, %v679_v43  ;;  %v621_v17 = vmul.f32 %v11586_v30, %v11490_v15  ;;  %v1391_v9 = vld [vmem:[#allocation2 + $0x8] sm:$0xf] }
 0x1b1   :  { %10288 = vmatprep.subr.mxu1 %v13744_v34  ;;  %v660_v19 = vadd.f32 %v11589_v32, %v622_v37  ;;  %v623_v51 = vmul.f32 %v11487_v13, %v11586_v30  ;;  %v662_v36 = vadd.f32 %v11589_v32, %v624_v20  ;;  %v688_v49 = vmax.f32 %v656_v10, 0.0  ;;  %10351 = vmatprep.subr.bf16.mxu0 %v10929_v25 }
 0x1b2   :  { %10289 = vmatpush3.msra.mxu1 %v701_v8  ;;  %v690_v38 = vmax.f32 %v658_v12, 0.0  ;;  %v706_v42 = vadd.f32 %v686_v16, %v684_v14  ;;  %v659_v40 = vadd.f32 %v11589_v32, %v621_v17  ;;  %v687_v44 = vmax.f32 %v655_v7, 0.0  ;;  %10352 = vmatpush3.bf16.msra.mxu0 %v10929_v25  ;;  %v1397_v12 = vld [vmem:[#allocation2 + $0xc] sm:$0x1] }
 0x1b3   :  { %10291 = vmatmul.mubr.msk.f32.vlgmr.msra.gmra.mxu1 %vm711_vm4, %v11631_v39  ;;  %10293 = vmatprep.subr.mxu1 %v13744_v34  ;;  %v661_v15 = vadd.f32 %v11589_v32, %v623_v51  ;;  %v689_v46 = vmax.f32 %v657_v5, 0.0  ;;  %v705_v13 = vadd.f32 %v685_v23, %v683_v21  ;;  %v692_v30 = vmax.f32 %v660_v19, 0.0  ;;  %v1400_v51 = vld [vmem:[#allocation2 + $0x10] sm:$0xf] }
 0x1b4   :  { %10294 = vmatpush3.msra.mxu1 %v704_v18  ;;  %10297 = vmatprep.mubr.msk.f32.mxu1 %vm11280_vm0, %v13744_v34  ;;  %v694_v47 = vmax.f32 %v662_v36, 0.0  ;;  %v708_v45 = vadd.f32 %v690_v38, %v688_v49  ;;  %v691_v48 = vmax.f32 %v659_v40, 0.0  ;;  %v1478_v63 = vshrl.u32 %v11789_v0, 16  ;;  %v1403_v36 = vld [vmem:[#allocation2 + $0x14] sm:$0x1] }
 0x1b5   :  { %10295 = vmatprep.subr.mxu1 %v13744_v34  ;;  %v693_v32 = vmax.f32 %v661_v15, 0.0  ;;  %v707_v50 = vadd.f32 %v689_v46, %v687_v44  ;;  %10353 = vmatprep.subr.bf16.mxu0 %v10931_v26  ;;  %v1481_v61 = vshll.u32 %v11789_v0, 16  ;;  %v13764_v8 = vmov 0  ;;  %v11805_v15 = vld [vmem:[#allocation2 + $0x4] sm:$0x1] }
 0x1b6   :  { %10296 = vmatpush3.msra.mxu1 %v703_v28  ;;  %v710_v52 = vadd.f32 %v694_v47, %v692_v30  ;;  %10354 = vmatpush3.bf16.msra.mxu0 %v10931_v26  ;;  %v13765_v8 = vsel %vm11793_vm9, 4294967295, %v13764_v8  ;;  %v13767_v10 = vmov 0  ;;  %v1480_v5 = vrot.slane %v1478_v63, 4  ;;  %v1412_v26 = vld [vmem:[#allocation2 + $0x20] sm:$0xf] }
 0x1b7   :  { %10298 = vmatmul.mubr.msk.f32.vlgmr.msra.gmra.mxu1 %vm711_vm4, %v11631_v39  ;;  %10300 = vmatprep.subr.mxu1 %v13744_v34  ;;  %v709_v59 = vadd.f32 %v693_v32, %v691_v48  ;;  %13766 = vst [vmem:[#allocation8_spill] sm:$0xff] %v13765_v8  ;;  %v13768_v10 = vsel %vm11797_vm10, 4294967295, %v13767_v10  ;;  %v1483_v21 = vrot.slane %v1481_v61, 5  ;;  %v1487_v30 = vshll.u32 %v11805_v15, 16  ;;  %v1406_v32 = vld [vmem:[#allocation2 + $0x18] sm:$0xf] }
 0x1b8   :  { %10301 = vmatpush3.msra.mxu1 %v706_v42  ;;  %10304 = vmatprep.mubr.msk.f32.mxu1 %vm11280_vm0, %v13744_v34  ;;  %13769 = vst [vmem:[#allocation9_spill] sm:$0xff] %v13768_v10 }
 0x1b9   :  { %10302 = vmatprep.subr.mxu1 %v13744_v34  ;;  %10355 = vmatprep.subr.bf16.mxu0 %v10933_v35 }
 0x1ba   :  { %10303 = vmatpush3.msra.mxu1 %v705_v13  ;;  %10356 = vmatpush3.bf16.msra.mxu0 %v10933_v35  ;;  %v1484_v13 = vor.u32 %v1483_v21, %v1480_v5 }
 0x1bb   :  { %10305 = vmatmul.mubr.msk.f32.vlgmr.msra.gmra.mxu1 %vm711_vm4, %v11631_v39  ;;  %10307 = vmatprep.subr.mxu1 %v13744_v34 }
 0x1bc   :  { %10308 = vmatpush3.msra.mxu1 %v708_v45  ;;  %10311 = vmatprep.mubr.msk.f32.mxu1 %vm11280_vm0, %v13744_v34 }
 0x1bd   :  { %10309 = vmatprep.subr.mxu1 %v13744_v34  ;;  %10357 = vmatprep.subr.bf16.mxu0 %v10935_v55 }
 0x1be   :  { %10310 = vmatpush3.msra.mxu1 %v707_v50  ;;  %10358 = vmatpush3.bf16.msra.mxu0 %v10935_v55  ;;  %v11814_v55 = vrot.slane %v1487_v30, 5 }
 0x1bf   :  { %10312 = vmatmul.mubr.msk.f32.vlgmr.msra.gmra.mxu1 %vm711_vm4, %v11631_v39  ;;  %10314 = vmatprep.subr.mxu1 %v13744_v34 }
 0x1c0   :  { %10315 = vmatpush3.msra.mxu1 %v710_v52  ;;  %10318 = vmatprep.mubr.msk.f32.mxu1 %vm11280_vm0, %v13744_v34  ;;  %v1409_v52 = vld [vmem:[#allocation2 + $0x1c] sm:$0x1] }
 0x1c1   :  { %10316 = vmatprep.subr.mxu1 %v13744_v34  ;;  %10359 = vmatprep.subr.bf16.mxu0 %v10938_v56 }
 0x1c2   :  { %10317 = vmatpush3.msra.mxu1 %v709_v59  ;;  %10360 = vmatpush3.bf16.msra.mxu0 %v10938_v56 }
 0x1c3   :  { %10319 = vmatmul.mubr.msk.f32.vlgmr.msra.gmra.mxu1 %vm711_vm4, %v11631_v39  ;;  %10321 = vmatprep.subr.bf16.mxu1 %v10928_v54 }
 0x1c4   :  { %10322 = vmatpush3.bf16.msra.mxu1 %v10928_v54  ;;  %10393 = vmatprep.subr.bf16.mxu0 %v11774_v31 }
 0x1c5   :  { %10323 = vmatprep.subr.bf16.mxu1 %v10930_v24 }
 0x1c8   :  { %10324 = vmatpush3.bf16.msra.mxu1 %v10930_v24 }
 0x1c9   :  { %10325 = vmatprep.subr.bf16.mxu1 %v10932_v27 }
 0x1cc   :  { %10326 = vmatpush3.bf16.msra.mxu1 %v10932_v27  ;;  %v1415_v27 = vld [vmem:[#allocation2 + $0x24] sm:$0x1] }
 0x1cd   :  { %10327 = vmatprep.subr.bf16.mxu1 %v10934_v33 }
 0x1d0   :  { %10328 = vmatpush3.bf16.msra.mxu1 %v10934_v33  ;;  %v11812_v33 = vrot.slane %v1484_v13, 4 }
 0x1d1   :  { %10329 = vmatprep.subr.bf16.mxu1 %v10936_v53 }
 0x1d4   :  { %10330 = vmatpush3.bf16.msra.mxu1 %v10936_v53 }
 0x1d5   :  { %10331 = vmatprep.subr.bf16.mxu1 %v10939_v58 }
 0x1d8   :  { %10332 = vmatpush3.bf16.msra.mxu1 %v10939_v58 }
 0x1d9   :  { %10333 = vmatprep.subr.bf16.mxu1 %v10941_v3 }
 0x1dc   :  { %10334 = vmatpush3.bf16.msra.mxu1 %v10941_v3 }
 0x1dd   :  { %10335 = vmatprep.subr.bf16.mxu1 %v10944_v1 }
 0x1e0   :  { %10336 = vmatpush3.bf16.msra.mxu1 %v10944_v1 }
 0x1e1   :  { %10369 = vmatprep.subr.bf16.mxu1 %v11786_v29 }
 0x267   :  { %v781_v60 = vpop.f32.mrf.mxu1 }
 0x268   :  { %v9697_v62 = vpack.c.bf16 %v781_v60, %v781_v60 }
 0x269   :  { %v10271_v2 = vpop.f32.mrf.mxu1 }
 0x26a   :  { %v1308_v4 = vshrl.u32 %v9697_v62, 16  ;;  %v1311_v41 = vshll.u32 %v9697_v62, 16  ;;  %v13770_v62 = vmov 0 }
 0x26b   :  { %v851_v6 = vpop.f32.mrf.mxu1  ;;  %v13771_v62 = vsel %vm11824_vm13, 4294967295, %v13770_v62 }
 0x26c   :  { %v1310_v43 = vrot.slane %v1308_v4, 7  ;;  %v9698_v11 = vpack.c.bf16 %v851_v6, %v851_v6  ;;  %13772 = vst [vmem:[#allocation10_spill] sm:$0xff] %v13771_v62 }
 0x26d   :  { %v10278_v14 = vpop.f32.mrf.mxu1 }
 0x26e   :  { %v1313_v16 = vor.u32 %v1311_v41, %v1310_v43  ;;  %v1314_v18 = vrot.slane %v1310_v43, 4  ;;  %v1316_v37 = vshrl.u32 %v9698_v11, 16  ;;  %v1319_v20 = vshll.u32 %v9698_v11, 16  ;;  %v1421_v14 = vld [vmem:[#allocation2 + $0x2c] sm:$0x1] }
 0x26f   :  { %v921_v7 = vpop.f32.mrf.mxu1 }
 0x270   :  { %v1392_v23 = vsel %vm11793_vm9, %v1313_v16, %v1391_v9  ;;  %v1398_v28 = vsel %vm11797_vm10, %v1314_v18, %v1397_v12  ;;  %v1318_v19 = vrot.slane %v1316_v37, 7  ;;  %v9699_v17 = vpack.c.bf16 %v921_v7, %v921_v7  ;;  %v1418_v12 = vld [vmem:[#allocation2 + $0x28] sm:$0xf] }
 0x271   :  { %1393 = vst [vmem:[#allocation2 + $0x8] sm:$0xf] %v1392_v23  ;;  %1399 = vst [vmem:[#allocation2 + $0xc] sm:$0x1] %v1398_v28  ;;  %v10285_v49 = vpop.f32.mrf.mxu1 }
 0x272   :  { %v1321_v38 = vor.u32 %v1319_v20, %v1318_v19  ;;  %v1322_v42 = vrot.slane %v1318_v19, 4  ;;  %v1324_v40 = vshrl.u32 %v9699_v17, 16  ;;  %v1327_v44 = vshll.u32 %v9699_v17, 16 }
 0x273   :  { %v991_v46 = vpop.f32.mrf.mxu1  ;;  %v1490_v20 = vsel %vm11824_vm13, %v11812_v33, %v11814_v55 }
 0x274   :  { %v1401_v47 = vsel %vm11793_vm9, %v1321_v38, %v1400_v51  ;;  %v1404_v45 = vsel %vm11797_vm10, %v1322_v42, %v1403_v36  ;;  %v1326_v48 = vrot.slane %v1324_v40, 7  ;;  %v9700_v50 = vpack.c.bf16 %v991_v46, %v991_v46 }
 0x275   :  { %1402 = vst [vmem:[#allocation2 + $0x10] sm:$0xf] %v1401_v47  ;;  %1405 = vst [vmem:[#allocation2 + $0x14] sm:$0x1] %v1404_v45  ;;  %v10292_v59 = vpop.f32.mrf.mxu1 }
 0x276   :  { %v1329_v57 = vor.u32 %v1327_v44, %v1326_v48  ;;  %v1330_v54 = vrot.slane %v1326_v48, 4  ;;  %v1332_v25 = vshrl.u32 %v9700_v50, 16  ;;  %v1335_v24 = vshll.u32 %v9700_v50, 16 }
 0x277   :  { %v1061_v35 = vpop.f32.mrf.mxu1 }
 0x278   :  { %v1407_v53 = vsel %vm11793_vm9, %v1329_v57, %v1406_v32  ;;  %v1410_v56 = vsel %vm11797_vm10, %v1330_v54, %v1409_v52  ;;  %v1334_v58 = vrot.slane %v1332_v25, 7  ;;  %v9701_v3 = vpack.c.bf16 %v1061_v35, %v1061_v35  ;;  %v1443_v1 = vld [vmem:[#allocation2 + $0x8] sm:$0xf]  ;;  %v11820_v60 = vld [vmem:[#allocation2 + $0xc] sm:$0x1] }
 0x279   :  { %1408 = vst [vmem:[#allocation2 + $0x18] sm:$0xf] %v1407_v53  ;;  %1411 = vst [vmem:[#allocation2 + $0x1c] sm:$0x1] %v1410_v56  ;;  %v10299_v2 = vpop.f32.mrf.mxu1  ;;  %v1492_v4 = vshrl.u32 %v1443_v1, 16  ;;  %v1495_v6 = vshll.u32 %v1443_v1, 16  ;;  %v9028_v63 = vcombine.low %v11789_v0, %v1443_v1 }
 0x27a   :  { %v1501_v61 = vshll.u32 %v11820_v60, 16  ;;  %v1337_v43 = vor.u32 %v1335_v24, %v1334_v58  ;;  %v1338_v41 = vrot.slane %v1334_v58, 4  ;;  %v1340_v11 = vshrl.u32 %v9701_v3, 16  ;;  %v1424_v52 = vld [vmem:[#allocation2 + $0x30] sm:$0xf] }
 0x27b   :  { %v1343_v9 = vshll.u32 %v9701_v3, 16  ;;  %v1131_v16 = vpop.f32.mrf.mxu1  ;;  %v1494_v18 = vrot.slane %v1492_v4, 4  ;;  %v1497_v37 = vrot.slane %v1495_v6, 5  ;;  %10361 = vmatprep.mubr.bf16.mxu0 %v9028_v63  ;;  %v1427_v54 = vld [vmem:[#allocation2 + $0x34] sm:$0x1] }
 0x27c   :  { %v1413_v0 = vsel %vm11793_vm9, %v1337_v43, %v1412_v26  ;;  %v1416_v7 = vsel %vm11797_vm10, %v1338_v41, %v1415_v27  ;;  %v1342_v5 = vrot.slane %v1340_v11, 7  ;;  %v9702_v21 = vpack.c.bf16 %v1131_v16, %v1131_v16  ;;  %v1444_v23 = vld [vmem:[#allocation2 + $0x10] sm:$0xf]  ;;  %v11838_v28 = vld [vmem:[#allocation2 + $0x14] sm:$0x1]  ;;  %v10945_v16 = vld [vmem:[%s13738_s4 + $0xe8] sm:$0xff]  }
 0x27d   :  { %1414 = vst [vmem:[#allocation2 + $0x20] sm:$0xf] %v1413_v0  ;;  %1417 = vst [vmem:[#allocation2 + $0x24] sm:$0x1] %v1416_v7  ;;  %v10306_v19 = vpop.f32.mrf.mxu1  ;;  %v1498_v17 = vor.u32 %v1497_v37, %v1494_v18  ;;  %v1503_v51 = vrot.slane %v1501_v61, 5  ;;  %v1506_v36 = vshrl.u32 %v1444_v23, 16 }
 0x27e   :  { %v1509_v49 = vshll.u32 %v1444_v23, 16  ;;  %v1345_v38 = vor.u32 %v1343_v9, %v1342_v5  ;;  %v1346_v42 = vrot.slane %v1342_v5, 4  ;;  %v1348_v40 = vshrl.u32 %v9702_v21, 16  ;;  %v10943_v27 = vld [vmem:[%s13738_s4 + $0xf0] sm:$0xff]   ;;  %v1430_v1 = vld [vmem:[#allocation2 + $0x38] sm:$0xf] }
 0x27f   :  { %v1351_v44 = vshll.u32 %v9702_v21, 16  ;;  %v1201_v46 = vpop.f32.mrf.mxu1  ;;  %v1499_v13 = vrot.slane %v1498_v17, 4  ;;  %v1508_v30 = vrot.slane %v1506_v36, 4  ;;  %v1515_v45 = vshll.u32 %v11838_v28, 16  ;;  %v1433_v9 = vld [vmem:[#allocation2 + $0x3c] sm:$0x1] }
 0x280   :  { %v1511_v47 = vrot.slane %v1509_v49, 5  ;;  %v1419_v48 = vsel %vm11793_vm9, %v1345_v38, %v1418_v12  ;;  %v1422_v32 = vsel %vm11797_vm10, %v1346_v42, %v1421_v14  ;;  %v1350_v50 = vrot.slane %v1348_v40, 7  ;;  %v1445_v57 = vld [vmem:[#allocation2 + $0x18] sm:$0xf]  ;;  %v11850_v3 = vld [vmem:[#allocation2 + $0x1c] sm:$0x1] }
 0x281   :  { %v9703_v59 = vpack.c.bf16 %v1201_v46, %v1201_v46  ;;  %1420 = vst [vmem:[#allocation2 + $0x28] sm:$0xf] %v1419_v48  ;;  %1423 = vst [vmem:[#allocation2 + $0x2c] sm:$0x1] %v1422_v32  ;;  %v10313_v25 = vpop.f32.mrf.mxu1  ;;  %v9029_v24 = vcombine.low %v1444_v23, %v1445_v57  ;;  %v1504_v26 = vsel %vm11824_vm13, %v1499_v13, %v1503_v51  ;;  %v1520_v33 = vshrl.u32 %v1445_v57, 16  ;;  %v10948_v13 = vld [vmem:[%s13738_s4 + $0xe0] sm:$0xff]  }
 0x282   :  { %v1512_v35 = vor.u32 %v1511_v47, %v1508_v30  ;;  %v1353_v55 = vor.u32 %v1351_v44, %v1350_v50  ;;  %v1354_v53 = vrot.slane %v1350_v50, 4  ;;  %v9016_v4 = vcombine.low %v1490_v20, %v1504_v26  ;;  %v1436_v19 = vld [vmem:[#allocation2 + $0x40] sm:$0xf] }
 0x283   :  { %v1356_v56 = vshrl.u32 %v9703_v59, 16  ;;  %v1359_v58 = vshll.u32 %v9703_v59, 16  ;;  %v1271_v2 = vpop.f32.mrf.mxu1  ;;  %10362 = vmatmul.mubr.bf16.vlgmr.msra.gmra.mxu0 %v9029_v24  ;;  %v1522_v63 = vrot.slane %v1520_v33, 4  ;;  %v1523_v61 = vshll.u32 %v1445_v57, 16 }
 0x284   :  { %v1513_v6 = vrot.slane %v1512_v35, 4  ;;  %v1425_v43 = vsel %vm11793_vm9, %v1353_v55, %v1424_v52  ;;  %v1428_v41 = vsel %vm11797_vm10, %v1354_v53, %v1427_v54  ;;  %v9704_v12 = vpack.c.bf16 %v1271_v2, %v1271_v2  ;;  %10394 = vmatpush3.bf16.msra.mxu0 %v11774_v31  ;;  %v1446_v14 = vld [vmem:[#allocation2 + $0x20] sm:$0xf]  ;;  %10337 = vmatprep.mubr.bf16.mxu1 %v9016_v4  ;;  %v1439_v31 = vld [vmem:[#allocation2 + $0x44] sm:$0x1]  ;;  %v10949_v53 = vld [vmem:[%s13738_s4 + $0xb0] sm:$0xff]  }
 0x285   :  { %v1358_v11 = vrot.slane %v1356_v56, 7  ;;  %1426 = vst [vmem:[#allocation2 + $0x30] sm:$0xf] %v1425_v43  ;;  %1429 = vst [vmem:[#allocation2 + $0x34] sm:$0x1] %v1428_v41  ;;  %10395 = vmatprep.subr.bf16.mxu0 %v10943_v27  ;;  %v1517_v18 = vrot.slane %v1515_v45, 5  ;;  %v10320_v0 = vpop.f32.mrf.mxu1 }
 0x286   :  { %v1525_v37 = vrot.slane %v1523_v61, 5  ;;  %v1529_v20 = vshll.u32 %v11850_v3, 16  ;;  %v1364_v21 = vshrl.u32 %v9704_v12, 16  ;;  %v1367_v23 = vshll.u32 %v9704_v12, 16  ;;  %v11870_v57 = vld [vmem:[#allocation2 + $0x24] sm:$0x1] }
 0x287   :  { %v1361_v7 = vor.u32 %v1359_v58, %v1358_v11  ;;  %v1362_v5 = vrot.slane %v1358_v11, 4  ;;  %v1518_v17 = vsel %vm11824_vm13, %v1513_v6, %v1517_v18  ;;  %v1534_v49 = vshrl.u32 %v1446_v14, 16  ;;  %v10952_v18 = vld [vmem:[%s13738_s4 + $0xa8] sm:$0xff]  }
 0x288   :  { %v1526_v51 = vor.u32 %v1525_v37, %v1522_v63  ;;  %v1531_v36 = vrot.slane %v1529_v20, 5  ;;  %v1366_v40 = vrot.slane %v1364_v21, 7  ;;  %10396 = vmatpush3.bf16.msra.mxu0 %v10943_v27  ;;  %v1447_v44 = vld [vmem:[#allocation2 + $0x28] sm:$0xf]  ;;  %v1537_v46 = vshll.u32 %v1446_v14, 16 }
 0x289   :  { %v1431_v38 = vsel %vm11793_vm9, %v1361_v7, %v1430_v1  ;;  %v1434_v42 = vsel %vm11797_vm10, %v1362_v5, %v1433_v9  ;;  %10397 = vmatprep.subr.bf16.mxu0 %v10945_v16  ;;  %v1536_v47 = vrot.slane %v1534_v49, 4  ;;  %v1548_v45 = vshrl.u32 %v1447_v44, 16  ;;  %v11874_v26 = vld [vmem:[#allocation2 + $0x2c] sm:$0x1]  ;;  %v10950_v1 = vld [vmem:[%s13738_s4 + $0xd8] sm:$0xff]  }
 0x28a   :  { %1432 = vst [vmem:[#allocation2 + $0x38] sm:$0xf] %v1431_v38  ;;  %1435 = vst [vmem:[#allocation2 + $0x3c] sm:$0x1] %v1434_v42  ;;  %v1527_v30 = vrot.slane %v1526_v51, 4  ;;  %v1551_v48 = vshll.u32 %v1447_v44, 16  ;;  %v1369_v32 = vor.u32 %v1367_v23, %v1366_v40  ;;  %v9030_v59 = vcombine.low %v1446_v14, %v1447_v44 }
 0x28b   :  { %v1370_v50 = vrot.slane %v1366_v40, 4  ;;  %v1539_v52 = vrot.slane %v1537_v46, 5  ;;  %v1550_v25 = vrot.slane %v1548_v45, 4  ;;  %v1543_v27 = vshll.u32 %v11870_v57, 16  ;;  %v1872_v20 = vld [vmem:[#allocation2] sm:$0xe] }
 0x28c   :  { %v1532_v54 = vsel %vm11824_vm13, %v1527_v30, %v1531_v36  ;;  %v1553_v24 = vrot.slane %v1551_v48, 5  ;;  %v1437_v35 = vsel %vm11793_vm9, %v1369_v32, %v1436_v19  ;;  %10398 = vmatpush3.bf16.msra.mxu0 %v10945_v16  ;;  %10365 = vmatprep.mubr.bf16.mxu0 %v9030_v59  ;;  %v1448_v56 = vld [vmem:[#allocation2 + $0x30] sm:$0xf]  ;;  %v1557_v58 = vshll.u32 %v11874_v26, 16  ;;  %v11888_v41 = vld [vmem:[#allocation2 + $0x34] sm:$0x1] }
 0x28d   :  { %v1440_v33 = vsel %vm11797_vm10, %v1370_v50, %v1439_v31  ;;  %v9017_v55 = vcombine.low %v1518_v17, %v1532_v54  ;;  %1438 = vst [vmem:[#allocation2 + $0x40] sm:$0xf] %v1437_v35  ;;  %10399 = vmatprep.subr.bf16.mxu0 %v10948_v13  ;;  %v1562_v2 = vshrl.u32 %v1448_v56, 16  ;;  %v1565_v4 = vshll.u32 %v1448_v56, 16  ;;  %v10954_v19 = vld [vmem:[%s13738_s4 + $0xd0] sm:$0xff]   ;;  %v10955_v44 = vld [vmem:[%s13738_s4 + $0xa0] sm:$0xff]  }
 0x28e   :  { %1441 = vst [vmem:[#allocation2 + $0x44] sm:$0x1] %v1440_v33  ;;  %v1540_v6 = vor.u32 %v1539_v52, %v1536_v47  ;;  %v1545_v63 = vrot.slane %v1543_v27, 5  ;;  %v1554_v61 = vor.u32 %v1553_v24, %v1550_v25  ;;  %v1559_v43 = vrot.slane %v1557_v58, 5  ;;  %v1873_v51 = vld [vmem:[#allocation2 + $0x8] sm:$0xe] }
 0x28f   :  { %10338 = vmatmul.mubr.bf16.vlgmr.msra.gmra.mxu1 %v9017_v55  ;;  %v1564_v11 = vrot.slane %v1562_v2, 4  ;;  %v1567_v9 = vrot.slane %v1565_v4, 5  ;;  %v1571_v14 = vshll.u32 %v11888_v41, 16  ;;  %v10953_v42 = vld [vmem:[#allocation2 + $0x8] ss:$8 sps:$4 sm:$0xff]   ;;  %v1901_v30 = vrot.slane %v11805_v15, 5 }
 0x290   :  { %10370 = vmatpush3.bf16.msra.mxu1 %v11786_v29  ;;  %v1541_v12 = vrot.slane %v1540_v6, 4  ;;  %10400 = vmatpush3.bf16.msra.mxu0 %v10948_v13  ;;  %v1555_v37 = vrot.slane %v1554_v61, 4  ;;  %v9040_v13 = vrot.slane %v1872_v20, 9  ;;  %v10956_v47 = vld [vmem:[%s13738_s4 + $0xc8] sm:$0xff]   ;;  %v9041_v32 = vrot.slane %v1873_v51, 9  ;;  %v10957_v54 = vld [vmem:[%s13738_s4 + $0x98] sm:$0xff]  }
 0x291   :  { %10371 = vmatprep.subr.bf16.mxu1 %v10949_v53  ;;  %v1449_v16 = vld [vmem:[#allocation2 + $0x38] sm:$0xf]  ;;  %10401 = vmatprep.subr.bf16.mxu0 %v10950_v1  ;;  %v11897_v21 = vld [vmem:[#allocation2 + $0x3c] sm:$0x1]  ;;  %v1568_v31 = vor.u32 %v1567_v9, %v1564_v11  ;;  %v1573_v40 = vrot.slane %v1571_v14, 5  ;;  %v1905_v50 = vrot.slane %v11820_v60, 5 }
 0x292   :  { %v1576_v0 = vshrl.u32 %v1449_v16, 16  ;;  %v1579_v7 = vshll.u32 %v1449_v16, 16  ;;  %v9031_v5 = vcombine.low %v1448_v56, %v1449_v16  ;;  %v1546_v29 = vsel %vm11824_vm13, %v1541_v12, %v1545_v63  ;;  %v10958_v27 = vld [vmem:[%s13738_s4 + $0xc0] sm:$0xff]   ;;  %v10959_v55 = vld [vmem:[%s13738_s4 + $0x90] sm:$0xff]   ;;  %v10962_v56 = vld [vmem:[%s13738_s4 + $0x88] sm:$0xff]  }
 0x293   :  { %v1560_v23 = vsel %vm11824_vm13, %v1555_v37, %v1559_v43  ;;  %v1585_v17 = vshll.u32 %v11897_v21, 16  ;;  %v1569_v46 = vrot.slane %v1568_v31, 4  ;;  %v13773_v52 = vmov 0  ;;  %v1874_v58 = vld [vmem:[#allocation2 + $0x10] sm:$0xe] }
 0x294   :  { %10372 = vmatpush3.bf16.msra.mxu1 %v10949_v53  ;;  %v1578_v36 = vrot.slane %v1576_v0, 4  ;;  %v1581_v49 = vrot.slane %v1579_v7, 5  ;;  %10366 = vmatmul.mubr.bf16.gmra.mxu0 %v9031_v5  ;;  %v9018_v38 = vcombine.low %v1546_v29, %v1560_v23  ;;  %v13774_v52 = vsel %vm11915_vm1, 4294967295, %v13773_v52  ;;  %v10961_v53 = vld [vmem:[%s13738_s4 + $0x178] sm:$0xff]   ;;  %v2257_v2 = vld [vmem:[#allocation2 + $0x10] sm:$0xf] }
 0x295   :  { %10373 = vmatprep.subr.bf16.mxu1 %v10952_v18  ;;  %10402 = vmatpush3.bf16.msra.mxu0 %v10950_v1  ;;  %v1587_v48 = vrot.slane %v1585_v17, 5  ;;  %13775 = vst [vmem:[#allocation11_spill] sm:$0xff] %v13774_v52  ;;  %v1574_v15 = vsel %vm11824_vm13, %v1569_v46, %v1573_v40  ;;  %v1902_v25 = vsel %vm11915_vm1, %v9040_v13, %v1901_v30  ;;  %v1875_v1 = vld [vmem:[#allocation2 + $0x18] sm:$0xe]  ;;  %v10964_v4 = vld [vmem:[%s13738_s4 + $0x170] sm:$0xff]   ;;  %v1909_v11 = vrot.slane %v11838_v28, 5 }
 0x296   :  { %10341 = vmatprep.mubr.bf16.mxu1 %v9018_v38  ;;  %10409 = vmatprep.mubr.bf16.mxu0 %v10953_v42  ;;  %v1582_v45 = vor.u32 %v1581_v49, %v1578_v36  ;;  %v1906_v24 = vsel %vm11915_vm1, %v9041_v32, %v1905_v50  ;;  %v11945_v6 = vld [vmem:[#allocation2 + $0xc] sm:$0x1]  ;;  %v11947_v63 = vld [vmem:[#allocation2 + $0x14] sm:$0x1]  ;;  %v2537_v61 = vld [vmem:[#allocation2 + $0x8] sm:$0xe] }
 0x297   :  { %10403 = vmatprep.subr.bf16.mxu0 %v10954_v19  ;;  %v9064_v33 = vcombine.low %v1902_v25, %v1906_v24  ;;  %v2538_v43 = vld [vmem:[#allocation2 + $0x10] sm:$0xe]  ;;  %v1913_v9 = vrot.slane %v11850_v3, 5  ;;  %v10960_v12 = vld [vmem:[#allocation2 + $0x18] ss:$8 sps:$4 sm:$0xff]   ;;  %v2286_v20 = vshrl.u32 %v2257_v2, 16 }
 0x298   :  { %10374 = vmatpush3.bf16.msra.mxu1 %v10952_v18  ;;  %v1583_v59 = vrot.slane %v1582_v45, 4  ;;  %v2255_v14 = vld [vmem:[#allocation2 + $0x8] sm:$0xf]  ;;  %v10965_v18 = vld [vmem:[%s13738_s4 + $0x80] sm:$0xff]   ;;  %v2289_v0 = vshll.u32 %v2257_v2, 16  ;;  %v9133_v7 = vrot.slane %v2538_v43, 9 }
 0x299   :  { %10375 = vmatprep.subr.bf16.mxu1 %v10955_v44  ;;  %10404 = vmatpush3.bf16.msra.mxu0 %v10954_v19  ;;  %v10963_v16 = vld [vmem:[#allocation2 + $0x28] ss:$8 sps:$4 sm:$0xff]   ;;  %v1876_v37 = vld [vmem:[#allocation2 + $0x20] sm:$0xe]  ;;  %v2567_v5 = vrot.slane %v11947_v63, 5  ;;  %v9042_v28 = vrot.slane %v1874_v58, 9 }
 0x29a   :  { %10405 = vmatprep.subr.bf16.mxu0 %v10956_v47  ;;  %v1588_v60 = vsel %vm11824_vm13, %v1583_v59, %v1587_v48  ;;  %v1877_v29 = vld [vmem:[#allocation2 + $0x28] sm:$0xe]  ;;  %v9043_v3 = vrot.slane %v1875_v1, 9  ;;  %v2272_v23 = vshrl.u32 %v2255_v14, 16  ;;  %v2275_v19 = vshll.u32 %v2255_v14, 16  ;;  %v10971_v2 = vld [vmem:[%s13738_s4 + $0x158] sm:$0xff]  }
 0x29b   :  { %v9019_v35 = vcombine.low %v1574_v15, %v1588_v60  ;;  %v9132_v31 = vrot.slane %v2537_v61, 9  ;;  %v2563_v17 = vrot.slane %v11945_v6, 5  ;;  %v9044_v51 = vrot.slane %v1876_v37, 9  ;;  %v10967_v49 = vld [vmem:[%s13738_s4 + $0x168] sm:$0xff]   ;;  %v1878_v30 = vld [vmem:[#allocation2 + $0x30] sm:$0xe] }
 0x29c   :  { %10376 = vmatpush3.bf16.msra.mxu1 %v10955_v44  ;;  %v1917_v36 = vrot.slane %v11870_v57, 5  ;;  %v9045_v38 = vrot.slane %v1877_v29, 9  ;;  %v1921_v42 = vrot.slane %v11874_v26, 5  ;;  %v2288_v40 = vrot.slane %v2286_v20, 4  ;;  %v10968_v57 = vld [vmem:[%s13738_s4 + $0x138] sm:$0xff]   ;;  %v10969_v60 = vld [vmem:[%s13738_s4 + $0x160] sm:$0xff]  }
 0x29d   :  { %10377 = vmatprep.subr.bf16.mxu1 %v10957_v54  ;;  %10406 = vmatpush3.bf16.msra.mxu0 %v10956_v47  ;;  %v2291_v44 = vrot.slane %v2289_v0, 5  ;;  %v2568_v46 = vsel %vm11915_vm1, %v9133_v7, %v2567_v5  ;;  %v1914_v13 = vsel %vm11915_vm1, %v9043_v3, %v1913_v9  ;;  %v2274_v47 = vrot.slane %v2272_v23, 4  ;;  %v10966_v48 = vld [vmem:[#allocation2 + $0x38] ss:$8 sps:$4 sm:$0xff]   ;;  %v11992_v43 = vld [vmem:[#allocation2 + $0x1c] sm:$0x1] }
 0x29e   :  { %10342 = vmatmul.mubr.bf16.gmra.mxu1 %v9019_v35  ;;  %10407 = vmatprep.subr.bf16.mxu0 %v10958_v27  ;;  %v2277_v45 = vrot.slane %v2275_v19, 5  ;;  %v1910_v26 = vsel %vm11915_vm1, %v9042_v28, %v1909_v11  ;;  %v2564_v32 = vsel %vm11915_vm1, %v9132_v31, %v2563_v17  ;;  %v1879_v50 = vld [vmem:[#allocation2 + $0x38] sm:$0xe]  ;;  %v1918_v59 = vsel %vm11915_vm1, %v9044_v51, %v1917_v36  ;;  %v2540_v11 = vld [vmem:[#allocation2 + $0x20] sm:$0xe]  ;;  %v10973_v7 = vld [vmem:[%s13738_s4 + $0x150] sm:$0xff]  }
 0x29f   :  { %10385 = vmatprep.mubr.bf16.mxu1 %v9064_v33  ;;  %v9156_v15 = vcombine.low %v2564_v32, %v2568_v46  ;;  %v2292_v25 = vor.u32 %v2291_v44, %v2288_v40  ;;  %v9065_v24 = vcombine.low %v1910_v26, %v1914_v13  ;;  %v1925_v35 = vrot.slane %v11888_v41, 5  ;;  %v10970_v33 = vld [vmem:[%s13738_s4 + $0x130] sm:$0xff]   ;;  %v10972_v41 = vld [vmem:[%s13738_s4 + $0x128] sm:$0xff]   ;;  %v2261_v23 = vld [vmem:[#allocation2 + $0x20] sm:$0xf] }
 0x2a0   :  { %10378 = vmatpush3.bf16.msra.mxu1 %v10957_v54  ;;  %v1922_v54 = vsel %vm11915_vm1, %v9045_v38, %v1921_v42  ;;  %v2295_v58 = vshll.u32 %v11947_v63, 16  ;;  %v2539_v63 = vld [vmem:[#allocation2 + $0x18] sm:$0xe]  ;;  %v2541_v37 = vld [vmem:[#allocation2 + $0x28] sm:$0xe]  ;;  %v2571_v3 = vrot.slane %v11992_v43, 5 }
 0x2a1   :  { %10379 = vmatprep.subr.bf16.mxu1 %v10959_v55  ;;  %10408 = vmatpush3.bf16.msra.mxu0 %v10958_v27  ;;  %v9046_v27 = vrot.slane %v1878_v30, 9  ;;  %v9066_v1 = vcombine.low %v1918_v59, %v1922_v54  ;;  %v2293_v61 = vrot.slane %v2292_v25, 4  ;;  %v2542_v5 = vld [vmem:[#allocation2 + $0x30] sm:$0xe]  ;;  %v9134_v28 = vrot.slane %v2539_v63, 9  ;;  %v10974_v31 = vld [vmem:[%s13738_s4 + $0x120] sm:$0xff]  }
 0x2a2   :  { %10441 = vmatprep.subr.bf16.mxu0 %v10961_v53  ;;  %v9135_v17 = vrot.slane %v2540_v11, 9  ;;  %v9136_v36 = vrot.slane %v2541_v37, 9  ;;  %v9137_v40 = vrot.slane %v2542_v5, 9  ;;  %v2920_v46 = vld [vmem:[#allocation2 + $0x18] sm:$0xf]  ;;  %v10975_v13 = vld [vmem:[%s13738_s4 + $0x148] sm:$0xff]  }
 0x2a3   :  { %v1926_v9 = vsel %vm11915_vm1, %v9046_v27, %v1925_v35  ;;  %v12024_v30 = vld [vmem:[#allocation2 + $0x38] sm:$0xe]  ;;  %v2263_v26 = vld [vmem:[#allocation2 + $0x28] sm:$0xf]  ;;  %v2265_v32 = vld [vmem:[#allocation2 + $0x30] sm:$0xf] }
 0x2a4   :  { %10380 = vmatpush3.bf16.msra.mxu1 %v10959_v55  ;;  %10410 = vmatmul.mubr.bf16.vlgmr.msra.gmra.mxu0 %v10960_v12  ;;  %v9047_v55 = vrot.slane %v1879_v50, 9  ;;  %v2259_v50 = vld [vmem:[#allocation2 + $0x18] sm:$0xf]  ;;  %v2949_v54 = vshrl.u32 %v2920_v46, 16  ;;  %v10977_v25 = vld [vmem:[%s13738_s4 + $0x140] sm:$0xff]  }
 0x2a5   :  { %10381 = vmatprep.subr.bf16.mxu1 %v10962_v56  ;;  %10413 = vmatprep.mubr.bf16.mxu0 %v10963_v16  ;;  %v2297_v16 = vrot.slane %v2295_v58, 5  ;;  %v2328_v58 = vshrl.u32 %v2263_v26, 16  ;;  %v2303_v63 = vshll.u32 %v2259_v50, 16 }
 0x2a6   :  { %10442 = vmatpush3.bf16.msra.mxu0 %v10961_v53  ;;  %v1929_v53 = vrot.slane %v11897_v21, 5  ;;  %v11994_v21 = vld [vmem:[#allocation2 + $0x24] sm:$0x1]  ;;  %v2951_v37 = vrot.slane %v2949_v54, 4 }
 0x2a7   :  { %10443 = vmatprep.subr.bf16.mxu0 %v10964_v4  ;;  %v2298_v0 = vsel %vm11824_vm13, %v2293_v61, %v2297_v16  ;;  %v2575_v51 = vrot.slane %v11994_v21, 5  ;;  %v2300_v61 = vshrl.u32 %v2259_v50, 16 }
 0x2a8   :  { %10382 = vmatpush3.bf16.msra.mxu1 %v10962_v56  ;;  %v2278_v56 = vor.u32 %v2277_v45, %v2274_v47  ;;  %v1930_v12 = vsel %vm11915_vm1, %v9047_v55, %v1929_v53  ;;  %v12028_v47 = vsel %vm11915_vm1, %v9134_v28, %v2571_v3  ;;  %v2314_v45 = vshrl.u32 %v2261_v23, 16  ;;  %v12047_v55 = vld [vmem:[#allocation2 + $0x44] sm:$0x1]  ;;  %v2267_v3 = vld [vmem:[#allocation2 + $0x38] sm:$0xf] }
 0x2a9   :  { %10383 = vmatprep.subr.bf16.mxu1 %v10965_v18  ;;  %v9067_v29 = vcombine.low %v1926_v9, %v1930_v12  ;;  %v9138_v53 = vrot.slane %v12024_v30, 9  ;;  %v12055_v12 = vld [vmem:[#allocation2 + $0x1c] sm:$0x1]  ;;  %v2591_v28 = vrot.slane %v12047_v55, 5 }
 0x2aa   :  { %10444 = vmatpush3.bf16.msra.mxu0 %v10964_v4  ;;  %v2281_v4 = vshll.u32 %v11945_v6, 16  ;;  %v2279_v14 = vrot.slane %v2278_v56, 4  ;;  %v12002_v6 = vld [vmem:[#allocation2 + $0x34] sm:$0x1]  ;;  %v12050_v56 = vld [vmem:[#allocation2 + $0x40] sm:$0xe] }
 0x2ab   :  { %10445 = vmatprep.subr.bf16.mxu0 %v10967_v49  ;;  %v2583_v44 = vrot.slane %v12002_v6, 5  ;;  %v2316_v11 = vrot.slane %v2314_v45, 4  ;;  %v2958_v45 = vshll.u32 %v12055_v12, 16  ;;  %v2351_v54 = vshll.u32 %v12002_v6, 16 }
 0x2ac   :  { %10384 = vmatpush3.bf16.msra.mxu1 %v10965_v18  ;;  %10414 = vmatmul.mubr.bf16.gmra.mxu0 %v10966_v48  ;;  %v12000_v18 = vld [vmem:[#allocation2 + $0x2c] sm:$0x1]  ;;  %v2283_v20 = vrot.slane %v2281_v4, 5  ;;  %v2317_v48 = vshll.u32 %v2261_v23, 16  ;;  %v10978_v4 = vld [vmem:[%s13738_s4 + $0x110] sm:$0xff]   ;;  %v2330_v23 = vrot.slane %v2328_v58, 4 }
 0x2ad   :  { %10417 = vmatprep.subr.bf16.mxu1 %v10968_v57  ;;  %10457 = vmatprep.mubr.bf16.mxu0 %v9156_v15  ;;  %v2579_v42 = vrot.slane %v12000_v18, 5  ;;  %v12043_v35 = vsel %vm11915_vm1, %v9137_v40, %v2583_v44  ;;  %v10980_v40 = vld [vmem:[%s13738_s4 + $0x108] sm:$0xff]  }
 0x2ae   :  { %10446 = vmatpush3.bf16.msra.mxu0 %v10967_v49  ;;  %v2284_v19 = vsel %vm11824_vm13, %v2279_v14, %v2283_v20  ;;  %v2918_v49 = vld [vmem:[#allocation2 + $0x10] sm:$0xf]  ;;  %v2319_v9 = vrot.slane %v2317_v48, 5  ;;  %v2359_v48 = vshll.u32 %v2267_v3, 16 }
 0x2af   :  { %10386 = vmatmul.mubr.bf16.vlgmr.msra.gmra.mxu1 %v9065_v24  ;;  %10447 = vmatprep.subr.bf16.mxu0 %v10969_v60  ;;  %v9120_v38 = vcombine.low %v2284_v19, %v2298_v0  ;;  %v2935_v15 = vshrl.u32 %v2918_v49, 16  ;;  %v2938_v59 = vshll.u32 %v2918_v49, 16  ;;  %v12035_v24 = vsel %vm11915_vm1, %v9135_v17, %v2575_v51  ;;  %v2269_v51 = vld [vmem:[#allocation2 + $0x40] sm:$0xf] }
 0x2b0   :  { %10389 = vmatprep.mubr.bf16.mxu1 %v9066_v1  ;;  %10418 = vmatpush3.bf16.msra.mxu1 %v10968_v57  ;;  %v10976_v57 = vld [vmem:[%s13738_s4 + $0x118] sm:$0xff]   ;;  %v12039_v27 = vsel %vm11915_vm1, %v9136_v36, %v2579_v42  ;;  %v2331_v1 = vshll.u32 %v2263_v26, 16  ;;  %v9157_v0 = vcombine.low %v12028_v47, %v12035_v24  ;;  %v2302_v49 = vrot.slane %v2300_v61, 4 }
 0x2b1   :  { %10419 = vmatprep.subr.bf16.mxu1 %v10970_v33  ;;  %v2937_v14 = vrot.slane %v2935_v15, 4  ;;  %v2940_v16 = vrot.slane %v2938_v59, 5  ;;  %v9158_v36 = vcombine.low %v12039_v27, %v12043_v35  ;;  %v2323_v42 = vshll.u32 %v11994_v21, 16  ;;  %v10981_v21 = vld [vmem:[%s13738_s4 + $0x1f0] sm:$0xff]   ;;  %v10982_v35 = vld [vmem:[%s13738_s4 + $0x100] sm:$0xff]  }
 0x2b2   :  { %10448 = vmatpush3.bf16.msra.mxu0 %v10969_v60  ;;  %v2952_v60 = vshll.u32 %v2920_v46, 16  ;;  %v2333_v19 = vrot.slane %v2331_v1, 5  ;;  %v2320_v44 = vor.u32 %v2319_v9, %v2316_v11  ;;  %v12071_v46 = vld [vmem:[#allocation2 + $0x14] sm:$0x1]  ;;  %v2370_v26 = vshrl.u32 %v2269_v51, 16 }
 0x2b3   :  { %10449 = vmatprep.subr.bf16.mxu0 %v10971_v2  ;;  %v2337_v15 = vshll.u32 %v12000_v18, 16  ;;  %v2309_v24 = vshll.u32 %v11992_v43, 16  ;;  %v2944_v27 = vshll.u32 %v12071_v46, 16  ;;  %v2960_v18 = vrot.slane %v2958_v45, 5  ;;  %v10983_v43 = vld [vmem:[%s13738_s4 + $0x1e8] sm:$0xff]  }
 0x2b4   :  { %10420 = vmatpush3.bf16.msra.mxu1 %v10970_v33  ;;  %v12045_v33 = vld [vmem:[#allocation2 + $0x3c] sm:$0x1]  ;;  %v2954_v20 = vrot.slane %v2952_v60, 5  ;;  %v2334_v50 = vor.u32 %v2333_v19, %v2330_v23  ;;  %v2353_v9 = vrot.slane %v2351_v54, 5  ;;  %v10988_v54 = vld [vmem:[%s13738_s4 + $0x1a8] sm:$0xff]  }
 0x2b5   :  { %10421 = vmatprep.subr.bf16.mxu1 %v10972_v41  ;;  %v2587_v5 = vrot.slane %v12045_v33, 5  ;;  %v2365_v23 = vshll.u32 %v12045_v33, 16  ;;  %v10985_v33 = vld [vmem:[%s13738_s4 + $0x1e0] sm:$0xff]  }
 0x2b6   :  { %10450 = vmatpush3.bf16.msra.mxu0 %v10971_v2  ;;  %v2342_v2 = vshrl.u32 %v2265_v32, 16  ;;  %v2955_v47 = vor.u32 %v2954_v20, %v2951_v37  ;;  %v2335_v61 = vrot.slane %v2334_v50, 4  ;;  %v2311_v20 = vrot.slane %v2309_v24, 5 }
 0x2b7   :  { %10390 = vmatmul.mubr.bf16.gmra.mxu1 %v9067_v29  ;;  %10451 = vmatprep.subr.bf16.mxu0 %v10973_v7  ;;  %v9139_v29 = vrot.slane %v12050_v56, 9  ;;  %v2321_v56 = vrot.slane %v2320_v44, 4  ;;  %v2926_v44 = vld [vmem:[#allocation2 + $0x30] sm:$0xf] }
 0x2b8   :  { %10422 = vmatpush3.bf16.msra.mxu1 %v10972_v41  ;;  %10433 = vmatprep.mubr.bf16.mxu1 %v9120_v38  ;;  %v2345_v41 = vshll.u32 %v2265_v32, 16  ;;  %v2305_v38 = vrot.slane %v2303_v63, 5  ;;  %v2373_v32 = vshll.u32 %v2269_v51, 16  ;;  %v2956_v1 = vrot.slane %v2955_v47, 4 }
 0x2b9   :  { %10423 = vmatprep.subr.bf16.mxu1 %v10974_v31  ;;  %v2339_v63 = vrot.slane %v2337_v15, 5 }
 0x2ba   :  { %10452 = vmatpush3.bf16.msra.mxu0 %v10973_v7  ;;  %v10979_v7 = vld [vmem:[%s13738_s4 + $0x1f8] sm:$0xff]   ;;  %v2347_v17 = vrot.slane %v2345_v41, 5  ;;  %v2306_v60 = vor.u32 %v2305_v38, %v2302_v49  ;;  %v2372_v41 = vrot.slane %v2370_v26, 4  ;;  %v10986_v38 = vld [vmem:[%s13738_s4 + $0x1b0] sm:$0xff]  }
 0x2bb   :  { %10453 = vmatprep.subr.bf16.mxu0 %v10975_v13  ;;  %v10987_v26 = vld [vmem:[%s13738_s4 + $0x1d8] sm:$0xff]  }
 0x2bc   :  { %10424 = vmatpush3.bf16.msra.mxu1 %v10974_v31  ;;  %v2344_v31 = vrot.slane %v2342_v2, 4  ;;  %v2361_v2 = vrot.slane %v2359_v48, 5  ;;  %v2307_v37 = vrot.slane %v2306_v60, 4  ;;  %v2928_v48 = vld [vmem:[#allocation2 + $0x38] sm:$0xf]  ;;  %v2994_v60 = vshll.u32 %v2926_v44, 16 }
 0x2bd   :  { %10425 = vmatprep.subr.bf16.mxu1 %v10976_v57  ;;  %v3005_v24 = vshrl.u32 %v2928_v48, 16 }
 0x2be   :  { %10454 = vmatpush3.bf16.msra.mxu0 %v10975_v13  ;;  %v2941_v13 = vor.u32 %v2940_v16, %v2937_v14  ;;  %v2348_v59 = vor.u32 %v2347_v17, %v2344_v31  ;;  %v2588_v14 = vsel %vm11915_vm1, %v9138_v53, %v2587_v5  ;;  %v2592_v16 = vsel %vm11915_vm1, %v9139_v29, %v2591_v28 }
 0x2bf   :  { %10455 = vmatprep.subr.bf16.mxu0 %v10977_v25  ;;  %v2379_v29 = vshll.u32 %v12047_v55, 16  ;;  %v9159_v28 = vcombine.low %v2588_v14, %v2592_v16  ;;  %v2340_v31 = vsel %vm11824_vm13, %v2335_v61, %v2339_v63  ;;  %v2312_v51 = vsel %vm11824_vm13, %v2307_v37, %v2311_v20  ;;  %v10989_v14 = vld [vmem:[#allocation2 + $0x10] ss:$8 sps:$4 sm:$0xff]   ;;  %v12132_v16 = vld [vmem:[#allocation2 + $0x24] sm:$0x1]  ;;  %v10992_v20 = vld [vmem:[%s13738_s4 + $0x1c8] sm:$0xff]  }
 0x2c0   :  { %10426 = vmatpush3.bf16.msra.mxu1 %v10976_v57  ;;  %v2356_v57 = vshrl.u32 %v2267_v3, 16  ;;  %v2942_v58 = vrot.slane %v2941_v13, 4  ;;  %v2349_v11 = vrot.slane %v2348_v59, 4  ;;  %v2961_v3 = vsel %vm11824_vm13, %v2956_v1, %v2960_v18  ;;  %v12134_v37 = vld [vmem:[#allocation2 + $0x2c] sm:$0x1] }
 0x2c1   :  { %10427 = vmatprep.subr.bf16.mxu1 %v10978_v4  ;;  %v2991_v59 = vshrl.u32 %v2926_v44, 16  ;;  %v2996_v61 = vrot.slane %v2994_v60, 5  ;;  %v3007_v63 = vrot.slane %v3005_v24, 4 }
 0x2c2   :  { %10456 = vmatpush3.bf16.msra.mxu0 %v10977_v25  ;;  %v2325_v25 = vrot.slane %v2323_v42, 5  ;;  %v2358_v6 = vrot.slane %v2356_v57, 4  ;;  %v2354_v17 = vsel %vm11824_vm13, %v2349_v11, %v2353_v9  ;;  %v2367_v42 = vrot.slane %v2365_v23, 5  ;;  %v2930_v9 = vld [vmem:[#allocation2 + $0x40] sm:$0xf] }
 0x2c3   :  { %10489 = vmatprep.subr.bf16.mxu0 %v10979_v7  ;;  %v9122_v13 = vcombine.low %v2340_v31, %v2354_v17  ;;  %v2381_v57 = vrot.slane %v2379_v29, 5  ;;  %v12143_v29 = vld [vmem:[#allocation2 + $0x3c] sm:$0x1] }
 0x2c4   :  { %10428 = vmatpush3.bf16.msra.mxu1 %v10978_v4  ;;  %v2375_v4 = vrot.slane %v2373_v32, 5  ;;  %v2326_v30 = vsel %vm11824_vm13, %v2321_v56, %v2325_v25  ;;  %v2362_v53 = vor.u32 %v2361_v2, %v2358_v6  ;;  %v3008_v25 = vshll.u32 %v2928_v48, 16  ;;  %v10990_v56 = vld [vmem:[%s13738_s4 + $0x1d0] sm:$0xff]   ;;  %v10993_v31 = vld [vmem:[%s13738_s4 + $0x198] sm:$0xff]  }
 0x2c5   :  { %10458 = vmatmul.mubr.bf16.vlgmr.msra.gmra.mxu0 %v9157_v0  ;;  %10429 = vmatprep.subr.bf16.mxu1 %v10980_v40  ;;  %v10984_v0 = vld [vmem:[%s13738_s4 + $0x1b8] sm:$0xff]   ;;  %v9121_v49 = vcombine.low %v2312_v51, %v2326_v30  ;;  %v2993_v2 = vrot.slane %v2991_v59, 4 }
 0x2c6   :  { %10461 = vmatprep.mubr.bf16.mxu0 %v9158_v36  ;;  %10490 = vmatpush3.bf16.msra.mxu0 %v10979_v7  ;;  %v2946_v7 = vrot.slane %v2944_v27, 5  ;;  %v2376_v5 = vor.u32 %v2375_v4, %v2372_v41  ;;  %v2922_v36 = vld [vmem:[#allocation2 + $0x20] sm:$0xf]  ;;  %v2363_v47 = vrot.slane %v2362_v53, 4  ;;  %v2932_v41 = vld [vmem:[#allocation2 + $0x48] sm:$0xf] }
 0x2c7   :  { %10491 = vmatprep.subr.bf16.mxu0 %v10981_v21  ;;  %v2963_v32 = vshrl.u32 %v2922_v36, 16  ;;  %v3010_v11 = vrot.slane %v3008_v25, 5  ;;  %v3036_v23 = vshll.u32 %v2932_v41, 16  ;;  %v2997_v17 = vor.u32 %v2996_v61, %v2993_v2 }
 0x2c8   :  { %10430 = vmatpush3.bf16.msra.mxu1 %v10980_v40  ;;  %v2947_v19 = vsel %vm11824_vm13, %v2942_v58, %v2946_v7  ;;  %v2924_v40 = vld [vmem:[#allocation2 + $0x28] sm:$0xf]  ;;  %v2377_v45 = vrot.slane %v2376_v5, 4  ;;  %v2368_v27 = vsel %vm11824_vm13, %v2363_v47, %v2367_v42  ;;  %v2986_v7 = vshll.u32 %v12134_v37, 16  ;;  %v12141_v5 = vld [vmem:[#allocation2 + $0x34] sm:$0x1] }
 0x2c9   :  { %10431 = vmatprep.subr.bf16.mxu1 %v10982_v35  ;;  %v9212_v55 = vcombine.low %v2947_v19, %v2961_v3  ;;  %v2977_v50 = vshrl.u32 %v2924_v40, 16  ;;  %v2980_v15 = vshll.u32 %v2924_v40, 16  ;;  %v2965_v58 = vrot.slane %v2963_v32, 4 }
 0x2ca   :  { %10492 = vmatpush3.bf16.msra.mxu0 %v10981_v21  ;;  %v2966_v21 = vshll.u32 %v2922_v36, 16  ;;  %v3033_v3 = vshrl.u32 %v2932_v41, 16  ;;  %v3022_v19 = vshll.u32 %v2930_v9, 16  ;;  %v3011_v51 = vor.u32 %v3010_v11, %v3007_v63  ;;  %v10994_v36 = vld [vmem:[%s13738_s4 + $0x1c0] sm:$0xff]   ;;  %v10999_v11 = vld [vmem:[%s13738_s4 + $0x238] sm:$0xff]  }
 0x2cb   :  { %10493 = vmatprep.subr.bf16.mxu0 %v10983_v43  ;;  %v2979_v18 = vrot.slane %v2977_v50, 4  ;;  %v2982_v6 = vrot.slane %v2980_v15, 5  ;;  %v3038_v40 = vrot.slane %v3036_v23, 5  ;;  %v2998_v48 = vrot.slane %v2997_v17, 4  ;;  %v12156_v50 = vld [vmem:[#allocation2 + $0x4c] sm:$0x1] }
 0x2cc   :  { %10432 = vmatpush3.bf16.msra.mxu1 %v10982_v35  ;;  %v2382_v35 = vsel %vm11824_vm13, %v2377_v45, %v2381_v57  ;;  %v2968_v1 = vrot.slane %v2966_v21, 5  ;;  %v3035_v42 = vrot.slane %v3033_v3, 4  ;;  %v3024_v45 = vrot.slane %v3022_v19, 5  ;;  %v10995_v57 = vld [vmem:[%s13738_s4 + $0x190] sm:$0xff]   ;;  %v12158_v15 = vld [vmem:[#allocation2 + $0x44] sm:$0x1] }
 0x2cd   :  { %10462 = vmatmul.mubr.bf16.gmra.mxu0 %v9159_v28  ;;  %10465 = vmatprep.subr.bf16.mxu1 %v10984_v0  ;;  %v9123_v4 = vcombine.low %v2368_v27, %v2382_v35  ;;  %v2983_v53 = vor.u32 %v2982_v6, %v2979_v18  ;;  %v3019_v28 = vshrl.u32 %v2930_v9, 16  ;;  %v3012_v32 = vrot.slane %v3011_v51, 4  ;;  %v10996_v35 = vld [vmem:[%s13738_s4 + $0x188] sm:$0xff]   ;;  %v3200_v3 = vld [vmem:[#allocation2 + $0x10] sm:$0xe] }
 0x2ce   :  { %10494 = vmatpush3.bf16.msra.mxu0 %v10983_v43  ;;  %10505 = vmatprep.mubr.bf16.mxu0 %v9212_v55  ;;  %v10991_v43 = vld [vmem:[%s13738_s4 + $0x1a0] sm:$0xff]   ;;  %v2969_v30 = vor.u32 %v2968_v1, %v2965_v58  ;;  %v3014_v55 = vshll.u32 %v12143_v29, 16  ;;  %v3039_v59 = vor.u32 %v3038_v40, %v3035_v42  ;;  %v3028_v27 = vshll.u32 %v12158_v15, 16  ;;  %v3204_v42 = vld [vmem:[#allocation2 + $0x30] sm:$0xe] }
 0x2cf   :  { %10434 = vmatmul.mubr.bf16.vlgmr.msra.gmra.mxu1 %v9121_v49  ;;  %10495 = vmatprep.subr.bf16.mxu0 %v10985_v33  ;;  %v3021_v47 = vrot.slane %v3019_v28, 4  ;;  %v9224_v28 = vrot.slane %v3200_v3, 9  ;;  %v3226_v19 = vrot.slane %v12071_v46, 5  ;;  %v11002_v17 = vld [vmem:[#allocation2 + $0x40] ss:$8 sps:$4 sm:$0xff]   ;;  %v11005_v46 = vld [vmem:[%s13738_s4 + $0x218] sm:$0xff]  }
 0x2d0   :  { %10437 = vmatprep.mubr.bf16.mxu1 %v9122_v13  ;;  %10466 = vmatpush3.bf16.msra.mxu1 %v10984_v0  ;;  %v2972_v0 = vshll.u32 %v12132_v16, 16  ;;  %v2970_v44 = vrot.slane %v2969_v30, 4  ;;  %v2984_v13 = vrot.slane %v2983_v53, 4  ;;  %v3016_v21 = vrot.slane %v3014_v55, 5  ;;  %v11003_v53 = vld [vmem:[%s13738_s4 + $0x228] sm:$0xff]   ;;  %v11006_v55 = vld [vmem:[%s13738_s4 + $0x210] sm:$0xff]  }
 0x2d1   :  { %10467 = vmatprep.subr.bf16.mxu1 %v10986_v38  ;;  %v3025_v25 = vor.u32 %v3024_v45, %v3021_v47  ;;  %v3030_v41 = vrot.slane %v3028_v27, 5  ;;  %v3230_v30 = vrot.slane %v12055_v12, 5  ;;  %v11004_v12 = vld [vmem:[%s13738_s4 + $0x220] sm:$0xff]   ;;  %v3205_v40 = vld [vmem:[#allocation2 + $0x38] sm:$0xe]  ;;  %v3234_v47 = vrot.slane %v12132_v16, 5 }
 0x2d2   :  { %10496 = vmatpush3.bf16.msra.mxu0 %v10985_v33  ;;  %v3000_v33 = vshll.u32 %v12141_v5, 16  ;;  %v2974_v49 = vrot.slane %v2972_v0, 5  ;;  %v3017_v58 = vsel %vm11824_vm13, %v3012_v32, %v3016_v21  ;;  %v11001_v0 = vld [vmem:[%s13738_s4 + $0x230] sm:$0xff]   ;;  %v9229_v32 = vrot.slane %v3205_v40, 9 }
 0x2d3   :  { %10497 = vmatprep.subr.bf16.mxu0 %v10987_v26  ;;  %v3026_v2 = vrot.slane %v3025_v25, 4  ;;  %v3246_v21 = vrot.slane %v12143_v29, 5  ;;  %v3250_v27 = vrot.slane %v12158_v15, 5 }
 0x2d4   :  { %10468 = vmatpush3.bf16.msra.mxu1 %v10986_v38  ;;  %v2988_v38 = vrot.slane %v2986_v7, 5  ;;  %v2975_v60 = vsel %vm11824_vm13, %v2970_v44, %v2974_v49  ;;  %v11000_v7 = vld [vmem:[#allocation2 + $0x30] ss:$8 sps:$4 sm:$0xff]   ;;  %v3202_v49 = vld [vmem:[#allocation2 + $0x20] sm:$0xe] }
 0x2d5   :  { %10469 = vmatprep.subr.bf16.mxu1 %v10988_v54  ;;  %v3031_v61 = vsel %vm11824_vm13, %v3026_v2, %v3030_v41  ;;  %v11008_v44 = vld [vmem:[%s13738_s4 + $0x200] sm:$0xff]  }
 0x2d6   :  { %10498 = vmatpush3.bf16.msra.mxu0 %v10987_v26  ;;  %v3002_v26 = vrot.slane %v3000_v33, 5  ;;  %v2989_v24 = vsel %vm11824_vm13, %v2984_v13, %v2988_v38  ;;  %v3227_v33 = vsel %vm11915_vm1, %v9224_v28, %v3226_v19  ;;  %v3203_v38 = vld [vmem:[#allocation2 + $0x28] sm:$0xe]  ;;  %v9226_v13 = vrot.slane %v3202_v49, 9 }
 0x2d7   :  { %10438 = vmatmul.mubr.bf16.gmra.mxu1 %v9123_v4  ;;  %10499 = vmatprep.subr.bf16.mxu0 %v10990_v56  ;;  %v9213_v1 = vcombine.low %v2975_v60, %v2989_v24  ;;  %v3040_v4 = vrot.slane %v3039_v59, 4  ;;  %v9227_v45 = vrot.slane %v3203_v38, 9  ;;  %v3206_v60 = vld [vmem:[#allocation2 + $0x40] sm:$0xe]  ;;  %v3207_v24 = vld [vmem:[#allocation2 + $0x48] sm:$0xe] }
 0x2d8   :  { %10470 = vmatpush3.bf16.msra.mxu1 %v10988_v54  ;;  %10481 = vmatprep.mubr.bf16.mxu1 %v10989_v14  ;;  %v3042_v54 = vshll.u32 %v12156_v50, 16  ;;  %v3201_v14 = vld [vmem:[#allocation2 + $0x18] sm:$0xe]  ;;  %v3235_v59 = vsel %vm11915_vm1, %v9226_v13, %v3234_v47  ;;  %v9230_v25 = vrot.slane %v3206_v60, 9 }
 0x2d9   :  { %10471 = vmatprep.subr.bf16.mxu1 %v10991_v43  ;;  %v9225_v23 = vrot.slane %v3201_v14, 9 }
 0x2da   :  { %10500 = vmatpush3.bf16.msra.mxu0 %v10990_v56  ;;  %v3003_v56 = vsel %vm11824_vm13, %v2998_v48, %v3002_v26  ;;  %v3044_v18 = vrot.slane %v3042_v54, 5  ;;  %v9228_v48 = vrot.slane %v3204_v42, 9  ;;  %v3242_v26 = vrot.slane %v12141_v5, 5 }
 0x2db   :  { %10501 = vmatprep.subr.bf16.mxu0 %v10992_v20  ;;  %v9214_v6 = vcombine.low %v3003_v56, %v3017_v58  ;;  %v3254_v56 = vrot.slane %v12156_v50, 5  ;;  %v3251_v58 = vsel %vm11915_vm1, %v9230_v25, %v3250_v27 }
 0x2dc   :  { %10472 = vmatpush3.bf16.msra.mxu1 %v10991_v43  ;;  %v10997_v43 = vld [vmem:[%s13738_s4 + $0x180] sm:$0xff]   ;;  %v3045_v63 = vsel %vm11824_vm13, %v3040_v4, %v3044_v18  ;;  %v3243_v16 = vsel %vm11915_vm1, %v9228_v48, %v3242_v26 }
 0x2dd   :  { %10473 = vmatprep.subr.bf16.mxu1 %v10993_v31  ;;  %v9215_v9 = vcombine.low %v3031_v61, %v3045_v63 }
 0x2de   :  { %10502 = vmatpush3.bf16.msra.mxu0 %v10992_v20  ;;  %v10998_v20 = vld [vmem:[#allocation2 + $0x20] ss:$8 sps:$4 sm:$0xff]  }
 0x2df   :  { %10503 = vmatprep.subr.bf16.mxu0 %v10994_v36 }
 0x2e0   :  { %10474 = vmatpush3.bf16.msra.mxu1 %v10993_v31  ;;  %v3231_v31 = vsel %vm11915_vm1, %v9225_v23, %v3230_v30 }
 0x2e1   :  { %10475 = vmatprep.subr.bf16.mxu1 %v10995_v57  ;;  %v9248_v51 = vcombine.low %v3227_v33, %v3231_v31 }
 0x2e2   :  { %10504 = vmatpush3.bf16.msra.mxu0 %v10994_v36  ;;  %v11007_v36 = vld [vmem:[%s13738_s4 + $0x208] sm:$0xff]  }
 0x2e3   :  { %10537 = vmatprep.subr.mxu0 %v13744_v34 }
 0x2e4   :  { %10476 = vmatpush3.bf16.msra.mxu1 %v10995_v57  ;;  %v3238_v57 = vrot.slane %v12134_v37, 5  ;;  %v3247_v37 = vsel %vm11915_vm1, %v9229_v32, %v3246_v21 }
 0x2e5   :  { %10506 = vmatmul.mubr.bf16.vlgmr.msra.gmra.mxu0 %v9213_v1  ;;  %10477 = vmatprep.subr.bf16.mxu1 %v10996_v35  ;;  %v9250_v29 = vcombine.low %v3243_v16, %v3247_v37 }
 0x2e6   :  { %10509 = vmatprep.mubr.bf16.mxu0 %v9214_v6  ;;  %v3239_v54 = vsel %vm11915_vm1, %v9227_v45, %v3238_v57 }
 0x2e7   :  { %v9249_v5 = vcombine.low %v3235_v59, %v3239_v54 }
 0x2e8   :  { %10478 = vmatpush3.bf16.msra.mxu1 %v10996_v35  ;;  %v9231_v35 = vrot.slane %v3207_v24, 9 }
 0x2e9   :  { %10479 = vmatprep.subr.bf16.mxu1 %v10997_v43 }
 0x2ea   :  { %v3255_v1 = vsel %vm11915_vm1, %v9231_v35, %v3254_v56 }
 0x2eb   :  { %v9251_v18 = vcombine.low %v3251_v58, %v3255_v1 }
 0x2ec   :  { %10480 = vmatpush3.bf16.msra.mxu1 %v10997_v43 }
 0x2ed   :  { %10510 = vmatmul.mubr.bf16.gmra.mxu0 %v9215_v9  ;;  %10513 = vmatprep.subr.bf16.mxu1 %v10999_v11 }
 0x2ee   :  { %10539 = vmatprep.mubr.msk.f32.mxu0 %vm11280_vm0, %v13744_v34 }
 0x2ef   :  { %10482 = vmatmul.mubr.bf16.vlgmr.msra.gmra.mxu1 %v10998_v20 }
 0x2f0   :  { %10485 = vmatprep.mubr.bf16.mxu1 %v11000_v7  ;;  %10514 = vmatpush3.bf16.msra.mxu1 %v10999_v11 }
 0x2f1   :  { %10515 = vmatprep.subr.bf16.mxu1 %v11001_v0 }
 0x2f4   :  { %10516 = vmatpush3.bf16.msra.mxu1 %v11001_v0 }
 0x2f5   :  { %10517 = vmatprep.subr.bf16.mxu1 %v11003_v53 }
 0x2f7   :  { %10486 = vmatmul.mubr.bf16.gmra.mxu1 %v11002_v17 }
 0x2f8   :  { %10518 = vmatpush3.bf16.msra.mxu1 %v11003_v53  ;;  %10529 = vmatprep.mubr.bf16.mxu1 %v9248_v51 }
 0x2f9   :  { %10519 = vmatprep.subr.bf16.mxu1 %v11004_v12 }
 0x2fc   :  { %10520 = vmatpush3.bf16.msra.mxu1 %v11004_v12 }
 0x2fd   :  { %10521 = vmatprep.subr.bf16.mxu1 %v11005_v46 }
 0x300   :  { %10522 = vmatpush3.bf16.msra.mxu1 %v11005_v46 }
 0x301   :  { %10523 = vmatprep.subr.bf16.mxu1 %v11006_v55 }
 0x304   :  { %10524 = vmatpush3.bf16.msra.mxu1 %v11006_v55 }
 0x305   :  { %10525 = vmatprep.subr.bf16.mxu1 %v11007_v36 }
 0x308   :  { %10526 = vmatpush3.bf16.msra.mxu1 %v11007_v36 }
 0x309   :  { %10527 = vmatprep.subr.bf16.mxu1 %v11008_v44 }
 0x30c   :  { %10528 = vmatpush3.bf16.msra.mxu1 %v11008_v44 }
 0x30d   :  { %10542 = vmatprep.subr.mxu1 %v13744_v34 }
 0x30f   :  { %10530 = vmatmul.mubr.bf16.vlgmr.msra.gmra.mxu1 %v9249_v5 }
 0x310   :  { %10533 = vmatprep.mubr.bf16.mxu1 %v9250_v29 }
 0x317   :  { %10534 = vmatmul.mubr.bf16.gmra.mxu1 %v9251_v18 }
 0x318   :  { %10544 = vmatprep.mubr.msk.f32.mxu1 %vm11280_vm0, %v13744_v34 }
 0x343   :  { %v10363_v4 = vpop.f32.mrf.mxu0 }
 0x345   :  { %v1841_v50 = vpop.f32.mrf.mxu0 }
 0x347   :  { %v10364_v63 = vpop.f32.mrf.mxu0 }
 0x349   :  { %v1844_v9 = vpop.f32.mrf.mxu0 }
 0x34f   :  { %v10339_v6 = vpop.f32.mrf.mxu1 }
 0x350   :  { %v1850_v34 = vadd.f32 %v10363_v4, %v10339_v6 }
 0x351   :  { %v1704_v2 = vpop.f32.mrf.mxu1 }
 0x352   :  { %v1842_v58 = vadd.f32 %v1841_v50, %v1704_v2 }
 0x353   :  { %v10340_v41 = vpop.f32.mrf.mxu1 }
 0x354   :  { %v10367_v20 = vpop.f32.mrf.mxu0  ;;  %v1853_v8 = vadd.f32 %v10364_v63, %v10340_v41 }
 0x355   :  { %v1707_v15 = vpop.f32.mrf.mxu1 }
 0x356   :  { %v1857_v7 = vpop.f32.mrf.mxu0  ;;  %v1845_v1 = vadd.f32 %v1844_v9, %v1707_v15 }
 0x358   :  { %v12238_v23 = vpop.f32.mrf.mxu0 }
 0x359   :  { %13778 = vst [vmem:[#allocation14_spill] sm:$0xff] %v12238_v23 }
 0x35a   :  { %v1860_v53 = vpop.f32.mrf.mxu0 }
 0x35e   :  { %v12234_v43 = vpop.f32.mrf.mxu1 }
 0x35f   :  { %13776 = vst [vmem:[#allocation12_spill] sm:$0xff] %v12234_v43 }
 0x360   :  { %v1720_v61 = vpop.f32.mrf.mxu1  ;;  %v13787_v41 = vld [vmem:[#allocation14_spill] sm:$0xff] }
 0x362   :  { %v12236_v11 = vpop.f32.mrf.mxu1 }
 0x363   :  { %13777 = vst [vmem:[#allocation13_spill] sm:$0xff] %v12236_v11 }
 0x364   :  { %v1723_v14 = vpop.f32.mrf.mxu1  ;;  %v10411_v19 = vpop.f32.mrf.mxu0 }
 0x366   :  { %v2216_v17 = vpop.f32.mrf.mxu0  ;;  %v13785_v50 = vld [vmem:[#allocation12_spill] sm:$0xff] }
 0x367   :  { %v1866_v15 = vadd.f32 %v10367_v20, %v13785_v50 }
 0x368   :  { %v10412_v12 = vpop.f32.mrf.mxu0 }
 0x36a   :  { %v2219_v46 = vpop.f32.mrf.mxu0 }
 0x36c   :  { %v12240_v36 = vpop.f32.mrf.mxu0 }
 0x36d   :  { %13779 = vst [vmem:[#allocation15_spill] sm:$0xff] %v12240_v36  ;;  %v1861_v36 = vadd.f32 %v1860_v53, %v1723_v14 }
 0x36e   :  { %v2232_v38 = vpop.f32.mrf.mxu0 }
 0x36f   :  { %v10387_v0 = vpop.f32.mrf.mxu1 }
 0x370   :  { %v12242_v40 = vpop.f32.mrf.mxu0  ;;  %v2079_v39 = vadd.f32 %v10387_v0, %v1850_v34 }
 0x371   :  { %v2046_v3 = vpop.f32.mrf.mxu1  ;;  %13780 = vst [vmem:[#allocation16_spill] sm:$0xff] %v12242_v40 }
 0x372   :  { %v2235_v13 = vpop.f32.mrf.mxu0  ;;  %v2077_v52 = vadd.f32 %v2046_v3, %v1842_v58  ;;  %v2249_v43 = vadd.f32 %v10411_v19, %v2079_v39 }
 0x373   :  { %v10388_v30 = vpop.f32.mrf.mxu1 }
 0x374   :  { %v2247_v40 = vadd.f32 %v2216_v17, %v2077_v52 }
 0x375   :  { %v2049_v28 = vpop.f32.mrf.mxu1 }
 0x376   :  { %v2078_v62 = vadd.f32 %v2049_v28, %v1845_v1  ;;  %v13786_v28 = vld [vmem:[#allocation13_spill] sm:$0xff] }
 0x377   :  { %v10391_v31 = vpop.f32.mrf.mxu1  ;;  %v1869_v34 = vadd.f32 %v13787_v41, %v13786_v28 }
 0x378   :  { %v2083_v63 = vadd.f32 %v10391_v31, %v1866_v15 }
 0x379   :  { %v2062_v33 = vpop.f32.mrf.mxu1 }
 0x37b   :  { %v10392_v51 = vpop.f32.mrf.mxu1 }
 0x37c   :  { %v2084_v0 = vadd.f32 %v10392_v51, %v1869_v34 }
 0x37d   :  { %v2065_v55 = vpop.f32.mrf.mxu1 }
 0x37e   :  { %v2082_v9 = vadd.f32 %v2065_v55, %v1861_v36 }
 0x385   :  { %v10459_v45 = vpop.f32.mrf.mxu0 }
 0x387   :  { %v2708_v48 = vpop.f32.mrf.mxu0 }
 0x389   :  { %v10460_v32 = vpop.f32.mrf.mxu0 }
 0x38b   :  { %v2711_v59 = vpop.f32.mrf.mxu0 }
 0x38d   :  { %v12246_v60 = vpop.f32.mrf.mxu0 }
 0x38e   :  { %13782 = vst [vmem:[#allocation18_spill] sm:$0xff] %v12246_v60  ;;  %v1858_v60 = vadd.f32 %v1857_v7, %v1720_v61  ;;  %v2252_v7 = vadd.f32 %v2235_v13, %v2082_v9 }
 0x38f   :  { %v10435_v49 = vpop.f32.mrf.mxu1  ;;  %v2724_v37 = vpop.f32.mrf.mxu0 }
 0x390   :  { %v2081_v11 = vadd.f32 %v2062_v33, %v1858_v60  ;;  %v2531_v4 = vadd.f32 %v10435_v49, %v2249_v43  ;;  %v13788_v33 = vld [vmem:[#allocation15_spill] sm:$0xff]  ;;  %v13789_v49 = vld [vmem:[#allocation16_spill] sm:$0xff] }
 0x391   :  { %v2498_v42 = vpop.f32.mrf.mxu1  ;;  %v12248_v5 = vpop.f32.mrf.mxu0  ;;  %v2253_v43 = vadd.f32 %v13788_v33, %v2083_v63 }
 0x392   :  { %13783 = vst [vmem:[#allocation19_spill] sm:$0xff] %v12248_v5  ;;  %v2248_v5 = vadd.f32 %v2219_v46, %v2078_v62  ;;  %v2251_v52 = vadd.f32 %v2232_v38, %v2081_v11  ;;  %v2741_v19 = vadd.f32 %v10459_v45, %v2531_v4 }
 0x393   :  { %v10436_v44 = vpop.f32.mrf.mxu1  ;;  %v2727_v29 = vpop.f32.mrf.mxu0 }
 0x395   :  { %v2501_v47 = vpop.f32.mrf.mxu1 }
 0x396   :  { %v2530_v2 = vadd.f32 %v2501_v47, %v2248_v5 }
 0x397   :  { %v10439_v57 = vpop.f32.mrf.mxu1 }
 0x398   :  { %v2740_v14 = vadd.f32 %v2711_v59, %v2530_v2  ;;  %v2535_v31 = vadd.f32 %v10439_v57, %v2253_v43  ;;  %v13791_v57 = vld [vmem:[#allocation18_spill] sm:$0xff] }
 0x399   :  { %v2514_v26 = vpop.f32.mrf.mxu1 }
 0x39a   :  { %v2533_v53 = vadd.f32 %v2514_v26, %v2251_v52 }
 0x39b   :  { %v12244_v21 = vpop.f32.mrf.mxu1 }
 0x39c   :  { %13781 = vst [vmem:[#allocation17_spill] sm:$0xff] %v12244_v21  ;;  %v2080_v21 = vadd.f32 %v10388_v30, %v1853_v8  ;;  %v2743_v51 = vadd.f32 %v2724_v37, %v2533_v53 }
 0x39d   :  { %v2517_v54 = vpop.f32.mrf.mxu1 }
 0x39e   :  { %v2250_v3 = vadd.f32 %v10412_v12, %v2080_v21  ;;  %v2534_v12 = vadd.f32 %v2517_v54, %v2252_v7 }
 0x3a0   :  { %v2532_v8 = vadd.f32 %v10436_v44, %v2250_v3  ;;  %v2744_v45 = vadd.f32 %v2727_v29, %v2534_v12 }
 0x3a2   :  { %v2742_v36 = vadd.f32 %v10460_v32, %v2532_v8 }
 0x3a3   :  { %v13790_v47 = vld [vmem:[#allocation17_spill] sm:$0xff] }
 0x3a5   :  { %v10507_v35 = vpop.f32.mrf.mxu0 }
 0x3a7   :  { %v3161_v18 = vpop.f32.mrf.mxu0 }
 0x3a9   :  { %v10508_v22 = vpop.f32.mrf.mxu0 }
 0x3ab   :  { %v3164_v6 = vpop.f32.mrf.mxu0 }
 0x3ad   :  { %v10511_v39 = vpop.f32.mrf.mxu0 }
 0x3af   :  { %v10483_v16 = vpop.f32.mrf.mxu1  ;;  %v3177_v11 = vpop.f32.mrf.mxu0 }
 0x3b0   :  { %v2912_v55 = vadd.f32 %v10483_v16, %v2741_v19  ;;  %v2745_v16 = vadd.f32 %v13791_v57, %v2535_v31 }
 0x3b1   :  { %v2879_v24 = vpop.f32.mrf.mxu1  ;;  %v10512_v32 = vpop.f32.mrf.mxu0 }
 0x3b2   :  { %v3194_v59 = vadd.f32 %v10507_v35, %v2912_v55 }
 0x3b3   :  { %v10484_v25 = vpop.f32.mrf.mxu1  ;;  %v3180_v50 = vpop.f32.mrf.mxu0 }
 0x3b5   :  { %v2882_v27 = vpop.f32.mrf.mxu1 }
 0x3b6   :  { %v2911_v17 = vadd.f32 %v2882_v27, %v2740_v14 }
 0x3b7   :  { %v12250_v56 = vpop.f32.mrf.mxu1 }
 0x3b8   :  { %13784 = vst [vmem:[#allocation20_spill] sm:$0xff] %v12250_v56  ;;  %v2529_v56 = vadd.f32 %v2498_v42, %v2247_v40  ;;  %v2254_v42 = vadd.f32 %v13789_v49, %v2084_v0  ;;  %v2913_v40 = vadd.f32 %v10484_v25, %v2742_v36  ;;  %v3193_v13 = vadd.f32 %v3164_v6, %v2911_v17 }
 0x3b9   :  { %v2895_v10 = vpop.f32.mrf.mxu1 }
 0x3ba   :  { %v2739_v62 = vadd.f32 %v2708_v48, %v2529_v56  ;;  %v2536_v48 = vadd.f32 %v13790_v47, %v2254_v42  ;;  %v2914_v21 = vadd.f32 %v2895_v10, %v2743_v51  ;;  %v3195_v37 = vadd.f32 %v10508_v22, %v2913_v40  ;;  %v13792_v56 = vld [vmem:[#allocation19_spill] sm:$0xff] }
 0x3bb   :  { %v10488_v23 = vpop.f32.mrf.mxu1 }
 0x3bc   :  { %v2910_v20 = vadd.f32 %v2879_v24, %v2739_v62  ;;  %v2746_v29 = vadd.f32 %v13792_v56, %v2536_v48  ;;  %v3196_v2 = vadd.f32 %v3177_v11, %v2914_v21 }
 0x3bd   :  { %v2898_v61 = vpop.f32.mrf.mxu1 }
 0x3be   :  { %v3192_v44 = vadd.f32 %v3161_v18, %v2910_v20  ;;  %v2915_v5 = vadd.f32 %v2898_v61, %v2744_v45  ;;  %v2917_v9 = vadd.f32 %v10488_v23, %v2746_v29  ;;  %v36_v29 = vld [vmem:[%s13739_s5] sm:$0x1] }
 0x3bf   :  { %v13793_v10 = vld [vmem:[#allocation20_spill] sm:$0xff] }
 0x3c0   :  { %v2916_v35 = vadd.f32 %v13793_v10, %v2745_v16  ;;  %v3197_v4 = vadd.f32 %v3180_v50, %v2915_v5  ;;  %v3199_v61 = vadd.f32 %v10512_v32, %v2917_v9 }
 0x3c2   :  { %v3198_v28 = vadd.f32 %v10511_v39, %v2916_v35  ;;  %v37_v35 = vld [vmem:[%s13740_s6] sm:$0x1] }
 0x3cf   :  { %v10531_v30 = vpop.f32.mrf.mxu1 }
 0x3d0   :  { %v12263_v27 = vadd.f32 %v10531_v30, %v3194_v59 }
 0x3d1   :  { %v3371_v46 = vpop.f32.mrf.mxu1 }
 0x3d2   :  { %v12258_v60 = vadd.f32 %v3371_v46, %v3192_v44 }
 0x3d3   :  { %v10532_v38 = vpop.f32.mrf.mxu1 }
 0x3d4   :  { %v12269_v1 = vadd.f32 %v10532_v38, %v3195_v37 }
 0x3d5   :  { %v3374_v26 = vpop.f32.mrf.mxu1 }
 0x3d6   :  { %v12260_v54 = vadd.f32 %v3374_v26, %v3193_v13 }
 0x3d7   :  { %v10535_v24 = vpop.f32.mrf.mxu1 }
 0x3d8   :  { %v3410_v25 = vadd.f32 %v12260_v54, %v12258_v60  ;;  %v3408_v63 = vadd.f32 %v10535_v24, %v3198_v28 }
 0x3d9   :  { %v3387_v58 = vpop.f32.mrf.mxu1 }
 0x3da   :  { %v3411_v18 = vadd.f32 %v3410_v25, %v12263_v27  ;;  %v12272_v6 = vadd.f32 %v3387_v58, %v3196_v2  ;;  %v13794_v2 = vld [vmem:[#allocation6_spill] sm:$0xff] }
 0x3db   :  { %v10536_v15 = vpop.f32.mrf.mxu1 }
 0x3dc   :  { %v3412_v22 = vadd.f32 %v3411_v18, %v12269_v1  ;;  %v3409_v52 = vadd.f32 %v10536_v15, %v3199_v61 }
 0x3dd   :  { %v3390_v3 = vpop.f32.mrf.mxu1 }
 0x3de   :  { %v3413_v41 = vadd.f32 %v3412_v22, %v12272_v6  ;;  %v3407_v34 = vadd.f32 %v3390_v3, %v3197_v4 }
 0x3e0   :  { %v3414_v8 = vadd.f32 %v3413_v41, %v3407_v34 }
 0x3e2   :  { %v3415_v62 = vadd.f32 %v3414_v8, %v3408_v63 }
 0x3e4   :  { %v3416_v14 = vadd.f32 %v3415_v62, %v3409_v52 }
 0x3e6   :  { %v3417_v0 = vrot.slane %v3416_v14, 4 }
 0x3e8   :  { %v3418_v7 = vadd.f32 %v3417_v0, %v3416_v14 }
 0x3ea   :  { %v3419_v30 = vrot.slane %v3418_v7, 2 }
 0x3ec   :  { %v3420_v23 = vadd.f32 %v3419_v30, %v3418_v7 }
 0x3ee   :  { %v3421_v53 = vrot.slane %v3420_v23, 1 }
 0x3f0   :  { %v3422_v19 = vadd.f32 %v3421_v53, %v3420_v23 }
 0x3f2   :  { %v3424_v20 = vmul.f32 0.015625, %v3422_v19 }
 0x3f4   :  { %v3425_v17 = vsub.f32 %v12258_v60, %v3424_v20  ;;  %v3426_v39 = vsub.f32 %v12260_v54, %v3424_v20  ;;  %v3427_v33 = vsub.f32 %v12263_v27, %v3424_v20  ;;  %v3428_v43 = vsub.f32 %v12269_v1, %v3424_v20 }
 0x3f5   :  { %v3429_v55 = vsub.f32 %v12272_v6, %v3424_v20  ;;  %v3430_v49 = vsub.f32 %v3407_v34, %v3424_v20  ;;  %v3431_v38 = vsub.f32 %v3408_v63, %v3424_v20  ;;  %v3432_v44 = vsub.f32 %v3409_v52, %v3424_v20 }
 0x3f6   :  { %v3433_v12 = vmul.f32 %v3425_v17, %v3425_v17  ;;  %v3434_v46 = vmul.f32 %v3426_v39, %v3426_v39  ;;  %v3435_v36 = vmul.f32 %v3427_v33, %v3427_v33  ;;  %v3436_v42 = vmul.f32 %v3428_v43, %v3428_v43 }
 0x3f7   :  { %v3437_v40 = vmul.f32 %v3429_v55, %v3429_v55  ;;  %v3438_v13 = vmul.f32 %v3430_v49, %v3430_v49  ;;  %v3439_v48 = vmul.f32 %v3431_v38, %v3431_v38  ;;  %v3440_v26 = vmul.f32 %v3432_v44, %v3432_v44  ;;  %v11011_v49 = vld [vmem:[%s13735_s1 + $0x28] sm:$0xff]   ;;  %v11014_v38 = vld [vmem:[%s13735_s1 + $0x10] sm:$0xff]  }
 0x3f8   :  { %v3441_v31 = vadd.f32 %v3434_v46, %v3433_v12  ;;  %v11009_v12 = vld [vmem:[%s13735_s1 + $0x38] sm:$0xff]   ;;  %v13796_v46 = vmov 0.0   ;;  %v11018_v44 = vld [vmem:[%s13734_s0 + $0x88] sm:$0xff]  }
 0x3fa   :  { %v3442_v11 = vadd.f32 %v3441_v31, %v3435_v36  ;;  %v11017_v36 = vld [vmem:[%s13734_s0 + $0x80] sm:$0xff]   ;;  %v11010_v31 = vld [vmem:[%s13735_s1 + $0x30] sm:$0xff]  }
 0x3fc   :  { %v3443_v51 = vadd.f32 %v3442_v11, %v3436_v42  ;;  %v11012_v42 = vld [vmem:[%s13735_s1 + $0x20] sm:$0xff]   ;;  %v11013_v11 = vld [vmem:[%s13735_s1 + $0x18] sm:$0xff]  }
 0x3fe   :  { %v3444_v47 = vadd.f32 %v3443_v51, %v3437_v40  ;;  %v11015_v40 = vld [vmem:[%s13735_s1 + $0x8] sm:$0xff]   ;;  %v11016_v51 = vld [vmem:[%s13735_s1] sm:$0xff]  }
 0x400   :  { %v3445_v45 = vadd.f32 %v3444_v47, %v3438_v13  ;;  %v11019_v13 = vld [vmem:[%s13734_s0 + $0x90] sm:$0xff]   ;;  %v11020_v47 = vld [vmem:[%s13734_s0 + $0x98] sm:$0xff]  }
 0x402   :  { %v3446_v21 = vadd.f32 %v3445_v45, %v3439_v48  ;;  %v11021_v48 = vld [vmem:[%s13734_s0 + $0xa0] sm:$0xff]   ;;  %v11022_v45 = vld [vmem:[%s13734_s0 + $0xa8] sm:$0xff]  }
 0x404   :  { %v3447_v59 = vadd.f32 %v3446_v21, %v3440_v26  ;;  %v11023_v26 = vld [vmem:[%s13734_s0 + $0xb0] sm:$0xff]   ;;  %v11024_v21 = vld [vmem:[%s13734_s0 + $0xb8] sm:$0xff]  }
 0x406   :  { %v3448_v32 = vrot.slane %v3447_v59, 4 }
 0x408   :  { %v3449_v57 = vadd.f32 %v3448_v32, %v3447_v59  ;;  %v11025_v59 = vld [vmem:[%s13734_s0 + $0xc0] sm:$0xff]   ;;  %v11026_v32 = vld [vmem:[%s13734_s0 + $0xc8] sm:$0xff]  }
 0x40a   :  { %v3450_v16 = vrot.slane %v3449_v57, 2 }
 0x40c   :  { %v3451_v24 = vadd.f32 %v3450_v16, %v3449_v57  ;;  %v11027_v57 = vld [vmem:[%s13734_s0 + $0xd0] sm:$0xff]   ;;  %v11028_v16 = vld [vmem:[%s13734_s0 + $0xd8] sm:$0xff]  }
 0x40e   :  { %v3452_v5 = vrot.slane %v3451_v24, 1 }
 0x410   :  { %v3453_v37 = vadd.f32 %v3452_v5, %v3451_v24  ;;  %v11029_v24 = vld [vmem:[%s13734_s0 + $0xe0] sm:$0xff]   ;;  %v11030_v5 = vld [vmem:[%s13734_s0 + $0xe8] sm:$0xff]  }
 0x412   :  { %v3454_v25 = vmul.f32 0.015625, %v3453_v37  ;;  %v11031_v37 = vld [vmem:[%s13734_s0 + $0xf0] sm:$0xff]  }
 0x414   :  { %v3455_v56 = vadd.f32 1e-05, %v3454_v25  ;;  %v11032_v25 = vld [vmem:[%s13734_s0 + $0xf8] sm:$0xff]  }
 0x416   :  { %11247 = vrsqrt.f32 %v3455_v56 }
 0x423   :  { %v11248_v58 = vpop.eup %11247 }
 0x424   :  { %v3457_v10 = vmul.f32 %v11248_v58, %v36_v29 }
 0x426   :  { %v3458_v18 = vmul.f32 %v3457_v10, %v3424_v20  ;;  %v3464_v50 = vrot.slane %v3457_v10, %v13794_v2 }
 0x428   :  { %v3459_v15 = vsub.f32 %v37_v35, %v3458_v18  ;;  %v3471_v9 = vmul.f32 %v3464_v50, %v3407_v34  ;;  %v3466_v4 = vmul.f32 %v3464_v50, %v12258_v60  ;;  %v3467_v3 = vmul.f32 %v3464_v50, %v12260_v54 }
 0x429   :  { %v3468_v28 = vmul.f32 %v3464_v50, %v12263_v27  ;;  %v3469_v41 = vmul.f32 %v3464_v50, %v12269_v1  ;;  %v3470_v61 = vmul.f32 %v3464_v50, %v12272_v6  ;;  %v3472_v8 = vmul.f32 %v3464_v50, %v3408_v63 }
 0x42a   :  { %v3478_v22 = vrot.slane %v3459_v15, %v13794_v2  ;;  %v3473_v62 = vmul.f32 %v3464_v50, %v3409_v52  ;;  %v13795_v52 = vld [vmem:[#allocation7_spill] sm:$0xff] }
 0x42c   :  { %v3485_v14 = vadd.f32 %v3478_v22, %v3471_v9  ;;  %v3480_v0 = vadd.f32 %v3478_v22, %v3466_v4  ;;  %v3481_v7 = vadd.f32 %v3478_v22, %v3467_v3  ;;  %v3482_v30 = vadd.f32 %v3478_v22, %v3468_v28 }
 0x42d   :  { %v3483_v23 = vadd.f32 %v3478_v22, %v3469_v41  ;;  %v3484_v34 = vadd.f32 %v3478_v22, %v3470_v61  ;;  %v3486_v53 = vadd.f32 %v3478_v22, %v3472_v8  ;;  %v3487_v19 = vadd.f32 %v3478_v22, %v3473_v62 }
 0x42e   :  { %v3488_v20 = vmax.f32 %v3480_v0, 0.0  ;;  %v3489_v60 = vmax.f32 %v3481_v7, 0.0  ;;  %v3490_v17 = vmax.f32 %v3482_v30, 0.0  ;;  %v3493_v54 = vmax.f32 %v3485_v14, 0.0 }
 0x42f   :  { %v3491_v39 = vmax.f32 %v3483_v23, 0.0  ;;  %v3492_v27 = vmax.f32 %v3484_v34, 0.0  ;;  %v3494_v1 = vmax.f32 %v3486_v53, 0.0  ;;  %v3495_v6 = vmax.f32 %v3487_v19, 0.0 }
 0x430   :  { %v3496_v33 = vadd.f32 %v3489_v60, %v3488_v20 }
 0x431   :  { %v3497_v63 = vadd.f32 %v3491_v39, %v3490_v17  ;;  %v3498_v43 = vadd.f32 %v3493_v54, %v3492_v27  ;;  %v3499_v55 = vadd.f32 %v3495_v6, %v3494_v1 }
 0x432   :  { %10538 = vmatpush3.msra.mxu0 %v3496_v33 }
 0x433   :  { %10543 = vmatpush3.msra.mxu1 %v3497_v63  ;;  %10540 = vmatmul.mubr.msk.f32.vlgmr.msra.gmra.mxu0 %vm3500_vm2, %v13795_v52 }
 0x434   :  { %10547 = vmatprep.subr.mxu0 %v13796_v46  ;;  %10552 = vmatprep.subr.mxu1 %v13796_v46 }
 0x435   :  { %10545 = vmatmul.mubr.msk.f32.vlgmr.msra.gmra.mxu1 %vm3500_vm2, %v13795_v52  ;;  %10548 = vmatpush3.msra.mxu0 %v3498_v43 }
 0x436   :  { %10553 = vmatpush3.msra.mxu1 %v3499_v55  ;;  %10549 = vmatprep.mubr.msk.f32.mxu0 %vm11280_vm0, %v13796_v46 }
 0x437   :  { %10557 = vmatprep.subr.bf16.mxu0 %v11009_v12  ;;  %10550 = vmatmul.mubr.msk.f32.vlgmr.msra.gmra.mxu0 %vm3500_vm2, %v13795_v52 }
 0x438   :  { %10558 = vmatpush3.bf16.msra.mxu0 %v11009_v12  ;;  %10573 = vmatprep.mubr.bf16.mxu0 %v11017_v36 }
 0x439   :  { %10559 = vmatprep.subr.bf16.mxu0 %v11010_v31  ;;  %10554 = vmatprep.mubr.msk.f32.mxu1 %vm11280_vm0, %v13796_v46 }
 0x43a   :  { %10555 = vmatmul.mubr.msk.f32.vlgmr.msra.gmra.mxu1 %vm3500_vm2, %v13795_v52  ;;  %10605 = vmatprep.subr.mxu1 %v13796_v46 }
 0x43b   :  { %10609 = vmatprep.mubr.msk.f32.mxu1 %vm11280_vm0, %v13796_v46 }
 0x43c   :  { %10560 = vmatpush3.bf16.msra.mxu0 %v11010_v31 }
 0x43d   :  { %10561 = vmatprep.subr.bf16.mxu0 %v11011_v49 }
 0x440   :  { %10562 = vmatpush3.bf16.msra.mxu0 %v11011_v49 }
 0x441   :  { %10563 = vmatprep.subr.bf16.mxu0 %v11012_v42 }
 0x444   :  { %10564 = vmatpush3.bf16.msra.mxu0 %v11012_v42 }
 0x445   :  { %10565 = vmatprep.subr.bf16.mxu0 %v11013_v11 }
 0x448   :  { %10566 = vmatpush3.bf16.msra.mxu0 %v11013_v11 }
 0x449   :  { %10567 = vmatprep.subr.bf16.mxu0 %v11014_v38 }
 0x44c   :  { %10568 = vmatpush3.bf16.msra.mxu0 %v11014_v38 }
 0x44d   :  { %10569 = vmatprep.subr.bf16.mxu0 %v11015_v40 }
 0x450   :  { %10570 = vmatpush3.bf16.msra.mxu0 %v11015_v40 }
 0x451   :  { %10571 = vmatprep.subr.bf16.mxu0 %v11016_v51 }
 0x454   :  { %10572 = vmatpush3.bf16.msra.mxu0 %v11016_v51 }
 0x457   :  { %10574 = vmatmul.mubr.bf16.vlgmr.msra.gmra.mxu0 %v11018_v44 }
 0x458   :  { %10577 = vmatprep.mubr.bf16.mxu0 %v11019_v13 }
 0x45f   :  { %10578 = vmatmul.mubr.bf16.gmra.mxu0 %v11020_v47 }
 0x460   :  { %10581 = vmatprep.mubr.bf16.mxu0 %v11021_v48 }
 0x467   :  { %10582 = vmatmul.mubr.bf16.gmra.mxu0 %v11022_v45 }
 0x468   :  { %10585 = vmatprep.mubr.bf16.mxu0 %v11023_v26 }
 0x46f   :  { %10586 = vmatmul.mubr.bf16.gmra.mxu0 %v11024_v21 }
 0x470   :  { %10589 = vmatprep.mubr.bf16.mxu0 %v11025_v59 }
 0x477   :  { %10590 = vmatmul.mubr.bf16.gmra.mxu0 %v11026_v32 }
 0x478   :  { %10593 = vmatprep.mubr.bf16.mxu0 %v11027_v57 }
 0x47f   :  { %10594 = vmatmul.mubr.bf16.gmra.mxu0 %v11028_v16 }
 0x480   :  { %10597 = vmatprep.mubr.bf16.mxu0 %v11029_v24 }
 0x487   :  { %10598 = vmatmul.mubr.bf16.gmra.mxu0 %v11030_v5 }
 0x488   :  { %10601 = vmatprep.mubr.bf16.mxu0 %v11031_v37 }
 0x48f   :  { %10602 = vmatmul.mubr.bf16.gmra.mxu0 %v11032_v25 }
 0x4f3   :  { %v12383_v56 = vpop.f32.mrf.mxu0 }
 0x4f4   :  { %13797 = vst [vmem:[#allocation12_spill] sm:$0xff] %v12383_v56 }
 0x4f5   :  { %v10541_v29 = vpop.f32.mrf.mxu0 }
 0x4f7   :  { %v12385_v58 = vpop.f32.mrf.mxu0 }
 0x4f8   :  { %13798 = vst [vmem:[#allocation13_spill] sm:$0xff] %v12385_v58 }
 0x4f9   :  { %v10551_v10 = vpop.f32.mrf.mxu0 }
 0x517   :  { %v12387_v35 = vpop.f32.mrf.mxu0 }
 0x519   :  { %v12389_v18 = vpop.f32.mrf.mxu0 }
 0x51b   :  { %v12391_v50 = vpop.f32.mrf.mxu0 }
 0x51d   :  { %v12393_v15 = vpop.f32.mrf.mxu0 }
 0x51e   :  { %v4176_v9 = vadd.f32 %v12393_v15, %v12389_v18 }
 0x51f   :  { %v12397_v22 = vpop.f32.mrf.mxu0 }
 0x520   :  { %v4177_v4 = vadd.f32 %v12387_v35, %v4176_v9 }
 0x521   :  { %v12400_v3 = vpop.f32.mrf.mxu0 }
 0x522   :  { %v4178_v28 = vadd.f32 %v12391_v50, %v4177_v4 }
 0x523   :  { %v12403_v41 = vpop.f32.mrf.mxu0 }
 0x524   :  { %v4179_v61 = vadd.f32 %v4178_v28, %v12400_v3 }
 0x525   :  { %v12406_v8 = vpop.f32.mrf.mxu0 }
 0x526   :  { %v4180_v62 = vadd.f32 %v4179_v61, %v12406_v8 }
 0x527   :  { %v12409_v14 = vpop.f32.mrf.mxu0 }
 0x528   :  { %v4181_v0 = vadd.f32 %v12397_v22, %v4180_v62 }
 0x529   :  { %v12412_v7 = vpop.f32.mrf.mxu0 }
 0x52a   :  { %v4182_v30 = vadd.f32 %v12403_v41, %v4181_v0 }
 0x52b   :  { %v12415_v23 = vpop.f32.mrf.mxu0 }
 0x52c   :  { %v4183_v34 = vadd.f32 %v4182_v30, %v12412_v7 }
 0x52d   :  { %v12418_v53 = vpop.f32.mrf.mxu0 }
 0x52e   :  { %v4184_v19 = vadd.f32 %v4183_v34, %v12418_v53 }
 0x52f   :  { %v12421_v20 = vpop.f32.mrf.mxu0 }
 0x530   :  { %v4185_v60 = vadd.f32 %v12409_v14, %v4184_v19 }
 0x531   :  { %v12424_v17 = vpop.f32.mrf.mxu0 }
 0x532   :  { %v4186_v54 = vadd.f32 %v12415_v23, %v4185_v60 }
 0x533   :  { %v12427_v39 = vpop.f32.mrf.mxu0 }
 0x534   :  { %v4187_v27 = vadd.f32 %v4186_v54, %v12424_v17 }
 0x535   :  { %v12430_v33 = vpop.f32.mrf.mxu0 }
 0x536   :  { %v4188_v1 = vadd.f32 %v4187_v27, %v12430_v33 }
 0x537   :  { %v12433_v6 = vpop.f32.mrf.mxu0 }
 0x538   :  { %v4189_v63 = vadd.f32 %v12421_v20, %v4188_v1 }
 0x539   :  { %v12436_v43 = vpop.f32.mrf.mxu0 }
 0x53a   :  { %v4190_v12 = vadd.f32 %v12427_v39, %v4189_v63 }
 0x53b   :  { %v12439_v55 = vpop.f32.mrf.mxu0 }
 0x53c   :  { %v4191_v36 = vadd.f32 %v4190_v12, %v12436_v43 }
 0x53d   :  { %v12442_v31 = vpop.f32.mrf.mxu0 }
 0x53e   :  { %v4192_v49 = vadd.f32 %v4191_v36, %v12442_v31 }
 0x53f   :  { %v12445_v42 = vpop.f32.mrf.mxu0 }
 0x540   :  { %v4193_v11 = vadd.f32 %v12433_v6, %v4192_v49 }
 0x541   :  { %v12448_v38 = vpop.f32.mrf.mxu0 }
 0x542   :  { %v4194_v40 = vadd.f32 %v12439_v55, %v4193_v11 }
 0x543   :  { %v12451_v51 = vpop.f32.mrf.mxu0 }
 0x544   :  { %v4195_v44 = vadd.f32 %v4194_v40, %v12448_v38 }
 0x545   :  { %v12454_v13 = vpop.f32.mrf.mxu0 }
 0x546   :  { %v4196_v47 = vadd.f32 %v4195_v44, %v12454_v13 }
 0x547   :  { %v12457_v48 = vpop.f32.mrf.mxu0 }
 0x548   :  { %v4197_v45 = vadd.f32 %v12445_v42, %v4196_v47 }
 0x549   :  { %v12460_v26 = vpop.f32.mrf.mxu0 }
 0x54a   :  { %v4198_v21 = vadd.f32 %v12451_v51, %v4197_v45 }
 0x54b   :  { %v12463_v59 = vpop.f32.mrf.mxu0 }
 0x54c   :  { %v4199_v32 = vadd.f32 %v4198_v21, %v12460_v26 }
 0x54d   :  { %v12466_v57 = vpop.f32.mrf.mxu0 }
 0x54e   :  { %v4200_v16 = vadd.f32 %v4199_v32, %v12466_v57 }
 0x54f   :  { %v12469_v24 = vpop.f32.mrf.mxu0 }
 0x550   :  { %v4201_v5 = vadd.f32 %v12457_v48, %v4200_v16 }
 0x551   :  { %v12472_v37 = vpop.f32.mrf.mxu0 }
 0x552   :  { %v4202_v25 = vadd.f32 %v12463_v59, %v4201_v5 }
 0x553   :  { %v12475_v29 = vpop.f32.mrf.mxu0 }
 0x554   :  { %v4203_v10 = vadd.f32 %v4202_v25, %v12472_v37 }
 0x555   :  { %v12478_v9 = vpop.f32.mrf.mxu0 }
 0x556   :  { %v4204_v4 = vadd.f32 %v4203_v10, %v12478_v9 }
 0x558   :  { %v4205_v28 = vadd.f32 %v12469_v24, %v4204_v4 }
 0x55a   :  { %v4206_v61 = vadd.f32 %v12475_v29, %v4205_v28 }
 0x55c   :  { %v4207_v62 = vrot.slane %v4206_v61, 4 }
 0x55e   :  { %v4208_v0 = vadd.f32 %v4207_v62, %v4206_v61 }
 0x560   :  { %v4209_v30 = vrot.slane %v4208_v0, 2 }
 0x562   :  { %v4210_v34 = vadd.f32 %v4209_v30, %v4208_v0 }
 0x564   :  { %v4211_v19 = vrot.slane %v4210_v34, 1 }
 0x566   :  { %v4212_v60 = vadd.f32 %v4211_v19, %v4210_v34 }
 0x568   :  { %v12483_v54 = vmul.f32 0.00390625, %v4212_v60 }
 0x56a   :  { %v4214_v27 = vsub.f32 %v12389_v18, %v12483_v54  ;;  %v4215_v1 = vsub.f32 %v12393_v15, %v12483_v54  ;;  %v4216_v63 = vsub.f32 %v12387_v35, %v12483_v54  ;;  %v4217_v49 = vsub.f32 %v12391_v50, %v12483_v54 }
 0x56b   :  { %v4218_v11 = vsub.f32 %v12400_v3, %v12483_v54  ;;  %v4219_v47 = vsub.f32 %v12406_v8, %v12483_v54  ;;  %v4220_v32 = vsub.f32 %v12397_v22, %v12483_v54  ;;  %v4221_v25 = vsub.f32 %v12403_v41, %v12483_v54 }
 0x56c   :  { %v4246_v12 = vmul.f32 %v4214_v27, %v4214_v27  ;;  %v4247_v36 = vmul.f32 %v4215_v1, %v4215_v1  ;;  %v4248_v40 = vmul.f32 %v4216_v63, %v4216_v63  ;;  %v4249_v45 = vmul.f32 %v4217_v49, %v4217_v49 }
 0x56d   :  { %v4250_v16 = vmul.f32 %v4218_v11, %v4218_v11  ;;  %v4251_v10 = vmul.f32 %v4219_v47, %v4219_v47  ;;  %v4222_v28 = vsub.f32 %v12412_v7, %v12483_v54  ;;  %v4252_v61 = vmul.f32 %v4220_v32, %v4220_v32 }
 0x56e   :  { %v4278_v44 = vadd.f32 %v4247_v36, %v4246_v12  ;;  %v4223_v0 = vsub.f32 %v12418_v53, %v12483_v54  ;;  %v4253_v30 = vmul.f32 %v4221_v25, %v4221_v25  ;;  %v4224_v19 = vsub.f32 %v12409_v14, %v12483_v54 }
 0x56f   :  { %v4254_v60 = vmul.f32 %v4222_v28, %v4222_v28  ;;  %v4225_v1 = vsub.f32 %v12415_v23, %v12483_v54  ;;  %v4226_v36 = vsub.f32 %v12424_v17, %v12483_v54 }
 0x570   :  { %v4279_v21 = vadd.f32 %v4278_v44, %v4248_v40  ;;  %v4255_v63 = vmul.f32 %v4223_v0, %v4223_v0  ;;  %v4256_v49 = vmul.f32 %v4224_v19, %v4224_v19  ;;  %v4227_v40 = vsub.f32 %v12430_v33, %v12483_v54  ;;  %v11034_v0 = vld [vmem:[%s13738_s4 + $0x30] sm:$0xff]  }
 0x571   :  { %v4257_v44 = vmul.f32 %v4225_v1, %v4225_v1 }
 0x572   :  { %v4280_v5 = vadd.f32 %v4279_v21, %v4249_v45  ;;  %v4228_v45 = vsub.f32 %v12421_v20, %v12483_v54  ;;  %v4258_v21 = vmul.f32 %v4226_v36, %v4226_v36  ;;  %v4233_v36 = vsub.f32 %v12439_v55, %v12483_v54 }
 0x574   :  { %v4281_v4 = vadd.f32 %v4280_v5, %v4250_v16  ;;  %v4229_v16 = vsub.f32 %v12427_v39, %v12483_v54  ;;  %v4259_v5 = vmul.f32 %v4227_v40, %v4227_v40 }
 0x576   :  { %v4282_v62 = vadd.f32 %v4281_v4, %v4251_v10  ;;  %v4230_v10 = vsub.f32 %v12436_v43, %v12483_v54  ;;  %v4260_v4 = vmul.f32 %v4228_v45, %v4228_v45 }
 0x578   :  { %v4283_v34 = vadd.f32 %v4282_v62, %v4252_v61  ;;  %v12519_v61 = vpop.f32.mrf.mxu1  ;;  %v11033_v62 = vld [vmem:[%s13738_s4 + $0x38] sm:$0xff]   ;;  %v4262_v1 = vmul.f32 %v4230_v10, %v4230_v10 }
 0x579   :  { %13799 = vst [vmem:[#allocation14_spill] sm:$0xff] %v12519_v61  ;;  %10685 = vmatprep.subr.bf16.mxu0 %v11033_v62 }
 0x57a   :  { %v4284_v27 = vadd.f32 %v4283_v34, %v4253_v30  ;;  %v4231_v30 = vsub.f32 %v12442_v31, %v12483_v54  ;;  %v4261_v34 = vmul.f32 %v4229_v16, %v4229_v16  ;;  %10686 = vmatpush3.bf16.msra.mxu0 %v11033_v62 }
 0x57b   :  { %10687 = vmatprep.subr.bf16.mxu0 %v11034_v0 }
 0x57c   :  { %v4285_v12 = vadd.f32 %v4284_v27, %v4254_v60  ;;  %v10546_v60 = vpop.f32.mrf.mxu1  ;;  %v4232_v27 = vsub.f32 %v12433_v6, %v12483_v54 }
 0x57e   :  { %v4286_v11 = vadd.f32 %v4285_v12, %v4255_v63  ;;  %v12531_v12 = vpop.f32.mrf.mxu1  ;;  %10688 = vmatpush3.bf16.msra.mxu0 %v11034_v0 }
 0x57f   :  { %13800 = vst [vmem:[#allocation15_spill] sm:$0xff] %v12531_v12 }
 0x580   :  { %v4287_v47 = vadd.f32 %v4286_v11, %v4256_v49  ;;  %v4263_v49 = vmul.f32 %v4231_v30, %v4231_v30  ;;  %v10556_v40 = vpop.f32.mrf.mxu1  ;;  %v4238_v30 = vsub.f32 %v12460_v26, %v12483_v54 }
 0x582   :  { %v4288_v32 = vadd.f32 %v4287_v47, %v4257_v44  ;;  %v4234_v44 = vsub.f32 %v12448_v38, %v12483_v54  ;;  %v4264_v47 = vmul.f32 %v4232_v27, %v4232_v27 }
 0x584   :  { %v4289_v25 = vadd.f32 %v4288_v32, %v4258_v21  ;;  %v4235_v21 = vsub.f32 %v12454_v13, %v12483_v54  ;;  %v4265_v32 = vmul.f32 %v4233_v36, %v4233_v36 }
 0x586   :  { %v4290_v28 = vadd.f32 %v4289_v25, %v4259_v5  ;;  %v4236_v5 = vsub.f32 %v12445_v42, %v12483_v54  ;;  %v4266_v25 = vmul.f32 %v4234_v44, %v4234_v44  ;;  %v4242_v44 = vsub.f32 %v12472_v37, %v12483_v54 }
 0x588   :  { %v4291_v19 = vadd.f32 %v4290_v28, %v4260_v4  ;;  %v4237_v4 = vsub.f32 %v12451_v51, %v12483_v54  ;;  %v4267_v28 = vmul.f32 %v4235_v21, %v4235_v21  ;;  %v4243_v21 = vsub.f32 %v12478_v9, %v12483_v54 }
 0x58a   :  { %v4292_v63 = vadd.f32 %v4291_v19, %v4261_v34  ;;  %v4268_v34 = vmul.f32 %v4236_v5, %v4236_v5  ;;  %v4239_v19 = vsub.f32 %v12466_v57, %v12483_v54  ;;  %v4269_v60 = vmul.f32 %v4237_v4, %v4237_v4 }
 0x58b   :  { %v4244_v5 = vsub.f32 %v12469_v24, %v12483_v54  ;;  %v4245_v4 = vsub.f32 %v12475_v29, %v12483_v54 }
 0x58c   :  { %v4293_v11 = vadd.f32 %v4292_v63, %v4262_v1  ;;  %v4240_v1 = vsub.f32 %v12457_v48, %v12483_v54  ;;  %v4270_v63 = vmul.f32 %v4238_v30, %v4238_v30 }
 0x58d   :  { %v4276_v30 = vmul.f32 %v4244_v5, %v4244_v5 }
 0x58e   :  { %v4294_v45 = vadd.f32 %v4293_v11, %v4263_v49  ;;  %v4241_v49 = vsub.f32 %v12463_v59, %v12483_v54  ;;  %v4271_v11 = vmul.f32 %v4239_v19, %v4239_v19 }
 0x590   :  { %v4295_v16 = vadd.f32 %v4294_v45, %v4264_v47  ;;  %v4272_v47 = vmul.f32 %v4240_v1, %v4240_v1 }
 0x592   :  { %v4296_v10 = vadd.f32 %v4295_v16, %v4265_v32  ;;  %v4273_v32 = vmul.f32 %v4241_v49, %v4241_v49 }
 0x594   :  { %v4297_v62 = vadd.f32 %v4296_v10, %v4266_v25  ;;  %v4274_v25 = vmul.f32 %v4242_v44, %v4242_v44 }
 0x596   :  { %v4298_v0 = vadd.f32 %v4297_v62, %v4267_v28  ;;  %v4275_v28 = vmul.f32 %v4243_v21, %v4243_v21 }
 0x598   :  { %v4299_v27 = vadd.f32 %v4298_v0, %v4268_v34  ;;  %v4277_v0 = vmul.f32 %v4245_v4, %v4245_v4 }
 0x59a   :  { %v4300_v36 = vadd.f32 %v4299_v27, %v4269_v60 }
 0x59c   :  { %v4301_v40 = vadd.f32 %v4300_v36, %v4270_v63 }
 0x59e   :  { %v4302_v45 = vadd.f32 %v4301_v40, %v4271_v11 }
 0x5a0   :  { %v4303_v16 = vadd.f32 %v4302_v45, %v4272_v47  ;;  %v11253_v45 = vld [vmem:[%s13736_s2] sm:$0x1] }
 0x5a2   :  { %v4304_v10 = vadd.f32 %v4303_v16, %v4273_v32  ;;  %v11254_v16 = vld [vmem:[%s13737_s3] sm:$0x1] }
 0x5a4   :  { %v4305_v62 = vadd.f32 %v4304_v10, %v4274_v25 }
 0x5a6   :  { %v4306_v34 = vadd.f32 %v4305_v62, %v4275_v28 }
 0x5a8   :  { %v4307_v19 = vadd.f32 %v4306_v34, %v4276_v30 }
 0x5aa   :  { %v4308_v60 = vadd.f32 %v4307_v19, %v4277_v0 }
 0x5ac   :  { %v4309_v27 = vrot.slane %v4308_v60, 4 }
 0x5ae   :  { %v4310_v1 = vadd.f32 %v4309_v27, %v4308_v60 }
 0x5b0   :  { %v4311_v63 = vrot.slane %v4310_v1, 2 }
 0x5b2   :  { %v4312_v36 = vadd.f32 %v4311_v63, %v4310_v1 }
 0x5b4   :  { %v4313_v49 = vrot.slane %v4312_v36, 1 }
 0x5b6   :  { %v4314_v11 = vadd.f32 %v4313_v49, %v4312_v36 }
 0x5b8   :  { %v4315_v40 = vmul.f32 0.00390625, %v4314_v11 }
 0x5ba   :  { %v4316_v47 = vadd.f32 1e-05, %v4315_v40 }
 0x5bc   :  { %11249 = vrsqrt.f32 %v4316_v47 }
 0x5c9   :  { %v11250_v44 = vpop.eup %11249 }
 0x5ca   :  { %v4318_v21 = vmul.f32 %v11253_v45, %v11250_v44 }
 0x5cc   :  { %v4319_v32 = vmul.f32 %v4318_v21, %v12483_v54  ;;  %v12567_v25 = vrot.slane %v4318_v21, %v13794_v2 }
 0x5ce   :  { %v4320_v5 = vsub.f32 %v11254_v16, %v4319_v32  ;;  %v4328_v4 = vmul.f32 %v12567_v25, %v12393_v15  ;;  %v4330_v28 = vmul.f32 %v12391_v50, %v12567_v25  ;;  %v4327_v54 = vmul.f32 %v12567_v25, %v12389_v18 }
 0x5cf   :  { %v4329_v62 = vmul.f32 %v12387_v35, %v12567_v25  ;;  %v4332_v0 = vmul.f32 %v12567_v25, %v12406_v8  ;;  %v4334_v19 = vmul.f32 %v12403_v41, %v12567_v25  ;;  %v4331_v18 = vmul.f32 %v12567_v25, %v12400_v3 }
 0x5d0   :  { %v12570_v10 = vrot.slane %v4320_v5, %v13794_v2  ;;  %v4333_v35 = vmul.f32 %v12397_v22, %v12567_v25  ;;  %v4336_v8 = vmul.f32 %v12567_v25, %v12418_v53  ;;  %v4338_v41 = vmul.f32 %v12415_v23, %v12567_v25 }
 0x5d1   :  { %v4335_v22 = vmul.f32 %v12567_v25, %v12412_v7  ;;  %v4337_v40 = vmul.f32 %v12409_v14, %v12567_v25  ;;  %v4340_v23 = vmul.f32 %v12567_v25, %v12430_v33  ;;  %v4342_v32 = vmul.f32 %v12427_v39, %v12567_v25 }
 0x5d2   :  { %v4366_v30 = vadd.f32 %v12570_v10, %v4328_v4  ;;  %v4368_v34 = vadd.f32 %v12570_v10, %v4330_v28  ;;  %v4365_v15 = vadd.f32 %v12570_v10, %v4327_v54  ;;  %v4367_v50 = vadd.f32 %v12570_v10, %v4329_v62 }
 0x5d3   :  { %v4370_v60 = vadd.f32 %v12570_v10, %v4332_v0  ;;  %v4372_v27 = vadd.f32 %v12570_v10, %v4334_v19  ;;  %v4369_v36 = vadd.f32 %v12570_v10, %v4331_v18  ;;  %v4371_v49 = vadd.f32 %v12570_v10, %v4333_v35 }
 0x5d4   :  { %v4398_v1 = vmax.f32 %v4366_v30, 0.0  ;;  %v4400_v63 = vmax.f32 %v4368_v34, 0.0  ;;  %v4397_v3 = vmax.f32 %v4365_v15, 0.0  ;;  %v4399_v11 = vmax.f32 %v4367_v50, 0.0 }
 0x5d5   :  { %v4374_v47 = vadd.f32 %v12570_v10, %v4336_v8  ;;  %v4376_v44 = vadd.f32 %v12570_v10, %v4338_v41  ;;  %v4402_v53 = vmax.f32 %v4370_v60, 0.0  ;;  %v4404_v45 = vmax.f32 %v4372_v27, 0.0 }
 0x5d6   :  { %v4430_v21 = vadd.f32 %v4400_v63, %v4398_v1  ;;  %v4373_v16 = vadd.f32 %v12570_v10, %v4335_v22  ;;  %v4375_v7 = vadd.f32 %v12570_v10, %v4337_v40  ;;  %v4401_v5 = vmax.f32 %v4369_v36, 0.0 }
 0x5d7   :  { %v4403_v4 = vmax.f32 %v4371_v49, 0.0  ;;  %v4429_v14 = vadd.f32 %v4399_v11, %v4397_v3  ;;  %v4339_v28 = vmul.f32 %v12567_v25, %v12424_v17  ;;  %v4341_v54 = vmul.f32 %v12421_v20, %v12567_v25 }
 0x5d8   :  { %10606 = vmatpush3.msra.mxu1 %v4430_v21  ;;  %v4378_v62 = vadd.f32 %v12570_v10, %v4340_v23  ;;  %v4380_v39 = vadd.f32 %v12570_v10, %v4342_v32  ;;  %v4406_v33 = vmax.f32 %v4374_v47, 0.0  ;;  %v4408_v30 = vmax.f32 %v4376_v44, 0.0 }
 0x5d9   :  { %10607 = vmatprep.subr.mxu1 %v13796_v46  ;;  %v4432_v34 = vadd.f32 %v4404_v45, %v4402_v53  ;;  %v4344_v0 = vmul.f32 %v12567_v25, %v12442_v31  ;;  %v4346_v19 = vmul.f32 %v12439_v55, %v12567_v25  ;;  %v4377_v17 = vadd.f32 %v12570_v10, %v4339_v28 }
 0x5da   :  { %10608 = vmatpush3.msra.mxu1 %v4429_v14  ;;  %v4379_v20 = vadd.f32 %v12570_v10, %v4341_v54  ;;  %v4405_v15 = vmax.f32 %v4373_v16, 0.0  ;;  %v4407_v50 = vmax.f32 %v4375_v7, 0.0  ;;  %v4431_v18 = vadd.f32 %v4403_v4, %v4401_v5 }
 0x5db   :  { %10610 = vmatmul.mubr.msk.f32.vlgmr.msra.gmra.mxu1 %vm711_vm4, %v13795_v52  ;;  %10612 = vmatprep.subr.mxu1 %v13796_v46  ;;  %v4343_v31 = vmul.f32 %v12567_v25, %v12436_v43  ;;  %v4345_v55 = vmul.f32 %v12433_v6, %v12567_v25  ;;  %v4382_v35 = vadd.f32 %v12570_v10, %v4344_v0  ;;  %v4410_v27 = vmax.f32 %v4378_v62, 0.0 }
 0x5dc   :  { %10613 = vmatpush3.msra.mxu1 %v4432_v34  ;;  %10616 = vmatprep.mubr.msk.f32.mxu1 %vm11280_vm0, %v13796_v46  ;;  %v4384_v60 = vadd.f32 %v12570_v10, %v4346_v19  ;;  %v4412_v1 = vmax.f32 %v4380_v39, 0.0  ;;  %v4434_v63 = vadd.f32 %v4408_v30, %v4406_v33  ;;  %v4348_v8 = vmul.f32 %v12567_v25, %v12454_v13 }
 0x5dd   :  { %10614 = vmatprep.subr.mxu1 %v13796_v46  ;;  %v4350_v41 = vmul.f32 %v12451_v51, %v12567_v25  ;;  %v4381_v43 = vadd.f32 %v12570_v10, %v4343_v31  ;;  %v4383_v6 = vadd.f32 %v12570_v10, %v4345_v55  ;;  %v4409_v36 = vmax.f32 %v4377_v17, 0.0 }
 0x5de   :  { %10615 = vmatpush3.msra.mxu1 %v4431_v18  ;;  %v4411_v49 = vmax.f32 %v4379_v20, 0.0  ;;  %v4433_v3 = vadd.f32 %v4407_v50, %v4405_v15  ;;  %v4347_v13 = vmul.f32 %v12567_v25, %v12448_v38  ;;  %v4349_v51 = vmul.f32 %v12445_v42, %v12567_v25 }
 0x5df   :  { %10617 = vmatmul.mubr.msk.f32.vlgmr.msra.gmra.mxu1 %vm711_vm4, %v13795_v52  ;;  %10619 = vmatprep.subr.mxu1 %v13796_v46  ;;  %v4386_v11 = vadd.f32 %v12570_v10, %v4348_v8  ;;  %v4388_v22 = vadd.f32 %v12570_v10, %v4350_v41  ;;  %v4414_v40 = vmax.f32 %v4382_v35, 0.0  ;;  %v4416_v47 = vmax.f32 %v4384_v60, 0.0  ;;  %v11037_v8 = vld [vmem:[%s13738_s4 + $0x20] sm:$0xff]   ;;  %v11038_v41 = vld [vmem:[%s13738_s4 + $0x70] sm:$0xff]  }
 0x5e0   :  { %10620 = vmatpush3.msra.mxu1 %v4434_v63  ;;  %10623 = vmatprep.mubr.msk.f32.mxu1 %vm11280_vm0, %v13796_v46  ;;  %v4436_v44 = vadd.f32 %v4412_v1, %v4410_v27  ;;  %v4352_v53 = vmul.f32 %v12567_v25, %v12466_v57  ;;  %v4354_v45 = vmul.f32 %v12463_v59, %v12567_v25  ;;  %v4413_v21 = vmax.f32 %v4381_v43, 0.0  ;;  %v11035_v1 = vld [vmem:[%s13738_s4 + $0x28] sm:$0xff]   ;;  %v11036_v63 = vld [vmem:[%s13738_s4 + $0x78] sm:$0xff]  }
 0x5e1   :  { %10621 = vmatprep.subr.mxu1 %v13796_v46  ;;  %v4385_v38 = vadd.f32 %v12570_v10, %v4347_v13  ;;  %v4387_v42 = vadd.f32 %v12570_v10, %v4349_v51  ;;  %v4415_v23 = vmax.f32 %v4383_v6, 0.0  ;;  %v4435_v32 = vadd.f32 %v4411_v49, %v4409_v36  ;;  %10689 = vmatprep.subr.bf16.mxu0 %v11035_v1  ;;  %v11039_v43 = vld [vmem:[%s13738_s4 + $0x18] sm:$0xff]   ;;  %v11040_v6 = vld [vmem:[%s13738_s4 + $0x68] sm:$0xff]   ;;  %v11041_v36 = vld [vmem:[%s13738_s4 + $0x10] sm:$0xff]  }
 0x5e2   :  { %10622 = vmatpush3.msra.mxu1 %v4433_v3  ;;  %v4351_v57 = vmul.f32 %v12567_v25, %v12460_v26  ;;  %v4353_v59 = vmul.f32 %v12457_v48, %v12567_v25  ;;  %v4390_v16 = vadd.f32 %v12570_v10, %v4352_v53  ;;  %v4392_v7 = vadd.f32 %v12570_v10, %v4354_v45  ;;  %v11042_v49 = vld [vmem:[%s13738_s4 + $0x60] sm:$0xff]   ;;  %v11043_v3 = vld [vmem:[%s13738_s4 + $0x8] sm:$0xff]   ;;  %v11044_v13 = vld [vmem:[%s13738_s4 + $0x58] sm:$0xff]  }
 0x5e3   :  { %10624 = vmatmul.mubr.msk.f32.vlgmr.msra.gmra.mxu1 %vm711_vm4, %v13795_v52  ;;  %10626 = vmatprep.subr.mxu1 %v13796_v46  ;;  %v4418_v5 = vmax.f32 %v4386_v11, 0.0  ;;  %v4420_v4 = vmax.f32 %v4388_v22, 0.0  ;;  %v4438_v14 = vadd.f32 %v4416_v47, %v4414_v40  ;;  %v4356_v28 = vmul.f32 %v12567_v25, %v12478_v9  ;;  %v11046_v51 = vld [vmem:[%s13738_s4] sm:$0xff]   ;;  %v11047_v11 = vld [vmem:[%s13738_s4 + $0x50] sm:$0xff]   ;;  %v12752_v22 = vld [vmem:[%s13738_s4 + $0xf8] sm:$0xff]  }
 0x5e4   :  { %10627 = vmatpush3.msra.mxu1 %v4436_v44  ;;  %10630 = vmatprep.mubr.msk.f32.mxu1 %vm11280_vm0, %v13796_v46  ;;  %v4358_v54 = vmul.f32 %v12475_v29, %v12567_v25  ;;  %v4389_v26 = vadd.f32 %v12570_v10, %v4351_v57  ;;  %v4391_v48 = vadd.f32 %v12570_v10, %v4353_v59  ;;  %v4417_v62 = vmax.f32 %v4385_v38, 0.0  ;;  %v11049_v40 = vld [vmem:[%s13738_s4 + $0x48] sm:$0xff]   ;;  %v11052_v47 = vld [vmem:[%s13738_s4 + $0x40] sm:$0xff]   ;;  %v12764_v44 = vld [vmem:[%s13738_s4 + $0xb8] sm:$0xff]  }
 0x5e5   :  { %10628 = vmatprep.subr.mxu1 %v13796_v46  ;;  %v4419_v39 = vmax.f32 %v4387_v42, 0.0  ;;  %v4437_v33 = vadd.f32 %v4415_v23, %v4413_v21  ;;  %v4394_v9 = vadd.f32 %v12570_v10, %v4356_v28  ;;  %v4355_v29 = vmul.f32 %v12567_v25, %v12472_v37  ;;  %10690 = vmatpush3.bf16.msra.mxu0 %v11035_v1  ;;  %v12767_v38 = vld [vmem:[#allocation2 + $0x50] sm:$0xf] }
 0x5e6   :  { %10629 = vmatpush3.msra.mxu1 %v4435_v32  ;;  %v4357_v30 = vmul.f32 %v12469_v24, %v12567_v25  ;;  %v4396_v34 = vadd.f32 %v12570_v10, %v4358_v54  ;;  %v4422_v0 = vmax.f32 %v4390_v16, 0.0  ;;  %v4424_v19 = vmax.f32 %v4392_v7, 0.0  ;;  %10691 = vmatprep.subr.bf16.mxu0 %v11037_v8 }
 0x5e7   :  { %10631 = vmatmul.mubr.msk.f32.vlgmr.msra.gmra.mxu1 %vm711_vm4, %v13795_v52  ;;  %10633 = vmatprep.subr.mxu1 %v13796_v46  ;;  %v4440_v17 = vadd.f32 %v4420_v4, %v4418_v5  ;;  %v4393_v20 = vadd.f32 %v12570_v10, %v4355_v29  ;;  %v4421_v15 = vmax.f32 %v4389_v26, 0.0  ;;  %v4423_v50 = vmax.f32 %v4391_v48, 0.0  ;;  %v5118_v5 = vld [vmem:[#allocation2 + $0x58] sm:$0xf]  ;;  %v5121_v4 = vld [vmem:[#allocation2 + $0x5c] sm:$0x1] }
 0x5e8   :  { %10634 = vmatpush3.msra.mxu1 %v4438_v14  ;;  %10637 = vmatprep.mubr.msk.f32.mxu1 %vm11280_vm0, %v13796_v46  ;;  %v4395_v37 = vadd.f32 %v12570_v10, %v4357_v30  ;;  %v4439_v24 = vadd.f32 %v4419_v39, %v4417_v62  ;;  %v4426_v25 = vmax.f32 %v4394_v9, 0.0  ;;  %v4428_v18 = vmax.f32 %v4396_v34, 0.0  ;;  %v11058_v9 = vld [vmem:[%s13738_s4 + $0xd8] sm:$0xff]  }
 0x5e9   :  { %10635 = vmatprep.subr.mxu1 %v13796_v46  ;;  %v4442_v31 = vadd.f32 %v4424_v19, %v4422_v0  ;;  %v4425_v55 = vmax.f32 %v4393_v20, 0.0  ;;  %v4441_v35 = vadd.f32 %v4423_v50, %v4421_v15  ;;  %10692 = vmatpush3.bf16.msra.mxu0 %v11037_v8  ;;  %v5200_v32 = vshrl.u32 %v12767_v38, 16  ;;  %v5127_v20 = vld [vmem:[#allocation2 + $0x64] sm:$0x1]  ;;  %v5133_v8 = vld [vmem:[#allocation2 + $0x6c] sm:$0x1] }
 0x5ea   :  { %10636 = vmatpush3.msra.mxu1 %v4437_v33  ;;  %v4427_v10 = vmax.f32 %v4395_v37, 0.0  ;;  %v4444_v60 = vadd.f32 %v4428_v18, %v4426_v25  ;;  %10693 = vmatprep.subr.bf16.mxu0 %v11039_v43  ;;  %v5203_v57 = vshll.u32 %v12767_v38, 16  ;;  %v12775_v25 = vld [vmem:[#allocation2 + $0x54] sm:$0x1] }
 0x5eb   :  { %10638 = vmatmul.mubr.msk.f32.vlgmr.msra.gmra.mxu1 %vm711_vm4, %v13795_v52  ;;  %10640 = vmatprep.subr.mxu1 %v13796_v46  ;;  %v5202_v39 = vrot.slane %v5200_v32, 4 }
 0x5ec   :  { %10641 = vmatpush3.msra.mxu1 %v4440_v17  ;;  %10644 = vmatprep.mubr.msk.f32.mxu1 %vm11280_vm0, %v13796_v46  ;;  %v4443_v27 = vadd.f32 %v4427_v10, %v4425_v55  ;;  %v5205_v33 = vrot.slane %v5203_v57, 5  ;;  %v5124_v17 = vld [vmem:[#allocation2 + $0x60] sm:$0xf]  ;;  %v5209_v10 = vshll.u32 %v12775_v25, 16 }
 0x5ed   :  { %10642 = vmatprep.subr.mxu1 %v13796_v46  ;;  %10694 = vmatpush3.bf16.msra.mxu0 %v11039_v43 }
 0x5ee   :  { %10643 = vmatpush3.msra.mxu1 %v4439_v24  ;;  %10695 = vmatprep.subr.bf16.mxu0 %v11041_v36  ;;  %v5206_v55 = vor.u32 %v5205_v33, %v5202_v39 }
 0x5ef   :  { %10645 = vmatmul.mubr.msk.f32.vlgmr.msra.gmra.mxu1 %vm711_vm4, %v13795_v52  ;;  %10647 = vmatprep.subr.mxu1 %v13796_v46 }
 0x5f0   :  { %10648 = vmatpush3.msra.mxu1 %v4442_v31  ;;  %10651 = vmatprep.mubr.msk.f32.mxu1 %vm11280_vm0, %v13796_v46 }
 0x5f1   :  { %10649 = vmatprep.subr.mxu1 %v13796_v46  ;;  %10696 = vmatpush3.bf16.msra.mxu0 %v11041_v36 }
 0x5f2   :  { %10650 = vmatpush3.msra.mxu1 %v4441_v35  ;;  %10697 = vmatprep.subr.bf16.mxu0 %v11043_v3 }
 0x5f3   :  { %10652 = vmatmul.mubr.msk.f32.vlgmr.msra.gmra.mxu1 %vm711_vm4, %v13795_v52  ;;  %10654 = vmatprep.subr.mxu1 %v13796_v46 }
 0x5f4   :  { %10655 = vmatpush3.msra.mxu1 %v4444_v60  ;;  %10658 = vmatprep.mubr.msk.f32.mxu1 %vm11280_vm0, %v13796_v46 }
 0x5f5   :  { %10656 = vmatprep.subr.mxu1 %v13796_v46  ;;  %10698 = vmatpush3.bf16.msra.mxu0 %v11043_v3  ;;  %v5136_v3 = vld [vmem:[#allocation2 + $0x70] sm:$0xf] }
 0x5f6   :  { %10657 = vmatpush3.msra.mxu1 %v4443_v27  ;;  %10699 = vmatprep.subr.bf16.mxu0 %v11046_v51 }
 0x5f7   :  { %10659 = vmatmul.mubr.msk.f32.vlgmr.msra.gmra.mxu1 %vm711_vm4, %v13795_v52  ;;  %10661 = vmatprep.subr.bf16.mxu1 %v11036_v63 }
 0x5f8   :  { %10662 = vmatpush3.bf16.msra.mxu1 %v11036_v63  ;;  %v5130_v63 = vld [vmem:[#allocation2 + $0x68] sm:$0xf] }
 0x5f9   :  { %10663 = vmatprep.subr.bf16.mxu1 %v11038_v41  ;;  %10700 = vmatpush3.bf16.msra.mxu0 %v11046_v51 }
 0x5fa   :  { %10733 = vmatprep.subr.bf16.mxu0 %v12752_v22 }
 0x5fc   :  { %10664 = vmatpush3.bf16.msra.mxu1 %v11038_v41 }
 0x5fd   :  { %10665 = vmatprep.subr.bf16.mxu1 %v11040_v6 }
 0x600   :  { %10666 = vmatpush3.bf16.msra.mxu1 %v11040_v6 }
 0x601   :  { %10667 = vmatprep.subr.bf16.mxu1 %v11042_v49 }
 0x604   :  { %10668 = vmatpush3.bf16.msra.mxu1 %v11042_v49 }
 0x605   :  { %10669 = vmatprep.subr.bf16.mxu1 %v11044_v13 }
 0x608   :  { %10670 = vmatpush3.bf16.msra.mxu1 %v11044_v13  ;;  %v5139_v13 = vld [vmem:[#allocation2 + $0x74] sm:$0x1] }
 0x609   :  { %10671 = vmatprep.subr.bf16.mxu1 %v11047_v11 }
 0x60c   :  { %10672 = vmatpush3.bf16.msra.mxu1 %v11047_v11  ;;  %v12782_v11 = vrot.slane %v5206_v55, 4 }
 0x60d   :  { %10673 = vmatprep.subr.bf16.mxu1 %v11049_v40 }
 0x610   :  { %10674 = vmatpush3.bf16.msra.mxu1 %v11049_v40  ;;  %v12784_v40 = vrot.slane %v5209_v10, 5 }
 0x611   :  { %10675 = vmatprep.subr.bf16.mxu1 %v11052_v47 }
 0x614   :  { %10676 = vmatpush3.bf16.msra.mxu1 %v11052_v47 }
 0x615   :  { %10709 = vmatprep.subr.bf16.mxu1 %v12764_v44 }
 0x69b   :  { %v4511_v53 = vpop.f32.mrf.mxu1 }
 0x69c   :  { %v9705_v45 = vpack.c.bf16 %v4511_v53, %v4511_v53 }
 0x69d   :  { %v10611_v42 = vpop.f32.mrf.mxu1 }
 0x69e   :  { %v5038_v21 = vshrl.u32 %v9705_v45, 16  ;;  %v5041_v16 = vshll.u32 %v9705_v45, 16 }
 0x69f   :  { %v4581_v23 = vpop.f32.mrf.mxu1 }
 0x6a0   :  { %v5040_v59 = vrot.slane %v5038_v21, 7  ;;  %v9706_v7 = vpack.c.bf16 %v4581_v23, %v4581_v23 }
 0x6a1   :  { %v10618_v14 = vpop.f32.mrf.mxu1 }
 0x6a2   :  { %v5043_v28 = vor.u32 %v5041_v16, %v5040_v59  ;;  %v5044_v54 = vrot.slane %v5040_v59, 4  ;;  %v5046_v26 = vshrl.u32 %v9706_v7, 16  ;;  %v5049_v48 = vshll.u32 %v9706_v7, 16 }
 0x6a3   :  { %v4651_v62 = vpop.f32.mrf.mxu1 }
 0x6a4   :  { %v5119_v29 = vsel %vm11793_vm9, %v5043_v28, %v5118_v5  ;;  %v5122_v34 = vsel %vm11797_vm10, %v5044_v54, %v5121_v4  ;;  %v5048_v0 = vrot.slane %v5046_v26, 7  ;;  %v9707_v19 = vpack.c.bf16 %v4651_v62, %v4651_v62  ;;  %v5142_v54 = vld [vmem:[#allocation2 + $0x78] sm:$0xf]  ;;  %v5145_v26 = vld [vmem:[#allocation2 + $0x7c] sm:$0x1] }
 0x6a5   :  { %5120 = vst [vmem:[#allocation2 + $0x58] sm:$0xf] %v5119_v29  ;;  %5123 = vst [vmem:[#allocation2 + $0x5c] sm:$0x1] %v5122_v34  ;;  %v10625_v37 = vpop.f32.mrf.mxu1  ;;  %v5212_v29 = vsel %vm11824_vm13, %v12782_v11, %v12784_v40 }
 0x6a6   :  { %v5051_v15 = vor.u32 %v5049_v48, %v5048_v0  ;;  %v5052_v50 = vrot.slane %v5048_v0, 4  ;;  %v5054_v24 = vshrl.u32 %v9707_v19, 16  ;;  %v5057_v18 = vshll.u32 %v9707_v19, 16 }
 0x6a7   :  { %v4721_v31 = vpop.f32.mrf.mxu1 }
 0x6a8   :  { %v5125_v35 = vsel %vm11793_vm9, %v5051_v15, %v5124_v17  ;;  %v5128_v60 = vsel %vm11797_vm10, %v5052_v50, %v5127_v20  ;;  %v5056_v27 = vrot.slane %v5054_v24, 7  ;;  %v9708_v1 = vpack.c.bf16 %v4721_v31, %v4721_v31 }
 0x6a9   :  { %5126 = vst [vmem:[#allocation2 + $0x60] sm:$0xf] %v5125_v35  ;;  %5129 = vst [vmem:[#allocation2 + $0x64] sm:$0x1] %v5128_v60  ;;  %v10632_v41 = vpop.f32.mrf.mxu1 }
 0x6aa   :  { %v5059_v43 = vor.u32 %v5057_v18, %v5056_v27  ;;  %v5060_v6 = vrot.slane %v5056_v27, 4  ;;  %v5062_v36 = vshrl.u32 %v9708_v1, 16  ;;  %v5065_v49 = vshll.u32 %v9708_v1, 16 }
 0x6ab   :  { %v4791_v51 = vpop.f32.mrf.mxu1 }
 0x6ac   :  { %v5131_v47 = vsel %vm11793_vm9, %v5059_v43, %v5130_v63  ;;  %v5134_v53 = vsel %vm11797_vm10, %v5060_v6, %v5133_v8  ;;  %v5064_v45 = vrot.slane %v5062_v36, 7  ;;  %v9709_v42 = vpack.c.bf16 %v4791_v51, %v4791_v51  ;;  %v5168_v21 = vld [vmem:[#allocation2 + $0x58] sm:$0xf]  ;;  %v12790_v23 = vld [vmem:[#allocation2 + $0x5c] sm:$0x1] }
 0x6ad   :  { %5132 = vst [vmem:[#allocation2 + $0x68] sm:$0xf] %v5131_v47  ;;  %5135 = vst [vmem:[#allocation2 + $0x6c] sm:$0x1] %v5134_v53  ;;  %v10639_v32 = vpop.f32.mrf.mxu1  ;;  %v5214_v57 = vshrl.u32 %v5168_v21, 16  ;;  %v5217_v59 = vshll.u32 %v5168_v21, 16  ;;  %v9332_v16 = vcombine.low %v12767_v38, %v5168_v21 }
 0x6ae   :  { %v5223_v7 = vshll.u32 %v12790_v23, 16  ;;  %v5067_v5 = vor.u32 %v5065_v49, %v5064_v45  ;;  %v5068_v4 = vrot.slane %v5064_v45, 4  ;;  %v5070_v14 = vshrl.u32 %v9709_v42, 16  ;;  %v5148_v36 = vld [vmem:[#allocation2 + $0x80] sm:$0xf]  ;;  %v11051_v47 = vld [vmem:[%s13738_s4 + $0xf0] sm:$0xff]  }
 0x6af   :  { %v5073_v28 = vshll.u32 %v9709_v42, 16  ;;  %v4861_v48 = vpop.f32.mrf.mxu1  ;;  %v5216_v62 = vrot.slane %v5214_v57, 4  ;;  %v5219_v39 = vrot.slane %v5217_v59, 5  ;;  %10701 = vmatprep.mubr.bf16.mxu0 %v9332_v16  ;;  %v5154_v16 = vld [vmem:[#allocation2 + $0x88] sm:$0xf] }
 0x6b0   :  { %v5137_v38 = vsel %vm11793_vm9, %v5067_v5, %v5136_v3  ;;  %v5140_v34 = vsel %vm11797_vm10, %v5068_v4, %v5139_v13  ;;  %v5072_v0 = vrot.slane %v5070_v14, 7  ;;  %v9710_v19 = vpack.c.bf16 %v4861_v48, %v4861_v48  ;;  %v5169_v17 = vld [vmem:[#allocation2 + $0x60] sm:$0xf]  ;;  %v12802_v20 = vld [vmem:[#allocation2 + $0x64] sm:$0x1] }
 0x6b1   :  { %5138 = vst [vmem:[#allocation2 + $0x70] sm:$0xf] %v5137_v38  ;;  %5141 = vst [vmem:[#allocation2 + $0x74] sm:$0x1] %v5140_v34  ;;  %v10646_v37 = vpop.f32.mrf.mxu1  ;;  %v5220_v15 = vor.u32 %v5219_v39, %v5216_v62  ;;  %v5225_v50 = vrot.slane %v5223_v7, 5  ;;  %v5228_v24 = vshrl.u32 %v5169_v17, 16 }
 0x6b2   :  { %v5231_v18 = vshll.u32 %v5169_v17, 16  ;;  %v5075_v31 = vor.u32 %v5073_v28, %v5072_v0  ;;  %v5076_v55 = vrot.slane %v5072_v0, 4  ;;  %v5078_v10 = vshrl.u32 %v9710_v19, 16  ;;  %v5151_v13 = vld [vmem:[#allocation2 + $0x84] sm:$0x1] }
 0x6b3   :  { %v5081_v35 = vshll.u32 %v9710_v19, 16  ;;  %v4931_v60 = vpop.f32.mrf.mxu1  ;;  %v5221_v27 = vrot.slane %v5220_v15, 4  ;;  %v5230_v1 = vrot.slane %v5228_v24, 4  ;;  %v5237_v8 = vshll.u32 %v12802_v20, 16  ;;  %v5157_v62 = vld [vmem:[#allocation2 + $0x8c] sm:$0x1] }
 0x6b4   :  { %v5233_v63 = vrot.slane %v5231_v18, 5  ;;  %v5143_v41 = vsel %vm11793_vm9, %v5075_v31, %v5142_v54  ;;  %v5146_v43 = vsel %vm11797_vm10, %v5076_v55, %v5145_v26  ;;  %v5080_v6 = vrot.slane %v5078_v10, 7  ;;  %v5170_v3 = vld [vmem:[#allocation2 + $0x68] sm:$0xf]  ;;  %v12814_v59 = vld [vmem:[#allocation2 + $0x6c] sm:$0x1] }
 0x6b5   :  { %v9711_v49 = vpack.c.bf16 %v4931_v60, %v4931_v60  ;;  %5144 = vst [vmem:[#allocation2 + $0x78] sm:$0xf] %v5143_v41  ;;  %5147 = vst [vmem:[#allocation2 + $0x7c] sm:$0x1] %v5146_v43  ;;  %v10653_v51 = vpop.f32.mrf.mxu1  ;;  %v9333_v11 = vcombine.low %v5169_v17, %v5170_v3  ;;  %v5226_v40 = vsel %vm11824_vm13, %v5221_v27, %v5225_v50  ;;  %v5242_v45 = vshrl.u32 %v5170_v3, 16  ;;  %v11056_v41 = vld [vmem:[%s13738_s4 + $0xe0] sm:$0xff]  }
 0x6b6   :  { %v5234_v53 = vor.u32 %v5233_v63, %v5230_v1  ;;  %v5083_v42 = vor.u32 %v5081_v35, %v5080_v6  ;;  %v5084_v21 = vrot.slane %v5080_v6, 4  ;;  %v9320_v5 = vcombine.low %v5212_v29, %v5226_v40  ;;  %v11053_v29 = vld [vmem:[%s13738_s4 + $0xe8] sm:$0xff]   ;;  %v5160_v18 = vld [vmem:[#allocation2 + $0x90] sm:$0xf] }
 0x6b7   :  { %v5086_v32 = vshrl.u32 %v9711_v49, 16  ;;  %v5089_v57 = vshll.u32 %v9711_v49, 16  ;;  %v5001_v7 = vpop.f32.mrf.mxu1  ;;  %10702 = vmatmul.mubr.bf16.vlgmr.msra.gmra.mxu0 %v9333_v11  ;;  %v5244_v14 = vrot.slane %v5242_v45, 4  ;;  %v5245_v28 = vshll.u32 %v5170_v3, 16 }
 0x6b8   :  { %v5235_v4 = vrot.slane %v5234_v53, 4  ;;  %v5149_v54 = vsel %vm11793_vm9, %v5083_v42, %v5148_v36  ;;  %v5152_v26 = vsel %vm11797_vm10, %v5084_v21, %v5151_v13  ;;  %v9712_v39 = vpack.c.bf16 %v5001_v7, %v5001_v7  ;;  %10734 = vmatpush3.bf16.msra.mxu0 %v12752_v22  ;;  %v5171_v38 = vld [vmem:[#allocation2 + $0x70] sm:$0xf]  ;;  %10677 = vmatprep.mubr.bf16.mxu1 %v9320_v5  ;;  %v5163_v22 = vld [vmem:[#allocation2 + $0x94] sm:$0x1] }
 0x6b9   :  { %v5088_v48 = vrot.slane %v5086_v32, 7  ;;  %5150 = vst [vmem:[#allocation2 + $0x80] sm:$0xf] %v5149_v54  ;;  %5153 = vst [vmem:[#allocation2 + $0x84] sm:$0x1] %v5152_v26  ;;  %10735 = vmatprep.subr.bf16.mxu0 %v11051_v47  ;;  %v5239_v34 = vrot.slane %v5237_v8, 5  ;;  %v10660_v17 = vpop.f32.mrf.mxu1 }
 0x6ba   :  { %v5247_v0 = vrot.slane %v5245_v28, 5  ;;  %v5251_v19 = vshll.u32 %v12814_v59, 16  ;;  %v5094_v50 = vshrl.u32 %v9712_v39, 16  ;;  %v5097_v24 = vshll.u32 %v9712_v39, 16  ;;  %v12834_v40 = vld [vmem:[#allocation2 + $0x74] sm:$0x1] }
 0x6bb   :  { %v5091_v37 = vor.u32 %v5089_v57, %v5088_v48  ;;  %v5092_v15 = vrot.slane %v5088_v48, 4  ;;  %v5240_v31 = vsel %vm11824_vm13, %v5235_v4, %v5239_v34  ;;  %v5256_v35 = vshrl.u32 %v5171_v38, 16  ;;  %v11057_v7 = vld [vmem:[%s13738_s4 + $0xb0] sm:$0xff]   ;;  %v11060_v17 = vld [vmem:[%s13738_s4 + $0xa8] sm:$0xff]  }
 0x6bc   :  { %v5248_v55 = vor.u32 %v5247_v0, %v5244_v14  ;;  %v5253_v10 = vrot.slane %v5251_v19, 5  ;;  %v5096_v1 = vrot.slane %v5094_v50, 7  ;;  %10736 = vmatpush3.bf16.msra.mxu0 %v11051_v47  ;;  %v5172_v63 = vld [vmem:[#allocation2 + $0x78] sm:$0xf]  ;;  %v5259_v8 = vshll.u32 %v5171_v38, 16 }
 0x6bd   :  { %v5155_v60 = vsel %vm11793_vm9, %v5091_v37, %v5154_v16  ;;  %v5158_v27 = vsel %vm11797_vm10, %v5092_v15, %v5157_v62  ;;  %10737 = vmatprep.subr.bf16.mxu0 %v11053_v29  ;;  %v5258_v6 = vrot.slane %v5256_v35, 4  ;;  %v5270_v36 = vshrl.u32 %v5172_v63, 16  ;;  %v12838_v42 = vld [vmem:[#allocation2 + $0x7c] sm:$0x1]  ;;  %v5593_v15 = vld [vmem:[#allocation2 + $0x50] sm:$0xe] }
 0x6be   :  { %5156 = vst [vmem:[#allocation2 + $0x88] sm:$0xf] %v5155_v60  ;;  %5159 = vst [vmem:[#allocation2 + $0x8c] sm:$0x1] %v5158_v27  ;;  %v5249_v43 = vrot.slane %v5248_v55, 4  ;;  %v5273_v49 = vshll.u32 %v5172_v63, 16  ;;  %v5099_v3 = vor.u32 %v5097_v24, %v5096_v1  ;;  %v9334_v11 = vcombine.low %v5171_v38, %v5172_v63 }
 0x6bf   :  { %v5100_v13 = vrot.slane %v5096_v1, 4  ;;  %v5261_v51 = vrot.slane %v5259_v8, 5  ;;  %v5272_v53 = vrot.slane %v5270_v36, 4  ;;  %v5265_v21 = vshll.u32 %v12834_v40, 16  ;;  %v11062_v55 = vld [vmem:[%s13738_s4 + $0xd0] sm:$0xff]  }
 0x6c0   :  { %v5254_v47 = vsel %vm11824_vm13, %v5249_v43, %v5253_v10  ;;  %v5275_v45 = vrot.slane %v5273_v49, 5  ;;  %v5161_v32 = vsel %vm11793_vm9, %v5099_v3, %v5160_v18  ;;  %10738 = vmatpush3.bf16.msra.mxu0 %v11053_v29  ;;  %10705 = vmatprep.mubr.bf16.mxu0 %v9334_v11  ;;  %v5173_v5 = vld [vmem:[#allocation2 + $0x80] sm:$0xf]  ;;  %v5279_v4 = vshll.u32 %v12838_v42, 16  ;;  %v12852_v39 = vld [vmem:[#allocation2 + $0x84] sm:$0x1] }
 0x6c1   :  { %v5164_v57 = vsel %vm11797_vm10, %v5100_v13, %v5163_v22  ;;  %v9321_v16 = vcombine.low %v5240_v31, %v5254_v47  ;;  %5162 = vst [vmem:[#allocation2 + $0x90] sm:$0xf] %v5161_v32  ;;  %10739 = vmatprep.subr.bf16.mxu0 %v11056_v41  ;;  %v5284_v14 = vshrl.u32 %v5173_v5, 16  ;;  %v5287_v28 = vshll.u32 %v5173_v5, 16  ;;  %v5594_v60 = vld [vmem:[#allocation2 + $0x58] sm:$0xe] }
 0x6c2   :  { %5165 = vst [vmem:[#allocation2 + $0x94] sm:$0x1] %v5164_v57  ;;  %v5262_v54 = vor.u32 %v5261_v51, %v5258_v6  ;;  %v5267_v26 = vrot.slane %v5265_v21, 5  ;;  %v5276_v48 = vor.u32 %v5275_v45, %v5272_v53  ;;  %v5281_v62 = vrot.slane %v5279_v4, 5  ;;  %v11061_v8 = vld [vmem:[#allocation2 + $0x58] ss:$8 sps:$4 sm:$0xff]  }
 0x6c3   :  { %10678 = vmatmul.mubr.bf16.vlgmr.msra.gmra.mxu1 %v9321_v16  ;;  %v5286_v38 = vrot.slane %v5284_v14, 4  ;;  %v5289_v29 = vrot.slane %v5287_v28, 5  ;;  %v5293_v0 = vshll.u32 %v12852_v39, 16  ;;  %v11063_v43 = vld [vmem:[%s13738_s4 + $0xa0] sm:$0xff]   ;;  %v9344_v36 = vrot.slane %v5593_v15, 9  ;;  %v11064_v3 = vld [vmem:[%s13738_s4 + $0xc8] sm:$0xff]  }
 0x6c4   :  { %10710 = vmatpush3.bf16.msra.mxu1 %v12764_v44  ;;  %v5263_v34 = vrot.slane %v5262_v54, 4  ;;  %10740 = vmatpush3.bf16.msra.mxu0 %v11056_v41  ;;  %v5277_v37 = vrot.slane %v5276_v48, 4  ;;  %v5619_v49 = vrot.slane %v12775_v25, 5  ;;  %v9345_v11 = vrot.slane %v5594_v60, 9  ;;  %v11065_v25 = vld [vmem:[%s13738_s4 + $0x98] sm:$0xff]   ;;  %v11066_v16 = vld [vmem:[%s13738_s4 + $0xc0] sm:$0xff]  }
 0x6c5   :  { %10711 = vmatprep.subr.bf16.mxu1 %v11057_v7  ;;  %v5174_v19 = vld [vmem:[#allocation2 + $0x88] sm:$0xf]  ;;  %10741 = vmatprep.subr.bf16.mxu0 %v11058_v9  ;;  %v12861_v22 = vld [vmem:[#allocation2 + $0x8c] sm:$0x1]  ;;  %v5290_v10 = vor.u32 %v5289_v29, %v5286_v38  ;;  %v5295_v41 = vrot.slane %v5293_v0, 5  ;;  %v5623_v47 = vrot.slane %v12790_v23, 5 }
 0x6c6   :  { %v5298_v50 = vshrl.u32 %v5174_v19, 16  ;;  %v5301_v24 = vshll.u32 %v5174_v19, 16  ;;  %v9335_v18 = vcombine.low %v5173_v5, %v5174_v19  ;;  %v5268_v44 = vsel %vm11824_vm13, %v5263_v34, %v5267_v26  ;;  %v11067_v4 = vld [vmem:[%s13738_s4 + $0x90] sm:$0xff]   ;;  %v11070_v14 = vld [vmem:[%s13738_s4 + $0x88] sm:$0xff]   ;;  %v5595_v28 = vld [vmem:[#allocation2 + $0x60] sm:$0xe] }
 0x6c7   :  { %v5282_v31 = vsel %vm11824_vm13, %v5277_v37, %v5281_v62  ;;  %v5307_v35 = vshll.u32 %v12861_v22, 16  ;;  %v5291_v6 = vrot.slane %v5290_v10, 4  ;;  %v5620_v57 = vsel %vm11915_vm1, %v9344_v36, %v5619_v49  ;;  %v5596_v54 = vld [vmem:[#allocation2 + $0x68] sm:$0xe]  ;;  %v5973_v26 = vld [vmem:[#allocation2 + $0x60] sm:$0xf] }
 0x6c8   :  { %10712 = vmatpush3.bf16.msra.mxu1 %v11057_v7  ;;  %v5300_v27 = vrot.slane %v5298_v50, 4  ;;  %v5303_v1 = vrot.slane %v5301_v24, 5  ;;  %10706 = vmatmul.mubr.bf16.gmra.mxu0 %v9335_v18  ;;  %v9322_v63 = vcombine.low %v5268_v44, %v5282_v31  ;;  %v5624_v23 = vsel %vm11915_vm1, %v9345_v11, %v5623_v47  ;;  %v11072_v48 = vld [vmem:[%s13738_s4 + $0x170] sm:$0xff]   ;;  %v12903_v62 = vld [vmem:[#allocation2 + $0x5c] sm:$0x1]  ;;  %v11073_v50 = vld [vmem:[%s13738_s4 + $0x80] sm:$0xff]  }
 0x6c9   :  { %10713 = vmatprep.subr.bf16.mxu1 %v11060_v17  ;;  %10742 = vmatpush3.bf16.msra.mxu0 %v11058_v9  ;;  %v5309_v51 = vrot.slane %v5307_v35, 5  ;;  %v5296_v53 = vsel %vm11824_vm13, %v5291_v6, %v5295_v41  ;;  %v9368_v5 = vcombine.low %v5620_v57, %v5624_v23  ;;  %v11069_v9 = vld [vmem:[%s13738_s4 + $0x178] sm:$0xff]   ;;  %v12905_v38 = vld [vmem:[#allocation2 + $0x64] sm:$0x1]  ;;  %v6253_v34 = vld [vmem:[#allocation2 + $0x60] sm:$0xe] }
 0x6ca   :  { %10681 = vmatprep.mubr.bf16.mxu1 %v9322_v63  ;;  %10749 = vmatprep.mubr.bf16.mxu0 %v11061_v8  ;;  %v5304_v13 = vor.u32 %v5303_v1, %v5300_v27  ;;  %v6252_v29 = vld [vmem:[#allocation2 + $0x58] sm:$0xe]  ;;  %v5627_v0 = vrot.slane %v12802_v20, 5  ;;  %v5631_v19 = vrot.slane %v12814_v59, 5  ;;  %v5597_v24 = vld [vmem:[#allocation2 + $0x70] sm:$0xe] }
 0x6cb   :  { %10743 = vmatprep.subr.bf16.mxu0 %v11062_v55  ;;  %v5971_v37 = vld [vmem:[#allocation2 + $0x58] sm:$0xf]  ;;  %v6002_v18 = vshrl.u32 %v5973_v26, 16  ;;  %v6005_v44 = vshll.u32 %v5973_v26, 16  ;;  %v9437_v31 = vrot.slane %v6253_v34, 9  ;;  %v9346_v20 = vrot.slane %v5595_v28, 9 }
 0x6cc   :  { %10714 = vmatpush3.bf16.msra.mxu1 %v11060_v17  ;;  %v5305_v45 = vrot.slane %v5304_v13, 4  ;;  %v11068_v17 = vld [vmem:[#allocation2 + $0x68] ss:$8 sps:$4 sm:$0xff]   ;;  %v11071_v15 = vld [vmem:[#allocation2 + $0x78] ss:$8 sps:$4 sm:$0xff]   ;;  %v9347_v59 = vrot.slane %v5596_v54, 9 }
 0x6cd   :  { %10715 = vmatprep.subr.bf16.mxu1 %v11063_v43  ;;  %10744 = vmatpush3.bf16.msra.mxu0 %v11062_v55  ;;  %v6282_v55 = vrot.slane %v12905_v38, 5  ;;  %v5598_v10 = vld [vmem:[#allocation2 + $0x78] sm:$0xe]  ;;  %v5988_v35 = vshrl.u32 %v5971_v37, 16  ;;  %v5991_v60 = vshll.u32 %v5971_v37, 16  ;;  %v9436_v27 = vrot.slane %v6252_v29, 9 }
 0x6ce   :  { %10745 = vmatprep.subr.bf16.mxu0 %v11064_v3  ;;  %v5310_v21 = vsel %vm11824_vm13, %v5305_v45, %v5309_v51  ;;  %v6278_v1 = vrot.slane %v12903_v62, 5  ;;  %v9348_v63 = vrot.slane %v5597_v24, 9  ;;  %v5635_v8 = vrot.slane %v12834_v40, 5  ;;  %v11075_v41 = vld [vmem:[%s13738_s4 + $0x168] sm:$0xff]   ;;  %v11076_v40 = vld [vmem:[%s13738_s4 + $0x138] sm:$0xff]  }
 0x6cf   :  { %v9323_v7 = vcombine.low %v5296_v53, %v5310_v21  ;;  %v5639_v6 = vrot.slane %v12838_v42, 5  ;;  %v6004_v36 = vrot.slane %v6002_v18, 4  ;;  %v6007_v49 = vrot.slane %v6005_v44, 5  ;;  %v5599_v51 = vld [vmem:[#allocation2 + $0x80] sm:$0xe]  ;;  %v11079_v34 = vld [vmem:[%s13738_s4 + $0x158] sm:$0xff]  }
 0x6d0   :  { %10716 = vmatpush3.bf16.msra.mxu1 %v11063_v43  ;;  %v9349_v43 = vrot.slane %v5598_v10, 9  ;;  %v5632_v13 = vsel %vm11915_vm1, %v9347_v59, %v5631_v19  ;;  %v5990_v11 = vrot.slane %v5988_v35, 4  ;;  %v5993_v47 = vrot.slane %v5991_v60, 5  ;;  %v11074_v53 = vld [vmem:[#allocation2 + $0x88] ss:$8 sps:$4 sm:$0xff]  }
 0x6d1   :  { %10717 = vmatprep.subr.bf16.mxu1 %v11065_v25  ;;  %10746 = vmatpush3.bf16.msra.mxu0 %v11064_v3  ;;  %v6283_v3 = vsel %vm11915_vm1, %v9437_v31, %v6282_v55  ;;  %v5628_v42 = vsel %vm11915_vm1, %v9346_v20, %v5627_v0  ;;  %v6279_v45 = vsel %vm11915_vm1, %v9436_v27, %v6278_v1  ;;  %v5647_v54 = vrot.slane %v12861_v22, 5  ;;  %v12952_v22 = vld [vmem:[#allocation2 + $0x74] sm:$0x1]  ;;  %v6255_v37 = vld [vmem:[#allocation2 + $0x70] sm:$0xe] }
 0x6d2   :  { %10682 = vmatmul.mubr.bf16.gmra.mxu1 %v9323_v7  ;;  %10747 = vmatprep.subr.bf16.mxu0 %v11066_v16  ;;  %v9460_v21 = vcombine.low %v6279_v45, %v6283_v3  ;;  %v5636_v57 = vsel %vm11915_vm1, %v9348_v63, %v5635_v8  ;;  %v5640_v23 = vsel %vm11915_vm1, %v9349_v43, %v5639_v6  ;;  %v5997_v0 = vshll.u32 %v12903_v62, 16  ;;  %v12958_v44 = vld [vmem:[#allocation2 + $0x7c] sm:$0x1]  ;;  %v12960_v62 = vld [vmem:[#allocation2 + $0x84] sm:$0x1]  ;;  %v11081_v20 = vld [vmem:[%s13738_s4 + $0x150] sm:$0xff]  }
 0x6d3   :  { %10725 = vmatprep.mubr.bf16.mxu1 %v9368_v5  ;;  %v6008_v7 = vor.u32 %v6007_v49, %v6004_v36  ;;  %v9369_v5 = vcombine.low %v5628_v42, %v5632_v13  ;;  %v5994_v26 = vor.u32 %v5993_v47, %v5990_v11  ;;  %v9370_v29 = vcombine.low %v5636_v57, %v5640_v23  ;;  %v6256_v31 = vld [vmem:[#allocation2 + $0x78] sm:$0xe]  ;;  %v6257_v59 = vld [vmem:[#allocation2 + $0x80] sm:$0xe]  ;;  %v5977_v1 = vld [vmem:[#allocation2 + $0x70] sm:$0xf] }
 0x6d4   :  { %10718 = vmatpush3.bf16.msra.mxu1 %v11065_v25  ;;  %v5600_v25 = vld [vmem:[#allocation2 + $0x88] sm:$0xe]  ;;  %v5999_v55 = vrot.slane %v5997_v0, 5  ;;  %v11082_v8 = vld [vmem:[%s13738_s4 + $0x120] sm:$0xff]   ;;  %v6290_v43 = vrot.slane %v12952_v22, 5  ;;  %v9440_v6 = vrot.slane %v6256_v31, 9 }
 0x6d5   :  { %10719 = vmatprep.subr.bf16.mxu1 %v11067_v4  ;;  %10748 = vmatpush3.bf16.msra.mxu0 %v11066_v16  ;;  %v11077_v16 = vld [vmem:[%s13738_s4 + $0x160] sm:$0xff]   ;;  %v9351_v28 = vrot.slane %v5600_v25, 9  ;;  %v6009_v19 = vrot.slane %v6008_v7, 4  ;;  %v5995_v24 = vrot.slane %v5994_v26, 4  ;;  %v6294_v3 = vrot.slane %v12958_v44, 5  ;;  %v11083_v11 = vld [vmem:[%s13738_s4 + $0x148] sm:$0xff]  }
 0x6d6   :  { %10781 = vmatprep.subr.bf16.mxu0 %v11069_v9  ;;  %v6631_v36 = vld [vmem:[#allocation2 + $0x60] sm:$0xf]  ;;  %v9441_v13 = vrot.slane %v6257_v59, 9  ;;  %v11084_v47 = vld [vmem:[%s13738_s4 + $0x118] sm:$0xff]   ;;  %v6030_v45 = vshrl.u32 %v5977_v1, 16  ;;  %v6033_v25 = vshll.u32 %v5977_v1, 16 }
 0x6d7   :  { %v6000_v63 = vsel %vm11824_vm13, %v5995_v24, %v5999_v55  ;;  %v5981_v57 = vld [vmem:[#allocation2 + $0x80] sm:$0xf]  ;;  %v5975_v23 = vld [vmem:[#allocation2 + $0x68] sm:$0xf]  ;;  %v6651_v7 = vshll.u32 %v6631_v36, 16 }
 0x6d8   :  { %10720 = vmatpush3.bf16.msra.mxu1 %v11067_v4  ;;  %10750 = vmatmul.mubr.bf16.vlgmr.msra.gmra.mxu0 %v11068_v17  ;;  %v9350_v4 = vrot.slane %v5599_v51, 9  ;;  %v12950_v17 = vld [vmem:[#allocation2 + $0x6c] sm:$0x1]  ;;  %v6633_v51 = vld [vmem:[#allocation2 + $0x68] sm:$0xf]  ;;  %v6032_v24 = vrot.slane %v6030_v45, 4 }
 0x6d9   :  { %10721 = vmatprep.subr.bf16.mxu1 %v11070_v14  ;;  %10753 = vmatprep.mubr.bf16.mxu0 %v11071_v15  ;;  %v6286_v27 = vrot.slane %v12950_v17, 5  ;;  %v13003_v26 = vld [vmem:[#allocation2 + $0x8c] sm:$0x1]  ;;  %v13029_v45 = vld [vmem:[#allocation2 + $0x64] sm:$0x1] }
 0x6da   :  { %10782 = vmatpush3.bf16.msra.mxu0 %v11069_v9  ;;  %v5643_v9 = vrot.slane %v12852_v39, 5  ;;  %v11080_v39 = vld [vmem:[%s13738_s4 + $0x128] sm:$0xff]  }
 0x6db   :  { %10783 = vmatprep.subr.bf16.mxu0 %v11072_v48  ;;  %v13013_v31 = vld [vmem:[#allocation2 + $0x6c] sm:$0x1] }
 0x6dc   :  { %10722 = vmatpush3.bf16.msra.mxu1 %v11070_v14  ;;  %v11078_v14 = vld [vmem:[%s13738_s4 + $0x130] sm:$0xff]   ;;  %v5644_v15 = vsel %vm11915_vm1, %v9350_v4, %v5643_v9  ;;  %v6665_v4 = vshll.u32 %v6633_v51, 16  ;;  %v11085_v9 = vld [vmem:[%s13738_s4 + $0x140] sm:$0xff]  }
 0x6dd   :  { %10723 = vmatprep.subr.bf16.mxu1 %v11073_v50 }
 0x6de   :  { %10784 = vmatpush3.bf16.msra.mxu0 %v11072_v48  ;;  %v6011_v48 = vshll.u32 %v12905_v38, 16  ;;  %v6254_v38 = vld [vmem:[#allocation2 + $0x68] sm:$0xe]  ;;  %v6667_v59 = vrot.slane %v6665_v4, 5  ;;  %v6053_v4 = vshll.u32 %v12958_v44, 16 }
 0x6df   :  { %10785 = vmatprep.subr.bf16.mxu0 %v11075_v41  ;;  %v9438_v60 = vrot.slane %v6254_v38, 9  ;;  %v6061_v38 = vshll.u32 %v5981_v57, 16 }
 0x6e0   :  { %10724 = vmatpush3.bf16.msra.mxu1 %v11073_v50  ;;  %10754 = vmatmul.mubr.bf16.gmra.mxu0 %v11074_v53  ;;  %v5648_v50 = vsel %vm11915_vm1, %v9351_v28, %v5647_v54  ;;  %v6013_v18 = vrot.slane %v6011_v48, 5  ;;  %v12982_v53 = vld [vmem:[#allocation2 + $0x88] sm:$0xe]  ;;  %v12997_v28 = vsel %vm11915_vm1, %v9440_v6, %v6294_v3  ;;  %v13005_v48 = vld [vmem:[#allocation2 + $0x94] sm:$0x1] }
 0x6e1   :  { %10757 = vmatprep.subr.bf16.mxu1 %v11076_v40  ;;  %10797 = vmatprep.mubr.bf16.mxu0 %v9460_v21  ;;  %v9371_v35 = vcombine.low %v5644_v15, %v5648_v50  ;;  %v12986_v42 = vsel %vm11915_vm1, %v9438_v60, %v6286_v27  ;;  %v5979_v21 = vld [vmem:[#allocation2 + $0x78] sm:$0xf]  ;;  %v6016_v15 = vshrl.u32 %v5975_v23, 16  ;;  %v6019_v50 = vshll.u32 %v5975_v23, 16 }
 0x6e2   :  { %10786 = vmatpush3.bf16.msra.mxu0 %v11075_v41  ;;  %v6014_v10 = vsel %vm11824_vm13, %v6009_v19, %v6013_v18  ;;  %v9439_v41 = vrot.slane %v6255_v37, 9  ;;  %v6047_v0 = vshll.u32 %v5979_v21, 16  ;;  %v6058_v19 = vshrl.u32 %v5981_v57, 16  ;;  %v11086_v37 = vld [vmem:[%s13738_s4 + $0x110] sm:$0xff]   ;;  %v11087_v60 = vld [vmem:[%s13738_s4 + $0x1f8] sm:$0xff]  }
 0x6e3   :  { %10726 = vmatmul.mubr.bf16.vlgmr.msra.gmra.mxu1 %v9369_v5  ;;  %10787 = vmatprep.subr.bf16.mxu0 %v11077_v16  ;;  %v9424_v49 = vcombine.low %v6000_v63, %v6014_v10  ;;  %v6662_v5 = vshrl.u32 %v6633_v51, 16  ;;  %v6035_v18 = vrot.slane %v6033_v25, 5  ;;  %v6653_v10 = vrot.slane %v6651_v7, 5 }
 0x6e4   :  { %10729 = vmatprep.mubr.bf16.mxu1 %v9370_v29  ;;  %10758 = vmatpush3.bf16.msra.mxu1 %v11076_v40  ;;  %v6298_v40 = vrot.slane %v12960_v62, 5  ;;  %v9442_v29 = vrot.slane %v12982_v53, 9  ;;  %v6302_v27 = vrot.slane %v13003_v26, 5  ;;  %v6306_v63 = vrot.slane %v13005_v48, 5 }
 0x6e5   :  { %10759 = vmatprep.subr.bf16.mxu1 %v11078_v14  ;;  %v6060_v6 = vrot.slane %v6058_v19, 4  ;;  %v6039_v51 = vshll.u32 %v12952_v22, 16  ;;  %v6671_v57 = vshll.u32 %v13013_v31, 16  ;;  %v11089_v22 = vld [vmem:[%s13738_s4 + $0x1f0] sm:$0xff]  }
 0x6e6   :  { %10788 = vmatpush3.bf16.msra.mxu0 %v11077_v16  ;;  %v6648_v16 = vshrl.u32 %v6631_v36, 16  ;;  %v13001_v54 = vsel %vm11915_vm1, %v9441_v13, %v6298_v40  ;;  %v6063_v36 = vrot.slane %v6061_v38, 5  ;;  %v6018_v13 = vrot.slane %v6016_v15, 4 }
 0x6e7   :  { %10789 = vmatprep.subr.bf16.mxu0 %v11079_v34  ;;  %v9462_v3 = vcombine.low %v12997_v28, %v13001_v54  ;;  %v6021_v40 = vrot.slane %v6019_v50, 5  ;;  %v6067_v28 = vshll.u32 %v12960_v62, 16  ;;  %v6673_v44 = vrot.slane %v6671_v57, 5  ;;  %v6639_v57 = vld [vmem:[#allocation2 + $0x80] sm:$0xf] }
 0x6e8   :  { %10760 = vmatpush3.bf16.msra.mxu1 %v11078_v14  ;;  %v12993_v14 = vsel %vm11915_vm1, %v9439_v41, %v6290_v43  ;;  %v6650_v55 = vrot.slane %v6648_v16, 4  ;;  %v6049_v43 = vrot.slane %v6047_v0, 5  ;;  %v11090_v0 = vld [vmem:[%s13738_s4 + $0x100] sm:$0xff]  }
 0x6e9   :  { %10761 = vmatprep.subr.bf16.mxu1 %v11080_v39  ;;  %v6022_v54 = vor.u32 %v6021_v40, %v6018_v13 }
 0x6ea   :  { %10790 = vmatpush3.bf16.msra.mxu0 %v11079_v34  ;;  %v13008_v34 = vld [vmem:[#allocation2 + $0x90] sm:$0xe]  ;;  %v6654_v25 = vor.u32 %v6653_v10, %v6650_v55  ;;  %v6055_v55 = vrot.slane %v6053_v4, 5 }
 0x6eb   :  { %10730 = vmatmul.mubr.bf16.gmra.mxu1 %v9371_v35  ;;  %10791 = vmatprep.subr.bf16.mxu0 %v11081_v20  ;;  %v9461_v35 = vcombine.low %v12986_v42, %v12993_v14  ;;  %v9443_v1 = vrot.slane %v13008_v34, 9  ;;  %v6036_v42 = vor.u32 %v6035_v18, %v6032_v24  ;;  %v6064_v14 = vor.u32 %v6063_v36, %v6060_v6 }
 0x6ec   :  { %10762 = vmatpush3.bf16.msra.mxu1 %v11080_v39  ;;  %10773 = vmatprep.mubr.bf16.mxu1 %v9424_v49  ;;  %v6044_v39 = vshrl.u32 %v5979_v21, 16  ;;  %v5985_v49 = vld [vmem:[#allocation2 + $0x90] sm:$0xf]  ;;  %v6025_v34 = vshll.u32 %v12950_v17, 16  ;;  %v6655_v38 = vrot.slane %v6654_v25, 4  ;;  %v11091_v17 = vld [vmem:[%s13738_s4 + $0x1e8] sm:$0xff]  }
 0x6ed   :  { %10763 = vmatprep.subr.bf16.mxu1 %v11082_v8  ;;  %v6086_v16 = vshrl.u32 %v5985_v49, 16  ;;  %v6089_v7 = vshll.u32 %v5985_v49, 16  ;;  %v6037_v19 = vrot.slane %v6036_v42, 4  ;;  %v6065_v10 = vrot.slane %v6064_v14, 4  ;;  %v11094_v42 = vld [vmem:[%s13738_s4 + $0x1b0] sm:$0xff]  }
 0x6ee   :  { %10792 = vmatpush3.bf16.msra.mxu0 %v11081_v20  ;;  %v6664_v20 = vrot.slane %v6662_v5, 4  ;;  %v6046_v41 = vrot.slane %v6044_v39, 4  ;;  %v6657_v39 = vshll.u32 %v13029_v45, 16  ;;  %v6081_v36 = vshll.u32 %v13003_v26, 16  ;;  %v11093_v26 = vld [vmem:[%s13738_s4 + $0x1e0] sm:$0xff]  }
 0x6ef   :  { %10793 = vmatprep.subr.bf16.mxu0 %v11083_v11  ;;  %v6088_v50 = vrot.slane %v6086_v16, 4  ;;  %v6091_v24 = vrot.slane %v6089_v7, 5 }
 0x6f0   :  { %10764 = vmatpush3.bf16.msra.mxu1 %v11082_v8  ;;  %v5983_v8 = vld [vmem:[#allocation2 + $0x88] sm:$0xf]  ;;  %v6668_v21 = vor.u32 %v6667_v59, %v6664_v20  ;;  %v6050_v5 = vor.u32 %v6049_v43, %v6046_v41  ;;  %v6069_v20 = vrot.slane %v6067_v28, 5  ;;  %v6303_v59 = vsel %vm11915_vm1, %v9442_v29, %v6302_v27  ;;  %v11092_v41 = vld [vmem:[%s13738_s4 + $0x1b8] sm:$0xff]  }
 0x6f1   :  { %10765 = vmatprep.subr.bf16.mxu1 %v11084_v47  ;;  %v6075_v23 = vshll.u32 %v5983_v8, 16  ;;  %v6659_v43 = vrot.slane %v6657_v39, 5  ;;  %v6092_v27 = vor.u32 %v6091_v24, %v6088_v50  ;;  %v6083_v25 = vrot.slane %v6081_v36, 5 }
 0x6f2   :  { %10794 = vmatpush3.bf16.msra.mxu0 %v11083_v11  ;;  %v11088_v11 = vld [vmem:[%s13738_s4 + $0x108] sm:$0xff]   ;;  %v6669_v15 = vrot.slane %v6668_v21, 4  ;;  %v6051_v18 = vrot.slane %v6050_v5, 4  ;;  %v6070_v13 = vsel %vm11824_vm13, %v6065_v10, %v6069_v20  ;;  %v6637_v21 = vld [vmem:[#allocation2 + $0x78] sm:$0xf]  ;;  %v6707_v39 = vshll.u32 %v6639_v57, 16 }
 0x6f3   :  { %10795 = vmatprep.subr.bf16.mxu0 %v11085_v9  ;;  %v6660_v49 = vsel %vm11824_vm13, %v6655_v38, %v6659_v43  ;;  %v6093_v16 = vrot.slane %v6092_v27, 4  ;;  %v11095_v5 = vld [vmem:[%s13738_s4 + $0x1d8] sm:$0xff]   ;;  %v6690_v28 = vshrl.u32 %v6637_v21, 16  ;;  %v11099_v10 = vld [vmem:[%s13738_s4 + $0x1a0] sm:$0xff]  }
 0x6f4   :  { %10766 = vmatpush3.bf16.msra.mxu1 %v11084_v47  ;;  %v6072_v47 = vshrl.u32 %v5983_v8, 16  ;;  %v6027_v8 = vrot.slane %v6025_v34, 5  ;;  %v6674_v6 = vsel %vm11824_vm13, %v6669_v15, %v6673_v44  ;;  %v6704_v34 = vshrl.u32 %v6639_v57, 16  ;;  %v11098_v44 = vld [vmem:[%s13738_s4 + $0x1d0] sm:$0xff]   ;;  %v13092_v43 = vld [vmem:[#allocation2 + $0x7c] sm:$0x1] }
 0x6f5   :  { %10767 = vmatprep.subr.bf16.mxu1 %v11086_v37  ;;  %v6692_v50 = vrot.slane %v6690_v28, 4  ;;  %v6709_v20 = vrot.slane %v6707_v39, 5  ;;  %v13116_v39 = vld [vmem:[#allocation2 + $0x94] sm:$0x1] }
 0x6f6   :  { %10796 = vmatpush3.bf16.msra.mxu0 %v11085_v9  ;;  %v6041_v9 = vrot.slane %v6039_v51, 5  ;;  %v6074_v62 = vrot.slane %v6072_v47, 4  ;;  %v6635_v51 = vld [vmem:[#allocation2 + $0x70] sm:$0xf] }
 0x6f7   :  { %10829 = vmatprep.subr.bf16.mxu0 %v11087_v60  ;;  %v6676_v4 = vshrl.u32 %v6635_v51, 16  ;;  %v6679_v14 = vshll.u32 %v6635_v51, 16 }
 0x6f8   :  { %10768 = vmatpush3.bf16.msra.mxu1 %v11086_v37  ;;  %v6077_v37 = vrot.slane %v6075_v23, 5  ;;  %v6042_v53 = vsel %vm11824_vm13, %v6037_v19, %v6041_v9  ;;  %v11096_v9 = vld [vmem:[%s13738_s4 + $0x1a8] sm:$0xff]  }
 0x6f9   :  { %10798 = vmatmul.mubr.bf16.vlgmr.msra.gmra.mxu0 %v9461_v35  ;;  %10769 = vmatprep.subr.bf16.mxu1 %v11088_v11  ;;  %v6307_v35 = vsel %vm11915_vm1, %v9443_v1, %v6306_v63  ;;  %v6095_v1 = vshll.u32 %v13005_v48, 16  ;;  %v9516_v48 = vcombine.low %v6660_v49, %v6674_v6  ;;  %v11100_v6 = vld [vmem:[%s13738_s4 + $0x1c8] sm:$0xff]   ;;  %v13099_v49 = vld [vmem:[#allocation2 + $0x84] sm:$0x1] }
 0x6fa   :  { %10801 = vmatprep.mubr.bf16.mxu0 %v9462_v3  ;;  %10830 = vmatpush3.bf16.msra.mxu0 %v11087_v60  ;;  %v6023_v60 = vrot.slane %v6022_v54, 4  ;;  %v6078_v29 = vor.u32 %v6077_v37, %v6074_v62  ;;  %v9463_v63 = vcombine.low %v6303_v59, %v6307_v35  ;;  %v6056_v3 = vsel %vm11824_vm13, %v6051_v18, %v6055_v55  ;;  %v6645_v18 = vld [vmem:[#allocation2 + $0x98] sm:$0xf] }
 0x6fb   :  { %10831 = vmatprep.subr.bf16.mxu0 %v11089_v22  ;;  %v9426_v47 = vcombine.low %v6056_v3, %v6070_v13  ;;  %v6097_v7 = vrot.slane %v6095_v1, 5  ;;  %v6693_v54 = vshll.u32 %v6637_v21, 16  ;;  %v6678_v62 = vrot.slane %v6676_v4, 4  ;;  %v13101_v3 = vld [vmem:[#allocation2 + $0x8c] sm:$0x1]  ;;  %v11103_v4 = vld [vmem:[%s13738_s4 + $0x190] sm:$0xff]  }
 0x6fc   :  { %10770 = vmatpush3.bf16.msra.mxu1 %v11088_v11  ;;  %v6028_v40 = vsel %vm11824_vm13, %v6023_v60, %v6027_v8  ;;  %v6079_v23 = vrot.slane %v6078_v29, 4  ;;  %v6681_v37 = vrot.slane %v6679_v14, 5  ;;  %v6643_v60 = vld [vmem:[#allocation2 + $0x90] sm:$0xf]  ;;  %v11097_v8 = vld [vmem:[#allocation2 + $0x60] ss:$8 sps:$4 sm:$0xff]  }
 0x6fd   :  { %10771 = vmatprep.subr.bf16.mxu1 %v11090_v0  ;;  %v9425_v11 = vcombine.low %v6028_v40, %v6042_v53  ;;  %v6098_v15 = vsel %vm11824_vm13, %v6093_v16, %v6097_v7  ;;  %v6695_v24 = vrot.slane %v6693_v54, 5  ;;  %v6699_v53 = vshll.u32 %v13092_v43, 16  ;;  %v11101_v40 = vld [vmem:[%s13738_s4 + $0x198] sm:$0xff]  }
 0x6fe   :  { %10832 = vmatpush3.bf16.msra.mxu0 %v11089_v22  ;;  %v6641_v22 = vld [vmem:[#allocation2 + $0x88] sm:$0xf]  ;;  %v6084_v38 = vsel %vm11824_vm13, %v6079_v23, %v6083_v25  ;;  %v6746_v29 = vshrl.u32 %v6645_v18, 16  ;;  %v6749_v27 = vshll.u32 %v6645_v18, 16  ;;  %v6682_v1 = vor.u32 %v6681_v37, %v6678_v62  ;;  %v11102_v25 = vld [vmem:[%s13738_s4 + $0x1c0] sm:$0xff]  }
 0x6ff   :  { %10833 = vmatprep.subr.bf16.mxu0 %v11091_v17  ;;  %v6721_v19 = vshll.u32 %v6641_v22, 16  ;;  %v9427_v55 = vcombine.low %v6084_v38, %v6098_v15  ;;  %v6732_v13 = vshrl.u32 %v6643_v60, 16  ;;  %v6713_v51 = vshll.u32 %v13099_v49, 16  ;;  %v11104_v37 = vld [vmem:[%s13738_s4 + $0x188] sm:$0xff]  }
 0x700   :  { %10772 = vmatpush3.bf16.msra.mxu1 %v11090_v0  ;;  %v6718_v0 = vshrl.u32 %v6641_v22, 16  ;;  %v6701_v57 = vrot.slane %v6699_v53, 5  ;;  %v6751_v23 = vrot.slane %v6749_v27, 5  ;;  %v6683_v16 = vrot.slane %v6682_v1, 4  ;;  %v6913_v53 = vld [vmem:[#allocation2 + $0x68] sm:$0xe] }
 0x701   :  { %10802 = vmatmul.mubr.bf16.gmra.mxu0 %v9463_v63  ;;  %10805 = vmatprep.subr.bf16.mxu1 %v11092_v41  ;;  %v6723_v35 = vrot.slane %v6721_v19, 5  ;;  %v6696_v63 = vor.u32 %v6695_v24, %v6692_v50  ;;  %v6734_v22 = vrot.slane %v6732_v13, 4  ;;  %v6715_v28 = vrot.slane %v6713_v51, 5  ;;  %v11109_v27 = vld [vmem:[%s13738_s4 + $0x230] sm:$0xff]   ;;  %v11108_v1 = vld [vmem:[#allocation2 + $0x80] ss:$8 sps:$4 sm:$0xff]  }
 0x702   :  { %10834 = vmatpush3.bf16.msra.mxu0 %v11091_v17  ;;  %10845 = vmatprep.mubr.bf16.mxu0 %v9516_v48  ;;  %v6706_v17 = vrot.slane %v6704_v34, 4  ;;  %v6720_v59 = vrot.slane %v6718_v0, 4  ;;  %v6741_v62 = vshll.u32 %v13116_v39, 16  ;;  %v9529_v33 = vrot.slane %v6913_v53, 9 }
 0x703   :  { %10774 = vmatmul.mubr.bf16.vlgmr.msra.gmra.mxu1 %v9425_v11  ;;  %10835 = vmatprep.subr.bf16.mxu0 %v11093_v26  ;;  %v6697_v7 = vrot.slane %v6696_v63, 4  ;;  %v6912_v63 = vld [vmem:[#allocation2 + $0x60] sm:$0xe]  ;;  %v6942_v13 = vrot.slane %v13013_v31, 5 }
 0x704   :  { %10777 = vmatprep.mubr.bf16.mxu1 %v9426_v47  ;;  %10806 = vmatpush3.bf16.msra.mxu1 %v11092_v41  ;;  %v13090_v41 = vld [vmem:[#allocation2 + $0x74] sm:$0x1]  ;;  %v6710_v48 = vor.u32 %v6709_v20, %v6706_v17  ;;  %v6724_v11 = vor.u32 %v6723_v35, %v6720_v59  ;;  %v6748_v47 = vrot.slane %v6746_v29, 4  ;;  %v6743_v20 = vrot.slane %v6741_v62, 5  ;;  %v11105_v35 = vld [vmem:[%s13738_s4 + $0x180] sm:$0xff]  }
 0x705   :  { %10807 = vmatprep.subr.bf16.mxu1 %v11094_v42  ;;  %v6685_v36 = vshll.u32 %v13090_v41, 16  ;;  %v6702_v15 = vsel %vm11824_vm13, %v6697_v7, %v6701_v57  ;;  %v11106_v29 = vld [vmem:[#allocation2 + $0x70] ss:$8 sps:$4 sm:$0xff]   ;;  %v6943_v51 = vsel %vm11915_vm1, %v9529_v33, %v6942_v13  ;;  %v11112_v31 = vld [vmem:[%s13738_s4 + $0x220] sm:$0xff]   ;;  %v11115_v57 = vld [vmem:[%s13738_s4 + $0x208] sm:$0xff]  }
 0x706   :  { %10836 = vmatpush3.bf16.msra.mxu0 %v11093_v26  ;;  %v6735_v26 = vshll.u32 %v6643_v60, 16  ;;  %v6711_v14 = vrot.slane %v6710_v48, 4  ;;  %v6725_v54 = vrot.slane %v6724_v11, 4  ;;  %v6752_v0 = vor.u32 %v6751_v23, %v6748_v47  ;;  %v11110_v11 = vld [vmem:[#allocation2 + $0x90] ss:$8 sps:$4 sm:$0xff]  }
 0x707   :  { %10837 = vmatprep.subr.bf16.mxu0 %v11095_v5  ;;  %v6687_v21 = vrot.slane %v6685_v36, 5  ;;  %v6938_v48 = vrot.slane %v13029_v45, 5  ;;  %v11113_v45 = vld [vmem:[%s13738_s4 + $0x218] sm:$0xff]   ;;  %v6914_v47 = vld [vmem:[#allocation2 + $0x70] sm:$0xe] }
 0x708   :  { %10808 = vmatpush3.bf16.msra.mxu1 %v11094_v42  ;;  %v6727_v42 = vshll.u32 %v13101_v3, 16  ;;  %v6716_v50 = vsel %vm11824_vm13, %v6711_v14, %v6715_v28  ;;  %v6753_v59 = vrot.slane %v6752_v0, 4  ;;  %v6915_v23 = vld [vmem:[#allocation2 + $0x78] sm:$0xe]  ;;  %v6917_v7 = vld [vmem:[#allocation2 + $0x88] sm:$0xe] }
 0x709   :  { %10809 = vmatprep.subr.bf16.mxu1 %v11096_v9  ;;  %v6688_v38 = vsel %vm11824_vm13, %v6683_v16, %v6687_v21  ;;  %v11114_v21 = vld [vmem:[%s13738_s4 + $0x210] sm:$0xff]   ;;  %v6916_v16 = vld [vmem:[#allocation2 + $0x80] sm:$0xe]  ;;  %v9531_v14 = vrot.slane %v6915_v23, 9  ;;  %v6950_v28 = vrot.slane %v13092_v43, 5  ;;  %v9533_v0 = vrot.slane %v6917_v7, 9 }
 0x70a   :  { %10838 = vmatpush3.bf16.msra.mxu0 %v11095_v5  ;;  %v6737_v5 = vrot.slane %v6735_v26, 5  ;;  %v6729_v34 = vrot.slane %v6727_v42, 5  ;;  %v9517_v17 = vcombine.low %v6688_v38, %v6702_v15  ;;  %v11111_v26 = vld [vmem:[%s13738_s4 + $0x228] sm:$0xff]   ;;  %v6919_v62 = vld [vmem:[#allocation2 + $0x98] sm:$0xe] }
 0x70b   :  { %10778 = vmatmul.mubr.bf16.gmra.mxu1 %v9427_v55  ;;  %10839 = vmatprep.subr.bf16.mxu0 %v11098_v44  ;;  %v6951_v15 = vsel %vm11915_vm1, %v9531_v14, %v6950_v28 }
 0x70c   :  { %10810 = vmatpush3.bf16.msra.mxu1 %v11096_v9  ;;  %10821 = vmatprep.mubr.bf16.mxu1 %v11097_v8  ;;  %v13114_v9 = vld [vmem:[#allocation2 + $0x9c] sm:$0x1]  ;;  %v6730_v24 = vsel %vm11824_vm13, %v6725_v54, %v6729_v34  ;;  %v9532_v54 = vrot.slane %v6916_v16, 9  ;;  %v6954_v34 = vrot.slane %v13099_v49, 5 }
 0x70d   :  { %10811 = vmatprep.subr.bf16.mxu1 %v11099_v10  ;;  %v6755_v19 = vshll.u32 %v13114_v9, 16  ;;  %v9518_v55 = vcombine.low %v6716_v50, %v6730_v24  ;;  %v6962_v50 = vrot.slane %v13116_v39, 5  ;;  %v9535_v24 = vrot.slane %v6919_v62, 9 }
 0x70e   :  { %10840 = vmatpush3.bf16.msra.mxu0 %v11098_v44  ;;  %v6738_v44 = vor.u32 %v6737_v5, %v6734_v22  ;;  %v11116_v22 = vld [vmem:[%s13738_s4 + $0x200] sm:$0xff]   ;;  %v9530_v5 = vrot.slane %v6914_v47, 9 }
 0x70f   :  { %10841 = vmatprep.subr.bf16.mxu0 %v11100_v6  ;;  %v6757_v18 = vrot.slane %v6755_v19, 5  ;;  %v6958_v19 = vrot.slane %v13101_v3, 5 }
 0x710   :  { %10812 = vmatpush3.bf16.msra.mxu1 %v11099_v10  ;;  %v6739_v10 = vrot.slane %v6738_v44, 4  ;;  %v6918_v44 = vld [vmem:[#allocation2 + $0x90] sm:$0xe] }
 0x711   :  { %10813 = vmatprep.subr.bf16.mxu1 %v11101_v40  ;;  %v6758_v8 = vsel %vm11824_vm13, %v6753_v59, %v6757_v18  ;;  %v6959_v43 = vsel %vm11915_vm1, %v9533_v0, %v6958_v19 }
 0x712   :  { %10842 = vmatpush3.bf16.msra.mxu0 %v11100_v6  ;;  %v6744_v60 = vsel %vm11824_vm13, %v6739_v10, %v6743_v20  ;;  %v11107_v6 = vld [vmem:[%s13738_s4 + $0x238] sm:$0xff]  }
 0x713   :  { %10843 = vmatprep.subr.bf16.mxu0 %v11102_v25  ;;  %v9519_v36 = vcombine.low %v6744_v60, %v6758_v8 }
 0x714   :  { %10814 = vmatpush3.bf16.msra.mxu1 %v11101_v40  ;;  %v9528_v40 = vrot.slane %v6912_v63, 9 }
 0x715   :  { %10815 = vmatprep.subr.bf16.mxu1 %v11103_v4 }
 0x716   :  { %10844 = vmatpush3.bf16.msra.mxu0 %v11102_v25  ;;  %v6939_v42 = vsel %vm11915_vm1, %v9528_v40, %v6938_v48 }
 0x717   :  { %10877 = vmatprep.subr.mxu0 %v13796_v46  ;;  %v9552_v25 = vcombine.low %v6939_v42, %v6943_v51 }
 0x718   :  { %10816 = vmatpush3.bf16.msra.mxu1 %v11103_v4  ;;  %v6946_v4 = vrot.slane %v13090_v41, 5  ;;  %v6955_v41 = vsel %vm11915_vm1, %v9532_v54, %v6954_v34 }
 0x719   :  { %10846 = vmatmul.mubr.bf16.vlgmr.msra.gmra.mxu0 %v9517_v17  ;;  %10817 = vmatprep.subr.bf16.mxu1 %v11104_v37  ;;  %v9554_v3 = vcombine.low %v6955_v41, %v6959_v43  ;;  %v6966_v17 = vrot.slane %v13114_v9, 5 }
 0x71a   :  { %10849 = vmatprep.mubr.bf16.mxu0 %v9518_v55  ;;  %v6947_v38 = vsel %vm11915_vm1, %v9530_v5, %v6946_v4 }
 0x71b   :  { %v9553_v49 = vcombine.low %v6947_v38, %v6951_v15  ;;  %v6967_v55 = vsel %vm11915_vm1, %v9535_v24, %v6966_v17 }
 0x71c   :  { %10818 = vmatpush3.bf16.msra.mxu1 %v11104_v37  ;;  %v9534_v37 = vrot.slane %v6918_v44, 9 }
 0x71d   :  { %10819 = vmatprep.subr.bf16.mxu1 %v11105_v35 }
 0x71e   :  { %v6963_v18 = vsel %vm11915_vm1, %v9534_v37, %v6962_v50 }
 0x71f   :  { %v9555_v10 = vcombine.low %v6963_v18, %v6967_v55 }
 0x720   :  { %10820 = vmatpush3.bf16.msra.mxu1 %v11105_v35 }
 0x721   :  { %10850 = vmatmul.mubr.bf16.gmra.mxu0 %v9519_v36  ;;  %10853 = vmatprep.subr.bf16.mxu1 %v11107_v6 }
 0x722   :  { %10879 = vmatprep.mubr.msk.f32.mxu0 %vm11280_vm0, %v13796_v46 }
 0x723   :  { %10822 = vmatmul.mubr.bf16.vlgmr.msra.gmra.mxu1 %v11106_v29 }
 0x724   :  { %10825 = vmatprep.mubr.bf16.mxu1 %v11108_v1  ;;  %10854 = vmatpush3.bf16.msra.mxu1 %v11107_v6 }
 0x725   :  { %10855 = vmatprep.subr.bf16.mxu1 %v11109_v27 }
 0x728   :  { %10856 = vmatpush3.bf16.msra.mxu1 %v11109_v27 }
 0x729   :  { %10857 = vmatprep.subr.bf16.mxu1 %v11111_v26 }
 0x72b   :  { %10826 = vmatmul.mubr.bf16.gmra.mxu1 %v11110_v11 }
 0x72c   :  { %10858 = vmatpush3.bf16.msra.mxu1 %v11111_v26  ;;  %10869 = vmatprep.mubr.bf16.mxu1 %v9552_v25 }
 0x72d   :  { %10859 = vmatprep.subr.bf16.mxu1 %v11112_v31 }
 0x730   :  { %10860 = vmatpush3.bf16.msra.mxu1 %v11112_v31 }
 0x731   :  { %10861 = vmatprep.subr.bf16.mxu1 %v11113_v45 }
 0x734   :  { %10862 = vmatpush3.bf16.msra.mxu1 %v11113_v45 }
 0x735   :  { %10863 = vmatprep.subr.bf16.mxu1 %v11114_v21 }
 0x738   :  { %10864 = vmatpush3.bf16.msra.mxu1 %v11114_v21 }
 0x739   :  { %10865 = vmatprep.subr.bf16.mxu1 %v11115_v57 }
 0x73c   :  { %10866 = vmatpush3.bf16.msra.mxu1 %v11115_v57 }
 0x73d   :  { %10867 = vmatprep.subr.bf16.mxu1 %v11116_v22 }
 0x740   :  { %10868 = vmatpush3.bf16.msra.mxu1 %v11116_v22 }
 0x741   :  { %10882 = vmatprep.subr.mxu1 %v13796_v46 }
 0x743   :  { %10870 = vmatmul.mubr.bf16.vlgmr.msra.gmra.mxu1 %v9553_v49 }
 0x744   :  { %10873 = vmatprep.mubr.bf16.mxu1 %v9554_v3 }
 0x74b   :  { %10874 = vmatmul.mubr.bf16.gmra.mxu1 %v9555_v10 }
 0x74c   :  { %10884 = vmatprep.mubr.msk.f32.mxu1 %vm11280_vm0, %v13796_v46 }
 0x777   :  { %v10703_v60 = vpop.f32.mrf.mxu0 }
 0x779   :  { %v5562_v9 = vpop.f32.mrf.mxu0 }
 0x77b   :  { %v10704_v36 = vpop.f32.mrf.mxu0 }
 0x77d   :  { %v5565_v29 = vpop.f32.mrf.mxu0 }
 0x783   :  { %v10679_v20 = vpop.f32.mrf.mxu1 }
 0x784   :  { %v5571_v58 = vadd.f32 %v10703_v60, %v10679_v20 }
 0x785   :  { %v5425_v59 = vpop.f32.mrf.mxu1 }
 0x786   :  { %v5563_v55 = vadd.f32 %v5562_v9, %v5425_v59 }
 0x787   :  { %v10680_v35 = vpop.f32.mrf.mxu1 }
 0x788   :  { %v10707_v27 = vpop.f32.mrf.mxu0  ;;  %v5574_v46 = vadd.f32 %v10704_v36, %v10680_v35 }
 0x789   :  { %v5428_v39 = vpop.f32.mrf.mxu1 }
 0x78a   :  { %v5578_v63 = vpop.f32.mrf.mxu0  ;;  %v5566_v10 = vadd.f32 %v5565_v29, %v5428_v39 }
 0x78c   :  { %v13196_v13 = vpop.f32.mrf.mxu0 }
 0x78d   :  { %13807 = vst [vmem:[#allocation18_spill] sm:$0xff] %v13196_v13 }
 0x78e   :  { %v5581_v40 = vpop.f32.mrf.mxu0 }
 0x792   :  { %v13192_v8 = vpop.f32.mrf.mxu1 }
 0x793   :  { %13805 = vst [vmem:[#allocation16_spill] sm:$0xff] %v13192_v8 }
 0x794   :  { %v5441_v6 = vpop.f32.mrf.mxu1  ;;  %v13816_v35 = vld [vmem:[#allocation18_spill] sm:$0xff] }
 0x796   :  { %v13194_v53 = vpop.f32.mrf.mxu1 }
 0x797   :  { %13806 = vst [vmem:[#allocation17_spill] sm:$0xff] %v13194_v53 }
 0x798   :  { %v5444_v32 = vpop.f32.mrf.mxu1  ;;  %v10751_v51 = vpop.f32.mrf.mxu0 }
 0x79a   :  { %v5932_v42 = vpop.f32.mrf.mxu0  ;;  %v13814_v59 = vld [vmem:[#allocation16_spill] sm:$0xff] }
 0x79b   :  { %v5587_v39 = vadd.f32 %v10707_v27, %v13814_v59 }
 0x79c   :  { %v10752_v25 = vpop.f32.mrf.mxu0 }
 0x79e   :  { %v5935_v21 = vpop.f32.mrf.mxu0 }
 0x7a0   :  { %v13198_v47 = vpop.f32.mrf.mxu0 }
 0x7a1   :  { %13808 = vst [vmem:[#allocation19_spill] sm:$0xff] %v13198_v47  ;;  %v5582_v47 = vadd.f32 %v5581_v40, %v5444_v32 }
 0x7a2   :  { %v5948_v16 = vpop.f32.mrf.mxu0 }
 0x7a3   :  { %v10727_v1 = vpop.f32.mrf.mxu1 }
 0x7a4   :  { %v13200_v22 = vpop.f32.mrf.mxu0  ;;  %v5796_v52 = vadd.f32 %v10727_v1, %v5571_v58 }
 0x7a5   :  { %v5763_v33 = vpop.f32.mrf.mxu1  ;;  %13809 = vst [vmem:[#allocation20_spill] sm:$0xff] %v13200_v22 }
 0x7a6   :  { %v5951_v4 = vpop.f32.mrf.mxu0  ;;  %v5794_v30 = vadd.f32 %v5763_v33, %v5563_v55  ;;  %v5965_v8 = vadd.f32 %v10751_v51, %v5796_v52 }
 0x7a7   :  { %v10728_v26 = vpop.f32.mrf.mxu1 }
 0x7a8   :  { %v5963_v22 = vadd.f32 %v5932_v42, %v5794_v30 }
 0x7a9   :  { %v5766_v48 = vpop.f32.mrf.mxu1 }
 0x7aa   :  { %v5795_v61 = vadd.f32 %v5766_v48, %v5566_v10  ;;  %v13815_v48 = vld [vmem:[#allocation17_spill] sm:$0xff] }
 0x7ab   :  { %v10731_v11 = vpop.f32.mrf.mxu1  ;;  %v5590_v58 = vadd.f32 %v13816_v35, %v13815_v48 }
 0x7ac   :  { %v5800_v36 = vadd.f32 %v10731_v11, %v5587_v39 }
 0x7ad   :  { %v5779_v31 = vpop.f32.mrf.mxu1 }
 0x7af   :  { %v10732_v45 = vpop.f32.mrf.mxu1 }
 0x7b0   :  { %v5801_v1 = vadd.f32 %v10732_v45, %v5590_v58 }
 0x7b1   :  { %v5782_v57 = vpop.f32.mrf.mxu1 }
 0x7b2   :  { %v5799_v29 = vadd.f32 %v5782_v57, %v5582_v47 }
 0x7b9   :  { %v10799_v28 = vpop.f32.mrf.mxu0 }
 0x7bb   :  { %v6422_v34 = vpop.f32.mrf.mxu0 }
 0x7bd   :  { %v10800_v19 = vpop.f32.mrf.mxu0 }
 0x7bf   :  { %v6425_v15 = vpop.f32.mrf.mxu0 }
 0x7c1   :  { %v13204_v41 = vpop.f32.mrf.mxu0 }
 0x7c2   :  { %13811 = vst [vmem:[#allocation10_spill] sm:$0xff] %v13204_v41  ;;  %v5579_v41 = vadd.f32 %v5578_v63, %v5441_v6  ;;  %v5968_v63 = vadd.f32 %v5951_v4, %v5799_v29 }
 0x7c3   :  { %v10775_v23 = vpop.f32.mrf.mxu1  ;;  %v6438_v62 = vpop.f32.mrf.mxu0 }
 0x7c4   :  { %v5798_v53 = vadd.f32 %v5779_v31, %v5579_v41  ;;  %v6246_v60 = vadd.f32 %v10775_v23, %v5965_v8  ;;  %v13817_v31 = vld [vmem:[#allocation19_spill] sm:$0xff]  ;;  %v13818_v23 = vld [vmem:[#allocation20_spill] sm:$0xff] }
 0x7c5   :  { %v6213_v7 = vpop.f32.mrf.mxu1  ;;  %v13206_v37 = vpop.f32.mrf.mxu0  ;;  %v5969_v8 = vadd.f32 %v13817_v31, %v5800_v36 }
 0x7c6   :  { %13812 = vst [vmem:[#allocation11_spill] sm:$0xff] %v13206_v37  ;;  %v5964_v37 = vadd.f32 %v5935_v21, %v5795_v61  ;;  %v5967_v30 = vadd.f32 %v5948_v16, %v5798_v53  ;;  %v6455_v51 = vadd.f32 %v10799_v28, %v6246_v60 }
 0x7c7   :  { %v10776_v5 = vpop.f32.mrf.mxu1  ;;  %v6441_v50 = vpop.f32.mrf.mxu0 }
 0x7c9   :  { %v6216_v14 = vpop.f32.mrf.mxu1 }
 0x7ca   :  { %v6245_v9 = vadd.f32 %v6216_v14, %v5964_v37 }
 0x7cb   :  { %v10779_v54 = vpop.f32.mrf.mxu1 }
 0x7cc   :  { %v6454_v32 = vadd.f32 %v6425_v15, %v6245_v9  ;;  %v6250_v11 = vadd.f32 %v10779_v54, %v5969_v8  ;;  %v13820_v54 = vld [vmem:[#allocation10_spill] sm:$0xff] }
 0x7cd   :  { %v6229_v0 = vpop.f32.mrf.mxu1 }
 0x7ce   :  { %v6248_v40 = vadd.f32 %v6229_v0, %v5967_v30 }
 0x7cf   :  { %v13202_v38 = vpop.f32.mrf.mxu1 }
 0x7d0   :  { %13810 = vst [vmem:[#allocation8_spill] sm:$0xff] %v13202_v38  ;;  %v5797_v38 = vadd.f32 %v10728_v26, %v5574_v46  ;;  %v6457_v45 = vadd.f32 %v6438_v62, %v6248_v40 }
 0x7d1   :  { %v6232_v44 = vpop.f32.mrf.mxu1 }
 0x7d2   :  { %v5966_v33 = vadd.f32 %v10752_v25, %v5797_v38  ;;  %v6249_v25 = vadd.f32 %v6232_v44, %v5968_v63 }
 0x7d4   :  { %v6247_v46 = vadd.f32 %v10776_v5, %v5966_v33  ;;  %v6458_v28 = vadd.f32 %v6441_v50, %v6249_v25 }
 0x7d6   :  { %v6456_v47 = vadd.f32 %v10800_v19, %v6247_v46 }
 0x7d7   :  { %v13819_v14 = vld [vmem:[#allocation8_spill] sm:$0xff] }
 0x7d9   :  { %v10847_v17 = vpop.f32.mrf.mxu0 }
 0x7db   :  { %v6873_v12 = vpop.f32.mrf.mxu0 }
 0x7dd   :  { %v10848_v2 = vpop.f32.mrf.mxu0 }
 0x7df   :  { %v6876_v20 = vpop.f32.mrf.mxu0 }
 0x7e1   :  { %v10851_v52 = vpop.f32.mrf.mxu0 }
 0x7e3   :  { %v10823_v43 = vpop.f32.mrf.mxu1  ;;  %v6889_v53 = vpop.f32.mrf.mxu0 }
 0x7e4   :  { %v6625_v57 = vadd.f32 %v10823_v43, %v6455_v51  ;;  %v6459_v43 = vadd.f32 %v13820_v54, %v6250_v11 }
 0x7e5   :  { %v6592_v49 = vpop.f32.mrf.mxu1  ;;  %v10852_v19 = vpop.f32.mrf.mxu0 }
 0x7e6   :  { %v6906_v15 = vadd.f32 %v10847_v17, %v6625_v57 }
 0x7e7   :  { %v10824_v3 = vpop.f32.mrf.mxu1  ;;  %v6892_v59 = vpop.f32.mrf.mxu0 }
 0x7e9   :  { %v6595_v24 = vpop.f32.mrf.mxu1 }
 0x7ea   :  { %v6624_v42 = vadd.f32 %v6595_v24, %v6454_v32 }
 0x7eb   :  { %v13208_v18 = vpop.f32.mrf.mxu1 }
 0x7ec   :  { %13813 = vst [vmem:[#allocation21_spill] sm:$0xff] %v13208_v18  ;;  %v6244_v18 = vadd.f32 %v6213_v7, %v5963_v22  ;;  %v5970_v7 = vadd.f32 %v13818_v23, %v5801_v1  ;;  %v6626_v22 = vadd.f32 %v10824_v3, %v6456_v47  ;;  %v6905_v4 = vadd.f32 %v6876_v20, %v6624_v42  ;;  %v13821_v3 = vld [vmem:[#allocation11_spill] sm:$0xff] }
 0x7ed   :  { %v6608_v56 = vpop.f32.mrf.mxu1 }
 0x7ee   :  { %v6453_v61 = vadd.f32 %v6422_v34, %v6244_v18  ;;  %v6251_v34 = vadd.f32 %v13819_v14, %v5970_v7  ;;  %v6627_v38 = vadd.f32 %v6608_v56, %v6457_v45  ;;  %v6907_v62 = vadd.f32 %v10848_v2, %v6626_v22 }
 0x7ef   :  { %v10828_v13 = vpop.f32.mrf.mxu1 }
 0x7f0   :  { %v6623_v27 = vadd.f32 %v6592_v49, %v6453_v61  ;;  %v6460_v50 = vadd.f32 %v13821_v3, %v6251_v34  ;;  %v6908_v9 = vadd.f32 %v6889_v53, %v6627_v38 }
 0x7f1   :  { %v6611_v6 = vpop.f32.mrf.mxu1 }
 0x7f2   :  { %v6904_v5 = vadd.f32 %v6873_v12, %v6623_v27  ;;  %v6628_v37 = vadd.f32 %v6611_v6, %v6458_v28  ;;  %v6630_v29 = vadd.f32 %v10828_v13, %v6460_v50 }
 0x7f3   :  { %v13822_v56 = vld [vmem:[#allocation21_spill] sm:$0xff] }
 0x7f4   :  { %v6629_v17 = vadd.f32 %v13822_v56, %v6459_v43  ;;  %v6909_v60 = vadd.f32 %v6892_v59, %v6628_v37  ;;  %v6911_v6 = vadd.f32 %v10852_v19, %v6630_v29  ;;  %v11256_v59 = vld [vmem:[%s13740_s6] sm:$0x1] }
 0x7f6   :  { %v6910_v48 = vadd.f32 %v10851_v52, %v6629_v17 }
 0x803   :  { %v10871_v26 = vpop.f32.mrf.mxu1 }
 0x804   :  { %v13221_v24 = vadd.f32 %v10871_v26, %v6906_v15 }
 0x805   :  { %v7082_v21 = vpop.f32.mrf.mxu1 }
 0x806   :  { %v13216_v41 = vadd.f32 %v7082_v21, %v6904_v5 }
 0x807   :  { %v10872_v16 = vpop.f32.mrf.mxu1 }
 0x808   :  { %v13227_v55 = vadd.f32 %v10872_v16, %v6907_v62 }
 0x809   :  { %v7085_v0 = vpop.f32.mrf.mxu1 }
 0x80a   :  { %v13218_v44 = vadd.f32 %v7085_v0, %v6905_v4 }
 0x80b   :  { %v10875_v49 = vpop.f32.mrf.mxu1 }
 0x80c   :  { %v7121_v12 = vadd.f32 %v13218_v44, %v13216_v41  ;;  %v7119_v36 = vadd.f32 %v10875_v49, %v6910_v48 }
 0x80d   :  { %v7098_v18 = vpop.f32.mrf.mxu1 }
 0x80e   :  { %v7122_v10 = vadd.f32 %v7121_v12, %v13221_v24  ;;  %v13230_v20 = vadd.f32 %v7098_v18, %v6908_v9  ;;  %v11255_v18 = vld [vmem:[%s13739_s5] sm:$0x1] }
 0x80f   :  { %v10876_v39 = vpop.f32.mrf.mxu1 }
 0x810   :  { %v7123_v2 = vadd.f32 %v7122_v10, %v13227_v55  ;;  %v7120_v30 = vadd.f32 %v10876_v39, %v6911_v6  ;;  %v13823_v10 = vld [vmem:[#allocation6_spill] sm:$0xff] }
 0x811   :  { %v7101_v33 = vpop.f32.mrf.mxu1 }
 0x812   :  { %v7124_v35 = vadd.f32 %v7123_v2, %v13230_v20  ;;  %v7118_v58 = vadd.f32 %v7101_v33, %v6909_v60 }
 0x814   :  { %v7125_v46 = vadd.f32 %v7124_v35, %v7118_v58 }
 0x816   :  { %v7126_v61 = vadd.f32 %v7125_v46, %v7119_v36 }
 0x818   :  { %v7127_v32 = vadd.f32 %v7126_v61, %v7120_v30 }
 0x81a   :  { %v7128_v1 = vrot.slane %v7127_v32, 4 }
 0x81c   :  { %v7129_v63 = vadd.f32 %v7128_v1, %v7127_v32 }
 0x81e   :  { %v7130_v26 = vrot.slane %v7129_v63, 2 }
 0x820   :  { %v7131_v13 = vadd.f32 %v7130_v26, %v7129_v63 }
 0x822   :  { %v7132_v40 = vrot.slane %v7131_v13, 1 }
 0x824   :  { %v7133_v51 = vadd.f32 %v7132_v40, %v7131_v13 }
 0x826   :  { %v7134_v27 = vmul.f32 0.015625, %v7133_v51 }
 0x828   :  { %v7135_v42 = vsub.f32 %v13216_v41, %v7134_v27  ;;  %v7136_v52 = vsub.f32 %v13218_v44, %v7134_v27  ;;  %v7137_v31 = vsub.f32 %v13221_v24, %v7134_v27  ;;  %v7138_v8 = vsub.f32 %v13227_v55, %v7134_v27 }
 0x829   :  { %v7139_v57 = vsub.f32 %v13230_v20, %v7134_v27  ;;  %v7140_v23 = vsub.f32 %v7118_v58, %v7134_v27  ;;  %v7141_v16 = vsub.f32 %v7119_v36, %v7134_v27  ;;  %v7142_v5 = vsub.f32 %v7120_v30, %v7134_v27 }
 0x82a   :  { %v7143_v25 = vmul.f32 %v7135_v42, %v7135_v42  ;;  %v7144_v21 = vmul.f32 %v7136_v52, %v7136_v52  ;;  %v7145_v47 = vmul.f32 %v7137_v31, %v7137_v31  ;;  %v7146_v7 = vmul.f32 %v7138_v8, %v7138_v8 }
 0x82b   :  { %v7147_v22 = vmul.f32 %v7139_v57, %v7139_v57  ;;  %v7148_v4 = vmul.f32 %v7140_v23, %v7140_v23  ;;  %v7149_v34 = vmul.f32 %v7141_v16, %v7141_v16  ;;  %v7150_v0 = vmul.f32 %v7142_v5, %v7142_v5  ;;  %v11117_v57 = vld [vmem:[%s13741_s7 + $0x78] sm:$0xff]   ;;  %v11122_v16 = vld [vmem:[%s13741_s7 + $0x30] sm:$0xff]   ;;  %v11127_v5 = vld [vmem:[%s13741_s7 + $0xe8] sm:$0xff]  }
 0x82c   :  { %v7151_v11 = vadd.f32 %v7144_v21, %v7143_v25  ;;  %v13825_v25 = vmov 0.0   ;;  %v11120_v23 = vld [vmem:[%s13741_s7 + $0xb8] sm:$0xff]  }
 0x82e   :  { %v7152_v53 = vadd.f32 %v7151_v11, %v7145_v47  ;;  %v11118_v47 = vld [vmem:[%s13741_s7 + $0x38] sm:$0xff]  }
 0x82f   :  { %v11119_v11 = vld [vmem:[%s13741_s7 + $0xf8] sm:$0xff]  }
 0x830   :  { %v7153_v45 = vadd.f32 %v7152_v53, %v7146_v7  ;;  %v11121_v7 = vld [vmem:[%s13741_s7 + $0x70] sm:$0xff]  }
 0x831   :  { %v11123_v53 = vld [vmem:[%s13741_s7 + $0xf0] sm:$0xff]  }
 0x832   :  { %v7154_v14 = vadd.f32 %v7153_v45, %v7147_v22  ;;  %v11124_v22 = vld [vmem:[%s13741_s7 + $0xb0] sm:$0xff]   ;;  %v11125_v45 = vld [vmem:[%s13741_s7 + $0x68] sm:$0xff]  }
 0x834   :  { %v7155_v28 = vadd.f32 %v7154_v14, %v7148_v4  ;;  %v11126_v4 = vld [vmem:[%s13741_s7 + $0x28] sm:$0xff]  }
 0x835   :  { %v11128_v14 = vld [vmem:[%s13741_s7 + $0xa8] sm:$0xff]  }
 0x836   :  { %v7156_v38 = vadd.f32 %v7155_v28, %v7149_v34  ;;  %v11129_v34 = vld [vmem:[%s13741_s7 + $0x60] sm:$0xff]  }
 0x837   :  { %v11131_v28 = vld [vmem:[%s13741_s7 + $0xe0] sm:$0xff]  }
 0x838   :  { %v7157_v15 = vadd.f32 %v7156_v38, %v7150_v0  ;;  %v11130_v0 = vld [vmem:[%s13741_s7 + $0x20] sm:$0xff]  }
 0x839   :  { %v11132_v38 = vld [vmem:[%s13741_s7 + $0xa0] sm:$0xff]  }
 0x83a   :  { %v7158_v19 = vrot.slane %v7157_v15, 4 }
 0x83c   :  { %v7159_v54 = vadd.f32 %v7158_v19, %v7157_v15  ;;  %v11133_v15 = vld [vmem:[%s13741_s7 + $0x58] sm:$0xff]  }
 0x83d   :  { %v11135_v19 = vld [vmem:[%s13741_s7 + $0xd8] sm:$0xff]  }
 0x83e   :  { %v7160_v43 = vrot.slane %v7159_v54, 2 }
 0x840   :  { %v7161_v49 = vadd.f32 %v7160_v43, %v7159_v54  ;;  %v11134_v54 = vld [vmem:[%s13741_s7 + $0x18] sm:$0xff]  }
 0x841   :  { %v11136_v43 = vld [vmem:[%s13741_s7 + $0x98] sm:$0xff]  }
 0x842   :  { %v7162_v37 = vrot.slane %v7161_v49, 1 }
 0x844   :  { %v7163_v62 = vadd.f32 %v7162_v37, %v7161_v49  ;;  %v11137_v49 = vld [vmem:[%s13741_s7 + $0x50] sm:$0xff]  }
 0x845   :  { %v11139_v37 = vld [vmem:[%s13741_s7 + $0xd0] sm:$0xff]  }
 0x846   :  { %v7164_v12 = vmul.f32 0.015625, %v7163_v62  ;;  %v11138_v62 = vld [vmem:[%s13741_s7 + $0x10] sm:$0xff]  }
 0x848   :  { %v7165_v3 = vadd.f32 1e-05, %v7164_v12  ;;  %v11140_v12 = vld [vmem:[%s13741_s7 + $0x90] sm:$0xff]  }
 0x84a   :  { %11251 = vrsqrt.f32 %v7165_v3  ;;  %v11141_v3 = vld [vmem:[%s13741_s7 + $0x48] sm:$0xff]  }
 0x857   :  { %v11252_v50 = vpop.eup %11251 }
 0x858   :  { %v7167_v56 = vmul.f32 %v11255_v18, %v11252_v50  ;;  %v11142_v50 = vld [vmem:[%s13741_s7 + $0x8] sm:$0xff]  }
 0x859   :  { %v11143_v18 = vld [vmem:[%s13741_s7 + $0xc8] sm:$0xff]  }
 0x85a   :  { %v7168_v17 = vmul.f32 %v7167_v56, %v7134_v27  ;;  %v7174_v9 = vrot.slane %v7167_v56, %v13823_v10  ;;  %v11144_v56 = vld [vmem:[%s13741_s7 + $0x88] sm:$0xff]  }
 0x85c   :  { %v7169_v39 = vsub.f32 %v11256_v59, %v7168_v17  ;;  %v7181_v29 = vmul.f32 %v7174_v9, %v7118_v58  ;;  %v7176_v60 = vmul.f32 %v7174_v9, %v13216_v41  ;;  %v7177_v33 = vmul.f32 %v7174_v9, %v13218_v44  ;;  %v11145_v17 = vld [vmem:[%s13741_s7 + $0x40] sm:$0xff]  }
 0x85d   :  { %v7178_v48 = vmul.f32 %v7174_v9, %v13221_v24  ;;  %v7179_v35 = vmul.f32 %v7174_v9, %v13227_v55  ;;  %v7180_v6 = vmul.f32 %v7174_v9, %v13230_v20  ;;  %v7182_v46 = vmul.f32 %v7174_v9, %v7119_v36  ;;  %v13824_v36 = vld [vmem:[#allocation7_spill] sm:$0xff]  ;;  %v11148_v59 = vld [vmem:[%s13741_s7 + $0x80] sm:$0xff]  }
 0x85e   :  { %v7188_v2 = vrot.slane %v7169_v39, %v13823_v10  ;;  %v7183_v61 = vmul.f32 %v7174_v9, %v7120_v30  ;;  %v11146_v10 = vld [vmem:[%s13741_s7] sm:$0xff]   ;;  %v11149_v39 = vld [vmem:[%s13741_s7 + $0x178] sm:$0xff]  }
 0x85f   :  { %v11147_v9 = vld [vmem:[%s13741_s7 + $0xc0] sm:$0xff]  }
 0x860   :  { %v7195_v32 = vadd.f32 %v7188_v2, %v7181_v29  ;;  %v7190_v1 = vadd.f32 %v7188_v2, %v7176_v60  ;;  %v7191_v63 = vadd.f32 %v7188_v2, %v7177_v33  ;;  %v7192_v26 = vadd.f32 %v7188_v2, %v7178_v48  ;;  %v11151_v29 = vld [vmem:[%s13741_s7 + $0x1f8] sm:$0xff]  }
 0x861   :  { %v7193_v13 = vadd.f32 %v7188_v2, %v7179_v35  ;;  %v7194_v58 = vadd.f32 %v7188_v2, %v7180_v6  ;;  %v7196_v40 = vadd.f32 %v7188_v2, %v7182_v46  ;;  %v7197_v51 = vadd.f32 %v7188_v2, %v7183_v61  ;;  %v13826_v2 = vld [vmem:[#allocation12_spill] sm:$0xff]  ;;  %v13827_v61 = vld [vmem:[#allocation14_spill] sm:$0xff] }
 0x862   :  { %v7198_v27 = vmax.f32 %v7190_v1, 0.0  ;;  %v7199_v41 = vmax.f32 %v7191_v63, 0.0  ;;  %v7200_v42 = vmax.f32 %v7192_v26, 0.0  ;;  %v7203_v44 = vmax.f32 %v7195_v32, 0.0 }
 0x863   :  { %v7201_v52 = vmax.f32 %v7193_v13, 0.0  ;;  %v7202_v24 = vmax.f32 %v7194_v58, 0.0  ;;  %v7204_v55 = vmax.f32 %v7196_v40, 0.0  ;;  %v7205_v8 = vmax.f32 %v7197_v51, 0.0 }
 0x864   :  { %v7206_v31 = vadd.f32 %v7199_v41, %v7198_v27  ;;  %v3573_v60 = vpack.c.bf16 %v13826_v2, %v13826_v2  ;;  %v13374_v32 = vpack.c.bf16 %v13827_v61, %v13827_v61 }
 0x865   :  { %v7207_v20 = vadd.f32 %v7201_v52, %v7200_v42  ;;  %v7208_v30 = vadd.f32 %v7203_v44, %v7202_v24  ;;  %v7209_v21 = vadd.f32 %v7205_v8, %v7204_v55  ;;  %v11150_v42 = vld [vmem:[%s13741_s7 + $0x138] sm:$0xff]  }
 0x866   :  { %10878 = vmatpush3.msra.mxu0 %v7206_v31  ;;  %v3788_v13 = vshrl.u32 %v3573_v60, 16  ;;  %v3797_v31 = vshrl.u32 %v13374_v32, 16 }
 0x867   :  { %10883 = vmatpush3.msra.mxu1 %v7207_v20  ;;  %10880 = vmatmul.mubr.msk.f32.vlgmr.msra.gmra.mxu0 %vm3500_vm2, %v13824_v36 }
 0x868   :  { %10885 = vmatmul.mubr.msk.f32.vlgmr.msra.gmra.mxu1 %vm3500_vm2, %v13824_v36  ;;  %10887 = vmatprep.subr.mxu0 %v13825_v25 }
 0x869   :  { %10892 = vmatprep.subr.mxu1 %v13825_v25  ;;  %10888 = vmatpush3.msra.mxu0 %v7208_v30 }
 0x86a   :  { %10893 = vmatpush3.msra.mxu1 %v7209_v21  ;;  %10889 = vmatprep.mubr.msk.f32.mxu0 %vm11280_vm0, %v13825_v25  ;;  %v3794_v21 = vrot.slane %v3788_v13, 1 }
 0x86b   :  { %10894 = vmatprep.mubr.msk.f32.mxu1 %vm11280_vm0, %v13825_v25  ;;  %10890 = vmatmul.mubr.msk.f32.vlgmr.msra.gmra.mxu0 %vm3500_vm2, %v13824_v36 }
 0x86c   :  { %10895 = vmatmul.mubr.msk.f32.vlgmr.msra.gmra.mxu1 %vm3500_vm2, %v13824_v36  ;;  %10041 = vmatprep.subr.bf16.mxu0 %v11117_v57  ;;  %v11153_v36 = vld [vmem:[%s13741_s7 + $0x170] sm:$0xff]  }
 0x86d   :  { %10042 = vmatpush3.bf16.msra.mxu0 %v11118_v47  ;;  %10063 = vmatprep.subr.bf16.mxu1 %v11119_v11  ;;  %v3792_v47 = vrot.slane %v3573_v60, 1 }
 0x86e   :  { %10064 = vmatpush3.bf16.msra.mxu1 %v11120_v23  ;;  %10043 = vmatprep.subr.bf16.mxu0 %v11121_v7  ;;  %v11152_v23 = vld [vmem:[%s13741_s7 + $0x1b8] sm:$0xff]  }
 0x86f   :  { %10065 = vmatprep.subr.bf16.mxu1 %v11123_v53 }
 0x871   :  { %10044 = vmatpush3.bf16.msra.mxu0 %v11122_v16  ;;  %v11154_v16 = vld [vmem:[%s13741_s7 + $0x130] sm:$0xff]  }
 0x872   :  { %10066 = vmatpush3.bf16.msra.mxu1 %v11124_v22  ;;  %10045 = vmatprep.subr.bf16.mxu0 %v11125_v45  ;;  %v3803_v45 = vrot.slane %v3797_v31, 1 }
 0x873   :  { %10067 = vmatprep.subr.bf16.mxu1 %v11127_v5 }
 0x875   :  { %10046 = vmatpush3.bf16.msra.mxu0 %v11126_v4  ;;  %v11155_v4 = vld [vmem:[%s13741_s7 + $0x1f0] sm:$0xff]  }
 0x876   :  { %10068 = vmatpush3.bf16.msra.mxu1 %v11128_v14  ;;  %10047 = vmatprep.subr.bf16.mxu0 %v11129_v34  ;;  %v11157_v14 = vld [vmem:[%s13741_s7 + $0x168] sm:$0xff]  }
 0x877   :  { %10069 = vmatprep.subr.bf16.mxu1 %v11131_v28  ;;  %v11156_v28 = vld [vmem:[%s13741_s7 + $0x1b0] sm:$0xff]  }
 0x879   :  { %10048 = vmatpush3.bf16.msra.mxu0 %v11130_v0  ;;  %v11158_v0 = vld [vmem:[%s13741_s7 + $0x128] sm:$0xff]  }
 0x87a   :  { %10070 = vmatpush3.bf16.msra.mxu1 %v11132_v38  ;;  %10049 = vmatprep.subr.bf16.mxu0 %v11133_v15  ;;  %v11159_v38 = vld [vmem:[%s13741_s7 + $0x1e8] sm:$0xff]   ;;  %v11161_v15 = vld [vmem:[%s13741_s7 + $0x160] sm:$0xff]  }
 0x87b   :  { %10071 = vmatprep.subr.bf16.mxu1 %v11135_v19  ;;  %v11160_v19 = vld [vmem:[%s13741_s7 + $0x1a8] sm:$0xff]  }
 0x87d   :  { %10050 = vmatpush3.bf16.msra.mxu0 %v11134_v54  ;;  %v11162_v54 = vld [vmem:[%s13741_s7 + $0x120] sm:$0xff]  }
 0x87e   :  { %10072 = vmatpush3.bf16.msra.mxu1 %v11136_v43  ;;  %10051 = vmatprep.subr.bf16.mxu0 %v11137_v49  ;;  %v11163_v43 = vld [vmem:[%s13741_s7 + $0x1e0] sm:$0xff]   ;;  %v11165_v49 = vld [vmem:[%s13741_s7 + $0x158] sm:$0xff]  }
 0x87f   :  { %10073 = vmatprep.subr.bf16.mxu1 %v11139_v37  ;;  %v11164_v37 = vld [vmem:[%s13741_s7 + $0x1a0] sm:$0xff]  }
 0x881   :  { %10052 = vmatpush3.bf16.msra.mxu0 %v11138_v62  ;;  %v11166_v62 = vld [vmem:[%s13741_s7 + $0x118] sm:$0xff]  }
 0x882   :  { %10074 = vmatpush3.bf16.msra.mxu1 %v11140_v12  ;;  %10053 = vmatprep.subr.bf16.mxu0 %v11141_v3  ;;  %v11167_v12 = vld [vmem:[%s13741_s7 + $0x1d8] sm:$0xff]   ;;  %v11169_v3 = vld [vmem:[%s13741_s7 + $0x150] sm:$0xff]  }
 0x883   :  { %10075 = vmatprep.subr.bf16.mxu1 %v11143_v18  ;;  %v11170_v18 = vld [vmem:[%s13741_s7 + $0x110] sm:$0xff]  }
 0x885   :  { %10054 = vmatpush3.bf16.msra.mxu0 %v11142_v50  ;;  %v11168_v50 = vld [vmem:[%s13741_s7 + $0x198] sm:$0xff]  }
 0x886   :  { %10076 = vmatpush3.bf16.msra.mxu1 %v11144_v56  ;;  %10055 = vmatprep.subr.bf16.mxu0 %v11145_v17  ;;  %v11171_v56 = vld [vmem:[%s13741_s7 + $0x1d0] sm:$0xff]   ;;  %v11173_v17 = vld [vmem:[%s13741_s7 + $0x148] sm:$0xff]  }
 0x887   :  { %10077 = vmatprep.subr.bf16.mxu1 %v11147_v9  ;;  %v11172_v9 = vld [vmem:[%s13741_s7 + $0x190] sm:$0xff]  }
 0x889   :  { %10056 = vmatpush3.bf16.msra.mxu0 %v11146_v10 }
 0x88a   :  { %10078 = vmatpush3.bf16.msra.mxu1 %v11148_v59  ;;  %10085 = vmatprep.subr.bf16.mxu0 %v11149_v39  ;;  %v11174_v59 = vld [vmem:[%s13741_s7 + $0x108] sm:$0xff]  }
 0x88b   :  { %10107 = vmatprep.subr.bf16.mxu1 %v11151_v29  ;;  %v11175_v39 = vld [vmem:[%s13741_s7 + $0x1c8] sm:$0xff]   ;;  %v11177_v29 = vld [vmem:[%s13741_s7 + $0x140] sm:$0xff]  }
 0x927   :  { %v7276_v33 = vpop.f32.mrf.mxu0 }
 0x928   :  { %v7280_v48 = vpack.c.bf16 %v7276_v33, %v7276_v33  ;;  %v7347_v35 = vpop.f32.mrf.mxu1  ;;  %v13829_v33 = vld [vmem:[#allocation13_spill] sm:$0xff] }
 0x929   :  { %v13370_v6 = vpack.c.bf16 %v7347_v35, %v7347_v35  ;;  %v10881_v46 = vpop.f32.mrf.mxu0  ;;  %v11178_v35 = vld [vmem:[%s13741_s7 + $0x100] sm:$0xff]  }
 0x92a   :  { %v7495_v1 = vshrl.u32 %v7280_v48, 16  ;;  %v7498_v63 = vrot.slane %v7280_v48, 1  ;;  %v10886_v26 = vpop.f32.mrf.mxu1  ;;  %v7518_v58 = vshll.u32 %v7280_v48, 16  ;;  %v13482_v48 = vpack.c.bf16 %v13829_v33, %v13829_v33  ;;  %v11179_v46 = vld [vmem:[%s13741_s7 + $0x1c0] sm:$0xff]   ;;  %v11217_v33 = vld [vmem:[%s13741_s7 + $0x370] sm:$0xff]  }
 0x92b   :  { %v7501_v40 = vshrl.u32 %v13370_v6, 16  ;;  %v13377_v51 = vpop.f32.mrf.mxu0  ;;  %v7504_v61 = vrot.slane %v13370_v6, 1 }
 0x92c   :  { %v13379_v27 = vpop.f32.mrf.mxu1  ;;  %v7521_v41 = vshll.u32 %v7495_v1, 16  ;;  %v7499_v44 = vrot.slane %v7495_v1, 1  ;;  %v7524_v55 = vshll.u32 %v7498_v63, 16  ;;  %v7578_v25 = vsel %vm11797_vm10, %v3573_v60, %v7518_v58  ;;  %v11176_v60 = vld [vmem:[%s13741_s7 + $0x188] sm:$0xff]   ;;  %v11181_v1 = vld [vmem:[%s13741_s7 + $0x278] sm:$0xff]  }
 0x92d   :  { %v7532_v52 = vshll.u32 %v7501_v40, 16  ;;  %v10891_v24 = vpop.f32.mrf.mxu0  ;;  %v7505_v7 = vrot.slane %v7501_v40, 1  ;;  %v13462_v10 = vpack.c.bf16 %v13377_v51, %v13377_v51  ;;  %v7529_v63 = vshll.u32 %v13370_v6, 16  ;;  %v11182_v51 = vld [vmem:[%s13741_s7 + $0x238] sm:$0xff]  }
 0x92e   :  { %v7579_v20 = vsel %vm11797_vm10, %v3788_v13, %v7521_v41  ;;  %v10896_v30 = vpop.f32.mrf.mxu1  ;;  %v7527_v57 = vshll.u32 %v7499_v44, 16  ;;  %v7580_v22 = vsel %vm11797_vm10, %v3792_v47, %v7524_v55  ;;  %v11180_v13 = vld [vmem:[%s13741_s7 + $0x180] sm:$0xff]   ;;  %v3806_v40 = vshrl.u32 %v13482_v48, 16  ;;  %v11183_v6 = vld [vmem:[%s13741_s7 + $0x2f8] sm:$0xff]   ;;  %v11190_v47 = vld [vmem:[%s13741_s7 + $0x228] sm:$0xff]  }
 0x92f   :  { %8657 = vmatprep.mubr.bf16.mxu0 %v7579_v20  ;;  %v7583_v11 = vsel %vm11797_vm10, %v3797_v31, %v7532_v52  ;;  %v7538_v5 = vshll.u32 %v7505_v7, 16  ;;  %v7507_v2 = vshrl.u32 %v13462_v10, 16  ;;  %v7535_v41 = vshll.u32 %v7504_v61, 16  ;;  %v11184_v55 = vld [vmem:[%s13741_s7 + $0x2b8] sm:$0xff]   ;;  %v11192_v7 = vld [vmem:[%s13741_s7 + $0x2a8] sm:$0xff]  }
 0x930   :  { %8658 = vmatmul.mubr.bf16.vlgmr.msra.gmra.mxu0 %v7578_v25  ;;  %v7581_v53 = vsel %vm11797_vm10, %v3794_v21, %v7527_v57  ;;  %v7582_v44 = vsel %vm11797_vm10, %v13374_v32, %v7529_v63  ;;  %v3801_v24 = vrot.slane %v13374_v32, 1  ;;  %v3812_v20 = vrot.slane %v3806_v40, 1  ;;  %v11187_v32 = vld [vmem:[%s13741_s7 + $0x2f0] sm:$0xff]   ;;  %v11189_v25 = vld [vmem:[%s13741_s7 + $0x268] sm:$0xff]   ;;  %v11216_v63 = vld [vmem:[%s13741_s7 + $0x3b8] sm:$0xff]  }
 0x931   :  { %10086 = vmatpush3.bf16.msra.mxu0 %v11150_v42  ;;  %8737 = vmatprep.mubr.bf16.mxu0 %v7583_v11  ;;  %v7585_v34 = vsel %vm11797_vm10, %v3803_v45, %v7538_v5  ;;  %v7511_v26 = vrot.slane %v7507_v2, 1  ;;  %v7543_v58 = vshll.u32 %v7507_v2, 16  ;;  %v11185_v42 = vld [vmem:[%s13741_s7 + $0x270] sm:$0xff]   ;;  %v11191_v11 = vld [vmem:[%s13741_s7 + $0x2e8] sm:$0xff]   ;;  %v11196_v45 = vld [vmem:[%s13741_s7 + $0x2a0] sm:$0xff]   ;;  %v3810_v61 = vrot.slane %v13482_v48, 1 }
 0x932   :  { %8697 = vmatprep.mubr.bf16.mxu1 %v7581_v53  ;;  %10087 = vmatprep.subr.bf16.mxu0 %v11153_v36  ;;  %v11186_v36 = vld [vmem:[%s13741_s7 + $0x230] sm:$0xff]   ;;  %v7584_v30 = vsel %vm11797_vm10, %v3801_v24, %v7535_v41  ;;  %v11194_v53 = vld [vmem:[%s13741_s7 + $0x220] sm:$0xff]   ;;  %v11198_v5 = vld [vmem:[%s13741_s7 + $0x218] sm:$0xff]  }
 0x933   :  { %8698 = vmatmul.mubr.bf16.vlgmr.msra.gmra.mxu1 %v7580_v22  ;;  %v7549_v52 = vshll.u32 %v7511_v26, 16  ;;  %v7587_v31 = vsel %vm11797_vm10, %v3806_v40, %v7543_v58  ;;  %v11188_v57 = vld [vmem:[%s13741_s7 + $0x2b0] sm:$0xff]   ;;  %v11197_v22 = vld [vmem:[%s13741_s7 + $0x258] sm:$0xff]   ;;  %v11221_v40 = vld [vmem:[%s13741_s7 + $0x368] sm:$0xff]  }
 0x934   :  { %10108 = vmatpush3.bf16.msra.mxu1 %v11152_v23  ;;  %8777 = vmatprep.mubr.bf16.mxu1 %v7585_v34  ;;  %v11193_v23 = vld [vmem:[%s13741_s7 + $0x260] sm:$0xff]   ;;  %v11200_v34 = vld [vmem:[%s13741_s7 + $0x298] sm:$0xff]   ;;  %v11220_v41 = vld [vmem:[%s13741_s7 + $0x3b0] sm:$0xff]  }
 0x935   :  { %10088 = vmatpush3.bf16.msra.mxu0 %v11154_v16  ;;  %10109 = vmatprep.subr.bf16.mxu1 %v11155_v4  ;;  %v7589_v21 = vsel %vm11797_vm10, %v3812_v20, %v7549_v52  ;;  %v11195_v16 = vld [vmem:[%s13741_s7 + $0x2e0] sm:$0xff]   ;;  %v11199_v4 = vld [vmem:[%s13741_s7 + $0x2d8] sm:$0xff]   ;;  %v11224_v52 = vld [vmem:[%s13741_s7 + $0x3a8] sm:$0xff]  }
 0x936   :  { %10089 = vmatprep.subr.bf16.mxu0 %v11157_v14  ;;  %v11201_v14 = vld [vmem:[%s13741_s7 + $0x250] sm:$0xff]   ;;  %v11214_v2 = vld [vmem:[%s13741_s7 + $0x338] sm:$0xff]   ;;  %v11226_v24 = vld [vmem:[%s13741_s7 + $0x320] sm:$0xff]  }
 0x937   :  { %v11228_v20 = vld [vmem:[%s13741_s7 + $0x3a0] sm:$0xff]  }
 0x938   :  { %10110 = vmatpush3.bf16.msra.mxu1 %v11156_v28  ;;  %v11202_v28 = vld [vmem:[%s13741_s7 + $0x210] sm:$0xff]  }
 0x939   :  { %10090 = vmatpush3.bf16.msra.mxu0 %v11158_v0  ;;  %10111 = vmatprep.subr.bf16.mxu1 %v11159_v38  ;;  %v11203_v0 = vld [vmem:[%s13741_s7 + $0x2d0] sm:$0xff]   ;;  %v11205_v38 = vld [vmem:[%s13741_s7 + $0x248] sm:$0xff]  }
 0x93a   :  { %10091 = vmatprep.subr.bf16.mxu0 %v11161_v15  ;;  %v13580_v15 = vpack.c.bf16 %v13379_v27, %v13379_v27  ;;  %v11209_v27 = vld [vmem:[%s13741_s7 + $0x240] sm:$0xff]  }
 0x93c   :  { %10112 = vmatpush3.bf16.msra.mxu1 %v11160_v19  ;;  %v11204_v19 = vld [vmem:[%s13741_s7 + $0x290] sm:$0xff]  }
 0x93d   :  { %10092 = vmatpush3.bf16.msra.mxu0 %v11162_v54  ;;  %10113 = vmatprep.subr.bf16.mxu1 %v11163_v43  ;;  %v11206_v54 = vld [vmem:[%s13741_s7 + $0x208] sm:$0xff]  }
 0x93e   :  { %10093 = vmatprep.subr.bf16.mxu0 %v11165_v49  ;;  %v11207_v43 = vld [vmem:[%s13741_s7 + $0x2c8] sm:$0xff]   ;;  %v7513_v49 = vshrl.u32 %v13580_v15, 16 }
 0x940   :  { %10114 = vmatpush3.bf16.msra.mxu1 %v11164_v37  ;;  %v11208_v37 = vld [vmem:[%s13741_s7 + $0x288] sm:$0xff]  }
 0x941   :  { %10094 = vmatpush3.bf16.msra.mxu0 %v11166_v62  ;;  %10115 = vmatprep.subr.bf16.mxu1 %v11167_v12  ;;  %v13830_v62 = vld [vmem:[#allocation15_spill] sm:$0xff] }
 0x942   :  { %10095 = vmatprep.subr.bf16.mxu0 %v11169_v3  ;;  %v13600_v12 = vpack.c.bf16 %v13830_v62, %v13830_v62  ;;  %v11210_v3 = vld [vmem:[%s13741_s7 + $0x200] sm:$0xff]  }
 0x944   :  { %10116 = vmatpush3.bf16.msra.mxu1 %v11168_v50  ;;  %v11211_v50 = vld [vmem:[%s13741_s7 + $0x2c0] sm:$0xff]  }
 0x945   :  { %10096 = vmatpush3.bf16.msra.mxu0 %v11170_v18  ;;  %10117 = vmatprep.subr.bf16.mxu1 %v11171_v56  ;;  %v7510_v18 = vrot.slane %v13462_v10, 1  ;;  %v11213_v56 = vld [vmem:[%s13741_s7 + $0x378] sm:$0xff]  }
 0x946   :  { %10097 = vmatprep.subr.bf16.mxu0 %v11173_v17  ;;  %v7540_v17 = vshll.u32 %v13462_v10, 16  ;;  %v11215_v10 = vld [vmem:[%s13741_s7 + $0x3f8] sm:$0xff]  }
 0x948   :  { %10118 = vmatpush3.bf16.msra.mxu1 %v11172_v9  ;;  %v7517_v9 = vrot.slane %v7513_v49, 1 }
 0x949   :  { %10098 = vmatpush3.bf16.msra.mxu0 %v11174_v59  ;;  %10119 = vmatprep.subr.bf16.mxu1 %v11175_v39  ;;  %v11212_v59 = vld [vmem:[%s13741_s7 + $0x280] sm:$0xff]   ;;  %v7554_v39 = vshll.u32 %v7513_v49, 16 }
 0x94a   :  { %10099 = vmatprep.subr.bf16.mxu0 %v11177_v29  ;;  %v3815_v29 = vshrl.u32 %v13600_v12, 16 }
 0x94c   :  { %10120 = vmatpush3.bf16.msra.mxu1 %v11176_v60  ;;  %v7546_v60 = vshll.u32 %v7510_v18, 16  ;;  %v3821_v26 = vrot.slane %v3815_v29, 1 }
 0x94d   :  { %10100 = vmatpush3.bf16.msra.mxu0 %v11178_v35  ;;  %10121 = vmatprep.subr.bf16.mxu1 %v11179_v46  ;;  %v7586_v35 = vsel %vm11797_vm10, %v13482_v48, %v7540_v17  ;;  %v7560_v46 = vshll.u32 %v7517_v9, 16  ;;  %v11219_v48 = vld [vmem:[%s13741_s7 + $0x3f0] sm:$0xff]  }
 0x94e   :  { %10129 = vmatprep.subr.bf16.mxu0 %v11181_v1  ;;  %v7591_v1 = vsel %vm11797_vm10, %v3815_v29, %v7554_v39  ;;  %v7588_v58 = vsel %vm11797_vm10, %v3810_v61, %v7546_v60 }
 0x950   :  { %10122 = vmatpush3.bf16.msra.mxu1 %v11180_v13  ;;  %8738 = vmatmul.mubr.bf16.vlgmr.msra.gmra.mxu0 %v7582_v44  ;;  %v11218_v13 = vld [vmem:[%s13741_s7 + $0x330] sm:$0xff]   ;;  %v11225_v44 = vld [vmem:[%s13741_s7 + $0x360] sm:$0xff]  }
 0x951   :  { %10130 = vmatpush3.bf16.msra.mxu0 %v11182_v51  ;;  %8817 = vmatprep.mubr.bf16.mxu0 %v7587_v31  ;;  %v7593_v51 = vsel %vm11797_vm10, %v3821_v26, %v7560_v46  ;;  %v11227_v31 = vld [vmem:[%s13741_s7 + $0x3e0] sm:$0xff]  }
 0x952   :  { %10151 = vmatprep.subr.bf16.mxu1 %v11183_v6  ;;  %10131 = vmatprep.subr.bf16.mxu0 %v11185_v42  ;;  %v11222_v6 = vld [vmem:[%s13741_s7 + $0x328] sm:$0xff]  }
 0x953   :  { %8778 = vmatmul.mubr.bf16.vlgmr.msra.gmra.mxu1 %v7584_v30  ;;  %v11223_v42 = vld [vmem:[%s13741_s7 + $0x3e8] sm:$0xff]   ;;  %v11233_v30 = vld [vmem:[%s13741_s7 + $0x350] sm:$0xff]  }
 0x954   :  { %10152 = vmatpush3.bf16.msra.mxu1 %v11184_v55  ;;  %8857 = vmatprep.mubr.bf16.mxu1 %v7589_v21  ;;  %v11229_v55 = vld [vmem:[%s13741_s7 + $0x358] sm:$0xff]   ;;  %v11234_v21 = vld [vmem:[%s13741_s7 + $0x310] sm:$0xff]  }
 0x955   :  { %10132 = vmatpush3.bf16.msra.mxu0 %v11186_v36  ;;  %10153 = vmatprep.subr.bf16.mxu1 %v11187_v32  ;;  %v11230_v36 = vld [vmem:[%s13741_s7 + $0x318] sm:$0xff]  }
 0x956   :  { %10133 = vmatprep.subr.bf16.mxu0 %v11189_v25  ;;  %v11231_v32 = vld [vmem:[%s13741_s7 + $0x3d8] sm:$0xff]  }
 0x957   :  { %v11232_v25 = vld [vmem:[%s13741_s7 + $0x398] sm:$0xff]  }
 0x958   :  { %10154 = vmatpush3.bf16.msra.mxu1 %v11188_v57  ;;  %v11235_v57 = vld [vmem:[%s13741_s7 + $0x3d0] sm:$0xff]  }
 0x959   :  { %10134 = vmatpush3.bf16.msra.mxu0 %v11190_v47  ;;  %10155 = vmatprep.subr.bf16.mxu1 %v11191_v11  ;;  %v11237_v47 = vld [vmem:[%s13741_s7 + $0x348] sm:$0xff]   ;;  %v11236_v11 = vld [vmem:[%s13741_s7 + $0x390] sm:$0xff]  }
 0x95a   :  { %10135 = vmatprep.subr.bf16.mxu0 %v11193_v23  ;;  %v11238_v23 = vld [vmem:[%s13741_s7 + $0x308] sm:$0xff]  }
 0x95c   :  { %10156 = vmatpush3.bf16.msra.mxu1 %v11192_v7  ;;  %v11239_v7 = vld [vmem:[%s13741_s7 + $0x3c8] sm:$0xff]  }
 0x95d   :  { %10136 = vmatpush3.bf16.msra.mxu0 %v11194_v53  ;;  %10157 = vmatprep.subr.bf16.mxu1 %v11195_v16  ;;  %v11241_v53 = vld [vmem:[%s13741_s7 + $0x340] sm:$0xff]   ;;  %v11240_v16 = vld [vmem:[%s13741_s7 + $0x388] sm:$0xff]  }
 0x95e   :  { %10137 = vmatprep.subr.bf16.mxu0 %v11197_v22  ;;  %v11242_v22 = vld [vmem:[%s13741_s7 + $0x300] sm:$0xff]  }
 0x960   :  { %10158 = vmatpush3.bf16.msra.mxu1 %v11196_v45  ;;  %v11243_v45 = vld [vmem:[%s13741_s7 + $0x3c0] sm:$0xff]  }
 0x961   :  { %10138 = vmatpush3.bf16.msra.mxu0 %v11198_v5  ;;  %10159 = vmatprep.subr.bf16.mxu1 %v11199_v4  ;;  %v7516_v5 = vrot.slane %v13580_v15, 1  ;;  %v7551_v4 = vshll.u32 %v13580_v15, 16 }
 0x962   :  { %10139 = vmatprep.subr.bf16.mxu0 %v11201_v14  ;;  %v11244_v14 = vld [vmem:[%s13741_s7 + $0x380] sm:$0xff]   ;;  %s11282_s7 = smov [#allocation3]  }
 0x964   :  { %10160 = vmatpush3.bf16.msra.mxu1 %v11200_v34  ;;  %v7557_v34 = vshll.u32 %v7516_v5, 16 }
 0x965   :  { %10140 = vmatpush3.bf16.msra.mxu0 %v11202_v28  ;;  %10161 = vmatprep.subr.bf16.mxu1 %v11203_v0  ;;  %v7590_v28 = vsel %vm11797_vm10, %v13600_v12, %v7551_v4  ;;  %v3819_v0 = vrot.slane %v13600_v12, 1 }
 0x966   :  { %10141 = vmatprep.subr.bf16.mxu0 %v11205_v38 }
 0x967   :  { %v7592_v38 = vsel %vm11797_vm10, %v3819_v0, %v7557_v34 }
 0x968   :  { %10162 = vmatpush3.bf16.msra.mxu1 %v11204_v19  ;;  %v9568_v19 = vld [vmem:[%s13742_s8] ss:$0 sm:$0xff]  ;;  %s8952_s8 = sshll.u32 %s11282_s7, 4  ;;  %s8953_s8 = int_to_ptr.vmem [resolvable:$true] %s8952_s8 }
 0x969   :  { %10142 = vmatpush3.bf16.msra.mxu0 %v11206_v54  ;;  %10163 = vmatprep.subr.bf16.mxu1 %v11207_v43  ;;  %s11257_s28 = scalar_lea.vmem %s8953_s8, 32  ;;  %p11262_p1 = scmp.lt.s32.totalorder %s8953_s8, %s8953_s8 }
 0x96a   :  { %10143 = vmatprep.subr.bf16.mxu0 %v11209_v27  ;;  %p11258_p0 = scmp.ne.s32.totalorder %s8953_s8, %s11257_s28  ;;  %p11263_p2 = scmp.lt.s32.totalorder %s11257_s28, %s11257_s28 }
 0x96c   :  { %10164 = vmatpush3.bf16.msra.mxu1 %v11208_v37  ;;  %p11264_p3 = por %p11263_p2, %p11262_p1 }
 0x96d   :  { %10144 = vmatpush3.bf16.msra.mxu0 %v11210_v3  ;;  %10165 = vmatprep.subr.bf16.mxu1 %v11211_v50 }
 0x96e   :  { %10173 = vmatprep.subr.bf16.mxu0 %v11213_v56  ;;  %p11265_p4 = pnand %p11264_p3, %p11258_p0 }
 0x970   :  { %10166 = vmatpush3.bf16.msra.mxu1 %v11212_v59  ;;  %8818 = vmatmul.mubr.bf16.vlgmr.msra.gmra.mxu0 %v7586_v35 }
 0x971   :  { %10174 = vmatpush3.bf16.msra.mxu0 %v11214_v2  ;;  %8897 = vmatprep.mubr.bf16.mxu0 %v7591_v1 }
 0x972   :  { %10195 = vmatprep.subr.bf16.mxu1 %v11215_v10  ;;  %10175 = vmatprep.subr.bf16.mxu0 %v11217_v33 }
 0x973   :  { %8858 = vmatmul.mubr.bf16.vlgmr.msra.gmra.mxu1 %v7588_v58 }
 0x974   :  { %10196 = vmatpush3.bf16.msra.mxu1 %v11216_v63  ;;  %8937 = vmatprep.mubr.bf16.mxu1 %v7593_v51 }
 0x975   :  { %10176 = vmatpush3.bf16.msra.mxu0 %v11218_v13  ;;  %10197 = vmatprep.subr.bf16.mxu1 %v11219_v48 }
 0x976   :  { %10177 = vmatprep.subr.bf16.mxu0 %v11221_v40 }
 0x978   :  { %10198 = vmatpush3.bf16.msra.mxu1 %v11220_v41 }
 0x979   :  { %10178 = vmatpush3.bf16.msra.mxu0 %v11222_v6  ;;  %10199 = vmatprep.subr.bf16.mxu1 %v11223_v42 }
 0x97a   :  { %10179 = vmatprep.subr.bf16.mxu0 %v11225_v44 }
 0x97c   :  { %10200 = vmatpush3.bf16.msra.mxu1 %v11224_v52 }
 0x97d   :  { %10180 = vmatpush3.bf16.msra.mxu0 %v11226_v24  ;;  %10201 = vmatprep.subr.bf16.mxu1 %v11227_v31 }
 0x97e   :  { %10181 = vmatprep.subr.bf16.mxu0 %v11229_v55 }
 0x980   :  { %10202 = vmatpush3.bf16.msra.mxu1 %v11228_v20 }
 0x981   :  { %10182 = vmatpush3.bf16.msra.mxu0 %v11230_v36  ;;  %10203 = vmatprep.subr.bf16.mxu1 %v11231_v32 }
 0x982   :  { %10183 = vmatprep.subr.bf16.mxu0 %v11233_v30 }
 0x984   :  { %10204 = vmatpush3.bf16.msra.mxu1 %v11232_v25 }
 0x985   :  { %10184 = vmatpush3.bf16.msra.mxu0 %v11234_v21  ;;  %10205 = vmatprep.subr.bf16.mxu1 %v11235_v57 }
 0x986   :  { %10185 = vmatprep.subr.bf16.mxu0 %v11237_v47 }
 0x988   :  { %10206 = vmatpush3.bf16.msra.mxu1 %v11236_v11 }
 0x989   :  { %10186 = vmatpush3.bf16.msra.mxu0 %v11238_v23  ;;  %10207 = vmatprep.subr.bf16.mxu1 %v11239_v7 }
 0x98a   :  { %10187 = vmatprep.subr.bf16.mxu0 %v11241_v53 }
 0x98c   :  { %10208 = vmatpush3.bf16.msra.mxu1 %v11240_v16 }
 0x98d   :  { %10188 = vmatpush3.bf16.msra.mxu0 %v11242_v22  ;;  %10209 = vmatprep.subr.bf16.mxu1 %v11243_v45 }
 0x990   :  { %10210 = vmatpush3.bf16.msra.mxu1 %v11244_v14  ;;  %8898 = vmatmul.mubr.bf16.vlgmr.msra.gmra.mxu0 %v7590_v28 }
 0x993   :  { %8938 = vmatmul.mubr.bf16.vlgmr.msra.gmra.mxu1 %v7592_v38 }
 0x9f0   :  { %v10057_v15 = vpop.f32.mrf.mxu0 }
 0x9f2   :  { %v10058_v54 = vpop.f32.mrf.mxu0 }
 0x9f3   :  { %v10059_v43 = vadd.f32 %v10058_v54, %v10057_v15  ;;  %v10079_v27 = vpop.f32.mrf.mxu1 }
 0x9f4   :  { %v10060_v49 = vpop.f32.mrf.mxu0 }
 0x9f5   :  { %v8660_v37 = vadd.f32 %v10059_v43, %v9568_v19  ;;  %v10080_v62 = vpop.f32.mrf.mxu1 }
 0x9f6   :  { %v10081_v3 = vadd.f32 %v10080_v62, %v10079_v27  ;;  %v10061_v50 = vpop.f32.mrf.mxu0 }
 0x9f7   :  { %v10082_v12 = vpop.f32.mrf.mxu1 }
 0x9f8   :  { %v8700_v18 = vadd.f32 %v10081_v3, %v8660_v37 }
 0x9f9   :  { %v10083_v56 = vpop.f32.mrf.mxu1 }
 0xa10   :  { %v10101_v17 = vpop.f32.mrf.mxu0 }
 0xa12   :  { %v10102_v8 = vpop.f32.mrf.mxu0 }
 0xa13   :  { %v10123_v9 = vpop.f32.mrf.mxu1  ;;  %v10103_v13 = vadd.f32 %v10102_v8, %v10101_v17 }
 0xa14   :  { %v10104_v59 = vpop.f32.mrf.mxu0 }
 0xa15   :  { %v10124_v39 = vpop.f32.mrf.mxu1  ;;  %v8740_v48 = vadd.f32 %v10103_v13, %v8700_v18 }
 0xa16   :  { %v10105_v29 = vpop.f32.mrf.mxu0  ;;  %v10125_v58 = vadd.f32 %v10124_v39, %v10123_v9 }
 0xa17   :  { %v10126_v2 = vpop.f32.mrf.mxu1 }
 0xa18   :  { %v8780_v51 = vadd.f32 %v10125_v58, %v8740_v48 }
 0xa19   :  { %v10127_v60 = vpop.f32.mrf.mxu1 }
 0xa30   :  { %v10145_v10 = vpop.f32.mrf.mxu0 }
 0xa32   :  { %v10146_v33 = vpop.f32.mrf.mxu0 }
 0xa33   :  { %v10167_v35 = vpop.f32.mrf.mxu1  ;;  %v10147_v40 = vadd.f32 %v10146_v33, %v10145_v10 }
 0xa34   :  { %v10148_v46 = vpop.f32.mrf.mxu0 }
 0xa35   :  { %v10168_v61 = vpop.f32.mrf.mxu1  ;;  %v8820_v41 = vadd.f32 %v10147_v40, %v8780_v51 }
 0xa36   :  { %v10149_v1 = vpop.f32.mrf.mxu0  ;;  %v10169_v6 = vadd.f32 %v10168_v61, %v10167_v35 }
 0xa37   :  { %v10170_v63 = vpop.f32.mrf.mxu1 }
 0xa38   :  { %v8860_v52 = vadd.f32 %v10169_v6, %v8820_v41 }
 0xa39   :  { %v10171_v26 = vpop.f32.mrf.mxu1 }
 0xa50   :  { %v10189_v42 = vpop.f32.mrf.mxu0 }
 0xa52   :  { %v10190_v44 = vpop.f32.mrf.mxu0 }
 0xa53   :  { %v10191_v24 = vadd.f32 %v10190_v44, %v10189_v42  ;;  %v10211_v31 = vpop.f32.mrf.mxu1 }
 0xa54   :  { %v10192_v55 = vpop.f32.mrf.mxu0 }
 0xa55   :  { %v8900_v20 = vadd.f32 %v10191_v24, %v8860_v52  ;;  %v10212_v36 = vpop.f32.mrf.mxu1 }
 0xa56   :  { %v10213_v32 = vadd.f32 %v10212_v36, %v10211_v31  ;;  %v10193_v30 = vpop.f32.mrf.mxu0 }
 0xa57   :  { %v10214_v25 = vpop.f32.mrf.mxu1 }
 0xa58   :  { %v8940_v21 = vadd.f32 %v10213_v32, %v8900_v20 }
 0xa59   :  { %v10215_v57 = vpop.f32.mrf.mxu1 }
 0xa5a   :  { %8945 = vst [vmem:[#allocation3] sm:$0x3] %v8940_v21 }
 0xa5b   :  { %11268 = shalt.err (!%p11265_p4)
}
 0xa5c   :  { %8955 = dma.vmem_to_hbm [thread:$0]  %s8953_s8, 32, %s13743_s9, [#allocation4]  }
 0xa5d   :  { %11277 = dma.done.wait [#allocation4], 32  }
 0xa5e   :  { %11278 = vsyncadd [#allocation4], 4294967264 }
 0xa5f   :  { %8959 = vsyncpa [#allocation4], 1 }

</bundles_post_ra>
